<compile_context>
chip_gen: v5e
topology: v5e:2x2
jax: 0.10.0
libtpu: 0.0.40
codegen_flags: <defaults>
</compile_context>

<pallas_src>
import math

import jax
import jax.numpy as jnp
from jax import lax
from jax.experimental import pallas as pl
from jax.experimental.pallas import tpu as pltpu


NUM_CHANNELS = 6  # the module hard-codes dnn_1 .. dnn_6


# ----------------------------------------------------------------------------
# Fused Pallas kernel: 6x (matmul + bias) -> concat-equivalent encoder -> bias
# ----------------------------------------------------------------------------
def _predictor_force_kernel(x_ref, wd_ref, bd_ref, we_ref, be_ref, o_ref):
    # x_ref : (6, B, V)   per-channel input slabs (channel-major -> x_ref[i] is 2-D)
    # wd_ref: (6, V, C)   dnn_i weights, stored as (in, out)
    # bd_ref: (6, 1, C)   dnn_i biases
    # we_ref: (6, 1, C)   encoder weight, split per channel block of the concat
    # be_ref: (1, 1)      encoder bias
    # o_ref : (B, 1)      predicted force
    B = o_ref.shape[0]
    acc = jnp.zeros((B, 1), jnp.float32)
    for i in range(NUM_CHANNELS):  # static unroll; all operands stay on-chip
        code = jnp.dot(
            x_ref[i], wd_ref[i],
            preferred_element_type=jnp.float32,
            precision=lax.Precision.HIGHEST,
        ) + bd_ref[i]                                                   # (B, C)
        # Encoder contribution of this channel's block of the concatenation.
        acc = acc + jnp.sum(code * we_ref[i], axis=-1, keepdims=True)   # (B, 1)
    o_ref[...] = (acc + be_ref[...]).astype(o_ref.dtype)


def predictor_force_forward(params, x):
    """x: (B, 6, vect_length) -> (B, 1, 1), matching Predictor_Force.forward."""
    B, nch, V = x.shape
    assert nch == NUM_CHANNELS
    C = V // 256
    assert C >= 1, "vect_length must be >= 256 (Linear(V, V // 256))"

    # Layout glue (outside the kernel): channel-major input, stacked params.
    x_t = jnp.transpose(x, (1, 0, 2))                                   # (6, B, V)
    wd = jnp.stack([w for (w, _) in params["dnn"]], axis=0)             # (6, V, C)
    bd = jnp.stack([b for (_, b) in params["dnn"]], axis=0).reshape(NUM_CHANNELS, 1, C)
    we_full, be_full = params["encoder"]                                # (6C, 1), (1,)
    we = we_full.reshape(NUM_CHANNELS, 1, C)   # block i = rows [i*C, (i+1)*C) of W_enc
    be = be_full.reshape(1, 1)

    flops = NUM_CHANNELS * (2 * B * V * C + 3 * B * C) + B
    bytes_accessed = 4 * (x_t.size + wd.size + bd.size + we.size + be.size + B)

    out = pl.pallas_call(
        _predictor_force_kernel,
        out_shape=jax.ShapeDtypeStruct((B, 1), jnp.float32),
        grid=(1,),
        in_specs=[
            pl.BlockSpec((NUM_CHANNELS, B, V), lambda i: (0, 0, 0)),
            pl.BlockSpec((NUM_CHANNELS, V, C), lambda i: (0, 0, 0)),
            pl.BlockSpec((NUM_CHANNELS, 1, C), lambda i: (0, 0, 0)),
            pl.BlockSpec((NUM_CHANNELS, 1, C), lambda i: (0, 0, 0)),
            pl.BlockSpec((1, 1), lambda i: (0, 0)),
        ],
        out_specs=pl.BlockSpec((B, 1), lambda i: (0, 0)),
        compiler_params=pltpu.CompilerParams(
            dimension_semantics=("arbitrary",)),
        cost_estimate=pl.CostEstimate(
            flops=flops, transcendentals=0, bytes_accessed=bytes_accessed),
    )(x_t, wd, bd, we, be)

    return out.reshape(B, 1, 1)


# ----------------------------------------------------------------------------
# Parameter construction (deterministic, mirrors Predictor_Force.__init__)
# ----------------------------------------------------------------------------
def _init_linear(key, fan_in, fan_out):
    kw, kb = jax.random.split(key)
    bound = 1.0 / math.sqrt(fan_in)  # PyTorch nn.Linear default init
    w = jax.random.uniform(kw, (fan_in, fan_out), jnp.float32, -bound, bound)
    b = jax.random.uniform(kb, (fan_out,), jnp.float32, -bound, bound)
    return w, b


def init_params(key, vect_length):
    C = vect_length // 256
    params = {"dnn": []}
    for _ in range(NUM_CHANNELS):
        key, sub = jax.random.split(key)
        params["dnn"].append(_init_linear(sub, vect_length, C))
    key, sub = jax.random.split(key)
    params["encoder"] = _init_linear(sub, NUM_CHANNELS * C, 1)
    return params


# ----------------------------------------------------------------------------
# Pure-JAX reference (exactly the PyTorch math) for correctness checking
# ----------------------------------------------------------------------------
def reference_forward(params, x):
    B = x.shape[0]
    codes = [
        jnp.dot(x[:, i, :], w, precision=lax.Precision.HIGHEST) + b
        for i, (w, b) in enumerate(params["dnn"])
    ]
    code_all = jnp.concatenate(codes, axis=-1)                          # (B, 6C)
    we, be = params["encoder"]
    out = jnp.dot(code_all, we, precision=lax.Precision.HIGHEST) + be   # (B, 1)
    return out.reshape(B, 1, 1)


if __name__ == "__main__":
    VECT_LENGTH, BATCH = 512, 8   # small but valid: V // 256 = 2 features per channel

    key = jax.random.PRNGKey(0)
    kp, kx = jax.random.split(key)
    params = init_params(kp, VECT_LENGTH)
    x = jax.random.normal(kx, (BATCH, NUM_CHANNELS, VECT_LENGTH), jnp.float32)

    fwd = jax.jit(predictor_force_forward)
    out = fwd(params, x)
    jax.block_until_ready(out)

    ref = reference_forward(params, x)
    assert out.shape == (BATCH, 1, 1), out.shape
    assert jnp.allclose(out, ref, atol=1e-3, rtol=1e-3), "mismatch vs JAX reference"

    print("KERNEL_OK")
</pallas_src>

<mosaic_0001>
module attributes {stable_mosaic.version = 11 : i64} {
  func.func @_predictor_force_kernel(%arg0: i32, %arg1: memref<6x8x512xf32, #tpu.memory_space<vmem>>, %arg2: memref<6x512x2xf32, #tpu.memory_space<vmem>>, %arg3: memref<6x1x2xf32, #tpu.memory_space<vmem>>, %arg4: memref<6x1x2xf32, #tpu.memory_space<vmem>>, %arg5: memref<1x1xf32, #tpu.memory_space<vmem>>, %arg6: memref<8x1xf32, #tpu.memory_space<vmem>>) attributes {dimension_semantics = [#tpu.dimension_semantics<arbitrary>], iteration_bounds = array<i64: 1>, scalar_prefetch = 0 : i64, scratch_operands = 0 : i64, tpu.core_type = #tpu.core_type<tc>, window_params = [{pipeline_mode = #tpu.pipeline_mode<synchronous>, transform_indices = @transform_0, window_bounds = array<i64: 6, 8, 512>}, {pipeline_mode = #tpu.pipeline_mode<synchronous>, transform_indices = @transform_1, window_bounds = array<i64: 6, 512, 2>}, {pipeline_mode = #tpu.pipeline_mode<synchronous>, transform_indices = @transform_2, window_bounds = array<i64: 6, 1, 2>}, {pipeline_mode = #tpu.pipeline_mode<synchronous>, transform_indices = @transform_3, window_bounds = array<i64: 6, 1, 2>}, {pipeline_mode = #tpu.pipeline_mode<synchronous>, transform_indices = @transform_4, window_bounds = array<i64: 1, 1>}, {pipeline_mode = #tpu.pipeline_mode<synchronous>, transform_indices = @transform_5, window_bounds = array<i64: 8, 1>}]} {
    %cst = arith.constant 0.000000e+00 : f32
    %0 = vector.broadcast %cst : f32 to vector<8x1xf32>
    %c0 = arith.constant 0 : index
    %c0_0 = arith.constant 0 : index
    %c0_1 = arith.constant 0 : index
    %1 = vector.load %arg1[%c0, %c0_0, %c0_1] : memref<6x8x512xf32, #tpu.memory_space<vmem>>, vector<1x8x512xf32>
    %2 = vector.shape_cast %1 : vector<1x8x512xf32> to vector<8x512xf32>
    %c0_2 = arith.constant 0 : index
    %c0_3 = arith.constant 0 : index
    %c0_4 = arith.constant 0 : index
    %3 = vector.load %arg2[%c0_2, %c0_3, %c0_4] : memref<6x512x2xf32, #tpu.memory_space<vmem>>, vector<1x512x2xf32>
    %4 = vector.shape_cast %3 : vector<1x512x2xf32> to vector<512x2xf32>
    %cst_5 = arith.constant dense<0.000000e+00> : vector<8x2xf32>
    %5 = tpu.matmul %2, %4, %cst_5 {dimension_numbers = #tpu.dot_dimension_numbers<[1], [0], [0], [1], [0, 0, 1, 1], [], []>, precision = #tpu.contract_precision<fp32>} : vector<8x512xf32>, vector<512x2xf32>, vector<8x2xf32> -> vector<8x2xf32>
    %c0_6 = arith.constant 0 : index
    %c0_7 = arith.constant 0 : index
    %c0_8 = arith.constant 0 : index
    %6 = vector.load %arg3[%c0_6, %c0_7, %c0_8] : memref<6x1x2xf32, #tpu.memory_space<vmem>>, vector<1x1x2xf32>
    %7 = vector.shape_cast %6 : vector<1x1x2xf32> to vector<1x2xf32>
    %8 = vector.broadcast %7 : vector<1x2xf32> to vector<8x2xf32>
    %9 = arith.addf %5, %8 : vector<8x2xf32>
    %c0_9 = arith.constant 0 : index
    %c0_10 = arith.constant 0 : index
    %c0_11 = arith.constant 0 : index
    %10 = vector.load %arg4[%c0_9, %c0_10, %c0_11] : memref<6x1x2xf32, #tpu.memory_space<vmem>>, vector<1x1x2xf32>
    %11 = vector.shape_cast %10 : vector<1x1x2xf32> to vector<1x2xf32>
    %12 = vector.broadcast %11 : vector<1x2xf32> to vector<8x2xf32>
    %13 = arith.mulf %9, %12 : vector<8x2xf32>
    %cst_12 = arith.constant dense<0.000000e+00> : vector<8xf32>
    %14 = vector.multi_reduction <add>, %13, %cst_12 [1] : vector<8x2xf32> to vector<8xf32>
    %15 = vector.shape_cast %14 : vector<8xf32> to vector<8x1xf32>
    %16 = arith.addf %0, %15 : vector<8x1xf32>
    %c1 = arith.constant 1 : index
    %c0_13 = arith.constant 0 : index
    %c0_14 = arith.constant 0 : index
    %17 = vector.load %arg1[%c1, %c0_13, %c0_14] : memref<6x8x512xf32, #tpu.memory_space<vmem>>, vector<1x8x512xf32>
    %18 = vector.shape_cast %17 : vector<1x8x512xf32> to vector<8x512xf32>
    %c1_15 = arith.constant 1 : index
    %c0_16 = arith.constant 0 : index
    %c0_17 = arith.constant 0 : index
    %19 = vector.load %arg2[%c1_15, %c0_16, %c0_17] : memref<6x512x2xf32, #tpu.memory_space<vmem>>, vector<1x512x2xf32>
    %20 = vector.shape_cast %19 : vector<1x512x2xf32> to vector<512x2xf32>
    %cst_18 = arith.constant dense<0.000000e+00> : vector<8x2xf32>
    %21 = tpu.matmul %18, %20, %cst_18 {dimension_numbers = #tpu.dot_dimension_numbers<[1], [0], [0], [1], [0, 0, 1, 1], [], []>, precision = #tpu.contract_precision<fp32>} : vector<8x512xf32>, vector<512x2xf32>, vector<8x2xf32> -> vector<8x2xf32>
    %c1_19 = arith.constant 1 : index
    %c0_20 = arith.constant 0 : index
    %c0_21 = arith.constant 0 : index
    %22 = vector.load %arg3[%c1_19, %c0_20, %c0_21] : memref<6x1x2xf32, #tpu.memory_space<vmem>>, vector<1x1x2xf32>
    %23 = vector.shape_cast %22 : vector<1x1x2xf32> to vector<1x2xf32>
    %24 = vector.broadcast %23 : vector<1x2xf32> to vector<8x2xf32>
    %25 = arith.addf %21, %24 : vector<8x2xf32>
    %c1_22 = arith.constant 1 : index
    %c0_23 = arith.constant 0 : index
    %c0_24 = arith.constant 0 : index
    %26 = vector.load %arg4[%c1_22, %c0_23, %c0_24] : memref<6x1x2xf32, #tpu.memory_space<vmem>>, vector<1x1x2xf32>
    %27 = vector.shape_cast %26 : vector<1x1x2xf32> to vector<1x2xf32>
    %28 = vector.broadcast %27 : vector<1x2xf32> to vector<8x2xf32>
    %29 = arith.mulf %25, %28 : vector<8x2xf32>
    %cst_25 = arith.constant dense<0.000000e+00> : vector<8xf32>
    %30 = vector.multi_reduction <add>, %29, %cst_25 [1] : vector<8x2xf32> to vector<8xf32>
    %31 = vector.shape_cast %30 : vector<8xf32> to vector<8x1xf32>
    %32 = arith.addf %16, %31 : vector<8x1xf32>
    %c2 = arith.constant 2 : index
    %c0_26 = arith.constant 0 : index
    %c0_27 = arith.constant 0 : index
    %33 = vector.load %arg1[%c2, %c0_26, %c0_27] : memref<6x8x512xf32, #tpu.memory_space<vmem>>, vector<1x8x512xf32>
    %34 = vector.shape_cast %33 : vector<1x8x512xf32> to vector<8x512xf32>
    %c2_28 = arith.constant 2 : index
    %c0_29 = arith.constant 0 : index
    %c0_30 = arith.constant 0 : index
    %35 = vector.load %arg2[%c2_28, %c0_29, %c0_30] : memref<6x512x2xf32, #tpu.memory_space<vmem>>, vector<1x512x2xf32>
    %36 = vector.shape_cast %35 : vector<1x512x2xf32> to vector<512x2xf32>
    %cst_31 = arith.constant dense<0.000000e+00> : vector<8x2xf32>
    %37 = tpu.matmul %34, %36, %cst_31 {dimension_numbers = #tpu.dot_dimension_numbers<[1], [0], [0], [1], [0, 0, 1, 1], [], []>, precision = #tpu.contract_precision<fp32>} : vector<8x512xf32>, vector<512x2xf32>, vector<8x2xf32> -> vector<8x2xf32>
    %c2_32 = arith.constant 2 : index
    %c0_33 = arith.constant 0 : index
    %c0_34 = arith.constant 0 : index
    %38 = vector.load %arg3[%c2_32, %c0_33, %c0_34] : memref<6x1x2xf32, #tpu.memory_space<vmem>>, vector<1x1x2xf32>
    %39 = vector.shape_cast %38 : vector<1x1x2xf32> to vector<1x2xf32>
    %40 = vector.broadcast %39 : vector<1x2xf32> to vector<8x2xf32>
    %41 = arith.addf %37, %40 : vector<8x2xf32>
    %c2_35 = arith.constant 2 : index
    %c0_36 = arith.constant 0 : index
    %c0_37 = arith.constant 0 : index
    %42 = vector.load %arg4[%c2_35, %c0_36, %c0_37] : memref<6x1x2xf32, #tpu.memory_space<vmem>>, vector<1x1x2xf32>
    %43 = vector.shape_cast %42 : vector<1x1x2xf32> to vector<1x2xf32>
    %44 = vector.broadcast %43 : vector<1x2xf32> to vector<8x2xf32>
    %45 = arith.mulf %41, %44 : vector<8x2xf32>
    %cst_38 = arith.constant dense<0.000000e+00> : vector<8xf32>
    %46 = vector.multi_reduction <add>, %45, %cst_38 [1] : vector<8x2xf32> to vector<8xf32>
    %47 = vector.shape_cast %46 : vector<8xf32> to vector<8x1xf32>
    %48 = arith.addf %32, %47 : vector<8x1xf32>
    %c3 = arith.constant 3 : index
    %c0_39 = arith.constant 0 : index
    %c0_40 = arith.constant 0 : index
    %49 = vector.load %arg1[%c3, %c0_39, %c0_40] : memref<6x8x512xf32, #tpu.memory_space<vmem>>, vector<1x8x512xf32>
    %50 = vector.shape_cast %49 : vector<1x8x512xf32> to vector<8x512xf32>
    %c3_41 = arith.constant 3 : index
    %c0_42 = arith.constant 0 : index
    %c0_43 = arith.constant 0 : index
    %51 = vector.load %arg2[%c3_41, %c0_42, %c0_43] : memref<6x512x2xf32, #tpu.memory_space<vmem>>, vector<1x512x2xf32>
    %52 = vector.shape_cast %51 : vector<1x512x2xf32> to vector<512x2xf32>
    %cst_44 = arith.constant dense<0.000000e+00> : vector<8x2xf32>
    %53 = tpu.matmul %50, %52, %cst_44 {dimension_numbers = #tpu.dot_dimension_numbers<[1], [0], [0], [1], [0, 0, 1, 1], [], []>, precision = #tpu.contract_precision<fp32>} : vector<8x512xf32>, vector<512x2xf32>, vector<8x2xf32> -> vector<8x2xf32>
    %c3_45 = arith.constant 3 : index
    %c0_46 = arith.constant 0 : index
    %c0_47 = arith.constant 0 : index
    %54 = vector.load %arg3[%c3_45, %c0_46, %c0_47] : memref<6x1x2xf32, #tpu.memory_space<vmem>>, vector<1x1x2xf32>
    %55 = vector.shape_cast %54 : vector<1x1x2xf32> to vector<1x2xf32>
    %56 = vector.broadcast %55 : vector<1x2xf32> to vector<8x2xf32>
    %57 = arith.addf %53, %56 : vector<8x2xf32>
    %c3_48 = arith.constant 3 : index
    %c0_49 = arith.constant 0 : index
    %c0_50 = arith.constant 0 : index
    %58 = vector.load %arg4[%c3_48, %c0_49, %c0_50] : memref<6x1x2xf32, #tpu.memory_space<vmem>>, vector<1x1x2xf32>
    %59 = vector.shape_cast %58 : vector<1x1x2xf32> to vector<1x2xf32>
    %60 = vector.broadcast %59 : vector<1x2xf32> to vector<8x2xf32>
    %61 = arith.mulf %57, %60 : vector<8x2xf32>
    %cst_51 = arith.constant dense<0.000000e+00> : vector<8xf32>
    %62 = vector.multi_reduction <add>, %61, %cst_51 [1] : vector<8x2xf32> to vector<8xf32>
    %63 = vector.shape_cast %62 : vector<8xf32> to vector<8x1xf32>
    %64 = arith.addf %48, %63 : vector<8x1xf32>
    %c4 = arith.constant 4 : index
    %c0_52 = arith.constant 0 : index
    %c0_53 = arith.constant 0 : index
    %65 = vector.load %arg1[%c4, %c0_52, %c0_53] : memref<6x8x512xf32, #tpu.memory_space<vmem>>, vector<1x8x512xf32>
    %66 = vector.shape_cast %65 : vector<1x8x512xf32> to vector<8x512xf32>
    %c4_54 = arith.constant 4 : index
    %c0_55 = arith.constant 0 : index
    %c0_56 = arith.constant 0 : index
    %67 = vector.load %arg2[%c4_54, %c0_55, %c0_56] : memref<6x512x2xf32, #tpu.memory_space<vmem>>, vector<1x512x2xf32>
    %68 = vector.shape_cast %67 : vector<1x512x2xf32> to vector<512x2xf32>
    %cst_57 = arith.constant dense<0.000000e+00> : vector<8x2xf32>
    %69 = tpu.matmul %66, %68, %cst_57 {dimension_numbers = #tpu.dot_dimension_numbers<[1], [0], [0], [1], [0, 0, 1, 1], [], []>, precision = #tpu.contract_precision<fp32>} : vector<8x512xf32>, vector<512x2xf32>, vector<8x2xf32> -> vector<8x2xf32>
    %c4_58 = arith.constant 4 : index
    %c0_59 = arith.constant 0 : index
    %c0_60 = arith.constant 0 : index
    %70 = vector.load %arg3[%c4_58, %c0_59, %c0_60] : memref<6x1x2xf32, #tpu.memory_space<vmem>>, vector<1x1x2xf32>
    %71 = vector.shape_cast %70 : vector<1x1x2xf32> to vector<1x2xf32>
    %72 = vector.broadcast %71 : vector<1x2xf32> to vector<8x2xf32>
    %73 = arith.addf %69, %72 : vector<8x2xf32>
    %c4_61 = arith.constant 4 : index
    %c0_62 = arith.constant 0 : index
    %c0_63 = arith.constant 0 : index
    %74 = vector.load %arg4[%c4_61, %c0_62, %c0_63] : memref<6x1x2xf32, #tpu.memory_space<vmem>>, vector<1x1x2xf32>
    %75 = vector.shape_cast %74 : vector<1x1x2xf32> to vector<1x2xf32>
    %76 = vector.broadcast %75 : vector<1x2xf32> to vector<8x2xf32>
    %77 = arith.mulf %73, %76 : vector<8x2xf32>
    %cst_64 = arith.constant dense<0.000000e+00> : vector<8xf32>
    %78 = vector.multi_reduction <add>, %77, %cst_64 [1] : vector<8x2xf32> to vector<8xf32>
    %79 = vector.shape_cast %78 : vector<8xf32> to vector<8x1xf32>
    %80 = arith.addf %64, %79 : vector<8x1xf32>
    %c5 = arith.constant 5 : index
    %c0_65 = arith.constant 0 : index
    %c0_66 = arith.constant 0 : index
    %81 = vector.load %arg1[%c5, %c0_65, %c0_66] : memref<6x8x512xf32, #tpu.memory_space<vmem>>, vector<1x8x512xf32>
    %82 = vector.shape_cast %81 : vector<1x8x512xf32> to vector<8x512xf32>
    %c5_67 = arith.constant 5 : index
    %c0_68 = arith.constant 0 : index
    %c0_69 = arith.constant 0 : index
    %83 = vector.load %arg2[%c5_67, %c0_68, %c0_69] : memref<6x512x2xf32, #tpu.memory_space<vmem>>, vector<1x512x2xf32>
    %84 = vector.shape_cast %83 : vector<1x512x2xf32> to vector<512x2xf32>
    %cst_70 = arith.constant dense<0.000000e+00> : vector<8x2xf32>
    %85 = tpu.matmul %82, %84, %cst_70 {dimension_numbers = #tpu.dot_dimension_numbers<[1], [0], [0], [1], [0, 0, 1, 1], [], []>, precision = #tpu.contract_precision<fp32>} : vector<8x512xf32>, vector<512x2xf32>, vector<8x2xf32> -> vector<8x2xf32>
    %c5_71 = arith.constant 5 : index
    %c0_72 = arith.constant 0 : index
    %c0_73 = arith.constant 0 : index
    %86 = vector.load %arg3[%c5_71, %c0_72, %c0_73] : memref<6x1x2xf32, #tpu.memory_space<vmem>>, vector<1x1x2xf32>
    %87 = vector.shape_cast %86 : vector<1x1x2xf32> to vector<1x2xf32>
    %88 = vector.broadcast %87 : vector<1x2xf32> to vector<8x2xf32>
    %89 = arith.addf %85, %88 : vector<8x2xf32>
    %c5_74 = arith.constant 5 : index
    %c0_75 = arith.constant 0 : index
    %c0_76 = arith.constant 0 : index
    %90 = vector.load %arg4[%c5_74, %c0_75, %c0_76] : memref<6x1x2xf32, #tpu.memory_space<vmem>>, vector<1x1x2xf32>
    %91 = vector.shape_cast %90 : vector<1x1x2xf32> to vector<1x2xf32>
    %92 = vector.broadcast %91 : vector<1x2xf32> to vector<8x2xf32>
    %93 = arith.mulf %89, %92 : vector<8x2xf32>
    %cst_77 = arith.constant dense<0.000000e+00> : vector<8xf32>
    %94 = vector.multi_reduction <add>, %93, %cst_77 [1] : vector<8x2xf32> to vector<8xf32>
    %95 = vector.shape_cast %94 : vector<8xf32> to vector<8x1xf32>
    %96 = arith.addf %80, %95 : vector<8x1xf32>
    %c0_78 = arith.constant 0 : index
    %c0_79 = arith.constant 0 : index
    %97 = vector.load %arg5[%c0_78, %c0_79] : memref<1x1xf32, #tpu.memory_space<vmem>>, vector<1x1xf32>
    %98 = vector.broadcast %97 : vector<1x1xf32> to vector<8x1xf32>
    %99 = arith.addf %96, %98 : vector<8x1xf32>
    %c0_80 = arith.constant 0 : index
    %c0_81 = arith.constant 0 : index
    %100 = vector.load %arg6[%c0_80, %c0_81] : memref<8x1xf32, #tpu.memory_space<vmem>>, vector<8x1xf32>
    tpu.vector_store %arg6[%c0_80, %c0_81], %99 {strides = array<i32>} : memref<8x1xf32, #tpu.memory_space<vmem>>, vector<8x1xf32>,
    return
  }
  func.func @transform_0(%arg0: i32) -> (i32, i32, i32) {
    %c0_i32 = arith.constant 0 : i32
    %c0_i32_0 = arith.constant 0 : i32
    %c0_i32_1 = arith.constant 0 : i32
    %c0_i32_2 = arith.constant 0 : i32
    return %c0_i32, %c0_i32_0, %c0_i32_1 : i32, i32, i32
  }
  func.func @transform_1(%arg0: i32) -> (i32, i32, i32) {
    %c0_i32 = arith.constant 0 : i32
    %c0_i32_0 = arith.constant 0 : i32
    %c0_i32_1 = arith.constant 0 : i32
    %c0_i32_2 = arith.constant 0 : i32
    return %c0_i32, %c0_i32_0, %c0_i32_1 : i32, i32, i32
  }
  func.func @transform_2(%arg0: i32) -> (i32, i32, i32) {
    %c0_i32 = arith.constant 0 : i32
    %c0_i32_0 = arith.constant 0 : i32
    %c0_i32_1 = arith.constant 0 : i32
    %c0_i32_2 = arith.constant 0 : i32
    return %c0_i32, %c0_i32_0, %c0_i32_1 : i32, i32, i32
  }
  func.func @transform_3(%arg0: i32) -> (i32, i32, i32) {
    %c0_i32 = arith.constant 0 : i32
    %c0_i32_0 = arith.constant 0 : i32
    %c0_i32_1 = arith.constant 0 : i32
    %c0_i32_2 = arith.constant 0 : i32
    return %c0_i32, %c0_i32_0, %c0_i32_1 : i32, i32, i32
  }
  func.func @transform_4(%arg0: i32) -> (i32, i32) {
    %c0_i32 = arith.constant 0 : i32
    %c0_i32_0 = arith.constant 0 : i32
    %c0_i32_1 = arith.constant 0 : i32
    return %c0_i32, %c0_i32_0 : i32, i32
  }
  func.func @transform_5(%arg0: i32) -> (i32, i32) {
    %c0_i32 = arith.constant 0 : i32
    %c0_i32_0 = arith.constant 0 : i32
    %c0_i32_1 = arith.constant 0 : i32
    return %c0_i32, %c0_i32_0 : i32, i32
  }
}

</mosaic_0001>

<bundles_post_ra>
// kernel: predictor_force_forward.1
= control target key start
LH: loop header
LB: loop body
LE: loop exit
PB: predicated region body
PF: predicated region fallthrough
CT: control target
= control target key end

     0   :  { %vm1463_vm0 = vcmask 15360   ;;  %vm8718_vm1 = vcmask 7168   ;;  %s16505_s1 = inlined_call_operand.vmem [shape: f32[6,512,2], index: 1, kind: input, shape index: {}]   ;;  %s16506_s0 = inlined_call_operand.vmem [shape: f32[6,8,512], index: 0, kind: input, shape index: {}]   ;;  %s16507_s2 = inlined_call_operand.vmem [shape: f32[6,1,2], index: 2, kind: input, shape index: {}]   ;;  %s16508_s3 = inlined_call_operand.vmem [shape: f32[6,1,2], index: 3, kind: input, shape index: {}]   ;;  %s16509_s4 = inlined_call_operand.<no memory space> [shape: f32[1,1], index: 4, kind: input, shape index: {}]   ;;  %s16510_s5 = inlined_call_operand.vmem [shape: f32[8,1], index: 5, kind: output, shape index: {}]  }
   0x1   :  { %v41_v0 = vld [vmem:[%s16505_s1 + $0x78] sm:$0xff]  ;;  %v40_v1 = vld [vmem:[%s16505_s1 + $0x70] sm:$0xff]  ;;  %v39_v2 = vld [vmem:[%s16505_s1 + $0x68] sm:$0xff] }
   0x2   :  { %v9126_v3 = vand.u32 4294901760, %v41_v0  ;;  %v9128_v4 = vand.u32 4294901760, %v40_v1  ;;  %v9130_v5 = vand.u32 4294901760, %v39_v2  ;;  %v38_v6 = vld [vmem:[%s16505_s1 + $0x60] sm:$0xff]  ;;  %v37_v7 = vld [vmem:[%s16505_s1 + $0x58] sm:$0xff]  ;;  %v36_v8 = vld [vmem:[%s16505_s1 + $0x50] sm:$0xff] }
   0x3   :  { %v9141_v9 = vand.u32 4294901760, %v38_v6  ;;  %v9143_v10 = vand.u32 4294901760, %v37_v7  ;;  %v9145_v11 = vand.u32 4294901760, %v36_v8  ;;  %v35_v12 = vld [vmem:[%s16505_s1 + $0x48] sm:$0xff]  ;;  %v34_v13 = vld [vmem:[%s16505_s1 + $0x40] sm:$0xff]  ;;  %v33_v21 = vld [vmem:[%s16505_s1 + $0x38] sm:$0xff] }
   0x4   :  { %95 = vmatpush.msra.mxu0 %v9126_v3  ;;  %v9155_v14 = vsub.f32 %v41_v0, %v9126_v3  ;;  %v9158_v15 = vsub.f32 %v40_v1, %v9128_v4  ;;  %291 = vmatpush.msra.mxu3 %v9126_v3  ;;  %v9162_v16 = vsub.f32 %v39_v2, %v9130_v5  ;;  %v9164_v17 = vand.u32 4294901760, %v35_v12  ;;  %v32_v26 = vld [vmem:[%s16505_s1 + $0x30] sm:$0xff]  ;;  %v31_v36 = vld [vmem:[%s16505_s1 + $0x28] sm:$0xff]  ;;  %v30_v42 = vld [vmem:[%s16505_s1 + $0x20] sm:$0xff] }
   0x5   :  { %v9167_v18 = vsub.f32 %v38_v6, %v9141_v9  ;;  %v9170_v19 = vsub.f32 %v37_v7, %v9143_v10  ;;  %v9173_v20 = vsub.f32 %v36_v8, %v9145_v11  ;;  %v9183_v25 = vand.u32 4294901760, %v34_v13  ;;  %v29_v47 = vld [vmem:[%s16505_s1 + $0x18] sm:$0xff]  ;;  %v28_v54 = vld [vmem:[%s16505_s1 + $0x10] sm:$0xff]  ;;  %v27_v61 = vld [vmem:[%s16505_s1 + $0x8] sm:$0xff] }
   0x6   :  { %97 = vmatpush.msra.mxu0 %v9128_v4  ;;  %238 = vmatpush.msra.mxu2 %v9155_v14  ;;  %v137_v22 = vand.u32 4294901760, %v9155_v14  ;;  %v16526_v23 = vand.u32 4294901760, %v9158_v15  ;;  %v16524_v24 = vand.u32 4294901760, %v9162_v16  ;;  %v9192_v29 = vsub.f32 %v35_v12, %v9164_v17  ;;  %v57_v59 = vld [vmem:[%s16505_s1 + $0xf8] sm:$0xff]  ;;  %v26_v2 = vld [vmem:[%s16505_s1] sm:$0xff]  ;;  %v56_v6 = vld [vmem:[%s16505_s1 + $0xf0] sm:$0xff] }
   0x7   :  { %293 = vmatpush.msra.mxu3 %v9128_v4  ;;  %v16523_v27 = vand.u32 4294901760, %v9167_v18  ;;  %v16520_v28 = vand.u32 4294901760, %v9170_v19  ;;  %v9205_v33 = vand.u32 4294901760, %v33_v21  ;;  %v9208_v34 = vand.u32 4294901760, %v32_v26 }
   0x8   :  { %99 = vmatpush.msra.mxu0 %v9130_v5  ;;  %241 = vmatpush.msra.mxu2 %v9158_v15  ;;  %v138_v30 = vsub.f32 %v9155_v14, %v137_v22  ;;  %v144_v31 = vsub.f32 %v9158_v15, %v16526_v23  ;;  %v150_v32 = vsub.f32 %v9162_v16, %v16524_v24  ;;  %v16518_v35 = vand.u32 4294901760, %v9173_v20 }
   0x9   :  { %295 = vmatpush.msra.mxu3 %v9130_v5  ;;  %v156_v39 = vsub.f32 %v9167_v18, %v16523_v27  ;;  %v9220_v40 = vsub.f32 %v34_v13, %v9183_v25  ;;  %v162_v41 = vsub.f32 %v9170_v19, %v16520_v28  ;;  %v9230_v44 = vand.u32 4294901760, %v31_v36 }
   0xa   :  { %101 = vmatpush.msra.mxu0 %v9141_v9  ;;  %v139_v37 = vand.u32 4294901760, %v138_v30  ;;  %244 = vmatpush.msra.mxu2 %v9162_v16  ;;  %v145_v38 = vand.u32 4294901760, %v144_v31  ;;  %v151_v43 = vand.u32 4294901760, %v150_v32  ;;  %v16517_v45 = vand.u32 4294901760, %v9192_v29  ;;  %v55_v32 = vld [vmem:[%s16505_s1 + $0xe8] sm:$0xff] }
   0xb   :  { %297 = vmatpush.msra.mxu3 %v9141_v9  ;;  %v9234_v46 = vsub.f32 %v33_v21, %v9205_v33  ;;  %v168_v48 = vsub.f32 %v9173_v20, %v16518_v35  ;;  %v157_v49 = vand.u32 4294901760, %v156_v39  ;;  %v9245_v50 = vand.u32 4294901760, %v30_v42 }
   0xc   :  { %103 = vmatpush.msra.mxu0 %v9143_v10  ;;  %140 = vmatpush.msra.mxu1 %v139_v37  ;;  %v16516_v51 = vand.u32 4294901760, %v9220_v40  ;;  %v9249_v52 = vsub.f32 %v32_v26, %v9208_v34  ;;  %v9253_v53 = vand.u32 4294901760, %v29_v47  ;;  %v163_v55 = vand.u32 4294901760, %v162_v41 }
   0xd   :  { %247 = vmatpush.msra.mxu2 %v9167_v18  ;;  %299 = vmatpush.msra.mxu3 %v9143_v10  ;;  %v174_v56 = vsub.f32 %v9192_v29, %v16517_v45  ;;  %v16515_v57 = vand.u32 4294901760, %v9234_v46  ;;  %v9264_v58 = vsub.f32 %v31_v36, %v9230_v44  ;;  %v169_v60 = vand.u32 4294901760, %v168_v48  ;;  %v50_v45 = vld [vmem:[%s16505_s1 + $0xc0] sm:$0xff] }
   0xe   :  { %105 = vmatpush.msra.mxu0 %v9145_v11  ;;  %146 = vmatpush.msra.mxu1 %v145_v38  ;;  %v180_v62 = vsub.f32 %v9220_v40, %v16516_v51  ;;  %v9278_v63 = vand.u32 4294901760, %v28_v54  ;;  %v16514_v0 = vand.u32 4294901760, %v9249_v52  ;;  %v9282_v1 = vsub.f32 %v30_v42, %v9245_v50 }
   0xf   :  { %250 = vmatpush.msra.mxu2 %v9170_v19  ;;  %301 = vmatpush.msra.mxu3 %v9145_v11  ;;  %v9293_v7 = vsub.f32 %v29_v47, %v9253_v53  ;;  %v9295_v8 = vand.u32 4294901760, %v57_v59  ;;  %v175_v12 = vand.u32 4294901760, %v174_v56  ;;  %v186_v13 = vsub.f32 %v9234_v46, %v16515_v57 }
  0x10   :  { %107 = vmatpush.msra.mxu0 %v9164_v17  ;;  %152 = vmatpush.msra.mxu1 %v151_v43  ;;  %v9301_v21 = vand.u32 4294901760, %v27_v61  ;;  %v16512_v26 = vand.u32 4294901760, %v9264_v58  ;;  %v9306_v30 = vand.u32 4294901760, %v26_v2  ;;  %v9308_v31 = vand.u32 4294901760, %v56_v6  ;;  %v54_v43 = vld [vmem:[%s16505_s1 + $0xe0] sm:$0xff] }
  0x11   :  { %253 = vmatpush.msra.mxu2 %v9173_v20  ;;  %303 = vmatpush.msra.mxu3 %v9164_v17  ;;  %v181_v36 = vand.u32 4294901760, %v180_v62  ;;  %v192_v37 = vsub.f32 %v9249_v52, %v16514_v0  ;;  %v16511_v38 = vand.u32 4294901760, %v9282_v1  ;;  %v9319_v39 = vsub.f32 %v28_v54, %v9278_v63 }
  0x12   :  { %109 = vmatpush.msra.mxu0 %v9183_v25  ;;  %158 = vmatpush.msra.mxu1 %v157_v49  ;;  %v16513_v41 = vand.u32 4294901760, %v9293_v7  ;;  %v9325_v42 = vsub.f32 %v57_v59, %v9295_v8  ;;  %v187_v47 = vand.u32 4294901760, %v186_v13  ;;  %v198_v48 = vsub.f32 %v9264_v58, %v16512_v26  ;;  %v53_v59 = vld [vmem:[%s16505_s1 + $0xd8] sm:$0xff]  ;;  %v52_v13 = vld [vmem:[%s16505_s1 + $0xd0] sm:$0xff] }
  0x13   :  { %256 = vmatpush.msra.mxu2 %v9192_v29  ;;  %305 = vmatpush.msra.mxu3 %v9183_v25  ;;  %v9335_v49 = vsub.f32 %v27_v61, %v9301_v21  ;;  %v9337_v54 = vand.u32 4294901760, %v55_v32  ;;  %v9345_v56 = vsub.f32 %v56_v6, %v9308_v31  ;;  %v204_v61 = vsub.f32 %v9282_v1, %v16511_v38 }
  0x14   :  { %111 = vmatpush.msra.mxu0 %v9205_v33  ;;  %164 = vmatpush.msra.mxu1 %v163_v55  ;;  %v9342_v55 = vsub.f32 %v26_v2, %v9306_v30  ;;  %v16519_v62 = vand.u32 4294901760, %v9319_v39  ;;  %v210_v2 = vsub.f32 %v9293_v7, %v16513_v41  ;;  %v16521_v6 = vand.u32 4294901760, %v9325_v42 }
  0x15   :  { %259 = vmatpush.msra.mxu2 %v9220_v40  ;;  %307 = vmatpush.msra.mxu3 %v9205_v33  ;;  %v9369_v38 = vsub.f32 %v55_v32, %v9337_v54  ;;  %v9371_v26 = vand.u32 4294901760, %v53_v59  ;;  %v16525_v0 = vand.u32 4294901760, %v9345_v56  ;;  %v9387_v51 = vand.u32 4294901760, %v52_v13 }
  0x16   :  { %113 = vmatpush.msra.mxu0 %v9208_v34  ;;  %170 = vmatpush.msra.mxu1 %v169_v60  ;;  %v193_v60 = vand.u32 4294901760, %v192_v37  ;;  %v16522_v37 = vand.u32 4294901760, %v9335_v49  ;;  %v16527_v41 = vand.u32 4294901760, %v9342_v55  ;;  %v216_v32 = vsub.f32 %v9319_v39, %v16519_v62 }
  0x17   :  { %262 = vmatpush.msra.mxu2 %v9234_v46  ;;  %309 = vmatpush.msra.mxu3 %v9208_v34  ;;  %v211_v35 = vand.u32 4294901760, %v210_v2  ;;  %v9403_v62 = vsub.f32 %v53_v59, %v9371_v26  ;;  %v49_v2 = vld [vmem:[%s16505_s1 + $0xb8] sm:$0xff]  ;;  %v9423_v24 = vsub.f32 %v52_v13, %v9387_v51 }
  0x18   :  { %115 = vmatpush.msra.mxu0 %v9230_v44  ;;  %176 = vmatpush.msra.mxu1 %v175_v12  ;;  %v9355_v12 = vand.u32 4294901760, %v54_v43  ;;  %v217_v59 = vand.u32 4294901760, %v216_v32  ;;  %v9428_v23 = vand.u32 4294901760, %v49_v2 }
  0x19   :  { %265 = vmatpush.msra.mxu2 %v9249_v52  ;;  %311 = vmatpush.msra.mxu3 %v9230_v44  ;;  %v16530_v14 = vand.u32 4294901760, %v9403_v62 }
  0x1a   :  { %117 = vmatpush.msra.mxu0 %v9245_v50  ;;  %182 = vmatpush.msra.mxu1 %v181_v36  ;;  %v199_v36 = vand.u32 4294901760, %v198_v48  ;;  %v205_v48 = vand.u32 4294901760, %v204_v61  ;;  %v9385_v57 = vsub.f32 %v54_v43, %v9355_v12  ;;  %v222_v43 = vsub.f32 %v9335_v49, %v16522_v37 }
  0x1b   :  { %268 = vmatpush.msra.mxu2 %v9264_v58  ;;  %313 = vmatpush.msra.mxu3 %v9245_v50  ;;  %v16528_v61 = vand.u32 4294901760, %v9369_v38  ;;  %v228_v37 = vsub.f32 %v9342_v55, %v16527_v41 }
  0x1c   :  { %119 = vmatpush.msra.mxu0 %v9253_v53  ;;  %188 = vmatpush.msra.mxu1 %v187_v47  ;;  %v51_v47 = vld [vmem:[%s16505_s1 + $0xc8] sm:$0xff]  ;;  %v16529_v27 = vand.u32 4294901760, %v9385_v57  ;;  %v223_v32 = vand.u32 4294901760, %v222_v43 }
  0x1d   :  { %271 = vmatpush.msra.mxu2 %v9282_v1  ;;  %315 = vmatpush.msra.mxu3 %v9253_v53  ;;  %v9405_v28 = vand.u32 4294901760, %v51_v47  ;;  %v491_v13 = vsub.f32 %v9369_v38, %v16528_v61  ;;  %v47_v43 = vld [vmem:[%s16505_s1 + $0xa8] sm:$0xff]  ;;  %v229_v61 = vand.u32 4294901760, %v228_v37 }
  0x1e   :  { %121 = vmatpush.msra.mxu0 %v9278_v63  ;;  %194 = vmatpush.msra.mxu1 %v193_v60  ;;  %v479_v60 = vsub.f32 %v9325_v42, %v16521_v6  ;;  %v9415_v6 = vand.u32 4294901760, %v50_v45 }
  0x1f   :  { %274 = vmatpush.msra.mxu2 %v9293_v7  ;;  %317 = vmatpush.msra.mxu3 %v9278_v63  ;;  %v492_v37 = vand.u32 4294901760, %v491_v13 }
  0x20   :  { %123 = vmatpush.msra.mxu0 %v9301_v21  ;;  %200 = vmatpush.msra.mxu1 %v199_v36  ;;  %v485_v36 = vsub.f32 %v9345_v56, %v16525_v0  ;;  %v480_v0 = vand.u32 4294901760, %v479_v60  ;;  %v16764_v60 = vand.u32 4294901760, %v9158_v15 }
  0x21   :  { %277 = vmatpush.msra.mxu2 %v9319_v39  ;;  %319 = vmatpush.msra.mxu3 %v9301_v21 }
  0x22   :  { %125 = vmatpush.msra.mxu0 %v9306_v30  ;;  %206 = vmatpush.msra.mxu1 %v205_v48  ;;  %v48_v48 = vld [vmem:[%s16505_s1 + $0xb0] sm:$0xff]  ;;  %v486_v41 = vand.u32 4294901760, %v485_v36  ;;  %v16765_v36 = vand.u32 4294901760, %v9162_v16  ;;  %v9470_v16 = vand.u32 4294901760, %v47_v43 }
  0x23   :  { %280 = vmatpush.msra.mxu2 %v9335_v49  ;;  %321 = vmatpush.msra.mxu3 %v9306_v30 }
  0x24   :  { %332 = vmatpush.msrb.mxu0 %v137_v22  ;;  %212 = vmatpush.msra.mxu1 %v211_v35  ;;  %v9439_v22 = vsub.f32 %v51_v47, %v9405_v28  ;;  %v9445_v35 = vsub.f32 %v50_v45, %v9415_v6  ;;  %v497_v47 = vsub.f32 %v9385_v57, %v16529_v27 }
  0x25   :  { %283 = vmatpush.msra.mxu2 %v9342_v55  ;;  %481 = vmatpush.msrb.mxu3 %v480_v0  ;;  %v9460_v45 = vsub.f32 %v49_v2, %v9428_v23  ;;  %v503_v27 = vsub.f32 %v9403_v62, %v16530_v14  ;;  %v16766_v0 = vand.u32 4294901760, %v9167_v18  ;;  %v9499_v2 = vsub.f32 %v47_v43, %v9470_v16 }
  0x26   :  { %336 = vmatpush.msrb.mxu0 %v16764_v60  ;;  %218 = vmatpush.msra.mxu1 %v217_v59  ;;  %v9455_v60 = vand.u32 4294901760, %v48_v48  ;;  %v46_v59 = vld [vmem:[%s16505_s1 + $0xa0] sm:$0xff]  ;;  %v498_v13 = vand.u32 4294901760, %v497_v47 }
  0x27   :  { %436 = vmatpush.msrb.mxu2 %v9295_v8  ;;  %487 = vmatpush.msrb.mxu3 %v486_v41  ;;  %v9485_v18 = vand.u32 4294901760, %v46_v59  ;;  %v16768_v41 = vand.u32 4294901760, %v9170_v19  ;;  %v504_v47 = vand.u32 4294901760, %v503_v27  ;;  %v44_v27 = vld [vmem:[%s16505_s1 + $0x90] sm:$0xff] }
  0x28   :  { %340 = vmatpush.msrb.mxu0 %v16765_v36  ;;  %224 = vmatpush.msra.mxu1 %v223_v32  ;;  %v45_v32 = vld [vmem:[%s16505_s1 + $0x98] sm:$0xff]  ;;  %v16767_v36 = vand.u32 4294901760, %v9423_v24  ;;  %v9483_v15 = vsub.f32 %v48_v48, %v9455_v60  ;;  %v16769_v48 = vand.u32 4294901760, %v9439_v22 }
  0x29   :  { %438 = vmatpush.msrb.mxu2 %v9308_v31  ;;  %493 = vmatpush.msrb.mxu3 %v492_v37  ;;  %v9501_v19 = vand.u32 4294901760, %v45_v32  ;;  %v9530_v37 = vand.u32 4294901760, %v44_v27 }
  0x2a   :  { %344 = vmatpush.msrb.mxu0 %v16766_v0  ;;  %230 = vmatpush.msra.mxu1 %v229_v61  ;;  %v509_v14 = vsub.f32 %v9423_v24, %v16767_v36  ;;  %v22_v61 = vld [vmem:[%s16506_s0] sm:$0xff]  ;;  %v515_v36 = vsub.f32 %v9439_v22, %v16769_v48  ;;  %v9515_v48 = vsub.f32 %v46_v59, %v9485_v18 }
  0x2b   :  { %440 = vmatpush.msrb.mxu2 %v9337_v54  ;;  %499 = vmatpush.msrb.mxu3 %v498_v13 }
  0x2c   :  { %348 = vmatpush.msrb.mxu0 %v16768_v41  ;;  %399 = vmatpush.msrb.mxu1 %v9126_v3  ;;  %v16770_v3 = vand.u32 4294901760, %v9173_v20  ;;  %v16771_v41 = vand.u32 4294901760, %v9445_v35  ;;  %v510_v43 = vand.u32 4294901760, %v509_v14  ;;  %v9517_v20 = vand.u32 4294901760, %v22_v61  ;;  %v43_v14 = vld [vmem:[%s16505_s1 + $0x88] sm:$0xff] }
  0x2d   :  { %442 = vmatpush.msrb.mxu2 %v9355_v12  ;;  %505 = vmatpush.msrb.mxu3 %v504_v47  ;;  %v516_v59 = vand.u32 4294901760, %v515_v36  ;;  %v16775_v47 = vand.u32 4294901760, %v9483_v15 }
  0x2e   :  { %352 = vmatpush.msrb.mxu0 %v16770_v3  ;;  %401 = vmatpush.msrb.mxu1 %v9128_v4  ;;  %v521_v0 = vsub.f32 %v9445_v35, %v16771_v41  ;;  %v16772_v4 = vand.u32 4294901760, %v9192_v29  ;;  %v16773_v3 = vand.u32 4294901760, %v9460_v45  ;;  %v9533_v29 = vsub.f32 %v45_v32, %v9501_v19 }
  0x2f   :  { %444 = vmatpush.msrb.mxu2 %v9371_v26  ;;  %511 = vmatpush.msrb.mxu3 %v510_v43  ;;  %v533_v36 = vsub.f32 %v9483_v15, %v16775_v47  ;;  %v9547_v13 = vsub.f32 %v22_v61, %v9517_v20  ;;  %v16777_v43 = vand.u32 4294901760, %v9499_v2  ;;  %v9560_v61 = vsub.f32 %v44_v27, %v9530_v37 }
  0x30   :  { %356 = vmatpush.msrb.mxu0 %v16772_v4  ;;  %403 = vmatpush.msrb.mxu1 %v9130_v5  ;;  %v527_v41 = vsub.f32 %v9460_v45, %v16773_v3  ;;  %v16774_v5 = vand.u32 4294901760, %v9220_v40  ;;  %v522_v4 = vand.u32 4294901760, %v521_v0  ;;  %v42_v3 = vld [vmem:[%s16505_s1 + $0x80] sm:$0xff]  ;;  %v9549_v40 = vand.u32 4294901760, %v43_v14 }
  0x31   :  { %446 = vmatpush.msrb.mxu2 %v9387_v51  ;;  %517 = vmatpush.msrb.mxu3 %v516_v59  ;;  %v550_v47 = vand.u32 4294901760, %v9533_v29  ;;  %v9562_v32 = vand.u32 4294901760, %v42_v3 }
  0x32   :  { %360 = vmatpush.msrb.mxu0 %v16774_v5  ;;  %405 = vmatpush.msrb.mxu1 %v9141_v9  ;;  %v16776_v9 = vand.u32 4294901760, %v9234_v46  ;;  %v528_v0 = vand.u32 4294901760, %v527_v41  ;;  %v539_v5 = vsub.f32 %v9499_v2, %v16777_v43  ;;  %v16778_v46 = vand.u32 4294901760, %v9249_v52 }
  0x33   :  { %448 = vmatpush.msrb.mxu2 %v9405_v28  ;;  %523 = vmatpush.msrb.mxu3 %v522_v4  ;;  %v16779_v41 = vand.u32 4294901760, %v9515_v48  ;;  %v9573_v27 = vsub.f32 %v43_v14, %v9549_v40  ;;  %v16780_v43 = vand.u32 4294901760, %v9264_v58  ;;  %v551_v52 = vsub.f32 %v9533_v29, %v550_v47 }
  0x34   :  { %364 = vmatpush.msrb.mxu0 %v16776_v9  ;;  %407 = vmatpush.msrb.mxu1 %v9143_v10  ;;  %v534_v10 = vand.u32 4294901760, %v533_v36  ;;  %v128_v9 = vand.u32 4294901760, %v9547_v13  ;;  %v556_v4 = vand.u32 4294901760, %v9560_v61  ;;  %v9584_v36 = vsub.f32 %v42_v3, %v9562_v32 }
  0x35   :  { %450 = vmatpush.msrb.mxu2 %v9415_v6  ;;  %v545_v59 = vsub.f32 %v9515_v48, %v16779_v41  ;;  %529 = vmatpush.msrb.mxu3 %v528_v0  ;;  %v16781_v14 = vand.u32 4294901760, %v9282_v1  ;;  %v16782_v3 = vand.u32 4294901760, %v9293_v7  ;;  %v16783_v41 = vand.u32 4294901760, %v9319_v39 }
  0x36   :  { %368 = vmatpush.msrb.mxu0 %v16778_v46  ;;  %409 = vmatpush.msrb.mxu1 %v9145_v11  ;;  %v540_v11 = vand.u32 4294901760, %v539_v5  ;;  %v129_v0 = vsub.f32 %v9547_v13, %v128_v9  ;;  %v562_v5 = vand.u32 4294901760, %v9573_v27  ;;  %v557_v1 = vsub.f32 %v9560_v61, %v556_v4 }
  0x37   :  { %452 = vmatpush.msrb.mxu2 %v9428_v23  ;;  %535 = vmatpush.msrb.mxu3 %v534_v10  ;;  %v546_v58 = vand.u32 4294901760, %v545_v59  ;;  %v568_v46 = vand.u32 4294901760, %v9584_v36  ;;  %v16784_v59 = vand.u32 4294901760, %v9335_v49 }
  0x38   :  { %372 = vmatpush.msrb.mxu0 %v16780_v43  ;;  %411 = vmatpush.msrb.mxu1 %v9164_v17  ;;  %v23_v17 = vld [vmem:[%s16506_s0 + $0x8] sm:$0xff]  ;;  %v563_v7 = vsub.f32 %v9573_v27, %v562_v5  ;;  %v558_v39 = vand.u32 4294901760, %v557_v1 }
  0x39   :  { %454 = vmatpush.msrb.mxu2 %v9455_v60  ;;  %541 = vmatpush.msrb.mxu3 %v540_v11  ;;  %v9603_v10 = vand.u32 4294901760, %v23_v17  ;;  %v16785_v11 = vand.u32 4294901760, %v9342_v55  ;;  %v16789_v55 = vand.u32 4294901760, %v9385_v57 }
  0x3a   :  { %376 = vmatpush.msrb.mxu0 %v16781_v14  ;;  %413 = vmatpush.msrb.mxu1 %v9183_v25  ;;  %v552_v25 = vand.u32 4294901760, %v551_v52 }
  0x3b   :  { %456 = vmatpush.msrb.mxu2 %v9470_v16  ;;  %547 = vmatpush.msrb.mxu3 %v546_v58  ;;  %v9620_v43 = vsub.f32 %v23_v17, %v9603_v10 }
  0x3c   :  { %380 = vmatpush.msrb.mxu0 %v16782_v3  ;;  %415 = vmatpush.msrb.mxu1 %v9205_v33  ;;  %v130_v33 = vand.u32 4294901760, %v129_v0  ;;  %v64_v0 = vld [vmem:[%s16505_s1 + $0x130] sm:$0xff] }
  0x3d   :  { %458 = vmatpush.msrb.mxu2 %v9485_v18  ;;  %553 = vmatpush.msrb.mxu3 %v552_v25  ;;  %v469_v52 = vand.u32 4294901760, %v9620_v43 }
  0x3e   :  { %384 = vmatpush.msrb.mxu0 %v16783_v41  ;;  %417 = vmatpush.msrb.mxu1 %v9208_v34  ;;  %v569_v34 = vsub.f32 %v9584_v36, %v568_v46 }
  0x3f   :  { %460 = vmatpush.msrb.mxu2 %v9501_v19  ;;  %131 = vmatmul.f32.vlgmr.msra.gmra.mxu0 %v130_v33  ;;  %v9821_v33 = vand.u32 4294901760, %v64_v0 }
  0x40   :  { %388 = vmatpush.msrb.mxu0 %v16784_v59  ;;  %419 = vmatpush.msrb.mxu1 %v9230_v44  ;;  %v564_v44 = vand.u32 4294901760, %v563_v7  ;;  %v570_v49 = vand.u32 4294901760, %v569_v34  ;;  %v62_v59 = vld [vmem:[%s16505_s1 + $0x120] sm:$0xff] }
  0x41   :  { %462 = vmatpush.msrb.mxu2 %v9530_v37  ;;  %559 = vmatpush.msrb.mxu3 %v558_v39 }
  0x42   :  { %392 = vmatpush.msrb.mxu0 %v16785_v11  ;;  %421 = vmatpush.msrb.mxu1 %v9245_v50  ;;  %v16786_v50 = vand.u32 4294901760, %v9325_v42 }
  0x43   :  { %464 = vmatpush.msrb.mxu2 %v9549_v40  ;;  %565 = vmatpush.msrb.mxu3 %v564_v44  ;;  %v24_v44 = vld [vmem:[%s16506_s0 + $0x10] sm:$0xff] }
  0x44   :  { %579 = vmatpush.msra.mxu0 %v9325_v42  ;;  %423 = vmatpush.msrb.mxu1 %v9253_v53  ;;  %v470_v53 = vsub.f32 %v9620_v43, %v469_v52 }
  0x45   :  { %466 = vmatpush.msrb.mxu2 %v9562_v32  ;;  %571 = vmatpush.msrb.mxu3 %v570_v49 }
  0x46   :  { %582 = vmatpush.msra.mxu0 %v9345_v56  ;;  %425 = vmatpush.msrb.mxu1 %v9278_v63  ;;  %v16787_v63 = vand.u32 4294901760, %v9345_v56  ;;  %v471_v42 = vand.u32 4294901760, %v470_v53  ;;  %v16796_v56 = vand.u32 4294901760, %v9499_v2  ;;  %v9854_v53 = vand.u32 4294901760, %v62_v59 }
  0x47   :  { %286 = vmatmul.f32.vlgmr.msra.gmra.mxu2 %v9547_v13  ;;  %325 = vmatmul.f32.vlgmr.msra.gmra.mxu3 %v128_v9 }
  0x48   :  { %585 = vmatpush.msra.mxu0 %v9369_v38  ;;  %673 = vmatpush.msra.mxu2 %v16786_v50 }
  0x49   :  { %427 = vmatpush.msrb.mxu1 %v9301_v21  ;;  %740 = vmatpush.msra.mxu3 %v9295_v8  ;;  %v16788_v21 = vand.u32 4294901760, %v9369_v38  ;;  %v16795_v38 = vand.u32 4294901760, %v9483_v15 }
  0x4a   :  { %588 = vmatpush.msra.mxu0 %v9385_v57  ;;  %677 = vmatpush.msra.mxu2 %v16787_v63  ;;  %v16791_v57 = vand.u32 4294901760, %v9423_v24 }
  0x4b   :  { %429 = vmatpush.msrb.mxu1 %v9306_v30  ;;  %742 = vmatpush.msra.mxu3 %v9308_v31  ;;  %v16790_v30 = vand.u32 4294901760, %v9403_v62 }
  0x4c   :  { %591 = vmatpush.msra.mxu0 %v9403_v62  ;;  %232 = vmatmul.f32.vlgmr.msra.gmra.mxu1 %v9517_v20 }
  0x4d   :  { %681 = vmatpush.msra.mxu2 %v16788_v21  ;;  %632 = vmatpush.msra.mxu1 %v9295_v8  ;;  %v16792_v8 = vand.u32 4294901760, %v9439_v22  ;;  %v9858_v21 = vsub.f32 %v64_v0, %v9821_v33 }
  0x4e   :  { %594 = vmatpush.msra.mxu0 %v9423_v24  ;;  %744 = vmatpush.msra.mxu3 %v9337_v54  ;;  %v16793_v24 = vand.u32 4294901760, %v9445_v35 }
  0x4f   :  { %685 = vmatpush.msra.mxu2 %v16789_v55  ;;  %634 = vmatpush.msra.mxu1 %v9308_v31  ;;  %v16794_v31 = vand.u32 4294901760, %v9460_v45  ;;  %v60_v55 = vld [vmem:[%s16505_s1 + $0x110] sm:$0xff] }
  0x50   :  { %472 = vmatmul.f32.vlgmr.msrb.gmra.mxu2 %v471_v42  ;;  %597 = vmatpush.msra.mxu0 %v9439_v22 }
  0x51   :  { %636 = vmatpush.msra.mxu1 %v9337_v54  ;;  %689 = vmatpush.msra.mxu2 %v16790_v30  ;;  %v71_v54 = vld [vmem:[%s16505_s1 + $0x168] sm:$0xff]  ;;  %v9865_v30 = vand.u32 4294901760, %v24_v44 }
  0x52   :  { %746 = vmatpush.msra.mxu3 %v9355_v12  ;;  %394 = vmatmul.f32.vlgmr.msrb.gmra.mxu0 %v9517_v20 }
  0x53   :  { %573 = vmatmul.f32.vlgmr.msrb.gmra.mxu3 %v9603_v10  ;;  %600 = vmatpush.msra.mxu0 %v9445_v35  ;;  %v69_v35 = vld [vmem:[%s16505_s1 + $0x158] sm:$0xff] }
  0x54   :  { %638 = vmatpush.msra.mxu1 %v9355_v12  ;;  %693 = vmatpush.msra.mxu2 %v16791_v57  ;;  %v70_v12 = vld [vmem:[%s16505_s1 + $0x160] sm:$0xff] }
  0x55   :  { %748 = vmatpush.msra.mxu3 %v9371_v26  ;;  %431 = vmatmul.f32.vlgmr.msrb.gmra.mxu1 %v9517_v20 }
  0x56   :  { %603 = vmatpush.msra.mxu0 %v9460_v45  ;;  %640 = vmatpush.msra.mxu1 %v9371_v26  ;;  %v73_v26 = vld [vmem:[%s16505_s1 + $0x178] sm:$0xff]  ;;  %v68_v45 = vld [vmem:[%s16505_s1 + $0x150] sm:$0xff] }
  0x57   :  { %697 = vmatpush.msra.mxu2 %v16792_v8  ;;  %750 = vmatpush.msra.mxu3 %v9387_v51  ;;  %v9749_v20 = vand.u32 4294901760, %v68_v45 }
  0x58   :  { %606 = vmatpush.msra.mxu0 %v9483_v15  ;;  %642 = vmatpush.msra.mxu1 %v9387_v51  ;;  %v72_v51 = vld [vmem:[%s16505_s1 + $0x170] sm:$0xff]  ;;  %v9728_v15 = vand.u32 4294901760, %v70_v12 }
  0x59   :  { %701 = vmatpush.msra.mxu2 %v16793_v24  ;;  %752 = vmatpush.msra.mxu3 %v9405_v28  ;;  %v9705_v62 = vand.u32 4294901760, %v72_v51 }
  0x5a   :  { %609 = vmatpush.msra.mxu0 %v9499_v2  ;;  %644 = vmatpush.msra.mxu1 %v9405_v28  ;;  %v9695_v28 = vand.u32 4294901760, %v73_v26  ;;  %v9738_v2 = vand.u32 4294901760, %v69_v35 }
  0x5b   :  { %705 = vmatpush.msra.mxu2 %v16794_v31  ;;  %754 = vmatpush.msra.mxu3 %v9415_v6 }
  0x5c   :  { %612 = vmatpush.msra.mxu0 %v9515_v48  ;;  %646 = vmatpush.msra.mxu1 %v9415_v6  ;;  %v9715_v6 = vand.u32 4294901760, %v71_v54  ;;  %v9718_v22 = vsub.f32 %v73_v26, %v9695_v28 }
  0x5d   :  { %709 = vmatpush.msra.mxu2 %v16795_v38  ;;  %756 = vmatpush.msra.mxu3 %v9428_v23  ;;  %v9883_v38 = vand.u32 4294901760, %v60_v55 }
  0x5e   :  { %615 = vmatpush.msra.mxu0 %v9533_v29  ;;  %648 = vmatpush.msra.mxu1 %v9428_v23  ;;  %v16797_v23 = vand.u32 4294901760, %v9515_v48  ;;  %v9745_v48 = vsub.f32 %v71_v54, %v9715_v6  ;;  %v9759_v29 = vsub.f32 %v70_v12, %v9728_v15  ;;  %v16534_v54 = vand.u32 4294901760, %v9858_v21  ;;  %v59_v12 = vld [vmem:[%s16505_s1 + $0x108] sm:$0xff] }
  0x5f   :  { %713 = vmatpush.msra.mxu2 %v16796_v56  ;;  %758 = vmatpush.msra.mxu3 %v9455_v60  ;;  %v9887_v56 = vsub.f32 %v62_v59, %v9854_v53 }
  0x60   :  { %618 = vmatpush.msra.mxu0 %v9560_v61  ;;  %650 = vmatpush.msra.mxu1 %v9455_v60  ;;  %v9731_v60 = vsub.f32 %v72_v51, %v9705_v62  ;;  %v16544_v17 = vand.u32 4294901760, %v9759_v29 }
  0x61   :  { %717 = vmatpush.msra.mxu2 %v16797_v23  ;;  %760 = vmatpush.msra.mxu3 %v9470_v16  ;;  %v9895_v23 = vsub.f32 %v24_v44, %v9865_v30 }
  0x62   :  { %621 = vmatpush.msra.mxu0 %v9573_v27  ;;  %652 = vmatpush.msra.mxu1 %v9470_v16  ;;  %v819_v16 = vand.u32 4294901760, %v9718_v22  ;;  %v825_v13 = vand.u32 4294901760, %v9731_v60  ;;  %v9781_v27 = vsub.f32 %v68_v45, %v9749_v20  ;;  %v838_v41 = vsub.f32 %v9759_v29, %v16544_v17 }
  0x63   :  { %721 = vmatpush.msra.mxu2 %v550_v47  ;;  %762 = vmatpush.msra.mxu3 %v9485_v18  ;;  %v66_v47 = vld [vmem:[%s16505_s1 + $0x140] sm:$0xff] }
  0x64   :  { %624 = vmatpush.msra.mxu0 %v9584_v36  ;;  %654 = vmatpush.msra.mxu1 %v9485_v18  ;;  %v67_v18 = vld [vmem:[%s16505_s1 + $0x148] sm:$0xff]  ;;  %v820_v61 = vsub.f32 %v9718_v22, %v819_v16  ;;  %v826_v36 = vsub.f32 %v9731_v60, %v825_v13  ;;  %v9791_v14 = vand.u32 4294901760, %v66_v47  ;;  %v16539_v1 = vand.u32 4294901760, %v9781_v27 }
  0x65   :  { %725 = vmatpush.msra.mxu2 %v556_v4  ;;  %764 = vmatpush.msra.mxu3 %v9501_v19  ;;  %v9775_v9 = vand.u32 4294901760, %v67_v18  ;;  %v65_v4 = vld [vmem:[%s16505_s1 + $0x138] sm:$0xff]  ;;  %v839_v50 = vand.u32 4294901760, %v838_v41 }
  0x66   :  { %627 = vmatmul.f32.vlgmr.msra.gmra.mxu0 %v9620_v43  ;;  %656 = vmatpush.msra.mxu1 %v9501_v19  ;;  %v9764_v19 = vsub.f32 %v69_v35, %v9738_v2  ;;  %v9805_v25 = vand.u32 4294901760, %v65_v4  ;;  %v9824_v7 = vsub.f32 %v66_v47, %v9791_v14  ;;  %v850_v49 = vsub.f32 %v9781_v27, %v16539_v1 }
  0x67   :  { %777 = vmatpush.msrb.mxu0 %v9695_v28  ;;  %729 = vmatpush.msra.mxu2 %v562_v5  ;;  %v821_v5 = vand.u32 4294901760, %v820_v61  ;;  %v89_v61 = vld [vmem:[%s16505_s1 + $0x1f8] sm:$0xff] }
  0x68   :  { %766 = vmatpush.msra.mxu3 %v9530_v37  ;;  %658 = vmatpush.msra.mxu1 %v9530_v37  ;;  %v831_v37 = vand.u32 4294901760, %v9745_v48  ;;  %v16541_v58 = vand.u32 4294901760, %v9764_v19  ;;  %v9840_v43 = vsub.f32 %v65_v4, %v9805_v25  ;;  %v16536_v63 = vand.u32 4294901760, %v9824_v7 }
  0x69   :  { %779 = vmatpush.msrb.mxu0 %v9705_v62  ;;  %733 = vmatpush.msra.mxu2 %v568_v46  ;;  %v63_v46 = vld [vmem:[%s16505_s1 + $0x128] sm:$0xff]  ;;  %v851_v31 = vand.u32 4294901760, %v850_v49  ;;  %v9910_v4 = vand.u32 4294901760, %v59_v12  ;;  %v9926_v41 = vand.u32 4294901760, %v89_v61 }
  0x6a   :  { %768 = vmatpush.msra.mxu3 %v9549_v40  ;;  %735 = vmatmul.f32.vlgmr.msra.gmra.mxu2 %v9603_v10  ;;  %v832_v3 = vsub.f32 %v9745_v48, %v831_v37  ;;  %v9836_v34 = vand.u32 4294901760, %v63_v46  ;;  %v16535_v24 = vand.u32 4294901760, %v9840_v43  ;;  %v862_v51 = vsub.f32 %v9824_v7, %v16536_v63 }
  0x6b   :  { %781 = vmatpush.msrb.mxu0 %v9715_v6  ;;  %920 = vmatpush.msrb.mxu2 %v9718_v22  ;;  %v81_v22 = vld [vmem:[%s16505_s1 + $0x1b8] sm:$0xff] }
  0x6c   :  { %660 = vmatpush.msra.mxu1 %v9549_v40  ;;  %770 = vmatpush.msra.mxu3 %v9562_v32  ;;  %v9808_v40 = vsub.f32 %v67_v18, %v9775_v9  ;;  %v833_v39 = vand.u32 4294901760, %v832_v3  ;;  %v9875_v26 = vsub.f32 %v63_v46, %v9836_v34  ;;  %v868_v45 = vsub.f32 %v9840_v43, %v16535_v24 }
  0x6d   :  { %772 = vmatmul.f32.vlgmr.msra.gmra.mxu3 %v9603_v10  ;;  %783 = vmatpush.msrb.mxu0 %v9728_v15  ;;  %v827_v10 = vand.u32 4294901760, %v826_v36  ;;  %v58_v36 = vld [vmem:[%s16505_s1 + $0x100] sm:$0xff]  ;;  %v863_v0 = vand.u32 4294901760, %v862_v51  ;;  %v16531_v3 = vand.u32 4294901760, %v9887_v56  ;;  %v9921_v46 = vsub.f32 %v60_v55, %v9883_v38 }
  0x6e   :  { %923 = vmatpush.msrb.mxu2 %v9731_v60  ;;  %973 = vmatpush.msrb.mxu3 %v9695_v28  ;;  %v16538_v11 = vand.u32 4294901760, %v9808_v40  ;;  %v16532_v18 = vand.u32 4294901760, %v9875_v26  ;;  %v869_v59 = vand.u32 4294901760, %v868_v45  ;;  %v9935_v44 = vand.u32 4294901760, %v58_v36  ;;  %v86_v51 = vld [vmem:[%s16505_s1 + $0x1e0] sm:$0xff]  ;;  %v80_v60 = vld [vmem:[%s16505_s1 + $0x1b0] sm:$0xff] }
  0x6f   :  { %662 = vmatpush.msra.mxu1 %v9562_v32  ;;  %785 = vmatpush.msrb.mxu0 %v9738_v2  ;;  %v844_v32 = vsub.f32 %v9764_v19, %v16541_v58  ;;  %v886_v55 = vsub.f32 %v9887_v56, %v16531_v3 }
  0x70   :  { %666 = vmatmul.f32.vlgmr.msra.gmra.mxu1 %v469_v52  ;;  %926 = vmatpush.msrb.mxu2 %v9745_v48  ;;  %v61_v52 = vld [vmem:[%s16505_s1 + $0x118] sm:$0xff]  ;;  %v856_v57 = vsub.f32 %v9808_v40, %v16538_v11 }
  0x71   :  { %822 = vmatpush.msrb.mxu1 %v821_v5  ;;  %975 = vmatpush.msrb.mxu3 %v9705_v62  ;;  %v845_v42 = vand.u32 4294901760, %v844_v32  ;;  %v9871_v8 = vand.u32 4294901760, %v61_v52  ;;  %v874_v5 = vsub.f32 %v9858_v21, %v16534_v54  ;;  %v88_v32 = vld [vmem:[%s16505_s1 + $0x1f0] sm:$0xff] }
  0x72   :  { %787 = vmatpush.msrb.mxu0 %v9749_v20  ;;  %929 = vmatpush.msrb.mxu2 %v9759_v29  ;;  %v857_v35 = vand.u32 4294901760, %v856_v57  ;;  %v16537_v57 = vand.u32 4294901760, %v9921_v46 }
  0x73   :  { %828 = vmatpush.msrb.mxu1 %v827_v10  ;;  %977 = vmatpush.msrb.mxu3 %v9715_v6  ;;  %v9903_v47 = vsub.f32 %v61_v52, %v9871_v8  ;;  %v810_v10 = vand.u32 4294901760, %v9895_v23  ;;  %v9941_v52 = vsub.f32 %v59_v12, %v9910_v4 }
  0x74   :  { %789 = vmatpush.msrb.mxu0 %v9775_v9  ;;  %932 = vmatpush.msrb.mxu2 %v9764_v19 }
  0x75   :  { %834 = vmatpush.msrb.mxu1 %v833_v39  ;;  %979 = vmatpush.msrb.mxu3 %v9728_v15  ;;  %v880_v39 = vsub.f32 %v9875_v26, %v16532_v18  ;;  %v16533_v49 = vand.u32 4294901760, %v9903_v47  ;;  %v811_v12 = vsub.f32 %v9895_v23, %v810_v10  ;;  %v85_v18 = vld [vmem:[%s16505_s1 + $0x1d8] sm:$0xff] }
  0x76   :  { %791 = vmatpush.msrb.mxu0 %v9791_v14  ;;  %935 = vmatpush.msrb.mxu2 %v9781_v27  ;;  %v9991_v63 = vand.u32 4294901760, %v85_v18 }
  0x77   :  { %840 = vmatpush.msrb.mxu1 %v839_v50  ;;  %981 = vmatpush.msrb.mxu3 %v9738_v2  ;;  %v87_v50 = vld [vmem:[%s16505_s1 + $0x1e8] sm:$0xff]  ;;  %v881_v45 = vand.u32 4294901760, %v880_v39  ;;  %v887_v39 = vand.u32 4294901760, %v886_v55  ;;  %v812_v54 = vand.u32 4294901760, %v811_v12 }
  0x78   :  { %793 = vmatpush.msrb.mxu0 %v9805_v25  ;;  %938 = vmatpush.msrb.mxu2 %v9808_v40  ;;  %v9971_v3 = vand.u32 4294901760, %v87_v50 }
  0x79   :  { %846 = vmatpush.msrb.mxu1 %v845_v42  ;;  %983 = vmatpush.msrb.mxu3 %v9749_v20  ;;  %v875_v42 = vand.u32 4294901760, %v874_v5  ;;  %v9969_v5 = vsub.f32 %v58_v36, %v9935_v44  ;;  %v898_v36 = vsub.f32 %v9921_v46, %v16537_v57 }
  0x7a   :  { %795 = vmatpush.msrb.mxu0 %v9821_v33  ;;  %941 = vmatpush.msrb.mxu2 %v9824_v7  ;;  %v9999_v57 = vsub.f32 %v87_v50, %v9971_v3 }
  0x7b   :  { %852 = vmatpush.msrb.mxu1 %v851_v31  ;;  %985 = vmatpush.msrb.mxu3 %v9775_v9  ;;  %v9951_v31 = vand.u32 4294901760, %v88_v32  ;;  %v899_v50 = vand.u32 4294901760, %v898_v36 }
  0x7c   :  { %797 = vmatpush.msrb.mxu0 %v9836_v34  ;;  %944 = vmatpush.msrb.mxu2 %v9840_v43  ;;  %v16545_v36 = vand.u32 4294901760, %v9999_v57 }
  0x7d   :  { %858 = vmatpush.msrb.mxu1 %v857_v35  ;;  %987 = vmatpush.msrb.mxu3 %v9791_v14  ;;  %v9962_v35 = vsub.f32 %v89_v61, %v9926_v41  ;;  %v16540_v61 = vand.u32 4294901760, %v9941_v52 }
  0x7e   :  { %799 = vmatpush.msrb.mxu0 %v9854_v53  ;;  %947 = vmatpush.msrb.mxu2 %v9858_v21 }
  0x7f   :  { %864 = vmatpush.msrb.mxu1 %v863_v0  ;;  %989 = vmatpush.msrb.mxu3 %v9805_v25  ;;  %v892_v0 = vsub.f32 %v9903_v47, %v16533_v49  ;;  %v9986_v49 = vsub.f32 %v88_v32, %v9951_v31  ;;  %v16542_v24 = vand.u32 4294901760, %v9962_v35  ;;  %v16543_v32 = vand.u32 4294901760, %v9969_v5 }
  0x80   :  { %801 = vmatpush.msrb.mxu0 %v9871_v8  ;;  %950 = vmatpush.msrb.mxu2 %v9875_v26  ;;  %v904_v12 = vsub.f32 %v9941_v52, %v16540_v61  ;;  %v10021_v61 = vsub.f32 %v85_v18, %v9991_v63 }
  0x81   :  { %870 = vmatpush.msrb.mxu1 %v869_v59  ;;  %991 = vmatpush.msrb.mxu3 %v9821_v33  ;;  %v9979_v59 = vand.u32 4294901760, %v86_v51  ;;  %v893_v55 = vand.u32 4294901760, %v892_v0  ;;  %v16546_v0 = vand.u32 4294901760, %v9986_v49 }
  0x82   :  { %803 = vmatpush.msrb.mxu0 %v9883_v38  ;;  %953 = vmatpush.msrb.mxu2 %v9887_v56  ;;  %v905_v18 = vand.u32 4294901760, %v904_v12  ;;  %v16548_v17 = vand.u32 4294901760, %v10021_v61 }
  0x83   :  { %876 = vmatpush.msrb.mxu1 %v875_v42  ;;  %993 = vmatpush.msrb.mxu3 %v9836_v34  ;;  %v84_v42 = vld [vmem:[%s16505_s1 + $0x1d0] sm:$0xff]  ;;  %v10007_v11 = vsub.f32 %v86_v51, %v9979_v59  ;;  %v1161_v51 = vsub.f32 %v9962_v35, %v16542_v24 }
  0x84   :  { %805 = vmatpush.msrb.mxu0 %v9910_v4  ;;  %956 = vmatpush.msrb.mxu2 %v9903_v47  ;;  %v10014_v1 = vand.u32 4294901760, %v84_v42 }
  0x85   :  { %882 = vmatpush.msrb.mxu1 %v881_v45  ;;  %995 = vmatpush.msrb.mxu3 %v9854_v53  ;;  %v83_v45 = vld [vmem:[%s16505_s1 + $0x1c8] sm:$0xff]  ;;  %v16547_v24 = vand.u32 4294901760, %v10007_v11  ;;  %v1162_v12 = vand.u32 4294901760, %v1161_v51  ;;  %v10065_v51 = vand.u32 4294901760, %v81_v22 }
  0x86   :  { %807 = vmatpush.msrb.mxu0 %v9935_v44  ;;  %959 = vmatpush.msrb.mxu2 %v9921_v46  ;;  %v10032_v58 = vand.u32 4294901760, %v83_v45 }
  0x87   :  { %888 = vmatpush.msrb.mxu1 %v887_v39  ;;  %997 = vmatpush.msrb.mxu3 %v9871_v8  ;;  %v82_v39 = vld [vmem:[%s16505_s1 + $0x1c0] sm:$0xff]  ;;  %v1179_v48 = vsub.f32 %v10007_v11, %v16547_v24  ;;  %v1185_v24 = vsub.f32 %v10021_v61, %v16548_v17 }
  0x88   :  { %813 = vmatmul.f32.vlgmr.msrb.gmra.mxu0 %v812_v54  ;;  %962 = vmatpush.msrb.mxu2 %v9941_v52  ;;  %v910_v54 = vsub.f32 %v9969_v5, %v16543_v32  ;;  %v10048_v32 = vand.u32 4294901760, %v82_v39 }
  0x89   :  { %1014 = vmatpush.msra.mxu0 %v819_v16  ;;  %894 = vmatpush.msrb.mxu1 %v893_v55  ;;  %v1167_v16 = vsub.f32 %v9986_v49, %v16546_v0  ;;  %v10046_v55 = vsub.f32 %v84_v42, %v10014_v1  ;;  %v1173_v42 = vsub.f32 %v9999_v57, %v16545_v36  ;;  %v10082_v0 = vand.u32 4294901760, %v80_v60 }
  0x8a   :  { %999 = vmatpush.msrb.mxu3 %v9883_v38  ;;  %965 = vmatpush.msrb.mxu2 %v9969_v5  ;;  %v1186_v17 = vand.u32 4294901760, %v1185_v24  ;;  %v16801_v24 = vand.u32 4294901760, %v9808_v40  ;;  %v75_v40 = vld [vmem:[%s16505_s1 + $0x188] sm:$0xff] }
  0x8b   :  { %1018 = vmatpush.msra.mxu0 %v825_v13  ;;  %900 = vmatpush.msrb.mxu1 %v899_v50  ;;  %v911_v13 = vand.u32 4294901760, %v910_v54  ;;  %v10063_v50 = vsub.f32 %v83_v45, %v10032_v58  ;;  %v16798_v54 = vand.u32 4294901760, %v9759_v29  ;;  %v1168_v45 = vand.u32 4294901760, %v1167_v16  ;;  %v78_v29 = vld [vmem:[%s16505_s1 + $0x1a0] sm:$0xff] }
  0x8c   :  { %1001 = vmatpush.msrb.mxu3 %v9910_v4  ;;  %968 = vmatmul.f32.vlgmr.msrb.gmra.mxu2 %v9895_v23  ;;  %v16549_v36 = vand.u32 4294901760, %v10046_v55  ;;  %v16799_v23 = vand.u32 4294901760, %v9764_v19  ;;  %v10095_v16 = vsub.f32 %v81_v22, %v10065_v51 }
  0x8d   :  { %1022 = vmatpush.msra.mxu0 %v831_v37  ;;  %1118 = vmatpush.msra.mxu2 %v9926_v41  ;;  %v79_v37 = vld [vmem:[%s16505_s1 + $0x1a8] sm:$0xff] }
  0x8e   :  { %906 = vmatpush.msrb.mxu1 %v905_v18  ;;  %1003 = vmatpush.msrb.mxu3 %v9935_v44  ;;  %v10080_v18 = vsub.f32 %v82_v39, %v10048_v32  ;;  %v16551_v39 = vand.u32 4294901760, %v10063_v50  ;;  %v1191_v19 = vsub.f32 %v10046_v55, %v16549_v36 }
  0x8f   :  { %1007 = vmatmul.f32.vlgmr.msrb.gmra.mxu3 %v810_v10  ;;  %1026 = vmatpush.msra.mxu0 %v16798_v54  ;;  %v1174_v10 = vand.u32 4294901760, %v1173_v42  ;;  %v10097_v54 = vand.u32 4294901760, %v79_v37  ;;  %v10110_v42 = vsub.f32 %v80_v60, %v10082_v0 }
  0x90   :  { %1120 = vmatpush.msra.mxu2 %v9951_v31  ;;  %1163 = vmatpush.msra.mxu3 %v1162_v12  ;;  %v1180_v12 = vand.u32 4294901760, %v1179_v48  ;;  %v16550_v22 = vand.u32 4294901760, %v10080_v18  ;;  %v16800_v48 = vand.u32 4294901760, %v9781_v27  ;;  %v76_v27 = vld [vmem:[%s16505_s1 + $0x190] sm:$0xff] }
  0x91   :  { %912 = vmatpush.msrb.mxu1 %v911_v13  ;;  %1030 = vmatpush.msra.mxu0 %v16799_v23  ;;  %v77_v13 = vld [vmem:[%s16505_s1 + $0x198] sm:$0xff]  ;;  %v10112_v23 = vand.u32 4294901760, %v78_v29  ;;  %v10123_v60 = vsub.f32 %v79_v37, %v10097_v54 }
  0x92   :  { %914 = vmatmul.f32.vlgmr.msrb.gmra.mxu1 %v9865_v30  ;;  %1122 = vmatpush.msra.mxu2 %v9971_v3  ;;  %v10125_v36 = vand.u32 4294901760, %v77_v13  ;;  %v1203_v37 = vsub.f32 %v10080_v18, %v16550_v22  ;;  %v16804_v22 = vand.u32 4294901760, %v9858_v21  ;;  %v16806_v21 = vand.u32 4294901760, %v9875_v26 }
  0x93   :  { %1081 = vmatpush.msra.mxu1 %v9695_v28  ;;  %1169 = vmatpush.msra.mxu3 %v1168_v45  ;;  %v1197_v28 = vsub.f32 %v10063_v50, %v16551_v39  ;;  %v16552_v45 = vand.u32 4294901760, %v10095_v16 }
  0x94   :  { %1034 = vmatpush.msra.mxu0 %v16800_v48  ;;  %1124 = vmatpush.msra.mxu2 %v9979_v59  ;;  %v10139_v48 = vsub.f32 %v78_v29, %v10112_v23  ;;  %v10158_v39 = vsub.f32 %v77_v13, %v10125_v36 }
  0x95   :  { %1083 = vmatpush.msra.mxu1 %v9705_v62  ;;  %1175 = vmatpush.msra.mxu3 %v1174_v10  ;;  %v1192_v62 = vand.u32 4294901760, %v1191_v19  ;;  %v16553_v10 = vand.u32 4294901760, %v10110_v42  ;;  %v1198_v29 = vand.u32 4294901760, %v1197_v28  ;;  %v1209_v19 = vsub.f32 %v10095_v16, %v16552_v45 }
  0x96   :  { %1038 = vmatpush.msra.mxu0 %v16801_v24  ;;  %1126 = vmatpush.msra.mxu2 %v9991_v63  ;;  %v25_v24 = vld [vmem:[%s16506_s0 + $0x18] sm:$0xff]  ;;  %v1204_v28 = vand.u32 4294901760, %v1203_v37  ;;  %v1226_v45 = vand.u32 4294901760, %v10139_v48 }
  0x97   :  { %1085 = vmatpush.msra.mxu1 %v9715_v6  ;;  %1181 = vmatpush.msra.mxu3 %v1180_v12  ;;  %v16802_v6 = vand.u32 4294901760, %v9824_v7  ;;  %v10150_v12 = vand.u32 4294901760, %v76_v27  ;;  %v74_v7 = vld [vmem:[%s16505_s1 + $0x180] sm:$0xff]  ;;  %v1215_v13 = vsub.f32 %v10110_v42, %v16553_v10  ;;  %v1232_v10 = vand.u32 4294901760, %v10158_v39 }
  0x98   :  { %1128 = vmatpush.msra.mxu2 %v10014_v1 }
  0x99   :  { %1042 = vmatpush.msra.mxu0 %v16802_v6  ;;  %1087 = vmatpush.msra.mxu1 %v9728_v15  ;;  %v16803_v6 = vand.u32 4294901760, %v9840_v43  ;;  %v10166_v15 = vand.u32 4294901760, %v75_v40  ;;  %v10179_v43 = vsub.f32 %v76_v27, %v10150_v12 }
  0x9a   :  { %1187 = vmatpush.msra.mxu3 %v1186_v17  ;;  %1130 = vmatpush.msra.mxu2 %v10032_v58  ;;  %v10168_v17 = vand.u32 4294901760, %v25_v24 }
  0x9b   :  { %1046 = vmatpush.msra.mxu0 %v16803_v6  ;;  %1089 = vmatpush.msra.mxu1 %v9738_v2  ;;  %v10181_v6 = vand.u32 4294901760, %v74_v7  ;;  %v1210_v2 = vand.u32 4294901760, %v1209_v19  ;;  %v16807_v19 = vand.u32 4294901760, %v9887_v56  ;;  %v1238_v26 = vand.u32 4294901760, %v10179_v43 }
  0x9c   :  { %1193 = vmatpush.msra.mxu3 %v1192_v62  ;;  %1132 = vmatpush.msra.mxu2 %v10048_v32  ;;  %v16805_v62 = vand.u32 4294901760, %v10123_v60  ;;  %v10195_v27 = vsub.f32 %v25_v24, %v10168_v17  ;;  %v1233_v24 = vsub.f32 %v10158_v39, %v1232_v10 }
  0x9d   :  { %1050 = vmatpush.msra.mxu0 %v16804_v22  ;;  %1091 = vmatpush.msra.mxu1 %v9749_v20  ;;  %v10192_v22 = vsub.f32 %v75_v40, %v10166_v15  ;;  %v1216_v20 = vand.u32 4294901760, %v1215_v13  ;;  %v10206_v40 = vsub.f32 %v74_v7, %v10181_v6 }
  0x9e   :  { %1199 = vmatpush.msra.mxu3 %v1198_v29  ;;  %v1221_v37 = vsub.f32 %v10123_v60, %v16805_v62  ;;  %1134 = vmatpush.msra.mxu2 %v10065_v51  ;;  %v1227_v29 = vsub.f32 %v10139_v48, %v1226_v45  ;;  %v1151_v13 = vand.u32 4294901760, %v10195_v27  ;;  %v1234_v62 = vand.u32 4294901760, %v1233_v24 }
  0x9f   :  { %1054 = vmatpush.msra.mxu0 %v16806_v21  ;;  %1093 = vmatpush.msra.mxu1 %v9775_v9  ;;  %v1244_v56 = vand.u32 4294901760, %v10192_v22 }
  0xa0   :  { %1205 = vmatpush.msra.mxu3 %v1204_v28  ;;  %1136 = vmatpush.msra.mxu2 %v10082_v0  ;;  %v1222_v9 = vand.u32 4294901760, %v1221_v37  ;;  %v16808_v28 = vand.u32 4294901760, %v9903_v47  ;;  %v1228_v7 = vand.u32 4294901760, %v1227_v29  ;;  %v1239_v47 = vsub.f32 %v10179_v43, %v1238_v26 }
  0xa1   :  { %1058 = vmatpush.msra.mxu0 %v16807_v19  ;;  %1095 = vmatpush.msra.mxu1 %v9791_v14  ;;  %v16809_v14 = vand.u32 4294901760, %v9921_v46  ;;  %v16810_v37 = vand.u32 4294901760, %v9941_v52  ;;  %v1152_v46 = vsub.f32 %v10195_v27, %v1151_v13 }
  0xa2   :  { %1211 = vmatpush.msra.mxu3 %v1210_v2  ;;  %1138 = vmatpush.msra.mxu2 %v10097_v54  ;;  %v1250_v2 = vand.u32 4294901760, %v10206_v40  ;;  %v1240_v52 = vand.u32 4294901760, %v1239_v47 }
  0xa3   :  { %1062 = vmatpush.msra.mxu0 %v16808_v28  ;;  %1097 = vmatpush.msra.mxu1 %v9805_v25  ;;  %v1245_v25 = vsub.f32 %v10192_v22, %v1244_v56 }
  0xa4   :  { %1217 = vmatpush.msra.mxu3 %v1216_v20  ;;  %1140 = vmatpush.msra.mxu2 %v10112_v23  ;;  %v1251_v21 = vsub.f32 %v10206_v40, %v1250_v2 }
  0xa5   :  { %1066 = vmatpush.msra.mxu0 %v16809_v14  ;;  %1099 = vmatpush.msra.mxu1 %v9821_v33  ;;  %v16811_v33 = vand.u32 4294901760, %v9969_v5  ;;  %v1246_v20 = vand.u32 4294901760, %v1245_v25 }
  0xa6   :  { %1223 = vmatpush.msra.mxu3 %v1222_v9  ;;  %1142 = vmatpush.msra.mxu2 %v10125_v36  ;;  %v1252_v5 = vand.u32 4294901760, %v1251_v21  ;;  %v8731_v21 = vld [vmem:[%s16505_s1 + $0x218] sm:$0xff] }
  0xa7   :  { %1070 = vmatpush.msra.mxu0 %v16810_v37  ;;  %1101 = vmatpush.msra.mxu1 %v9836_v34  ;;  %v1153_v34 = vand.u32 4294901760, %v1152_v46  ;;  %v8732_v37 = vld [vmem:[%s16505_s1 + $0x220] sm:$0xff] }
  0xa8   :  { %1229 = vmatpush.msra.mxu3 %v1228_v7  ;;  %1144 = vmatpush.msra.mxu2 %v10150_v12 }
  0xa9   :  { %1074 = vmatpush.msra.mxu0 %v16811_v33  ;;  %1103 = vmatpush.msra.mxu1 %v9854_v53  ;;  %v16812_v53 = vand.u32 4294901760, %v9962_v35 }
  0xaa   :  { %1235 = vmatpush.msra.mxu3 %v1234_v62  ;;  %1076 = vmatmul.f32.vlgmr.msra.gmra.mxu0 %v9865_v30 }
  0xab   :  { %1146 = vmatpush.msra.mxu2 %v10166_v15  ;;  %1261 = vmatpush.msrb.mxu0 %v9962_v35 }
  0xac   :  { %1105 = vmatpush.msra.mxu1 %v9871_v8  ;;  %1241 = vmatpush.msra.mxu3 %v1240_v52  ;;  %v16813_v8 = vand.u32 4294901760, %v9986_v49 }
  0xad   :  { %1148 = vmatpush.msra.mxu2 %v10181_v6  ;;  %1264 = vmatpush.msrb.mxu0 %v9986_v49  ;;  %v16821_v49 = vand.u32 4294901760, %v10110_v42 }
  0xae   :  { %1107 = vmatpush.msra.mxu1 %v9883_v38  ;;  %1247 = vmatpush.msra.mxu3 %v1246_v20  ;;  %v16814_v38 = vand.u32 4294901760, %v9999_v57 }
  0xaf   :  { %1154 = vmatmul.f32.vlgmr.msra.gmra.mxu2 %v1153_v34  ;;  %1267 = vmatpush.msrb.mxu0 %v9999_v57 }
  0xb0   :  { %1355 = vmatpush.msrb.mxu2 %v16812_v53  ;;  %1109 = vmatpush.msra.mxu1 %v9910_v4  ;;  %v16815_v4 = vand.u32 4294901760, %v10007_v11 }
  0xb1   :  { %1253 = vmatpush.msra.mxu3 %v1252_v5  ;;  %1270 = vmatpush.msrb.mxu0 %v10007_v11  ;;  %v16818_v11 = vand.u32 4294901760, %v10063_v50 }
  0xb2   :  { %1255 = vmatmul.f32.vlgmr.msra.gmra.mxu3 %v10168_v17  ;;  %1359 = vmatpush.msrb.mxu2 %v16813_v8  ;;  %v8730_v8 = vld [vmem:[%s16505_s1 + $0x210] sm:$0xff] }
  0xb3   :  { %1422 = vmatpush.msrb.mxu3 %v9926_v41  ;;  %1111 = vmatpush.msra.mxu1 %v9935_v44  ;;  %v16820_v44 = vand.u32 4294901760, %v10095_v16 }
  0xb4   :  { %1273 = vmatpush.msrb.mxu0 %v10021_v61  ;;  %1113 = vmatmul.f32.vlgmr.msra.gmra.mxu1 %v9865_v30  ;;  %v16816_v30 = vand.u32 4294901760, %v10021_v61  ;;  %v8740_v61 = vld [vmem:[%s16505_s1 + $0x260] sm:$0xff] }
  0xb5   :  { %1363 = vmatpush.msrb.mxu2 %v16814_v38  ;;  %1314 = vmatpush.msrb.mxu1 %v9926_v41  ;;  %v16817_v41 = vand.u32 4294901760, %v10046_v55 }
  0xb6   :  { %1424 = vmatpush.msrb.mxu3 %v9951_v31  ;;  %1276 = vmatpush.msrb.mxu0 %v10046_v55  ;;  %v8739_v55 = vld [vmem:[%s16505_s1 + $0x258] sm:$0xff] }
  0xb7   :  { %1367 = vmatpush.msrb.mxu2 %v16815_v4  ;;  %1316 = vmatpush.msrb.mxu1 %v9951_v31  ;;  %v8741_v31 = vld [vmem:[%s16505_s1 + $0x268] sm:$0xff] }
  0xb8   :  { %1426 = vmatpush.msrb.mxu3 %v9971_v3  ;;  %1279 = vmatpush.msrb.mxu0 %v10063_v50 }
  0xb9   :  { %1371 = vmatpush.msrb.mxu2 %v16816_v30  ;;  %1318 = vmatpush.msrb.mxu1 %v9971_v3  ;;  %v16819_v3 = vand.u32 4294901760, %v10080_v18  ;;  %v10479_v30 = vand.u32 4294901760, %v8731_v21 }
  0xba   :  { %1428 = vmatpush.msrb.mxu3 %v9979_v59  ;;  %1282 = vmatpush.msrb.mxu0 %v10080_v18  ;;  %v10353_v18 = vand.u32 4294901760, %v8739_v55 }
  0xbb   :  { %1375 = vmatpush.msrb.mxu2 %v16817_v41  ;;  %1320 = vmatpush.msrb.mxu1 %v9979_v59  ;;  %v10327_v59 = vand.u32 4294901760, %v8741_v31 }
  0xbc   :  { %1430 = vmatpush.msrb.mxu3 %v9991_v63  ;;  %1285 = vmatpush.msrb.mxu0 %v10095_v16 }
  0xbd   :  { %1379 = vmatpush.msrb.mxu2 %v16818_v11  ;;  %1322 = vmatpush.msrb.mxu1 %v9991_v63  ;;  %v8743_v63 = vld [vmem:[%s16505_s1 + $0x278] sm:$0xff]  ;;  %v10357_v16 = vsub.f32 %v8741_v31, %v10327_v59 }
  0xbe   :  { %1432 = vmatpush.msrb.mxu3 %v10014_v1  ;;  %1288 = vmatpush.msrb.mxu0 %v10110_v42  ;;  %v10307_v57 = vand.u32 4294901760, %v8743_v63 }
  0xbf   :  { %1383 = vmatpush.msrb.mxu2 %v16819_v3  ;;  %1324 = vmatpush.msrb.mxu1 %v10014_v1  ;;  %v8742_v1 = vld [vmem:[%s16505_s1 + $0x270] sm:$0xff] }
  0xc0   :  { %1434 = vmatpush.msrb.mxu3 %v10032_v58  ;;  %1291 = vmatpush.msrb.mxu0 %v10123_v60  ;;  %v10317_v35 = vand.u32 4294901760, %v8742_v1 }
  0xc1   :  { %1387 = vmatpush.msrb.mxu2 %v16820_v44  ;;  %1326 = vmatpush.msrb.mxu1 %v10032_v58  ;;  %v16822_v58 = vand.u32 4294901760, %v10123_v60  ;;  %v8736_v60 = vld [vmem:[%s16505_s1 + $0x240] sm:$0xff]  ;;  %v8729_v44 = vld [vmem:[%s16505_s1 + $0x208] sm:$0xff] }
  0xc2   :  { %1436 = vmatpush.msrb.mxu3 %v10048_v32  ;;  %1294 = vmatpush.msrb.mxu0 %v10139_v48  ;;  %v10343_v50 = vsub.f32 %v8742_v1, %v10317_v35  ;;  %v1598_v48 = vand.u32 4294901760, %v10357_v16  ;;  %v10400_v29 = vand.u32 4294901760, %v8736_v60  ;;  %v10497_v1 = vand.u32 4294901760, %v8730_v8 }
  0xc3   :  { %1391 = vmatpush.msrb.mxu2 %v16821_v49  ;;  %1328 = vmatpush.msrb.mxu1 %v10048_v32  ;;  %v10330_v32 = vsub.f32 %v8743_v63, %v10307_v57 }
  0xc4   :  { %1438 = vmatpush.msrb.mxu3 %v10065_v51  ;;  %1297 = vmatpush.msrb.mxu0 %v10158_v39  ;;  %v1599_v28 = vsub.f32 %v10357_v16, %v1598_v48  ;;  %v10436_v62 = vsub.f32 %v8736_v60, %v10400_v29  ;;  %v10515_v60 = vsub.f32 %v8731_v21, %v10479_v30 }
  0xc5   :  { %1395 = vmatpush.msrb.mxu2 %v16822_v58  ;;  %1330 = vmatpush.msrb.mxu1 %v10065_v51  ;;  %v8738_v51 = vld [vmem:[%s16505_s1 + $0x250] sm:$0xff]  ;;  %v1586_v39 = vand.u32 4294901760, %v10330_v32  ;;  %v8759_v58 = vld [vmem:[%s16505_s1 + $0x2f8] sm:$0xff] }
  0xc6   :  { %1440 = vmatpush.msrb.mxu3 %v10082_v0  ;;  %1300 = vmatpush.msrb.mxu0 %v10179_v43  ;;  %v10367_v42 = vand.u32 4294901760, %v8738_v51  ;;  %v10388_v43 = vsub.f32 %v8739_v55, %v10353_v18  ;;  %v1600_v25 = vand.u32 4294901760, %v1599_v28  ;;  %v16561_v5 = vand.u32 4294901760, %v10436_v62 }
  0xc7   :  { %1399 = vmatpush.msrb.mxu2 %v1226_v45  ;;  %1332 = vmatpush.msrb.mxu1 %v10082_v0  ;;  %v10340_v0 = vand.u32 4294901760, %v8740_v61 }
  0xc8   :  { %1442 = vmatpush.msrb.mxu3 %v10097_v54  ;;  %1303 = vmatpush.msrb.mxu0 %v10192_v22  ;;  %v8735_v22 = vld [vmem:[%s16505_s1 + $0x238] sm:$0xff]  ;;  %v1629_v49 = vsub.f32 %v10436_v62, %v16561_v5 }
  0xc9   :  { %1403 = vmatpush.msrb.mxu2 %v1232_v10  ;;  %1334 = vmatpush.msrb.mxu1 %v10097_v54  ;;  %v8737_v54 = vld [vmem:[%s16505_s1 + $0x248] sm:$0xff]  ;;  %v10371_v45 = vsub.f32 %v8740_v61, %v10340_v0  ;;  %v10411_v9 = vand.u32 4294901760, %v8735_v22  ;;  %v8728_v61 = vld [vmem:[%s16505_s1 + $0x200] sm:$0xff] }
  0xca   :  { %1444 = vmatpush.msrb.mxu3 %v10112_v23  ;;  %1306 = vmatpush.msrb.mxu0 %v10206_v40  ;;  %v10384_v10 = vand.u32 4294901760, %v8737_v54  ;;  %v8734_v40 = vld [vmem:[%s16505_s1 + $0x230] sm:$0xff]  ;;  %v10529_v28 = vand.u32 4294901760, %v8728_v61 }
  0xcb   :  { %1407 = vmatpush.msrb.mxu2 %v1238_v26  ;;  %1336 = vmatpush.msrb.mxu1 %v10112_v23  ;;  %v1592_v23 = vand.u32 4294901760, %v10343_v50  ;;  %v1604_v19 = vand.u32 4294901760, %v10371_v45  ;;  %v10404_v26 = vsub.f32 %v8738_v51, %v10367_v42  ;;  %v10511_v51 = vand.u32 4294901760, %v8729_v44 }
  0xcc   :  { %1446 = vmatpush.msrb.mxu3 %v10125_v36  ;;  %1309 = vmatmul.f32.vlgmr.msrb.gmra.mxu0 %v10195_v27  ;;  %v10420_v7 = vsub.f32 %v8737_v54, %v10384_v10  ;;  %v10456_v27 = vand.u32 4294901760, %v8732_v37 }
  0xcd   :  { %1411 = vmatpush.msrb.mxu2 %v1244_v56  ;;  %1544 = vmatpush.msra.mxu0 %v10307_v57  ;;  %v1610_v56 = vand.u32 4294901760, %v10388_v43  ;;  %v1605_v47 = vsub.f32 %v10371_v45, %v1604_v19  ;;  %v10548_v21 = vsub.f32 %v8729_v44, %v10511_v51  ;;  %v10563_v44 = vsub.f32 %v8728_v61, %v10529_v28 }
  0xce   :  { %1338 = vmatpush.msrb.mxu1 %v10125_v36  ;;  %1448 = vmatpush.msrb.mxu3 %v10150_v12  ;;  %v1587_v36 = vsub.f32 %v10330_v32, %v1586_v39  ;;  %v16562_v52 = vand.u32 4294901760, %v10420_v7  ;;  %v10488_v3 = vsub.f32 %v8732_v37, %v10456_v27  ;;  %v8756_v37 = vld [vmem:[%s16505_s1 + $0x2e0] sm:$0xff] }
  0xcf   :  { %1415 = vmatpush.msrb.mxu2 %v1250_v2  ;;  %1546 = vmatpush.msra.mxu0 %v10317_v35  ;;  %v16563_v2 = vand.u32 4294901760, %v10404_v26  ;;  %v1611_v46 = vsub.f32 %v10388_v43, %v1610_v56  ;;  %v1606_v20 = vand.u32 4294901760, %v1605_v47  ;;  %v8757_v47 = vld [vmem:[%s16505_s1 + $0x2e8] sm:$0xff] }
  0xd0   :  { %1340 = vmatpush.msrb.mxu1 %v10150_v12  ;;  %1450 = vmatpush.msrb.mxu3 %v10166_v15  ;;  %v1593_v12 = vsub.f32 %v10343_v50, %v1592_v23  ;;  %v1588_v24 = vand.u32 4294901760, %v1587_v36  ;;  %v1623_v4 = vsub.f32 %v10420_v7, %v16562_v52 }
  0xd1   :  { %1417 = vmatmul.f32.vlgmr.msrb.gmra.mxu2 %v10168_v17  ;;  %1548 = vmatpush.msra.mxu0 %v10327_v59  ;;  %v1617_v34 = vsub.f32 %v10404_v26, %v16563_v2  ;;  %v1612_v38 = vand.u32 4294901760, %v1611_v46  ;;  %v16555_v46 = vand.u32 4294901760, %v10515_v60 }
  0xd2   :  { %1687 = vmatpush.msra.mxu2 %v10330_v32  ;;  %1342 = vmatpush.msrb.mxu1 %v10166_v15  ;;  %v10424_v15 = vand.u32 4294901760, %v8734_v40  ;;  %v1594_v14 = vand.u32 4294901760, %v1593_v12  ;;  %v1624_v55 = vand.u32 4294901760, %v1623_v4  ;;  %v10523_v12 = vand.u32 4294901760, %v8759_v58 }
  0xd3   :  { %1452 = vmatpush.msrb.mxu3 %v10181_v6  ;;  %1550 = vmatpush.msra.mxu0 %v10340_v0  ;;  %v1618_v63 = vand.u32 4294901760, %v1617_v34  ;;  %v1659_v61 = vsub.f32 %v10515_v60, %v16555_v46  ;;  %v16565_v46 = vand.u32 4294901760, %v10563_v44 }
  0xd4   :  { %1454 = vmatmul.f32.vlgmr.msrb.gmra.mxu3 %v10168_v17  ;;  %1690 = vmatpush.msra.mxu2 %v10343_v50  ;;  %v8733_v17 = vld [vmem:[%s16505_s1 + $0x228] sm:$0xff] }
  0xd5   :  { %1740 = vmatpush.msra.mxu3 %v10307_v57  ;;  %1344 = vmatpush.msrb.mxu1 %v10181_v6  ;;  %v10445_v6 = vsub.f32 %v8735_v22, %v10411_v9  ;;  %v10451_v33 = vand.u32 4294901760, %v8733_v17  ;;  %v16554_v22 = vand.u32 4294901760, %v10488_v3  ;;  %v1677_v5 = vsub.f32 %v10563_v44, %v16565_v46 }
  0xd6   :  { %1552 = vmatpush.msra.mxu0 %v10353_v18  ;;  %1348 = vmatmul.f32.vlgmr.msrb.gmra.mxu1 %v1151_v13  ;;  %v10459_v13 = vsub.f32 %v8734_v40, %v10424_v15  ;;  %v8758_v40 = vld [vmem:[%s16505_s1 + $0x2f0] sm:$0xff] }
  0xd7   :  { %1693 = vmatpush.msra.mxu2 %v10357_v16  ;;  %1589 = vmatpush.msra.mxu1 %v1588_v24  ;;  %v16559_v53 = vand.u32 4294901760, %v10445_v6  ;;  %v10482_v41 = vsub.f32 %v8733_v17, %v10451_v33  ;;  %v1630_v24 = vand.u32 4294901760, %v1629_v49  ;;  %v10532_v17 = vsub.f32 %v8730_v8, %v10497_v1 }
  0xd8   :  { %1742 = vmatpush.msra.mxu3 %v10317_v35  ;;  %1554 = vmatpush.msra.mxu0 %v10367_v42  ;;  %v16557_v11 = vand.u32 4294901760, %v10459_v13  ;;  %v1653_v8 = vsub.f32 %v10488_v3, %v16554_v22  ;;  %v10567_v49 = vand.u32 4294901760, %v8756_v37 }
  0xd9   :  { %1696 = vmatpush.msra.mxu2 %v10371_v45  ;;  %1595 = vmatpush.msra.mxu1 %v1594_v14  ;;  %v1635_v31 = vsub.f32 %v10445_v6, %v16559_v53  ;;  %v16556_v54 = vand.u32 4294901760, %v10482_v41  ;;  %v16558_v4 = vand.u32 4294901760, %v10532_v17 }
  0xda   :  { %1744 = vmatpush.msra.mxu3 %v10327_v59  ;;  %1556 = vmatpush.msra.mxu0 %v10384_v10  ;;  %v1641_v36 = vsub.f32 %v10459_v13, %v16557_v11  ;;  %v10601_v11 = vsub.f32 %v8756_v37, %v10567_v49 }
  0xdb   :  { %1699 = vmatpush.msra.mxu2 %v10388_v43  ;;  %1601 = vmatpush.msra.mxu1 %v1600_v25  ;;  %v1636_v14 = vand.u32 4294901760, %v1635_v31  ;;  %v1647_v25 = vsub.f32 %v10482_v41, %v16556_v54  ;;  %v8755_v31 = vld [vmem:[%s16505_s1 + $0x2d8] sm:$0xff] }
  0xdc   :  { %1746 = vmatpush.msra.mxu3 %v10340_v0  ;;  %1558 = vmatpush.msra.mxu0 %v10400_v29  ;;  %v1642_v34 = vand.u32 4294901760, %v1641_v36  ;;  %v10585_v22 = vand.u32 4294901760, %v8755_v31 }
  0xdd   :  { %1702 = vmatpush.msra.mxu2 %v10404_v26  ;;  %1607 = vmatpush.msra.mxu1 %v1606_v20  ;;  %v10550_v20 = vand.u32 4294901760, %v8758_v40 }
  0xde   :  { %1748 = vmatpush.msra.mxu3 %v10353_v18  ;;  %1560 = vmatpush.msra.mxu0 %v10411_v9 }
  0xdf   :  { %1705 = vmatpush.msra.mxu2 %v10420_v7  ;;  %1613 = vmatpush.msra.mxu1 %v1612_v38  ;;  %v10558_v38 = vsub.f32 %v8759_v58, %v10523_v12  ;;  %v1648_v58 = vand.u32 4294901760, %v1647_v25  ;;  %v10580_v36 = vsub.f32 %v8758_v40, %v10550_v20  ;;  %v1654_v25 = vand.u32 4294901760, %v1653_v8 }
  0xe0   :  { %1750 = vmatpush.msra.mxu3 %v10367_v42  ;;  %1562 = vmatpush.msra.mxu0 %v10424_v15  ;;  %v1665_v40 = vsub.f32 %v10532_v17, %v16558_v4  ;;  %v1660_v8 = vand.u32 4294901760, %v1659_v61  ;;  %v8752_v61 = vld [vmem:[%s16505_s1 + $0x2c0] sm:$0xff] }
  0xe1   :  { %1708 = vmatpush.msra.mxu2 %v10436_v62  ;;  %1619 = vmatpush.msra.mxu1 %v1618_v63  ;;  %v10565_v63 = vand.u32 4294901760, %v8757_v47  ;;  %v16566_v4 = vand.u32 4294901760, %v10580_v36  ;;  %v10645_v32 = vand.u32 4294901760, %v8752_v61 }
  0xe2   :  { %1752 = vmatpush.msra.mxu3 %v10384_v10  ;;  %1564 = vmatpush.msra.mxu0 %v10451_v33 }
  0xe3   :  { %1711 = vmatpush.msra.mxu2 %v10445_v6  ;;  %1625 = vmatpush.msra.mxu1 %v1624_v55  ;;  %v16560_v55 = vand.u32 4294901760, %v10548_v21  ;;  %v10596_v54 = vsub.f32 %v8757_v47, %v10565_v63 }
  0xe4   :  { %1754 = vmatpush.msra.mxu3 %v10400_v29  ;;  %1566 = vmatpush.msra.mxu0 %v10456_v27 }
  0xe5   :  { %1714 = vmatpush.msra.mxu2 %v10459_v13  ;;  %1631 = vmatpush.msra.mxu1 %v1630_v24  ;;  %v16564_v24 = vand.u32 4294901760, %v10558_v38  ;;  %v1671_v47 = vsub.f32 %v10548_v21, %v16560_v55  ;;  %v1666_v55 = vand.u32 4294901760, %v1665_v40  ;;  %v16567_v52 = vand.u32 4294901760, %v10596_v54 }
  0xe6   :  { %1756 = vmatpush.msra.mxu3 %v10411_v9  ;;  %1568 = vmatpush.msra.mxu0 %v10479_v30 }
  0xe7   :  { %1717 = vmatpush.msra.mxu2 %v10482_v41  ;;  %1637 = vmatpush.msra.mxu1 %v1636_v14  ;;  %v8754_v14 = vld [vmem:[%s16505_s1 + $0x2d0] sm:$0xff]  ;;  %v1928_v37 = vsub.f32 %v10558_v38, %v16564_v24  ;;  %v1672_v40 = vand.u32 4294901760, %v1671_v47  ;;  %v1934_v24 = vsub.f32 %v10580_v36, %v16566_v4  ;;  %v1678_v4 = vand.u32 4294901760, %v1677_v5  ;;  %v8749_v5 = vld [vmem:[%s16505_s1 + $0x2a8] sm:$0xff] }
  0xe8   :  { %1758 = vmatpush.msra.mxu3 %v10424_v15  ;;  %1570 = vmatpush.msra.mxu0 %v10497_v1  ;;  %v10611_v53 = vand.u32 4294901760, %v8754_v14  ;;  %v8750_v47 = vld [vmem:[%s16505_s1 + $0x2b0] sm:$0xff]  ;;  %v10692_v45 = vand.u32 4294901760, %v8749_v5 }
  0xe9   :  { %1720 = vmatpush.msra.mxu2 %v10488_v3  ;;  %1643 = vmatpush.msra.mxu1 %v1642_v34  ;;  %v8753_v34 = vld [vmem:[%s16505_s1 + $0x2c8] sm:$0xff]  ;;  %v10677_v16 = vand.u32 4294901760, %v8750_v47 }
  0xea   :  { %1760 = vmatpush.msra.mxu3 %v10451_v33  ;;  %1572 = vmatpush.msra.mxu0 %v10511_v51  ;;  %v10629_v2 = vand.u32 4294901760, %v8753_v34  ;;  %v10643_v46 = vsub.f32 %v8754_v14, %v10611_v53  ;;  %v1940_v14 = vsub.f32 %v10596_v54, %v16567_v52  ;;  %v10675_v52 = vsub.f32 %v8752_v61, %v10645_v32 }
  0xeb   :  { %1723 = vmatpush.msra.mxu2 %v10515_v60  ;;  %1649 = vmatpush.msra.mxu1 %v1648_v58  ;;  %v10619_v58 = vsub.f32 %v8755_v31, %v10585_v22  ;;  %v16568_v31 = vand.u32 4294901760, %v10601_v11 }
  0xec   :  { %1762 = vmatpush.msra.mxu3 %v10456_v27  ;;  %1574 = vmatpush.msra.mxu0 %v10529_v28  ;;  %v10659_v50 = vsub.f32 %v8753_v34, %v10629_v2  ;;  %v1935_v34 = vand.u32 4294901760, %v1934_v24  ;;  %v8748_v24 = vld [vmem:[%s16505_s1 + $0x2a0] sm:$0xff] }
  0xed   :  { %1726 = vmatpush.msra.mxu2 %v10532_v17  ;;  %1655 = vmatpush.msra.mxu1 %v1654_v25  ;;  %v8751_v25 = vld [vmem:[%s16505_s1 + $0x2b8] sm:$0xff]  ;;  %v10708_v43 = vand.u32 4294901760, %v8748_v24 }
  0xee   :  { %1764 = vmatpush.msra.mxu3 %v10479_v30  ;;  %1781 = vmatpush.msrb.mxu0 %v1586_v39  ;;  %v1929_v39 = vand.u32 4294901760, %v1928_v37  ;;  %v16570_v37 = vand.u32 4294901760, %v10643_v46  ;;  %v16571_v61 = vand.u32 4294901760, %v10659_v50 }
  0xef   :  { %1729 = vmatpush.msra.mxu2 %v10548_v21  ;;  %1661 = vmatpush.msra.mxu1 %v1660_v8  ;;  %v16569_v8 = vand.u32 4294901760, %v10619_v58 }
  0xf0   :  { %1766 = vmatpush.msra.mxu3 %v10497_v1  ;;  %1785 = vmatpush.msrb.mxu0 %v1592_v23  ;;  %v10661_v23 = vand.u32 4294901760, %v8751_v25 }
  0xf1   :  { %1732 = vmatpush.msra.mxu2 %v10563_v44  ;;  %1667 = vmatpush.msra.mxu1 %v1666_v55  ;;  %v1946_v55 = vsub.f32 %v10601_v11, %v16568_v31 }
  0xf2   :  { %1768 = vmatpush.msra.mxu3 %v10511_v51  ;;  %1789 = vmatpush.msrb.mxu0 %v1598_v48  ;;  %v1952_v48 = vsub.f32 %v10619_v58, %v16569_v8  ;;  %v10690_v31 = vsub.f32 %v8751_v25, %v10661_v23  ;;  %v8747_v8 = vld [vmem:[%s16505_s1 + $0x298] sm:$0xff]  ;;  %v16572_v25 = vand.u32 4294901760, %v10675_v52 }
  0xf3   :  { %1885 = vmatpush.msrb.mxu2 %v10523_v12  ;;  %1673 = vmatpush.msra.mxu1 %v1672_v40  ;;  %v1941_v40 = vand.u32 4294901760, %v1940_v14 }
  0xf4   :  { %1770 = vmatpush.msra.mxu3 %v10529_v28  ;;  %1793 = vmatpush.msrb.mxu0 %v1604_v19  ;;  %v1947_v19 = vand.u32 4294901760, %v1946_v55  ;;  %v1953_v14 = vand.u32 4294901760, %v1952_v48  ;;  %v16573_v55 = vand.u32 4294901760, %v10690_v31 }
  0xf5   :  { %1887 = vmatpush.msrb.mxu2 %v10550_v20  ;;  %1679 = vmatpush.msra.mxu1 %v1678_v4  ;;  %v1958_v4 = vsub.f32 %v10643_v46, %v16570_v37  ;;  %v10724_v37 = vand.u32 4294901760, %v8747_v8 }
  0xf6   :  { %1930 = vmatpush.msrb.mxu3 %v1929_v39  ;;  %1797 = vmatpush.msrb.mxu0 %v1610_v56  ;;  %v10706_v39 = vsub.f32 %v8750_v47, %v10677_v16  ;;  %v16823_v56 = vand.u32 4294901760, %v10404_v26  ;;  %v1964_v47 = vsub.f32 %v10659_v50, %v16571_v61  ;;  %v8746_v26 = vld [vmem:[%s16505_s1 + $0x290] sm:$0xff]  ;;  %v10740_v61 = vsub.f32 %v8748_v24, %v10708_v43 }
  0xf7   :  { %1848 = vmatpush.msrb.mxu1 %v10307_v57  ;;  %1889 = vmatpush.msrb.mxu2 %v10565_v63  ;;  %v8724_v57 = vld [vmem:[%s16506_s0 + $0x20] sm:$0xff]  ;;  %v1976_v24 = vsub.f32 %v10690_v31, %v16573_v55 }
  0xf8   :  { %1936 = vmatpush.msrb.mxu3 %v1935_v34  ;;  %1801 = vmatpush.msrb.mxu0 %v16823_v56  ;;  %v10722_v34 = vsub.f32 %v8749_v5, %v10692_v45  ;;  %v10732_v48 = vand.u32 4294901760, %v8724_v57  ;;  %v1970_v5 = vsub.f32 %v10675_v52, %v16572_v25  ;;  %v1981_v56 = vand.u32 4294901760, %v10706_v39 }
  0xf9   :  { %1850 = vmatpush.msrb.mxu1 %v10317_v35  ;;  %1891 = vmatpush.msrb.mxu2 %v10567_v49  ;;  %v16824_v35 = vand.u32 4294901760, %v10420_v7  ;;  %v8745_v7 = vld [vmem:[%s16505_s1 + $0x288] sm:$0xff]  ;;  %v10756_v25 = vsub.f32 %v8747_v8, %v10724_v37  ;;  %v1993_v55 = vand.u32 4294901760, %v10740_v61 }
  0xfa   :  { %1942 = vmatpush.msrb.mxu3 %v1941_v40  ;;  %v1959_v40 = vand.u32 4294901760, %v1958_v4  ;;  %v1965_v4 = vand.u32 4294901760, %v1964_v47  ;;  %v10767_v47 = vand.u32 4294901760, %v8745_v7  ;;  %v1982_v8 = vsub.f32 %v10706_v39, %v1981_v56  ;;  %1681 = vmatmul.f32.vlgmr.msra.gmra.mxu1 %v10732_v48 }
  0xfb   :  { %1805 = vmatpush.msrb.mxu0 %v16824_v35  ;;  %1852 = vmatpush.msrb.mxu1 %v10327_v59  ;;  %v16825_v59 = vand.u32 4294901760, %v10436_v62  ;;  %v1987_v35 = vand.u32 4294901760, %v10722_v34  ;;  %v8744_v62 = vld [vmem:[%s16505_s1 + $0x280] sm:$0xff] }
  0xfc   :  { %1893 = vmatpush.msrb.mxu2 %v10585_v22  ;;  %1948 = vmatpush.msrb.mxu3 %v1947_v19  ;;  %v10748_v19 = vand.u32 4294901760, %v8746_v26 }
  0xfd   :  { %1809 = vmatpush.msrb.mxu0 %v16825_v59  ;;  %1854 = vmatpush.msrb.mxu1 %v10340_v0  ;;  %v16826_v0 = vand.u32 4294901760, %v10445_v6  ;;  %v1971_v59 = vand.u32 4294901760, %v1970_v5  ;;  %v16827_v6 = vand.u32 4294901760, %v10459_v13  ;;  %v1988_v5 = vsub.f32 %v10722_v34, %v1987_v35 }
  0xfe   :  { %1895 = vmatpush.msrb.mxu2 %v10611_v53  ;;  %1954 = vmatpush.msrb.mxu3 %v1953_v14  ;;  %v10765_v14 = vsub.f32 %v8724_v57, %v10732_v48  ;;  %v10780_v57 = vand.u32 4294901760, %v8744_v62  ;;  %v16828_v13 = vand.u32 4294901760, %v10482_v41 }
  0xff   :  { %1813 = vmatpush.msrb.mxu0 %v16826_v0  ;;  %1856 = vmatpush.msrb.mxu1 %v10353_v18  ;;  %v10778_v18 = vsub.f32 %v8746_v26, %v10748_v19  ;;  %v1999_v0 = vand.u32 4294901760, %v10756_v25  ;;  %v10792_v26 = vsub.f32 %v8745_v7, %v10767_v47  ;;  %v1989_v7 = vand.u32 4294901760, %v1988_v5 }
 0x100   :  { %1897 = vmatpush.msrb.mxu2 %v10629_v2  ;;  %1960 = vmatpush.msrb.mxu3 %v1959_v40  ;;  %v1977_v40 = vand.u32 4294901760, %v1976_v24  ;;  %v1994_v24 = vsub.f32 %v10740_v61, %v1993_v55  ;;  %v10803_v41 = vsub.f32 %v8744_v62, %v10780_v57  ;;  %v16831_v5 = vand.u32 4294901760, %v10532_v17 }
 0x101   :  { %1817 = vmatpush.msrb.mxu0 %v16827_v6  ;;  %1858 = vmatpush.msrb.mxu1 %v10367_v42  ;;  %v1577_v42 = vand.u32 4294901760, %v10765_v14  ;;  %v16829_v6 = vand.u32 4294901760, %v10488_v3  ;;  %v8725_v3 = vld [vmem:[%s16506_s0 + $0x28] sm:$0xff]  ;;  %v2011_v62 = vand.u32 4294901760, %v10792_v26 }
 0x102   :  { %1899 = vmatpush.msrb.mxu2 %v10645_v32  ;;  %1966 = vmatpush.msrb.mxu3 %v1965_v4  ;;  %v1983_v4 = vand.u32 4294901760, %v1982_v8  ;;  %v16830_v8 = vand.u32 4294901760, %v10515_v60 }
 0x103   :  { %1821 = vmatpush.msrb.mxu0 %v16828_v13  ;;  %1860 = vmatpush.msrb.mxu1 %v10384_v10  ;;  %v2005_v10 = vand.u32 4294901760, %v10778_v18  ;;  %v10827_v13 = vand.u32 4294901760, %v8725_v3 }
 0x104   :  { %1901 = vmatpush.msrb.mxu2 %v10661_v23  ;;  %1972 = vmatpush.msrb.mxu3 %v1971_v59  ;;  %v2000_v59 = vsub.f32 %v10756_v25, %v1999_v0 }
 0x105   :  { %1825 = vmatpush.msrb.mxu0 %v16829_v6  ;;  %1862 = vmatpush.msrb.mxu1 %v10400_v29  ;;  %v1578_v29 = vsub.f32 %v10765_v14, %v1577_v42  ;;  %v2006_v60 = vsub.f32 %v10778_v18, %v2005_v10 }
 0x106   :  { %1903 = vmatpush.msrb.mxu2 %v10677_v16  ;;  %1978 = vmatpush.msrb.mxu3 %v1977_v40  ;;  %v1995_v40 = vand.u32 4294901760, %v1994_v24  ;;  %v2001_v6 = vand.u32 4294901760, %v2000_v59  ;;  %v16833_v24 = vand.u32 4294901760, %v10563_v44  ;;  %v9074_v59 = vld [vmem:[%s16507_s2] ss:$0 sm:$0xff] }
 0x107   :  { %1829 = vmatpush.msrb.mxu0 %v16830_v8  ;;  %1864 = vmatpush.msrb.mxu1 %v10411_v9  ;;  %v2017_v9 = vand.u32 4294901760, %v10803_v41  ;;  %v1579_v17 = vand.u32 4294901760, %v1578_v29 }
 0x108   :  { %1905 = vmatpush.msrb.mxu2 %v10692_v45  ;;  %1984 = vmatpush.msrb.mxu3 %v1983_v4  ;;  %v16832_v4 = vand.u32 4294901760, %v10548_v21 }
 0x109   :  { %1833 = vmatpush.msrb.mxu0 %v16831_v5  ;;  %1866 = vmatpush.msrb.mxu1 %v10424_v15  ;;  %v2012_v15 = vsub.f32 %v10792_v26, %v2011_v62  ;;  %v2018_v21 = vsub.f32 %v10803_v41, %v2017_v9 }
 0x10a   :  { %1907 = vmatpush.msrb.mxu2 %v10708_v43  ;;  %1990 = vmatpush.msrb.mxu3 %v1989_v7  ;;  %v2007_v7 = vand.u32 4294901760, %v2006_v60  ;;  %v16835_v60 = vand.u32 4294901760, %v10580_v36 }
 0x10b   :  { %1837 = vmatpush.msrb.mxu0 %v16832_v4  ;;  %1868 = vmatpush.msrb.mxu1 %v10451_v33  ;;  %v10844_v33 = vsub.f32 %v8725_v3, %v10827_v13  ;;  %v2013_v44 = vand.u32 4294901760, %v2012_v15  ;;  %v2019_v3 = vand.u32 4294901760, %v2018_v21  ;;  %v8771_v4 = vld [vmem:[%s16505_s1 + $0x358] sm:$0xff]  ;;  %v8770_v15 = vld [vmem:[%s16505_s1 + $0x350] sm:$0xff] }
 0x10c   :  { %1909 = vmatpush.msrb.mxu2 %v10724_v37  ;;  %1996 = vmatpush.msrb.mxu3 %v1995_v40  ;;  %v16834_v40 = vand.u32 4294901760, %v10558_v38  ;;  %v10976_v21 = vand.u32 4294901760, %v8770_v15 }
 0x10d   :  { %1841 = vmatpush.msrb.mxu0 %v16833_v24  ;;  %1870 = vmatpush.msrb.mxu1 %v10456_v27  ;;  %v132_v27 = vpop.f32.mrf.mxu0  ;;  %v1918_v8 = vand.u32 4294901760, %v10844_v33 }
 0x10e   :  { %1911 = vmatpush.msrb.mxu2 %v10748_v19  ;;  %2002 = vmatpush.msrb.mxu3 %v2001_v6  ;;  %v133_v29 = vadd.f32 %v9074_v59, %v132_v27  ;;  %v326_v6 = vpop.f32.mrf.mxu3 }
 0x10f   :  { %1580 = vmatmul.f32.vlgmr.msra.gmra.mxu0 %v1579_v17  ;;  %1872 = vmatpush.msrb.mxu1 %v10479_v30  ;;  %v233_v30 = vpop.f32.mrf.mxu1 }
 0x110   :  { %2028 = vmatpush.msra.mxu0 %v10558_v38  ;;  %1913 = vmatpush.msrb.mxu2 %v10767_v47  ;;  %v234_v5 = vadd.f32 %v233_v30, %v133_v29  ;;  %v287_v38 = vpop.f32.mrf.mxu2 }
 0x111   :  { %2008 = vmatpush.msrb.mxu3 %v2007_v7  ;;  %1874 = vmatpush.msrb.mxu1 %v10497_v1  ;;  %v1919_v1 = vsub.f32 %v10844_v33, %v1918_v8 }
 0x112   :  { %2031 = vmatpush.msra.mxu0 %v10580_v36  ;;  %1915 = vmatpush.msrb.mxu2 %v10780_v57  ;;  %v16837_v36 = vand.u32 4294901760, %v10601_v11 }
 0x113   :  { %2014 = vmatpush.msrb.mxu3 %v2013_v44  ;;  %1735 = vmatmul.f32.vlgmr.msra.gmra.mxu2 %v10765_v14  ;;  %v1920_v14 = vand.u32 4294901760, %v1919_v1  ;;  %v8768_v44 = vld [vmem:[%s16505_s1 + $0x340] sm:$0xff] }
 0x114   :  { %2034 = vmatpush.msra.mxu0 %v10596_v54  ;;  %2122 = vmatpush.msra.mxu2 %v16834_v40  ;;  %v11018_v30 = vand.u32 4294901760, %v8768_v44 }
 0x115   :  { %1876 = vmatpush.msrb.mxu1 %v10511_v51  ;;  %2020 = vmatpush.msrb.mxu3 %v2019_v3  ;;  %v16836_v51 = vand.u32 4294901760, %v10596_v54  ;;  %v16838_v54 = vand.u32 4294901760, %v10619_v58  ;;  %v11008_v3 = vsub.f32 %v8770_v15, %v10976_v21 }
 0x116   :  { %1774 = vmatmul.f32.vlgmr.msra.gmra.mxu3 %v1577_v42  ;;  %2037 = vmatpush.msra.mxu0 %v10601_v11  ;;  %v288_v42 = vadd.f32 %v287_v38, %v234_v5  ;;  %v395_v11 = vpop.f32.mrf.mxu0  ;;  %v8766_v5 = vld [vmem:[%s16505_s1 + $0x330] sm:$0xff] }
 0x117   :  { %2126 = vmatpush.msra.mxu2 %v16835_v60  ;;  %2189 = vmatpush.msra.mxu3 %v10523_v12 }
 0x118   :  { %1878 = vmatpush.msrb.mxu1 %v10529_v28  ;;  %2040 = vmatpush.msra.mxu0 %v10619_v58  ;;  %v16839_v28 = vand.u32 4294901760, %v10643_v46  ;;  %v16840_v58 = vand.u32 4294901760, %v10659_v50 }
 0x119   :  { %2130 = vmatpush.msra.mxu2 %v16836_v51  ;;  %2191 = vmatpush.msra.mxu3 %v10550_v20 }
 0x11a   :  { %2081 = vmatpush.msra.mxu1 %v10523_v12  ;;  %2043 = vmatpush.msra.mxu0 %v10643_v46  ;;  %v327_v12 = vadd.f32 %v326_v6, %v288_v42  ;;  %v16841_v46 = vand.u32 4294901760, %v10675_v52 }
 0x11b   :  { %2134 = vmatpush.msra.mxu2 %v16837_v36  ;;  %2193 = vmatpush.msra.mxu3 %v10565_v63  ;;  %v16582_v36 = vand.u32 4294901760, %v11008_v3 }
 0x11c   :  { %2083 = vmatpush.msra.mxu1 %v10550_v20  ;;  %1921 = vmatmul.f32.vlgmr.msrb.gmra.mxu2 %v1920_v14  ;;  %v396_v20 = vadd.f32 %v395_v11, %v327_v12  ;;  %v11048_v11 = vand.u32 4294901760, %v8766_v5 }
 0x11d   :  { %2046 = vmatpush.msra.mxu0 %v10659_v50  ;;  %2138 = vmatpush.msra.mxu2 %v16838_v54  ;;  %v473_v50 = vpop.f32.mrf.mxu2 }
 0x11e   :  { %2085 = vmatpush.msra.mxu1 %v10565_v63  ;;  %2195 = vmatpush.msra.mxu3 %v10567_v49  ;;  %v432_v63 = vpop.f32.mrf.mxu1 }
 0x11f   :  { %1843 = vmatmul.f32.vlgmr.msrb.gmra.mxu0 %v10732_v48  ;;  %2022 = vmatmul.f32.vlgmr.msrb.gmra.mxu3 %v10827_v13 }
 0x120   :  { %2049 = vmatpush.msra.mxu0 %v10675_v52  ;;  %2087 = vmatpush.msra.mxu1 %v10567_v49  ;;  %v433_v49 = vadd.f32 %v432_v63, %v396_v20  ;;  %v8774_v52 = vld [vmem:[%s16505_s1 + $0x370] sm:$0xff]  ;;  %v8764_v63 = vld [vmem:[%s16505_s1 + $0x320] sm:$0xff] }
 0x121   :  { %2142 = vmatpush.msra.mxu2 %v16839_v28  ;;  %2197 = vmatpush.msra.mxu3 %v10585_v22  ;;  %v11051_v28 = vsub.f32 %v8768_v44, %v11018_v30 }
 0x122   :  { %1880 = vmatmul.f32.vlgmr.msrb.gmra.mxu1 %v10732_v48  ;;  %2052 = vmatpush.msra.mxu0 %v10690_v31  ;;  %v16842_v48 = vand.u32 4294901760, %v10690_v31  ;;  %v8773_v31 = vld [vmem:[%s16505_s1 + $0x368] sm:$0xff] }
 0x123   :  { %2089 = vmatpush.msra.mxu1 %v10585_v22  ;;  %2146 = vmatpush.msra.mxu2 %v16840_v58  ;;  %v8775_v22 = vld [vmem:[%s16505_s1 + $0x378] sm:$0xff] }
 0x124   :  { %2199 = vmatpush.msra.mxu3 %v10611_v53  ;;  %2055 = vmatpush.msra.mxu0 %v10706_v39  ;;  %v10932_v39 = vand.u32 4294901760, %v8774_v52 }
 0x125   :  { %2091 = vmatpush.msra.mxu1 %v10611_v53  ;;  %2150 = vmatpush.msra.mxu2 %v16841_v46  ;;  %v474_v53 = vadd.f32 %v473_v50, %v433_v49  ;;  %v2299_v50 = vsub.f32 %v11008_v3, %v16582_v36 }
 0x126   :  { %2201 = vmatpush.msra.mxu3 %v10629_v2  ;;  %2058 = vmatpush.msra.mxu0 %v10722_v34  ;;  %v10942_v34 = vand.u32 4294901760, %v8773_v31  ;;  %v667_v17 = vpop.f32.mrf.mxu1 }
 0x127   :  { %2093 = vmatpush.msra.mxu1 %v10629_v2  ;;  %2154 = vmatpush.msra.mxu2 %v16842_v48  ;;  %v10922_v2 = vand.u32 4294901760, %v8775_v22  ;;  %v8763_v48 = vld [vmem:[%s16505_s1 + $0x318] sm:$0xff] }
 0x128   :  { %2203 = vmatpush.msra.mxu3 %v10645_v32  ;;  %2061 = vmatpush.msra.mxu0 %v10740_v61  ;;  %v11098_v15 = vand.u32 4294901760, %v8763_v48 }
 0x129   :  { %2095 = vmatpush.msra.mxu1 %v10645_v32  ;;  %2158 = vmatpush.msra.mxu2 %v1981_v56  ;;  %v574_v32 = vpop.f32.mrf.mxu3  ;;  %v628_v56 = vpop.f32.mrf.mxu0 }
 0x12a   :  { %2205 = vmatpush.msra.mxu3 %v10661_v23  ;;  %2064 = vmatpush.msra.mxu0 %v10756_v25 }
 0x12b   :  { %2097 = vmatpush.msra.mxu1 %v10661_v23  ;;  %2162 = vmatpush.msra.mxu2 %v1987_v35  ;;  %v8772_v23 = vld [vmem:[%s16505_s1 + $0x360] sm:$0xff]  ;;  %v10945_v35 = vsub.f32 %v8775_v22, %v10922_v2 }
 0x12c   :  { %2207 = vmatpush.msra.mxu3 %v10677_v16  ;;  %2067 = vmatpush.msra.mxu0 %v10778_v18  ;;  %v10955_v61 = vand.u32 4294901760, %v8772_v23  ;;  %v736_v18 = vpop.f32.mrf.mxu2 }
 0x12d   :  { %2099 = vmatpush.msra.mxu1 %v10677_v16  ;;  %2166 = vmatpush.msra.mxu2 %v1993_v55  ;;  %v575_v16 = vadd.f32 %v574_v32, %v474_v53  ;;  %v10958_v55 = vsub.f32 %v8774_v52, %v10932_v39  ;;  %v2268_v25 = vand.u32 4294901760, %v10945_v35  ;;  %v16579_v32 = vand.u32 4294901760, %v11051_v28 }
 0x12e   :  { %2209 = vmatpush.msra.mxu3 %v10692_v45  ;;  %2070 = vmatpush.msra.mxu0 %v10792_v26  ;;  %v10986_v59 = vsub.f32 %v8772_v23, %v10955_v61  ;;  %v915_v6 = vpop.f32.mrf.mxu1  ;;  %v11085_v23 = vsub.f32 %v8766_v5, %v11048_v11 }
 0x12f   :  { %2101 = vmatpush.msra.mxu1 %v10692_v45  ;;  %2170 = vmatpush.msra.mxu2 %v1999_v0  ;;  %v629_v24 = vadd.f32 %v628_v56, %v575_v16  ;;  %v10965_v45 = vand.u32 4294901760, %v8771_v4  ;;  %v10972_v0 = vsub.f32 %v8773_v31, %v10942_v34  ;;  %v2269_v26 = vsub.f32 %v10945_v35, %v2268_v25 }
 0x130   :  { %2211 = vmatpush.msra.mxu3 %v10708_v43  ;;  %2073 = vmatpush.msra.mxu0 %v10803_v41  ;;  %v8767_v41 = vld [vmem:[%s16505_s1 + $0x338] sm:$0xff]  ;;  %v16584_v40 = vand.u32 4294901760, %v10986_v59  ;;  %v11081_v31 = vand.u32 4294901760, %v8764_v63 }
 0x131   :  { %2103 = vmatpush.msra.mxu1 %v10708_v43  ;;  %2174 = vmatpush.msra.mxu2 %v2005_v10  ;;  %v668_v7 = vadd.f32 %v667_v17, %v629_v24  ;;  %v8769_v43 = vld [vmem:[%s16505_s1 + $0x348] sm:$0xff]  ;;  %v2274_v10 = vand.u32 4294901760, %v10958_v55  ;;  %v814_v60 = vpop.f32.mrf.mxu0  ;;  %v2270_v38 = vand.u32 4294901760, %v2269_v26  ;;  %v11032_v14 = vand.u32 4294901760, %v8767_v41 }
 0x132   :  { %2213 = vmatpush.msra.mxu3 %v10724_v37  ;;  %2076 = vmatmul.f32.vlgmr.msra.gmra.mxu0 %v10844_v33  ;;  %v2287_v12 = vsub.f32 %v10986_v59, %v16584_v40  ;;  %v2311_v26 = vsub.f32 %v11051_v28, %v16579_v32 }
 0x133   :  { %2105 = vmatpush.msra.mxu1 %v10724_v37  ;;  %2226 = vmatpush.msrb.mxu0 %v10922_v2  ;;  %v10991_v37 = vsub.f32 %v8771_v4, %v10965_v45  ;;  %v737_v27 = vadd.f32 %v736_v18, %v668_v7  ;;  %v2275_v29 = vsub.f32 %v10958_v55, %v2274_v10  ;;  %v8762_v4 = vld [vmem:[%s16505_s1 + $0x310] sm:$0xff]  ;;  %v2300_v18 = vand.u32 4294901760, %v2299_v50 }
 0x134   :  { %2178 = vmatpush.msra.mxu2 %v2011_v62  ;;  %2215 = vmatpush.msra.mxu3 %v10748_v19  ;;  %v11002_v62 = vand.u32 4294901760, %v8769_v43  ;;  %v11067_v33 = vsub.f32 %v8767_v41, %v11032_v14  ;;  %v969_v52 = vpop.f32.mrf.mxu2  ;;  %v2288_v53 = vand.u32 4294901760, %v2287_v12  ;;  %v16576_v41 = vand.u32 4294901760, %v11085_v23 }
 0x135   :  { %2107 = vmatpush.msra.mxu1 %v10748_v19  ;;  %2228 = vmatpush.msrb.mxu0 %v10932_v39  ;;  %v16587_v19 = vand.u32 4294901760, %v10972_v0  ;;  %v16583_v1 = vand.u32 4294901760, %v10991_v37  ;;  %v2276_v54 = vand.u32 4294901760, %v2275_v29  ;;  %v8761_v29 = vld [vmem:[%s16505_s1 + $0x308] sm:$0xff] }
 0x136   :  { %2182 = vmatpush.msra.mxu2 %v2017_v9  ;;  %2217 = vmatpush.msra.mxu3 %v10767_v47  ;;  %v773_v9 = vpop.f32.mrf.mxu3  ;;  %v16577_v24 = vand.u32 4294901760, %v11067_v33 }
 0x137   :  { %2184 = vmatmul.f32.vlgmr.msra.gmra.mxu2 %v10827_v13  ;;  %2230 = vmatpush.msrb.mxu0 %v10942_v34  ;;  %v2281_v51 = vsub.f32 %v10972_v0, %v16587_v19  ;;  %v774_v42 = vadd.f32 %v773_v9, %v737_v27  ;;  %v11110_v27 = vand.u32 4294901760, %v8762_v4  ;;  %v11114_v9 = vsub.f32 %v8764_v63, %v11081_v31 }
 0x138   :  { %2369 = vmatpush.msrb.mxu2 %v10945_v35  ;;  %2109 = vmatpush.msra.mxu1 %v10767_v47  ;;  %v11035_v47 = vsub.f32 %v8769_v43, %v11002_v62  ;;  %v2312_v63 = vand.u32 4294901760, %v2311_v26  ;;  %v8789_v26 = vld [vmem:[%s16505_s1 + $0x3e8] sm:$0xff] }
 0x139   :  { %2219 = vmatpush.msra.mxu3 %v10780_v57  ;;  %2232 = vmatpush.msrb.mxu0 %v10955_v61  ;;  %v815_v20 = vadd.f32 %v814_v60, %v774_v42  ;;  %v2282_v58 = vand.u32 4294901760, %v2281_v51  ;;  %v1077_v60 = vpop.f32.mrf.mxu0  ;;  %v2317_v51 = vsub.f32 %v11067_v33, %v16577_v24 }
 0x13a   :  { %2221 = vmatmul.f32.vlgmr.msra.gmra.mxu3 %v10827_v13  ;;  %2372 = vmatpush.msrb.mxu2 %v10958_v55  ;;  %v8765_v13 = vld [vmem:[%s16505_s1 + $0x328] sm:$0xff]  ;;  %v16580_v49 = vand.u32 4294901760, %v11035_v47 }
 0x13b   :  { %2422 = vmatpush.msrb.mxu3 %v10922_v2  ;;  %2111 = vmatpush.msra.mxu1 %v10780_v57  ;;  %v2293_v57 = vsub.f32 %v10991_v37, %v16583_v1  ;;  %v11063_v46 = vand.u32 4294901760, %v8765_v13  ;;  %v916_v22 = vadd.f32 %v915_v6, %v815_v20  ;;  %v8760_v6 = vld [vmem:[%s16505_s1 + $0x300] sm:$0xff]  ;;  %v11140_v20 = vand.u32 4294901760, %v8761_v29 }
 0x13c   :  { %2234 = vmatpush.msrb.mxu0 %v10965_v45  ;;  %2115 = vmatmul.f32.vlgmr.msra.gmra.mxu1 %v1918_v8  ;;  %v8726_v8 = vld [vmem:[%s16506_s0 + $0x30] sm:$0xff]  ;;  %v2305_v17 = vsub.f32 %v11035_v47, %v16580_v49 }
 0x13d   :  { %2375 = vmatpush.msrb.mxu2 %v10972_v0  ;;  %2271 = vmatpush.msrb.mxu1 %v2270_v38  ;;  %v2294_v56 = vand.u32 4294901760, %v2293_v57  ;;  %v11092_v16 = vand.u32 4294901760, %v8726_v8  ;;  %v11102_v7 = vsub.f32 %v8765_v13, %v11063_v46  ;;  %v970_v43 = vadd.f32 %v969_v52, %v916_v22  ;;  %v1114_v57 = vpop.f32.mrf.mxu1 }
 0x13e   :  { %2424 = vmatpush.msrb.mxu3 %v10932_v39  ;;  %2236 = vmatpush.msrb.mxu0 %v10976_v21  ;;  %v1008_v44 = vpop.f32.mrf.mxu3  ;;  %v2306_v38 = vand.u32 4294901760, %v2305_v17  ;;  %v11130_v13 = vsub.f32 %v8763_v48, %v11098_v15  ;;  %v11148_v22 = vsub.f32 %v8762_v4, %v11110_v27  ;;  %v11152_v48 = vand.u32 4294901760, %v8760_v6 }
 0x13f   :  { %2378 = vmatpush.msrb.mxu2 %v10986_v59  ;;  %2277 = vmatpush.msrb.mxu1 %v2276_v54  ;;  %v11122_v5 = vsub.f32 %v8726_v8, %v11092_v16  ;;  %v16575_v42 = vand.u32 4294901760, %v11102_v7  ;;  %v8791_v54 = vld [vmem:[%s16505_s1 + $0x3f8] sm:$0xff]  ;;  %v1009_v12 = vadd.f32 %v1008_v44, %v970_v43  ;;  %v16574_v8 = vand.u32 4294901760, %v11114_v9 }
 0x140   :  { %2426 = vmatpush.msrb.mxu3 %v10942_v34  ;;  %2238 = vmatpush.msrb.mxu0 %v11002_v62  ;;  %v2318_v4 = vand.u32 4294901760, %v2317_v51  ;;  %v16578_v43 = vand.u32 4294901760, %v11130_v13  ;;  %v11168_v44 = vsub.f32 %v8761_v29, %v11140_v20 }
 0x141   :  { %2381 = vmatpush.msrb.mxu2 %v10991_v37  ;;  %2283 = vmatpush.msrb.mxu1 %v2282_v58  ;;  %v2323_v58 = vsub.f32 %v11085_v23, %v16576_v41  ;;  %v1078_v50 = vadd.f32 %v1077_v60, %v1009_v12  ;;  %v16586_v52 = vand.u32 4294901760, %v11122_v5  ;;  %v2329_v17 = vsub.f32 %v11102_v7, %v16575_v42  ;;  %v1155_v60 = vpop.f32.mrf.mxu2 }
 0x142   :  { %2428 = vmatpush.msrb.mxu3 %v10955_v61  ;;  %2240 = vmatpush.msrb.mxu0 %v11018_v30  ;;  %v2335_v51 = vsub.f32 %v11114_v9, %v16574_v8  ;;  %v16581_v12 = vand.u32 4294901760, %v11148_v22  ;;  %v2341_v42 = vsub.f32 %v11130_v13, %v16578_v43  ;;  %v11198_v41 = vand.u32 4294901760, %v8789_v26 }
 0x143   :  { %2384 = vmatpush.msrb.mxu2 %v11008_v3  ;;  %2289 = vmatpush.msrb.mxu1 %v2288_v53  ;;  %v11155_v53 = vand.u32 4294901760, %v8791_v54  ;;  %v2260_v29 = vsub.f32 %v11122_v5, %v16586_v52  ;;  %v2330_v8 = vand.u32 4294901760, %v2329_v17 }
 0x144   :  { %2430 = vmatpush.msrb.mxu3 %v10965_v45  ;;  %2242 = vmatpush.msrb.mxu0 %v11032_v14  ;;  %v2336_v17 = vand.u32 4294901760, %v2335_v51  ;;  %v2347_v43 = vsub.f32 %v11148_v22, %v16581_v12  ;;  %v8786_v51 = vld [vmem:[%s16505_s1 + $0x3d0] sm:$0xff]  ;;  %v11224_v12 = vsub.f32 %v8789_v26, %v11198_v41 }
 0x145   :  { %2387 = vmatpush.msrb.mxu2 %v11035_v47  ;;  %2295 = vmatpush.msrb.mxu1 %v2294_v56  ;;  %v8790_v56 = vld [vmem:[%s16505_s1 + $0x3f0] sm:$0xff]  ;;  %v2261_v32 = vand.u32 4294901760, %v2260_v29 }
 0x146   :  { %2432 = vmatpush.msrb.mxu3 %v10976_v21  ;;  %2244 = vmatpush.msrb.mxu0 %v11048_v11 }
 0x147   :  { %2390 = vmatpush.msrb.mxu2 %v11051_v28  ;;  %2301 = vmatpush.msrb.mxu1 %v2300_v18  ;;  %v1115_v18 = vadd.f32 %v1114_v57, %v1078_v50  ;;  %v11178_v57 = vand.u32 4294901760, %v8790_v56  ;;  %v8788_v50 = vld [vmem:[%s16505_s1 + $0x3e0] sm:$0xff] }
 0x148   :  { %2434 = vmatpush.msrb.mxu3 %v11002_v62  ;;  %2246 = vmatpush.msrb.mxu0 %v11063_v46 }
 0x149   :  { %2393 = vmatpush.msrb.mxu2 %v11067_v33  ;;  %2307 = vmatpush.msrb.mxu1 %v2306_v38  ;;  %v2324_v38 = vand.u32 4294901760, %v2323_v58  ;;  %v11189_v58 = vsub.f32 %v8791_v54, %v11155_v53  ;;  %v1156_v24 = vadd.f32 %v1155_v60, %v1115_v18  ;;  %v8787_v54 = vld [vmem:[%s16505_s1 + $0x3d8] sm:$0xff]  ;;  %v11211_v18 = vsub.f32 %v8790_v56, %v11178_v57  ;;  %v1310_v29 = vpop.f32.mrf.mxu0 }
 0x14a   :  { %2436 = vmatpush.msrb.mxu3 %v11018_v30  ;;  %2248 = vmatpush.msrb.mxu0 %v11081_v31  ;;  %v11213_v60 = vand.u32 4294901760, %v8788_v50  ;;  %v2342_v56 = vand.u32 4294901760, %v2341_v42  ;;  %v11226_v36 = vand.u32 4294901760, %v8787_v54  ;;  %v2348_v42 = vand.u32 4294901760, %v2347_v43 }
 0x14b   :  { %2396 = vmatpush.msrb.mxu2 %v11085_v23  ;;  %2313 = vmatpush.msrb.mxu1 %v2312_v63  ;;  %v11186_v63 = vsub.f32 %v8760_v6, %v11152_v48  ;;  %v16585_v6 = vand.u32 4294901760, %v11168_v44  ;;  %v16588_v49 = vand.u32 4294901760, %v11189_v58  ;;  %v16591_v26 = vand.u32 4294901760, %v11211_v18 }
 0x14c   :  { %2438 = vmatpush.msrb.mxu3 %v11032_v14  ;;  %2250 = vmatpush.msrb.mxu0 %v11098_v15 }
 0x14d   :  { %2399 = vmatpush.msrb.mxu2 %v11102_v7  ;;  %2319 = vmatpush.msrb.mxu1 %v2318_v4  ;;  %v1256_v4 = vpop.f32.mrf.mxu3  ;;  %v2353_v40 = vsub.f32 %v11168_v44, %v16585_v6  ;;  %v2610_v6 = vsub.f32 %v11189_v58, %v16588_v49  ;;  %v8784_v49 = vld [vmem:[%s16505_s1 + $0x3c0] sm:$0xff]  ;;  %v2616_v35 = vsub.f32 %v11211_v18, %v16591_v26 }
 0x14e   :  { %2440 = vmatpush.msrb.mxu3 %v11048_v11  ;;  %2252 = vmatpush.msrb.mxu0 %v11110_v27  ;;  %v1257_v1 = vadd.f32 %v1256_v4, %v1156_v24  ;;  %v11239_v24 = vsub.f32 %v8788_v50, %v11213_v60  ;;  %v11241_v4 = vand.u32 4294901760, %v8786_v51  ;;  %v16590_v50 = vand.u32 4294901760, %v11224_v12 }
 0x14f   :  { %2402 = vmatpush.msrb.mxu2 %v11114_v9  ;;  %2325 = vmatpush.msrb.mxu1 %v2324_v38  ;;  %v16589_v38 = vand.u32 4294901760, %v11186_v63  ;;  %v2611_v55 = vand.u32 4294901760, %v2610_v6  ;;  %v8782_v6 = vld [vmem:[%s16505_s1 + $0x3b0] sm:$0xff] }
 0x150   :  { %2442 = vmatpush.msrb.mxu3 %v11063_v46  ;;  %2254 = vmatpush.msrb.mxu0 %v11140_v20  ;;  %v1311_v43 = vadd.f32 %v1310_v29, %v1257_v1  ;;  %v16592_v1 = vand.u32 4294901760, %v11239_v24  ;;  %v16844_v29 = vand.u32 4294901760, %v10972_v0 }
 0x151   :  { %2405 = vmatpush.msrb.mxu2 %v11130_v13  ;;  %2331 = vmatpush.msrb.mxu1 %v2330_v8  ;;  %v8785_v8 = vld [vmem:[%s16505_s1 + $0x3c8] sm:$0xff] }
 0x152   :  { %2444 = vmatpush.msrb.mxu3 %v11081_v31  ;;  %2256 = vmatpush.msrb.mxu0 %v11152_v48  ;;  %v11256_v19 = vand.u32 4294901760, %v8785_v8 }
 0x153   :  { %2408 = vmatpush.msrb.mxu2 %v11148_v22  ;;  %2337 = vmatpush.msrb.mxu1 %v2336_v17  ;;  %v2359_v17 = vsub.f32 %v11186_v63, %v16589_v38  ;;  %v1349_v52 = vpop.f32.mrf.mxu1  ;;  %v2354_v38 = vand.u32 4294901760, %v2353_v40  ;;  %v11277_v40 = vand.u32 4294901760, %v8784_v49 }
 0x154   :  { %2446 = vmatpush.msrb.mxu3 %v11098_v15  ;;  %2262 = vmatmul.f32.vlgmr.msrb.gmra.mxu0 %v2261_v32  ;;  %v11254_v32 = vsub.f32 %v8787_v54, %v11226_v36  ;;  %16843 = vst [vmem:[#allocation3_spill] sm:$0xff] %v11256_v19  ;;  %v11270_v54 = vsub.f32 %v8786_v51, %v11241_v4 }
 0x155   :  { %2411 = vmatpush.msrb.mxu2 %v11168_v44  ;;  %2463 = vmatpush.msra.mxu0 %v2268_v25  ;;  %v1350_v25 = vadd.f32 %v1349_v52, %v1311_v43  ;;  %v2360_v52 = vand.u32 4294901760, %v2359_v17  ;;  %v2622_v51 = vsub.f32 %v11224_v12, %v16590_v50  ;;  %v11287_v43 = vsub.f32 %v8785_v8, %v11256_v19 }
 0x156   :  { %2343 = vmatpush.msrb.mxu1 %v2342_v56  ;;  %2448 = vmatpush.msrb.mxu3 %v11110_v27  ;;  %v8783_v56 = vld [vmem:[%s16505_s1 + $0x3b8] sm:$0xff]  ;;  %v16845_v17 = vand.u32 4294901760, %v11122_v5  ;;  %v2617_v50 = vand.u32 4294901760, %v2616_v35  ;;  %v2628_v8 = vsub.f32 %v11239_v24, %v16592_v1  ;;  %v16847_v35 = vand.u32 4294901760, %v10991_v37 }
 0x157   :  { %2414 = vmatpush.msrb.mxu2 %v11186_v63  ;;  %2467 = vmatpush.msra.mxu0 %v2274_v10  ;;  %v1418_v10 = vpop.f32.mrf.mxu2  ;;  %v11293_v0 = vand.u32 4294901760, %v8783_v56  ;;  %v16849_v1 = vand.u32 4294901760, %v11008_v3  ;;  %v8778_v3 = vld [vmem:[%s16505_s1 + $0x390] sm:$0xff] }
 0x158   :  { %2349 = vmatpush.msrb.mxu1 %v2348_v42  ;;  %2450 = vmatpush.msrb.mxu3 %v11140_v20  ;;  %v1419_v26 = vadd.f32 %v1418_v10, %v1350_v25  ;;  %v16593_v42 = vand.u32 4294901760, %v11270_v54  ;;  %v2623_v25 = vand.u32 4294901760, %v2622_v51  ;;  %v16848_v10 = vand.u32 4294901760, %v11254_v32 }
 0x159   :  { %2417 = vmatmul.f32.vlgmr.msrb.gmra.mxu2 %v11122_v5  ;;  %2471 = vmatpush.msra.mxu0 %v16844_v29  ;;  %v16846_v29 = vand.u32 4294901760, %v10986_v59  ;;  %v1455_v5 = vpop.f32.mrf.mxu3  ;;  %v11310_v59 = vand.u32 4294901760, %v8782_v6 }
 0x15a   :  { %2567 = vmatpush.msra.mxu2 %v11155_v53  ;;  %2355 = vmatpush.msrb.mxu1 %v2354_v38  ;;  %v8781_v38 = vld [vmem:[%s16505_s1 + $0x3a8] sm:$0xff]  ;;  %v1456_v51 = vadd.f32 %v1455_v5, %v1419_v26  ;;  %v16850_v5 = vand.u32 4294901760, %v11287_v43 }
 0x15b   :  { %2452 = vmatpush.msrb.mxu3 %v11152_v48  ;;  %2475 = vmatpush.msra.mxu0 %v16846_v29  ;;  %v2634_v29 = vsub.f32 %v11254_v32, %v16848_v10  ;;  %v11326_v37 = vand.u32 4294901760, %v8781_v38  ;;  %v9075_v10 = vld [vmem:[%s16508_s3] ss:$0 sm:$0xff]  ;;  %v11343_v26 = vsub.f32 %v8782_v6, %v11310_v59 }
 0x15c   :  { %2456 = vmatmul.f32.vlgmr.msrb.gmra.mxu3 %v16845_v17  ;;  %2569 = vmatpush.msra.mxu2 %v11178_v57  ;;  %v11308_v17 = vsub.f32 %v8784_v49, %v11277_v40  ;;  %v11324_v49 = vsub.f32 %v8783_v56, %v11293_v0  ;;  %v8779_v56 = vld [vmem:[%s16505_s1 + $0x398] sm:$0xff] }
 0x15d   :  { %2612 = vmatpush.msra.mxu3 %v2611_v55  ;;  %2361 = vmatpush.msrb.mxu1 %v2360_v52  ;;  %v8780_v55 = vld [vmem:[%s16505_s1 + $0x3a0] sm:$0xff]  ;;  %v2629_v52 = vand.u32 4294901760, %v2628_v8  ;;  %v2635_v8 = vand.u32 4294901760, %v2634_v29  ;;  %v1462_v29 = vmul.f32 %v9075_v10, %v1456_v51  ;;  %v8727_v51 = vld [vmem:[%s16506_s0 + $0x38] sm:$0xff] }
 0x15e   :  { %2479 = vmatpush.msra.mxu0 %v16847_v35  ;;  %2363 = vmatmul.f32.vlgmr.msrb.gmra.mxu1 %v11092_v16  ;;  %v2640_v35 = vsub.f32 %v11270_v54, %v16593_v42  ;;  %v2646_v42 = vsub.f32 %v11287_v43, %v16850_v5  ;;  %v16852_v5 = vand.u32 4294901760, %v11051_v28  ;;  %v16855_v10 = vand.u32 4294901760, %v11324_v49 }
 0x15f   :  { %2571 = vmatpush.msra.mxu2 %v11198_v41  ;;  %2530 = vmatpush.msra.mxu1 %v10922_v2  ;;  %v11359_v2 = vsub.f32 %v8781_v38, %v11326_v37  ;;  %v16853_v38 = vand.u32 4294901760, %v11308_v17 }
 0x160   :  { %2618 = vmatpush.msra.mxu3 %v2617_v50  ;;  %2483 = vmatpush.msra.mxu0 %v16849_v1  ;;  %v11345_v50 = vand.u32 4294901760, %v8780_v55  ;;  %v16851_v1 = vand.u32 4294901760, %v11035_v47  ;;  %v8777_v47 = vld [vmem:[%s16505_s1 + $0x388] sm:$0xff]  ;;  %v2647_v28 = vand.u32 4294901760, %v2646_v42  ;;  %v11400_v42 = vand.u32 4294901760, %v8727_v51 }
 0x161   :  { %2573 = vmatpush.msra.mxu2 %v11213_v60  ;;  %2532 = vmatpush.msra.mxu1 %v10932_v39  ;;  %v11361_v39 = vand.u32 4294901760, %v8779_v56  ;;  %v11393_v6 = vand.u32 4294901760, %v8777_v47 }
 0x162   :  { %2624 = vmatpush.msra.mxu3 %v2623_v25  ;;  %2487 = vmatpush.msra.mxu0 %v16851_v1  ;;  %v2641_v25 = vand.u32 4294901760, %v2640_v35  ;;  %v2652_v1 = vsub.f32 %v11308_v17, %v16853_v38  ;;  %v16854_v35 = vand.u32 4294901760, %v11067_v33  ;;  %v1464_v33 = vsel %vm1463_vm0, %v1462_v29, 0.0 }
 0x163   :  { %2575 = vmatpush.msra.mxu2 %v11226_v36  ;;  %2534 = vmatpush.msra.mxu1 %v10942_v34  ;;  %v11375_v34 = vsub.f32 %v8780_v55, %v11345_v50  ;;  %v2658_v55 = vsub.f32 %v11324_v49, %v16855_v10  ;;  %v11391_v38 = vsub.f32 %v8779_v56, %v11361_v39  ;;  %v16859_v29 = vand.u32 4294901760, %v11359_v2 }
 0x164   :  { %2630 = vmatpush.msra.mxu3 %v2629_v52  ;;  %2491 = vmatpush.msra.mxu0 %v16852_v5  ;;  %v11377_v52 = vand.u32 4294901760, %v8778_v3  ;;  %v2653_v56 = vand.u32 4294901760, %v2652_v1 }
 0x165   :  { %2577 = vmatpush.msra.mxu2 %v11241_v4  ;;  %2536 = vmatpush.msra.mxu1 %v10955_v61  ;;  %v8776_v61 = vld [vmem:[%s16505_s1 + $0x380] sm:$0xff]  ;;  %v2675_v5 = vand.u32 4294901760, %v11375_v34  ;;  %v2670_v1 = vsub.f32 %v11359_v2, %v16859_v29 }
 0x166   :  { %2636 = vmatpush.msra.mxu3 %v2635_v8  ;;  %2495 = vmatpush.msra.mxu0 %v16854_v35  ;;  %v16856_v8 = vand.u32 4294901760, %v11085_v23  ;;  %v16857_v35 = vand.u32 4294901760, %v11343_v26  ;;  %v16858_v23 = vand.u32 4294901760, %v11102_v7  ;;  %v16860_v7 = vand.u32 4294901760, %v11114_v9 }
 0x167   :  { %2579 = vmatpush.msra.mxu2 %v11256_v19  ;;  %2538 = vmatpush.msra.mxu1 %v10965_v45  ;;  %v11410_v19 = vsub.f32 %v8778_v3, %v11377_v52  ;;  %v11413_v45 = vand.u32 4294901760, %v8776_v61  ;;  %v2671_v9 = vand.u32 4294901760, %v2670_v1 }
 0x168   :  { %2642 = vmatpush.msra.mxu3 %v2641_v25  ;;  %2499 = vmatpush.msra.mxu0 %v16856_v8  ;;  %v2664_v10 = vsub.f32 %v11343_v26, %v16857_v35  ;;  %v2659_v25 = vand.u32 4294901760, %v2658_v55  ;;  %v2681_v8 = vand.u32 4294901760, %v11391_v38  ;;  %v11422_v35 = vsub.f32 %v8777_v47, %v11393_v6 }
 0x169   :  { %2581 = vmatpush.msra.mxu2 %v11277_v40  ;;  %2540 = vmatpush.msra.mxu1 %v10976_v21  ;;  %v11427_v21 = vsub.f32 %v8727_v51, %v11400_v42  ;;  %v2687_v55 = vand.u32 4294901760, %v11410_v19  ;;  %v16861_v47 = vand.u32 4294901760, %v11130_v13 }
 0x16a   :  { %2648 = vmatpush.msra.mxu3 %v2647_v28  ;;  %1465 = vadd.xlane.f32.xlu0 %v1464_v33  ;;  %v2665_v3 = vand.u32 4294901760, %v2664_v10  ;;  %v2676_v28 = vsub.f32 %v11375_v34, %v2675_v5  ;;  %v2682_v51 = vsub.f32 %v11391_v38, %v2681_v8  ;;  %v2693_v33 = vand.u32 4294901760, %v11422_v35 }
 0x16b   :  { %2503 = vmatpush.msra.mxu0 %v16858_v23  ;;  %2542 = vmatpush.msra.mxu1 %v11002_v62  ;;  %v11438_v62 = vsub.f32 %v8776_v61, %v11413_v45  ;;  %v16862_v61 = vand.u32 4294901760, %v11148_v22  ;;  %v2688_v13 = vsub.f32 %v11410_v19, %v2687_v55 }
 0x16c   :  { %2583 = vmatpush.msra.mxu2 %v11293_v0  ;;  %2654 = vmatpush.msra.mxu3 %v2653_v56  ;;  %v2677_v56 = vand.u32 4294901760, %v2676_v28  ;;  %v2683_v23 = vand.u32 4294901760, %v2682_v51  ;;  %v2694_v22 = vsub.f32 %v11422_v35, %v2693_v33 }
 0x16d   :  { %2507 = vmatpush.msra.mxu0 %v16860_v7  ;;  %2544 = vmatpush.msra.mxu1 %v11018_v30  ;;  %v2600_v30 = vand.u32 4294901760, %v11427_v21  ;;  %v2699_v10 = vand.u32 4294901760, %v11438_v62  ;;  %v2689_v29 = vand.u32 4294901760, %v2688_v13  ;;  %v8803_v13 = vld [vmem:[%s16505_s1 + $0x428] sm:$0xff] }
 0x16e   :  { %2585 = vmatpush.msra.mxu2 %v11310_v59  ;;  %2660 = vmatpush.msra.mxu3 %v2659_v25  ;;  %v16864_v25 = vand.u32 4294901760, %v11186_v63  ;;  %v16865_v63 = vand.u32 4294901760, %v11189_v58 }
 0x16f   :  { %2511 = vmatpush.msra.mxu0 %v16861_v47  ;;  %2546 = vmatpush.msra.mxu1 %v11032_v14  ;;  %v16863_v14 = vand.u32 4294901760, %v11168_v44  ;;  %v2700_v44 = vsub.f32 %v11438_v62, %v2699_v10 }
 0x170   :  { %2587 = vmatpush.msra.mxu2 %v11326_v37  ;;  %2666 = vmatpush.msra.mxu3 %v2665_v3 }
 0x171   :  { %2515 = vmatpush.msra.mxu0 %v16862_v61  ;;  %2548 = vmatpush.msra.mxu1 %v11048_v11  ;;  %v2601_v11 = vsub.f32 %v11427_v21, %v2600_v30 }
 0x172   :  { %2589 = vmatpush.msra.mxu2 %v11345_v50  ;;  %2672 = vmatpush.msra.mxu3 %v2671_v9  ;;  %v8804_v9 = vld [vmem:[%s16505_s1 + $0x430] sm:$0xff] }
 0x173   :  { %2519 = vmatpush.msra.mxu0 %v16863_v14  ;;  %2550 = vmatpush.msra.mxu1 %v11063_v46  ;;  %v2695_v46 = vand.u32 4294901760, %v2694_v22  ;;  %v2602_v1 = vand.u32 4294901760, %v2601_v11 }
 0x174   :  { %2591 = vmatpush.msra.mxu2 %v11361_v39  ;;  %2678 = vmatpush.msra.mxu3 %v2677_v56 }
 0x175   :  { %2523 = vmatpush.msra.mxu0 %v16864_v25  ;;  %2552 = vmatpush.msra.mxu1 %v11081_v31  ;;  %v2701_v31 = vand.u32 4294901760, %v2700_v44  ;;  %v8801_v44 = vld [vmem:[%s16505_s1 + $0x418] sm:$0xff] }
 0x176   :  { %2593 = vmatpush.msra.mxu2 %v11377_v52  ;;  %2684 = vmatpush.msra.mxu3 %v2683_v23  ;;  %v11665_v23 = vand.u32 4294901760, %v8804_v9 }
 0x177   :  { %2525 = vmatmul.f32.vlgmr.msra.gmra.mxu0 %v11092_v16  ;;  %2554 = vmatpush.msra.mxu1 %v11098_v15  ;;  %v16866_v15 = vand.u32 4294901760, %v11211_v18 }
 0x178   :  { %2710 = vmatpush.msrb.mxu0 %v11189_v58  ;;  %2595 = vmatpush.msra.mxu2 %v11393_v6  ;;  %v8812_v58 = vld [vmem:[%s16505_s1 + $0x470] sm:$0xff] }
 0x179   :  { %2690 = vmatpush.msra.mxu3 %v2689_v29  ;;  %2556 = vmatpush.msra.mxu1 %v11110_v27  ;;  %v16867_v27 = vand.u32 4294901760, %v11224_v12  ;;  %v11679_v29 = vand.u32 4294901760, %v8803_v13 }
 0x17a   :  { %2713 = vmatpush.msrb.mxu0 %v11211_v18  ;;  %2597 = vmatpush.msra.mxu2 %v11413_v45  ;;  %v16875_v18 = vand.u32 4294901760, %v11343_v26 }
 0x17b   :  { %2696 = vmatpush.msra.mxu3 %v2695_v46  ;;  %2603 = vmatmul.f32.vlgmr.msra.gmra.mxu2 %v2602_v1 }
 0x17c   :  { %2716 = vmatpush.msrb.mxu0 %v11224_v12  ;;  %2804 = vmatpush.msrb.mxu2 %v16865_v63  ;;  %v16873_v12 = vld [vmem:[#allocation3_spill] sm:$0xff]  ;;  %v11697_v63 = vsub.f32 %v8804_v9, %v11665_v23 }
 0x17d   :  { %2558 = vmatpush.msra.mxu1 %v11140_v20  ;;  %2702 = vmatpush.msra.mxu3 %v2701_v31  ;;  %v16868_v20 = vand.u32 4294901760, %v11239_v24 }
 0x17e   :  { %2719 = vmatpush.msrb.mxu0 %v11239_v24  ;;  %2704 = vmatmul.f32.vlgmr.msra.gmra.mxu3 %v11400_v42  ;;  %v8811_v24 = vld [vmem:[%s16505_s1 + $0x468] sm:$0xff] }
 0x17f   :  { %2808 = vmatpush.msrb.mxu2 %v16866_v15  ;;  %2871 = vmatpush.msrb.mxu3 %v11155_v53 }
 0x180   :  { %2560 = vmatpush.msra.mxu1 %v11152_v48  ;;  %2722 = vmatpush.msrb.mxu0 %v11254_v32  ;;  %v16870_v48 = vand.u32 4294901760, %v11270_v54 }
 0x181   :  { %2562 = vmatmul.f32.vlgmr.msra.gmra.mxu1 %v11092_v16  ;;  %2812 = vmatpush.msrb.mxu2 %v16867_v27  ;;  %v16869_v16 = vand.u32 4294901760, %v11254_v32  ;;  %v11547_v32 = vand.u32 4294901760, %v8812_v58  ;;  %v8800_v27 = vld [vmem:[%s16505_s1 + $0x410] sm:$0xff] }
 0x182   :  { %2763 = vmatpush.msrb.mxu1 %v11155_v53  ;;  %2873 = vmatpush.msrb.mxu3 %v11178_v57  ;;  %v16872_v53 = vand.u32 4294901760, %v11308_v17 }
 0x183   :  { %2725 = vmatpush.msrb.mxu0 %v11270_v54  ;;  %2816 = vmatpush.msrb.mxu2 %v16868_v20  ;;  %v8810_v54 = vld [vmem:[%s16505_s1 + $0x460] sm:$0xff] }
 0x184   :  { %2765 = vmatpush.msrb.mxu1 %v11178_v57  ;;  %2875 = vmatpush.msrb.mxu3 %v11198_v41  ;;  %v16874_v57 = vand.u32 4294901760, %v11324_v49 }
 0x185   :  { %2728 = vmatpush.msrb.mxu0 %v11287_v43  ;;  %2820 = vmatpush.msrb.mxu2 %v16869_v16  ;;  %v11708_v16 = vand.u32 4294901760, %v8801_v44 }
 0x186   :  { %2767 = vmatpush.msrb.mxu1 %v11198_v41  ;;  %2877 = vmatpush.msrb.mxu3 %v11213_v60  ;;  %v16871_v41 = vand.u32 4294901760, %v11287_v43 }
 0x187   :  { %2731 = vmatpush.msrb.mxu0 %v11308_v17  ;;  %2824 = vmatpush.msrb.mxu2 %v16870_v48  ;;  %v11570_v17 = vand.u32 4294901760, %v8810_v54 }
 0x188   :  { %2769 = vmatpush.msrb.mxu1 %v11213_v60  ;;  %2879 = vmatpush.msrb.mxu3 %v11226_v36 }
 0x189   :  { %2734 = vmatpush.msrb.mxu0 %v11324_v49  ;;  %2828 = vmatpush.msrb.mxu2 %v16871_v41  ;;  %v8808_v49 = vld [vmem:[%s16505_s1 + $0x450] sm:$0xff]  ;;  %v11712_v41 = vsub.f32 %v8803_v13, %v11679_v29 }
 0x18a   :  { %2771 = vmatpush.msrb.mxu1 %v11226_v36  ;;  %2881 = vmatpush.msrb.mxu3 %v11241_v4  ;;  %v8813_v36 = vld [vmem:[%s16505_s1 + $0x478] sm:$0xff] }
 0x18b   :  { %2737 = vmatpush.msrb.mxu0 %v11343_v26  ;;  %2832 = vmatpush.msrb.mxu2 %v16872_v53  ;;  %v11537_v60 = vand.u32 4294901760, %v8813_v36 }
 0x18c   :  { %2773 = vmatpush.msrb.mxu1 %v11241_v4  ;;  %2883 = vmatpush.msrb.mxu3 %v16873_v12  ;;  %v16876_v4 = vand.u32 4294901760, %v11359_v2 }
 0x18d   :  { %2740 = vmatpush.msrb.mxu0 %v11359_v2  ;;  %2836 = vmatpush.msrb.mxu2 %v16874_v57  ;;  %v11560_v43 = vsub.f32 %v8813_v36, %v11537_v60  ;;  %v11723_v57 = vand.u32 4294901760, %v8800_v27 }
 0x18e   :  { %2775 = vmatpush.msrb.mxu1 %v16873_v12  ;;  %2885 = vmatpush.msrb.mxu3 %v11277_v40  ;;  %v8799_v12 = vld [vmem:[%s16505_s1 + $0x408] sm:$0xff] }
 0x18f   :  { %2743 = vmatpush.msrb.mxu0 %v11375_v34  ;;  %2840 = vmatpush.msrb.mxu2 %v16875_v18  ;;  %v3035_v2 = vand.u32 4294901760, %v11560_v43  ;;  %v8807_v34 = vld [vmem:[%s16505_s1 + $0x448] sm:$0xff]  ;;  %v11755_v9 = vsub.f32 %v8800_v27, %v11723_v57 }
 0x190   :  { %2777 = vmatpush.msrb.mxu1 %v11277_v40  ;;  %2887 = vmatpush.msrb.mxu3 %v11293_v0  ;;  %v11557_v40 = vand.u32 4294901760, %v8811_v24 }
 0x191   :  { %2746 = vmatpush.msrb.mxu0 %v11391_v38  ;;  %2844 = vmatpush.msrb.mxu2 %v16876_v4  ;;  %v8806_v38 = vld [vmem:[%s16505_s1 + $0x440] sm:$0xff]  ;;  %v8829_v4 = vld [vmem:[%s16505_s1 + $0x4f8] sm:$0xff] }
 0x192   :  { %2779 = vmatpush.msrb.mxu1 %v11293_v0  ;;  %2889 = vmatpush.msrb.mxu3 %v11310_v59  ;;  %v8809_v0 = vld [vmem:[%s16505_s1 + $0x458] sm:$0xff]  ;;  %v11587_v26 = vsub.f32 %v8811_v24, %v11557_v40 }
 0x193   :  { %2749 = vmatpush.msrb.mxu0 %v11410_v19  ;;  %2848 = vmatpush.msrb.mxu2 %v2675_v5  ;;  %v11596_v19 = vand.u32 4294901760, %v8808_v49  ;;  %v11600_v5 = vsub.f32 %v8810_v54, %v11570_v17 }
 0x194   :  { %2781 = vmatpush.msrb.mxu1 %v11310_v59  ;;  %2891 = vmatpush.msrb.mxu3 %v11326_v37  ;;  %v11573_v59 = vsub.f32 %v8812_v58, %v11547_v32  ;;  %v3047_v7 = vand.u32 4294901760, %v11587_v26  ;;  %v16600_v58 = vand.u32 4294901760, %v11697_v63 }
 0x195   :  { %2752 = vmatpush.msrb.mxu0 %v11422_v35  ;;  %2852 = vmatpush.msrb.mxu2 %v2681_v8  ;;  %v11608_v8 = vand.u32 4294901760, %v8807_v34  ;;  %v11622_v35 = vand.u32 4294901760, %v8806_v38 }
 0x196   :  { %2783 = vmatpush.msrb.mxu1 %v11326_v37  ;;  %2893 = vmatpush.msrb.mxu3 %v11345_v50  ;;  %v11583_v37 = vand.u32 4294901760, %v8809_v0 }
 0x197   :  { %2755 = vmatpush.msrb.mxu0 %v11438_v62  ;;  %2856 = vmatpush.msrb.mxu2 %v2687_v55  ;;  %v3053_v55 = vand.u32 4294901760, %v11600_v5  ;;  %v11634_v62 = vsub.f32 %v8808_v49, %v11596_v19  ;;  %v11639_v47 = vsub.f32 %v8807_v34, %v11608_v8  ;;  %v11655_v56 = vsub.f32 %v8806_v38, %v11622_v35  ;;  %v8798_v38 = vld [vmem:[%s16505_s1 + $0x400] sm:$0xff] }
 0x198   :  { %2785 = vmatpush.msrb.mxu1 %v11345_v50  ;;  %2895 = vmatpush.msrb.mxu3 %v11361_v39  ;;  %v3041_v50 = vand.u32 4294901760, %v11573_v59  ;;  %v11617_v3 = vsub.f32 %v8809_v0, %v11583_v37  ;;  %v11738_v0 = vand.u32 4294901760, %v8799_v12  ;;  %v16598_v49 = vand.u32 4294901760, %v11712_v41 }
 0x199   :  { %2758 = vmatmul.f32.vlgmr.msrb.gmra.mxu0 %v11427_v21  ;;  %2860 = vmatpush.msrb.mxu2 %v2693_v33  ;;  %v3048_v33 = vsub.f32 %v11587_v26, %v3047_v7  ;;  %v3054_v14 = vsub.f32 %v11600_v5, %v3053_v55  ;;  %v16605_v22 = vand.u32 4294901760, %v11639_v47  ;;  %v11742_v34 = vsub.f32 %v8801_v44, %v11708_v16 }
 0x19a   :  { %2993 = vmatpush.msra.mxu0 %v11537_v60  ;;  %2787 = vmatpush.msrb.mxu1 %v11361_v39  ;;  %v3036_v39 = vsub.f32 %v11560_v43, %v3035_v2  ;;  %v3042_v28 = vsub.f32 %v11573_v59, %v3041_v50  ;;  %v11764_v13 = vand.u32 4294901760, %v8798_v38 }
 0x19b   :  { %2897 = vmatpush.msrb.mxu3 %v11377_v52  ;;  %2864 = vmatpush.msrb.mxu2 %v2699_v10  ;;  %v3049_v11 = vand.u32 4294901760, %v3048_v33  ;;  %v3055_v46 = vand.u32 4294901760, %v3054_v14  ;;  %v3072_v15 = vsub.f32 %v11639_v47, %v16605_v22  ;;  %v8828_v33 = vld [vmem:[%s16505_s1 + $0x4f0] sm:$0xff]  ;;  %v3096_v14 = vsub.f32 %v11712_v41, %v16598_v49 }
 0x19c   :  { %2995 = vmatpush.msra.mxu0 %v11547_v32  ;;  %2789 = vmatpush.msrb.mxu1 %v11377_v52  ;;  %v8805_v52 = vld [vmem:[%s16505_s1 + $0x438] sm:$0xff]  ;;  %v3037_v51 = vand.u32 4294901760, %v3036_v39  ;;  %v3043_v10 = vand.u32 4294901760, %v3042_v28  ;;  %v11779_v44 = vand.u32 4294901760, %v8828_v33 }
 0x19d   :  { %2899 = vmatpush.msrb.mxu3 %v11393_v6  ;;  %2866 = vmatmul.f32.vlgmr.msrb.gmra.mxu2 %v11400_v42  ;;  %v11649_v61 = vand.u32 4294901760, %v8805_v52  ;;  %v3073_v24 = vand.u32 4294901760, %v3072_v15  ;;  %v16599_v15 = vand.u32 4294901760, %v11755_v9 }
 0x19e   :  { %2997 = vmatpush.msra.mxu0 %v11557_v40  ;;  %3136 = vmatpush.msra.mxu2 %v11560_v43 }
 0x19f   :  { %2791 = vmatpush.msrb.mxu1 %v11393_v6  ;;  %2901 = vmatpush.msrb.mxu3 %v11413_v45  ;;  %v3059_v6 = vand.u32 4294901760, %v11617_v3  ;;  %v11682_v21 = vsub.f32 %v8805_v52, %v11649_v61  ;;  %v3090_v52 = vsub.f32 %v11697_v63, %v16600_v58 }
 0x1a0   :  { %2999 = vmatpush.msra.mxu0 %v11570_v17  ;;  %2903 = vmatmul.f32.vlgmr.msrb.gmra.mxu3 %v11400_v42  ;;  %v16609_v42 = vand.u32 4294901760, %v11634_v62 }
 0x1a1   :  { %3139 = vmatpush.msra.mxu2 %v11573_v59  ;;  %3189 = vmatpush.msra.mxu3 %v11537_v60  ;;  %v3060_v25 = vsub.f32 %v11617_v3, %v3059_v6  ;;  %v16601_v48 = vand.u32 4294901760, %v11682_v21  ;;  %v8820_v59 = vld [vmem:[%s16505_s1 + $0x4b0] sm:$0xff] }
 0x1a2   :  { %2793 = vmatpush.msrb.mxu1 %v11413_v45  ;;  %3001 = vmatpush.msra.mxu0 %v11583_v37  ;;  %v8802_v45 = vld [vmem:[%s16505_s1 + $0x420] sm:$0xff]  ;;  %v3066_v1 = vsub.f32 %v11634_v62, %v16609_v42 }
 0x1a3   :  { %2797 = vmatmul.f32.vlgmr.msrb.gmra.mxu1 %v2600_v30  ;;  %3142 = vmatpush.msra.mxu2 %v11587_v26  ;;  %v16603_v30 = vand.u32 4294901760, %v11655_v56  ;;  %v11694_v31 = vand.u32 4294901760, %v8802_v45  ;;  %v3061_v20 = vand.u32 4294901760, %v3060_v25  ;;  %v3084_v54 = vsub.f32 %v11682_v21, %v16601_v48  ;;  %v8827_v25 = vld [vmem:[%s16505_s1 + $0x4e8] sm:$0xff] }
 0x1a4   :  { %3038 = vmatpush.msra.mxu1 %v3037_v51  ;;  %3191 = vmatpush.msra.mxu3 %v11547_v32  ;;  %v3067_v36 = vand.u32 4294901760, %v3066_v1  ;;  %v11757_v51 = vand.u32 4294901760, %v8829_v4 }
 0x1a5   :  { %3003 = vmatpush.msra.mxu0 %v11596_v19  ;;  %3145 = vmatpush.msra.mxu2 %v11600_v5  ;;  %v3078_v53 = vsub.f32 %v11655_v56, %v16603_v30  ;;  %v11727_v18 = vsub.f32 %v8802_v45, %v11694_v31  ;;  %v16596_v45 = vand.u32 4294901760, %v11742_v34  ;;  %v8822_v30 = vld [vmem:[%s16505_s1 + $0x4c0] sm:$0xff] }
 0x1a6   :  { %3044 = vmatpush.msra.mxu1 %v3043_v10  ;;  %3193 = vmatpush.msra.mxu3 %v11557_v40  ;;  %v3085_v10 = vand.u32 4294901760, %v3084_v54  ;;  %v11787_v27 = vsub.f32 %v8829_v4, %v11757_v51  ;;  %v8825_v54 = vld [vmem:[%s16505_s1 + $0x4d8] sm:$0xff]  ;;  %v8818_v5 = vld [vmem:[%s16505_s1 + $0x4a0] sm:$0xff] }
 0x1a7   :  { %3005 = vmatpush.msra.mxu0 %v11608_v8  ;;  %3148 = vmatpush.msra.mxu2 %v11617_v3  ;;  %v3079_v39 = vand.u32 4294901760, %v3078_v53  ;;  %v16597_v28 = vand.u32 4294901760, %v11727_v18  ;;  %v11795_v53 = vsub.f32 %v8798_v38, %v11764_v13  ;;  %v11810_v38 = vsub.f32 %v8828_v33, %v11779_v44  ;;  %v8817_v3 = vld [vmem:[%s16505_s1 + $0x498] sm:$0xff] }
 0x1a8   :  { %3050 = vmatpush.msra.mxu1 %v3049_v11  ;;  %3195 = vmatpush.msra.mxu3 %v11570_v17  ;;  %v11772_v11 = vsub.f32 %v8799_v12, %v11738_v0  ;;  %v11797_v12 = vand.u32 4294901760, %v8827_v25  ;;  %v11828_v49 = vand.u32 4294901760, %v8825_v54 }
 0x1a9   :  { %3007 = vmatpush.msra.mxu0 %v11622_v35  ;;  %3151 = vmatpush.msra.mxu2 %v11634_v62  ;;  %v3102_v1 = vsub.f32 %v11727_v18, %v16597_v28  ;;  %v16606_v33 = vand.u32 4294901760, %v11795_v53 }
 0x1aa   :  { %3056 = vmatpush.msra.mxu1 %v3055_v46  ;;  %3197 = vmatpush.msra.mxu3 %v11583_v37  ;;  %v3091_v46 = vand.u32 4294901760, %v3090_v52  ;;  %v16602_v4 = vand.u32 4294901760, %v11772_v11  ;;  %v8824_v52 = vld [vmem:[%s16505_s1 + $0x4d0] sm:$0xff]  ;;  %v11826_v28 = vsub.f32 %v8827_v25, %v11797_v12  ;;  %v16607_v25 = vand.u32 4294901760, %v11810_v38 }
 0x1ab   :  { %3009 = vmatpush.msra.mxu0 %v11649_v61  ;;  %3154 = vmatpush.msra.mxu2 %v11639_v47  ;;  %v11837_v58 = vand.u32 4294901760, %v8824_v52 }
 0x1ac   :  { %3062 = vmatpush.msra.mxu1 %v3061_v20  ;;  %3199 = vmatpush.msra.mxu3 %v11596_v19  ;;  %v8826_v20 = vld [vmem:[%s16505_s1 + $0x4e0] sm:$0xff] }
 0x1ad   :  { %3011 = vmatpush.msra.mxu0 %v11665_v23  ;;  %3157 = vmatpush.msra.mxu2 %v11655_v56  ;;  %v11869_v43 = vsub.f32 %v8824_v52, %v11837_v58 }
 0x1ae   :  { %3068 = vmatpush.msra.mxu1 %v3067_v36  ;;  %3201 = vmatpush.msra.mxu3 %v11608_v8  ;;  %v3097_v36 = vand.u32 4294901760, %v3096_v14  ;;  %v3114_v14 = vsub.f32 %v11755_v9, %v16599_v15  ;;  %v3120_v15 = vsub.f32 %v11772_v11, %v16602_v4 }
 0x1af   :  { %3013 = vmatpush.msra.mxu0 %v11679_v29  ;;  %3160 = vmatpush.msra.mxu2 %v11682_v21 }
 0x1b0   :  { %3074 = vmatpush.msra.mxu1 %v3073_v24  ;;  %3203 = vmatpush.msra.mxu3 %v11622_v35  ;;  %v3108_v24 = vsub.f32 %v11742_v34, %v16596_v45  ;;  %v16604_v45 = vand.u32 4294901760, %v11787_v27  ;;  %v3121_v22 = vand.u32 4294901760, %v3120_v15 }
 0x1b1   :  { %3015 = vmatpush.msra.mxu0 %v11694_v31  ;;  %3163 = vmatpush.msra.mxu2 %v11697_v63 }
 0x1b2   :  { %3080 = vmatpush.msra.mxu1 %v3079_v39  ;;  %3205 = vmatpush.msra.mxu3 %v11649_v61  ;;  %v11812_v39 = vand.u32 4294901760, %v8826_v20 }
 0x1b3   :  { %3017 = vmatpush.msra.mxu0 %v11708_v16  ;;  %3166 = vmatpush.msra.mxu2 %v11712_v41 }
 0x1b4   :  { %3086 = vmatpush.msra.mxu1 %v3085_v10  ;;  %3207 = vmatpush.msra.mxu3 %v11665_v23  ;;  %v3103_v10 = vand.u32 4294901760, %v3102_v1  ;;  %v3109_v1 = vand.u32 4294901760, %v3108_v24  ;;  %v11843_v48 = vsub.f32 %v8826_v20, %v11812_v39  ;;  %v3377_v24 = vsub.f32 %v11787_v27, %v16604_v45  ;;  %v8821_v45 = vld [vmem:[%s16505_s1 + $0x4b8] sm:$0xff] }
 0x1b5   :  { %3019 = vmatpush.msra.mxu0 %v11723_v57  ;;  %3169 = vmatpush.msra.mxu2 %v11727_v18  ;;  %v3126_v20 = vsub.f32 %v11795_v53, %v16606_v33  ;;  %v11878_v33 = vand.u32 4294901760, %v8822_v30 }
 0x1b6   :  { %3092 = vmatpush.msra.mxu1 %v3091_v46  ;;  %3209 = vmatpush.msra.mxu3 %v11679_v29  ;;  %v8823_v46 = vld [vmem:[%s16505_s1 + $0x4c8] sm:$0xff]  ;;  %v3378_v15 = vand.u32 4294901760, %v3377_v24 }
 0x1b7   :  { %3021 = vmatpush.msra.mxu0 %v11738_v0  ;;  %3172 = vmatpush.msra.mxu2 %v11742_v34  ;;  %v11849_v4 = vand.u32 4294901760, %v8823_v46 }
 0x1b8   :  { %3098 = vmatpush.msra.mxu1 %v3097_v36  ;;  %3211 = vmatpush.msra.mxu3 %v11694_v31  ;;  %v3115_v36 = vand.u32 4294901760, %v3114_v14  ;;  %v11862_v14 = vsub.f32 %v8825_v54, %v11828_v49  ;;  %v16612_v54 = vand.u32 4294901760, %v11843_v48 }
 0x1b9   :  { %3023 = vmatpush.msra.mxu0 %v11764_v13  ;;  %3175 = vmatpush.msra.mxu2 %v11755_v9  ;;  %v11882_v52 = vsub.f32 %v8823_v46, %v11849_v4  ;;  %v16611_v46 = vand.u32 4294901760, %v11869_v43 }
 0x1ba   :  { %3104 = vmatpush.msra.mxu1 %v3103_v10  ;;  %3213 = vmatpush.msra.mxu3 %v11708_v16  ;;  %v16608_v10 = vand.u32 4294901760, %v11826_v28  ;;  %v16610_v24 = vand.u32 4294901760, %v11862_v14 }
 0x1bb   :  { %3230 = vmatpush.msrb.mxu0 %v3035_v2  ;;  %3178 = vmatpush.msra.mxu2 %v11772_v11  ;;  %v3383_v2 = vsub.f32 %v11810_v38, %v16607_v25  ;;  %v8819_v25 = vld [vmem:[%s16505_s1 + $0x4a8] sm:$0xff] }
 0x1bc   :  { %3110 = vmatpush.msra.mxu1 %v3109_v1  ;;  %3215 = vmatpush.msra.mxu3 %v11723_v57  ;;  %v11884_v1 = vand.u32 4294901760, %v8821_v45 }
 0x1bd   :  { %3234 = vmatpush.msrb.mxu0 %v3041_v50  ;;  %3181 = vmatpush.msra.mxu2 %v11795_v53  ;;  %v3127_v50 = vand.u32 4294901760, %v3126_v20  ;;  %v3384_v26 = vand.u32 4294901760, %v3383_v2  ;;  %v11908_v20 = vsub.f32 %v8822_v30, %v11878_v33  ;;  %v3401_v30 = vsub.f32 %v11862_v14, %v16610_v24 }
 0x1be   :  { %3116 = vmatpush.msra.mxu1 %v3115_v36  ;;  %3217 = vmatpush.msra.mxu3 %v11738_v0  ;;  %v3389_v36 = vsub.f32 %v11826_v28, %v16608_v10  ;;  %v16613_v10 = vand.u32 4294901760, %v11882_v52  ;;  %v11915_v42 = vsub.f32 %v8821_v45, %v11884_v1  ;;  %v11925_v2 = vand.u32 4294901760, %v8819_v25 }
 0x1bf   :  { %3238 = vmatpush.msrb.mxu0 %v3047_v7  ;;  %3334 = vmatpush.msrb.mxu2 %v11757_v51  ;;  %v3395_v7 = vsub.f32 %v11843_v48, %v16612_v54  ;;  %v3407_v45 = vsub.f32 %v11869_v43, %v16611_v46  ;;  %v11944_v24 = vand.u32 4294901760, %v8818_v5 }
 0x1c0   :  { %3122 = vmatpush.msra.mxu1 %v3121_v22  ;;  %3219 = vmatpush.msra.mxu3 %v11764_v13  ;;  %v11910_v22 = vand.u32 4294901760, %v8820_v59  ;;  %v3413_v46 = vsub.f32 %v11882_v52, %v16613_v10 }
 0x1c1   :  { %3242 = vmatpush.msrb.mxu0 %v3053_v55  ;;  %3336 = vmatpush.msrb.mxu2 %v11779_v44  ;;  %v3390_v55 = vand.u32 4294901760, %v3389_v36  ;;  %v3408_v10 = vand.u32 4294901760, %v3407_v45 }
 0x1c2   :  { %3379 = vmatpush.msrb.mxu3 %v3378_v15  ;;  %3128 = vmatpush.msra.mxu1 %v3127_v50  ;;  %v16877_v15 = vand.u32 4294901760, %v11634_v62  ;;  %v3396_v50 = vand.u32 4294901760, %v3395_v7  ;;  %v11942_v36 = vsub.f32 %v8820_v59, %v11910_v22  ;;  %v8816_v62 = vld [vmem:[%s16505_s1 + $0x490] sm:$0xff]  ;;  %v16878_v59 = vand.u32 4294901760, %v11639_v47 }
 0x1c3   :  { %3246 = vmatpush.msrb.mxu0 %v3059_v6  ;;  %3338 = vmatpush.msrb.mxu2 %v11797_v12  ;;  %v8794_v6 = vld [vmem:[%s16506_s0 + $0x40] sm:$0xff]  ;;  %v3402_v7 = vand.u32 4294901760, %v3401_v30  ;;  %v16879_v47 = vand.u32 4294901760, %v11655_v56  ;;  %v3414_v45 = vand.u32 4294901760, %v3413_v46 }
 0x1c4   :  { %3297 = vmatpush.msrb.mxu1 %v11537_v60  ;;  %3385 = vmatpush.msrb.mxu3 %v3384_v26  ;;  %v16614_v60 = vand.u32 4294901760, %v11908_v20  ;;  %v16615_v26 = vand.u32 4294901760, %v11915_v42  ;;  %v11962_v54 = vand.u32 4294901760, %v8794_v6  ;;  %v3430_v30 = vand.u32 4294901760, %v11942_v36  ;;  %v8814_v46 = vld [vmem:[%s16505_s1 + $0x480] sm:$0xff] }
 0x1c5   :  { %3250 = vmatpush.msrb.mxu0 %v16877_v15  ;;  %3340 = vmatpush.msrb.mxu2 %v11812_v39  ;;  %v11958_v15 = vsub.f32 %v8819_v25, %v11925_v2 }
 0x1c6   :  { %3299 = vmatpush.msrb.mxu1 %v11547_v32  ;;  %3391 = vmatpush.msrb.mxu3 %v3390_v55  ;;  %v11960_v32 = vand.u32 4294901760, %v8817_v3  ;;  %v8815_v55 = vld [vmem:[%s16505_s1 + $0x488] sm:$0xff]  ;;  %v3419_v25 = vsub.f32 %v11908_v20, %v16614_v60  ;;  %v3425_v56 = vsub.f32 %v11915_v42, %v16615_v26  ;;  %v11992_v60 = vsub.f32 %v8794_v6, %v11962_v54 }
 0x1c7   :  { %3254 = vmatpush.msrb.mxu0 %v16878_v59  ;;  %3342 = vmatpush.msrb.mxu2 %v11828_v49  ;;  %v11976_v59 = vsub.f32 %v8818_v5, %v11944_v24  ;;  %v12012_v26 = vand.u32 4294901760, %v8814_v46 }
 0x1c8   :  { %3301 = vmatpush.msrb.mxu1 %v11557_v40  ;;  %3397 = vmatpush.msrb.mxu3 %v3396_v50  ;;  %v11978_v40 = vand.u32 4294901760, %v8816_v62  ;;  %v16880_v50 = vand.u32 4294901760, %v11682_v21  ;;  %v11989_v5 = vsub.f32 %v8817_v3, %v11960_v32  ;;  %v16881_v21 = vand.u32 4294901760, %v11697_v63 }
 0x1c9   :  { %3258 = vmatpush.msrb.mxu0 %v16879_v47  ;;  %3344 = vmatpush.msrb.mxu2 %v11837_v58  ;;  %v3436_v47 = vand.u32 4294901760, %v11958_v15  ;;  %v3431_v3 = vsub.f32 %v11942_v36, %v3430_v30  ;;  %v3442_v6 = vand.u32 4294901760, %v11976_v59  ;;  %v16882_v63 = vand.u32 4294901760, %v11712_v41 }
 0x1ca   :  { %3303 = vmatpush.msrb.mxu1 %v11570_v17  ;;  %3403 = vmatpush.msrb.mxu3 %v3402_v7  ;;  %v11994_v17 = vand.u32 4294901760, %v8815_v55  ;;  %v3420_v7 = vand.u32 4294901760, %v3419_v25  ;;  %v3448_v25 = vand.u32 4294901760, %v11989_v5 }
 0x1cb   :  { %3262 = vmatpush.msrb.mxu0 %v16880_v50  ;;  %3346 = vmatpush.msrb.mxu2 %v11849_v4  ;;  %v12008_v50 = vsub.f32 %v8816_v62, %v11978_v40  ;;  %v3026_v62 = vand.u32 4294901760, %v11992_v60  ;;  %v3432_v41 = vand.u32 4294901760, %v3431_v3 }
 0x1cc   :  { %3305 = vmatpush.msrb.mxu1 %v11583_v37  ;;  %3409 = vmatpush.msrb.mxu3 %v3408_v10  ;;  %v3426_v37 = vand.u32 4294901760, %v3425_v56  ;;  %v3437_v10 = vsub.f32 %v11958_v15, %v3436_v47  ;;  %v3449_v3 = vsub.f32 %v11989_v5, %v3448_v25 }
 0x1cd   :  { %3266 = vmatpush.msrb.mxu0 %v16881_v21  ;;  %3348 = vmatpush.msrb.mxu2 %v11878_v33  ;;  %v12022_v21 = vsub.f32 %v8815_v55, %v11994_v17  ;;  %v3454_v56 = vand.u32 4294901760, %v12008_v50  ;;  %v12035_v55 = vsub.f32 %v8814_v46, %v12012_v26 }
 0x1ce   :  { %3307 = vmatpush.msrb.mxu1 %v11596_v19  ;;  %3415 = vmatpush.msrb.mxu3 %v3414_v45  ;;  %v16883_v19 = vand.u32 4294901760, %v11727_v18  ;;  %v3443_v45 = vsub.f32 %v11976_v59, %v3442_v6  ;;  %v16884_v18 = vand.u32 4294901760, %v11742_v34 }
 0x1cf   :  { %3270 = vmatpush.msrb.mxu0 %v16882_v63  ;;  %3350 = vmatpush.msrb.mxu2 %v11884_v1  ;;  %v3460_v46 = vand.u32 4294901760, %v12022_v21  ;;  %v3455_v63 = vsub.f32 %v12008_v50, %v3454_v56 }
 0x1d0   :  { %3309 = vmatpush.msrb.mxu1 %v11608_v8  ;;  %3421 = vmatpush.msrb.mxu3 %v3420_v7  ;;  %v8795_v8 = vld [vmem:[%s16506_s0 + $0x48] sm:$0xff]  ;;  %v3438_v7 = vand.u32 4294901760, %v3437_v10  ;;  %v3444_v34 = vand.u32 4294901760, %v3443_v45 }
 0x1d1   :  { %3274 = vmatpush.msrb.mxu0 %v16883_v19  ;;  %3352 = vmatpush.msrb.mxu2 %v11910_v22  ;;  %v12056_v10 = vand.u32 4294901760, %v8795_v8  ;;  %v3466_v19 = vand.u32 4294901760, %v12035_v55  ;;  %v3461_v45 = vsub.f32 %v12022_v21, %v3460_v46 }
 0x1d2   :  { %3311 = vmatpush.msrb.mxu1 %v11622_v35  ;;  %3427 = vmatpush.msrb.mxu3 %v3426_v37  ;;  %v3027_v35 = vsub.f32 %v11992_v60, %v3026_v62  ;;  %v16885_v37 = vand.u32 4294901760, %v11755_v9 }
 0x1d3   :  { %3278 = vmatpush.msrb.mxu0 %v16884_v18  ;;  %3354 = vmatpush.msrb.mxu2 %v11925_v2  ;;  %v3456_v18 = vand.u32 4294901760, %v3455_v63  ;;  %v16889_v63 = vand.u32 4294901760, %v11810_v38 }
 0x1d4   :  { %3313 = vmatpush.msrb.mxu1 %v11649_v61  ;;  %3433 = vmatpush.msrb.mxu3 %v3432_v41  ;;  %v16886_v61 = vand.u32 4294901760, %v11772_v11  ;;  %v3450_v41 = vand.u32 4294901760, %v3449_v3  ;;  %v3028_v9 = vand.u32 4294901760, %v3027_v35  ;;  %v3467_v11 = vsub.f32 %v12035_v55, %v3466_v19  ;;  %v1581_v3 = vpop.f32.mrf.mxu0 }
 0x1d5   :  { %3282 = vmatpush.msrb.mxu0 %v16885_v37  ;;  %3356 = vmatpush.msrb.mxu2 %v11944_v24  ;;  %v1682_v37 = vpop.f32.mrf.mxu1 }
 0x1d6   :  { %3315 = vmatpush.msrb.mxu1 %v11665_v23  ;;  %3439 = vmatpush.msrb.mxu3 %v3438_v7  ;;  %v16887_v23 = vand.u32 4294901760, %v11795_v53  ;;  %v12071_v7 = vsub.f32 %v8795_v8, %v12056_v10  ;;  %v3462_v53 = vand.u32 4294901760, %v3461_v45  ;;  %v3468_v8 = vand.u32 4294901760, %v3467_v11 }
 0x1d7   :  { %3286 = vmatpush.msrb.mxu0 %v16886_v61  ;;  %3358 = vmatpush.msrb.mxu2 %v11960_v32  ;;  %v1736_v61 = vpop.f32.mrf.mxu2 }
 0x1d8   :  { %3317 = vmatpush.msrb.mxu1 %v11679_v29  ;;  %3445 = vmatpush.msrb.mxu3 %v3444_v34  ;;  %v9076_v29 = vld [vmem:[%s16507_s2 + $0x1] ss:$0 sm:$0xff] }
 0x1d9   :  { %3290 = vmatpush.msrb.mxu0 %v16887_v23  ;;  %3360 = vmatpush.msrb.mxu2 %v11978_v40  ;;  %v1582_v35 = vadd.f32 %v9076_v29, %v1581_v3  ;;  %v8839_v29 = vld [vmem:[%s16505_s1 + $0x548] sm:$0xff]  ;;  %v8838_v3 = vld [vmem:[%s16505_s1 + $0x540] sm:$0xff] }
 0x1da   :  { %3319 = vmatpush.msrb.mxu1 %v11694_v31  ;;  %3451 = vmatpush.msrb.mxu3 %v3450_v41  ;;  %v3367_v31 = vand.u32 4294901760, %v12071_v7 }
 0x1db   :  { %3029 = vmatmul.f32.vlgmr.msra.gmra.mxu0 %v3028_v9  ;;  %3362 = vmatpush.msrb.mxu2 %v11994_v17 }
 0x1dc   :  { %3477 = vmatpush.msra.mxu0 %v11787_v27  ;;  %3321 = vmatpush.msrb.mxu1 %v11708_v16  ;;  %v16888_v16 = vand.u32 4294901760, %v11787_v27  ;;  %v3368_v34 = vsub.f32 %v12071_v7, %v3367_v31  ;;  %v16890_v27 = vand.u32 4294901760, %v11826_v28 }
 0x1dd   :  { %3457 = vmatpush.msrb.mxu3 %v3456_v18  ;;  %3364 = vmatpush.msrb.mxu2 %v12012_v26 }
 0x1de   :  { %3480 = vmatpush.msra.mxu0 %v11810_v38  ;;  %3323 = vmatpush.msrb.mxu1 %v11723_v57  ;;  %v1683_v57 = vadd.f32 %v1682_v37, %v1582_v35  ;;  %v1775_v38 = vpop.f32.mrf.mxu3 }
 0x1df   :  { %3463 = vmatpush.msrb.mxu3 %v3462_v53  ;;  %3184 = vmatmul.f32.vlgmr.msra.gmra.mxu2 %v11992_v60 }
 0x1e0   :  { %3483 = vmatpush.msra.mxu0 %v11826_v28  ;;  %3571 = vmatpush.msra.mxu2 %v16888_v16  ;;  %v1737_v60 = vadd.f32 %v1736_v61, %v1683_v57  ;;  %v8836_v57 = vld [vmem:[%s16505_s1 + $0x530] sm:$0xff] }
 0x1e1   :  { %3325 = vmatpush.msrb.mxu1 %v11738_v0  ;;  %3469 = vmatpush.msrb.mxu3 %v3468_v8  ;;  %v3369_v0 = vand.u32 4294901760, %v3368_v34  ;;  %v12231_v8 = vand.u32 4294901760, %v8839_v29 }
 0x1e2   :  { %3486 = vmatpush.msra.mxu0 %v11843_v48  ;;  %3223 = vmatmul.f32.vlgmr.msra.gmra.mxu3 %v3026_v62  ;;  %v1776_v28 = vadd.f32 %v1775_v38, %v1737_v60  ;;  %v1844_v62 = vpop.f32.mrf.mxu0 }
 0x1e3   :  { %3575 = vmatpush.msra.mxu2 %v16889_v63  ;;  %3638 = vmatpush.msra.mxu3 %v11757_v51 }
 0x1e4   :  { %3327 = vmatpush.msrb.mxu1 %v11764_v13  ;;  %3489 = vmatpush.msra.mxu0 %v11862_v14  ;;  %v16891_v13 = vand.u32 4294901760, %v11843_v48  ;;  %v16893_v48 = vand.u32 4294901760, %v11869_v43 }
 0x1e5   :  { %3130 = vmatmul.f32.vlgmr.msra.gmra.mxu1 %v11962_v54  ;;  %3579 = vmatpush.msra.mxu2 %v16890_v27 }
 0x1e6   :  { %3530 = vmatpush.msra.mxu1 %v11757_v51  ;;  %3640 = vmatpush.msra.mxu3 %v11779_v44  ;;  %v16892_v51 = vand.u32 4294901760, %v11862_v14  ;;  %v16894_v14 = vand.u32 4294901760, %v11882_v52 }
 0x1e7   :  { %3492 = vmatpush.msra.mxu0 %v11869_v43  ;;  %3583 = vmatpush.msra.mxu2 %v16891_v13  ;;  %v8835_v13 = vld [vmem:[%s16505_s1 + $0x528] sm:$0xff] }
 0x1e8   :  { %3532 = vmatpush.msra.mxu1 %v11779_v44  ;;  %3642 = vmatpush.msra.mxu3 %v11797_v12  ;;  %v1845_v44 = vadd.f32 %v1844_v62, %v1776_v28 }
 0x1e9   :  { %3370 = vmatmul.f32.vlgmr.msrb.gmra.mxu2 %v3369_v0  ;;  %3495 = vmatpush.msra.mxu0 %v11882_v52  ;;  %v16896_v52 = vand.u32 4294901760, %v11915_v42 }
 0x1ea   :  { %3534 = vmatpush.msra.mxu1 %v11797_v12  ;;  %3587 = vmatpush.msra.mxu2 %v16892_v51  ;;  %v1881_v12 = vpop.f32.mrf.mxu1 }
 0x1eb   :  { %3644 = vmatpush.msra.mxu3 %v11812_v39  ;;  %3292 = vmatmul.f32.vlgmr.msrb.gmra.mxu0 %v11962_v54  ;;  %v1882_v43 = vadd.f32 %v1881_v12, %v1845_v44  ;;  %v8834_v12 = vld [vmem:[%s16505_s1 + $0x520] sm:$0xff] }
 0x1ec   :  { %3471 = vmatmul.f32.vlgmr.msrb.gmra.mxu3 %v12056_v10  ;;  %3498 = vmatpush.msra.mxu0 %v11908_v20 }
 0x1ed   :  { %3536 = vmatpush.msra.mxu1 %v11812_v39  ;;  %3591 = vmatpush.msra.mxu2 %v16893_v48  ;;  %v16895_v39 = vand.u32 4294901760, %v11908_v20  ;;  %v12278_v48 = vand.u32 4294901760, %v8836_v57 }
 0x1ee   :  { %3646 = vmatpush.msra.mxu3 %v11828_v49  ;;  %3329 = vmatmul.f32.vlgmr.msrb.gmra.mxu1 %v11962_v54  ;;  %v1922_v54 = vpop.f32.mrf.mxu2 }
 0x1ef   :  { %3501 = vmatpush.msra.mxu0 %v11915_v42  ;;  %3538 = vmatpush.msra.mxu1 %v11828_v49  ;;  %v8845_v49 = vld [vmem:[%s16505_s1 + $0x578] sm:$0xff]  ;;  %v1923_v41 = vadd.f32 %v1922_v54, %v1882_v43  ;;  %v8843_v42 = vld [vmem:[%s16505_s1 + $0x568] sm:$0xff] }
 0x1f0   :  { %3595 = vmatpush.msra.mxu2 %v16894_v14  ;;  %3648 = vmatpush.msra.mxu3 %v11837_v58  ;;  %v12152_v20 = vand.u32 4294901760, %v8845_v49 }
 0x1f1   :  { %3504 = vmatpush.msra.mxu0 %v11942_v36  ;;  %3540 = vmatpush.msra.mxu1 %v11837_v58  ;;  %v8844_v58 = vld [vmem:[%s16505_s1 + $0x570] sm:$0xff]  ;;  %v8842_v36 = vld [vmem:[%s16505_s1 + $0x560] sm:$0xff] }
 0x1f2   :  { %3599 = vmatpush.msra.mxu2 %v16895_v39  ;;  %3650 = vmatpush.msra.mxu3 %v11849_v4  ;;  %v2116_v45 = vpop.f32.mrf.mxu1  ;;  %v12293_v39 = vand.u32 4294901760, %v8835_v13 }
 0x1f3   :  { %3507 = vmatpush.msra.mxu0 %v11958_v15  ;;  %3542 = vmatpush.msra.mxu1 %v11849_v4  ;;  %v2023_v4 = vpop.f32.mrf.mxu3  ;;  %v12175_v15 = vsub.f32 %v8845_v49, %v12152_v20 }
 0x1f4   :  { %3603 = vmatpush.msra.mxu2 %v16896_v52  ;;  %3652 = vmatpush.msra.mxu3 %v11878_v33  ;;  %v2024_v9 = vadd.f32 %v2023_v4, %v1923_v41  ;;  %v8833_v52 = vld [vmem:[%s16505_s1 + $0x518] sm:$0xff] }
 0x1f5   :  { %3510 = vmatpush.msra.mxu0 %v11976_v59  ;;  %3544 = vmatpush.msra.mxu1 %v11878_v33  ;;  %v12162_v33 = vand.u32 4294901760, %v8844_v58 }
 0x1f6   :  { %3607 = vmatpush.msra.mxu2 %v3430_v30  ;;  %3654 = vmatpush.msra.mxu3 %v11884_v1  ;;  %v2077_v30 = vpop.f32.mrf.mxu0 }
 0x1f7   :  { %3513 = vmatpush.msra.mxu0 %v11989_v5  ;;  %3546 = vmatpush.msra.mxu1 %v11884_v1  ;;  %v12172_v1 = vand.u32 4294901760, %v8843_v42  ;;  %v12188_v59 = vsub.f32 %v8844_v58, %v12162_v33  ;;  %v2078_v23 = vadd.f32 %v2077_v30, %v2024_v9 }
 0x1f8   :  { %3611 = vmatpush.msra.mxu2 %v3436_v47  ;;  %3656 = vmatpush.msra.mxu3 %v11910_v22  ;;  %v8841_v47 = vld [vmem:[%s16505_s1 + $0x558] sm:$0xff] }
 0x1f9   :  { %3516 = vmatpush.msra.mxu0 %v12008_v50  ;;  %3548 = vmatpush.msra.mxu1 %v11910_v22  ;;  %v12185_v22 = vand.u32 4294901760, %v8842_v36  ;;  %v12195_v18 = vand.u32 4294901760, %v8841_v47  ;;  %v12202_v5 = vsub.f32 %v8843_v42, %v12172_v1  ;;  %v3723_v50 = vand.u32 4294901760, %v12188_v59 }
 0x1fa   :  { %3615 = vmatpush.msra.mxu2 %v3442_v6  ;;  %3658 = vmatpush.msra.mxu3 %v11925_v2  ;;  %v8840_v6 = vld [vmem:[%s16505_s1 + $0x550] sm:$0xff]  ;;  %v2364_v28 = vpop.f32.mrf.mxu1  ;;  %v12311_v42 = vand.u32 4294901760, %v8834_v12 }
 0x1fb   :  { %3519 = vmatpush.msra.mxu0 %v12022_v21  ;;  %3550 = vmatpush.msra.mxu1 %v11925_v2  ;;  %v3717_v2 = vand.u32 4294901760, %v12175_v15  ;;  %v12206_v11 = vand.u32 4294901760, %v8840_v6  ;;  %v12221_v53 = vsub.f32 %v8841_v47, %v12195_v18  ;;  %v3729_v21 = vand.u32 4294901760, %v12202_v5  ;;  %v2222_v37 = vpop.f32.mrf.mxu3  ;;  %v8832_v47 = vld [vmem:[%s16505_s1 + $0x510] sm:$0xff] }
 0x1fc   :  { %3619 = vmatpush.msra.mxu2 %v3448_v25  ;;  %3660 = vmatpush.msra.mxu3 %v11944_v24  ;;  %v2117_v25 = vadd.f32 %v2116_v45, %v2078_v23  ;;  %v3724_v16 = vsub.f32 %v12188_v59, %v3723_v50 }
 0x1fd   :  { %3522 = vmatpush.msra.mxu0 %v12035_v55  ;;  %3552 = vmatpush.msra.mxu1 %v11944_v24  ;;  %v2185_v24 = vpop.f32.mrf.mxu2  ;;  %v12238_v35 = vsub.f32 %v8840_v6, %v12206_v11  ;;  %v12248_v55 = vand.u32 4294901760, %v8838_v3  ;;  %v16625_v34 = vand.u32 4294901760, %v12221_v53  ;;  %v3730_v0 = vsub.f32 %v12202_v5, %v3729_v21 }
 0x1fe   :  { %3623 = vmatpush.msra.mxu2 %v3454_v56  ;;  %3662 = vmatpush.msra.mxu3 %v11960_v32  ;;  %v12215_v56 = vsub.f32 %v8842_v36, %v12185_v22  ;;  %v2263_v63 = vpop.f32.mrf.mxu0  ;;  %v3725_v51 = vand.u32 4294901760, %v3724_v16  ;;  %v12315_v36 = vsub.f32 %v8836_v57, %v12278_v48  ;;  %v12328_v6 = vand.u32 4294901760, %v8833_v52  ;;  %v8831_v16 = vld [vmem:[%s16505_s1 + $0x508] sm:$0xff] }
 0x1ff   :  { %3525 = vmatmul.f32.vlgmr.msra.gmra.mxu0 %v12071_v7  ;;  %3554 = vmatpush.msra.mxu1 %v11960_v32  ;;  %v3718_v32 = vsub.f32 %v12175_v15, %v3717_v2  ;;  %v16623_v38 = vand.u32 4294901760, %v12238_v35  ;;  %v3731_v14 = vand.u32 4294901760, %v3730_v0 }
 0x200   :  { %3675 = vmatpush.msrb.mxu0 %v12152_v20  ;;  %3627 = vmatpush.msra.mxu2 %v3460_v46  ;;  %v2186_v46 = vadd.f32 %v2185_v24, %v2117_v25  ;;  %v12332_v25 = vsub.f32 %v8835_v13, %v12293_v39  ;;  %v12360_v13 = vsub.f32 %v8833_v52, %v12328_v6 }
 0x201   :  { %3664 = vmatpush.msra.mxu3 %v11978_v40  ;;  %3556 = vmatpush.msra.mxu1 %v11978_v40  ;;  %v8837_v40 = vld [vmem:[%s16505_s1 + $0x538] sm:$0xff]  ;;  %v3719_v61 = vand.u32 4294901760, %v3718_v32  ;;  %v3748_v54 = vsub.f32 %v12238_v35, %v16623_v38 }
 0x202   :  { %3677 = vmatpush.msrb.mxu0 %v12162_v33  ;;  %3631 = vmatpush.msra.mxu2 %v3466_v19  ;;  %v16627_v19 = vand.u32 4294901760, %v12215_v56  ;;  %v12262_v27 = vand.u32 4294901760, %v8837_v40  ;;  %v2223_v60 = vadd.f32 %v2222_v37, %v2186_v46  ;;  %v12340_v46 = vand.u32 4294901760, %v8832_v47 }
 0x203   :  { %3666 = vmatpush.msra.mxu3 %v11994_v17  ;;  %3633 = vmatmul.f32.vlgmr.msra.gmra.mxu2 %v12056_v10  ;;  %v3749_v24 = vand.u32 4294901760, %v3748_v54  ;;  %v12344_v37 = vsub.f32 %v8834_v12, %v12311_v42  ;;  %v2563_v54 = vpop.f32.mrf.mxu1 }
 0x204   :  { %3679 = vmatpush.msrb.mxu0 %v12172_v1  ;;  %3818 = vmatpush.msrb.mxu2 %v12175_v15  ;;  %v3736_v62 = vsub.f32 %v12215_v56, %v16627_v19  ;;  %v2264_v44 = vadd.f32 %v2263_v63, %v2223_v60  ;;  %v12297_v7 = vsub.f32 %v8837_v40, %v12262_v27  ;;  %v16618_v40 = vand.u32 4294901760, %v12315_v36  ;;  %v8855_v19 = vld [vmem:[%s16505_s1 + $0x5c8] sm:$0xff] }
 0x205   :  { %3558 = vmatpush.msra.mxu1 %v11994_v17  ;;  %3668 = vmatpush.msra.mxu3 %v12012_v26  ;;  %v12265_v17 = vsub.f32 %v8839_v29, %v12231_v8  ;;  %v2418_v58 = vpop.f32.mrf.mxu2  ;;  %v16617_v60 = vand.u32 4294901760, %v12332_v25 }
 0x206   :  { %3681 = vmatpush.msrb.mxu0 %v12185_v22  ;;  %3670 = vmatmul.f32.vlgmr.msra.gmra.mxu3 %v12056_v10  ;;  %v12281_v10 = vsub.f32 %v8838_v3, %v12248_v55  ;;  %v2365_v49 = vadd.f32 %v2364_v28, %v2264_v44  ;;  %v3737_v41 = vand.u32 4294901760, %v3736_v62  ;;  %v16620_v23 = vand.u32 4294901760, %v12297_v7  ;;  %v2457_v3 = vpop.f32.mrf.mxu3  ;;  %v2526_v63 = vpop.f32.mrf.mxu0  ;;  %v8861_v28 = vld [vmem:[%s16505_s1 + $0x5f8] sm:$0xff]  ;;  %v8830_v44 = vld [vmem:[%s16505_s1 + $0x500] sm:$0xff] }
 0x207   :  { %3821 = vmatpush.msrb.mxu2 %v12188_v59  ;;  %3871 = vmatpush.msrb.mxu3 %v12152_v20  ;;  %v16622_v43 = vand.u32 4294901760, %v12265_v17  ;;  %v12367_v62 = vand.u32 4294901760, %v8831_v16  ;;  %v3772_v12 = vsub.f32 %v12315_v36, %v16618_v40 }
 0x208   :  { %3560 = vmatpush.msra.mxu1 %v12012_v26  ;;  %3683 = vmatpush.msrb.mxu0 %v12195_v18  ;;  %v3742_v26 = vsub.f32 %v12221_v53, %v16625_v34  ;;  %v16621_v4 = vand.u32 4294901760, %v12281_v10  ;;  %v2419_v29 = vadd.f32 %v2418_v58, %v2365_v49  ;;  %v3766_v0 = vsub.f32 %v12297_v7, %v16620_v23 }
 0x209   :  { %3564 = vmatmul.f32.vlgmr.msra.gmra.mxu1 %v3367_v31  ;;  %3824 = vmatpush.msrb.mxu2 %v12202_v5  ;;  %v8796_v31 = vld [vmem:[%s16506_s0 + $0x50] sm:$0xff]  ;;  %v3754_v45 = vsub.f32 %v12265_v17, %v16622_v43  ;;  %v12383_v58 = vand.u32 4294901760, %v8861_v28 }
 0x20a   :  { %3720 = vmatpush.msrb.mxu1 %v3719_v61  ;;  %3873 = vmatpush.msrb.mxu3 %v12162_v33  ;;  %v3743_v30 = vand.u32 4294901760, %v3742_v26  ;;  %v12322_v9 = vand.u32 4294901760, %v8796_v31  ;;  %v3760_v32 = vsub.f32 %v12281_v10, %v16621_v4 }
 0x20b   :  { %3685 = vmatpush.msrb.mxu0 %v12206_v11  ;;  %3827 = vmatpush.msrb.mxu2 %v12215_v56  ;;  %v3755_v61 = vand.u32 4294901760, %v3754_v45  ;;  %v16619_v45 = vand.u32 4294901760, %v12360_v13 }
 0x20c   :  { %3726 = vmatpush.msrb.mxu1 %v3725_v51  ;;  %3875 = vmatpush.msrb.mxu3 %v12172_v1  ;;  %v12352_v57 = vsub.f32 %v8796_v31, %v12322_v9  ;;  %v2458_v51 = vadd.f32 %v2457_v3, %v2419_v29  ;;  %v3761_v26 = vand.u32 4294901760, %v3760_v32  ;;  %v12378_v31 = vsub.f32 %v8832_v47, %v12340_v46  ;;  %v8860_v29 = vld [vmem:[%s16505_s1 + $0x5f0] sm:$0xff] }
 0x20d   :  { %3687 = vmatpush.msrb.mxu0 %v12231_v8  ;;  %3830 = vmatpush.msrb.mxu2 %v12221_v53  ;;  %v12389_v47 = vand.u32 4294901760, %v8830_v44  ;;  %v3773_v32 = vand.u32 4294901760, %v3772_v12  ;;  %v12416_v12 = vand.u32 4294901760, %v8860_v29 }
 0x20e   :  { %3732 = vmatpush.msrb.mxu1 %v3731_v14  ;;  %3877 = vmatpush.msrb.mxu3 %v12185_v22  ;;  %v16616_v14 = vand.u32 4294901760, %v12344_v37  ;;  %v2527_v49 = vadd.f32 %v2526_v63, %v2458_v51  ;;  %v16626_v52 = vand.u32 4294901760, %v12352_v57  ;;  %v2604_v51 = vpop.f32.mrf.mxu2  ;;  %v2705_v4 = vpop.f32.mrf.mxu3 }
 0x20f   :  { %3689 = vmatpush.msrb.mxu0 %v12248_v55  ;;  %3833 = vmatpush.msrb.mxu2 %v12238_v35  ;;  %16897 = vst [vmem:[#allocation3_spill] sm:$0xff] %v12389_v47 }
 0x210   :  { %3738 = vmatpush.msrb.mxu1 %v3737_v41  ;;  %3879 = vmatpush.msrb.mxu3 %v12195_v18  ;;  %v3767_v41 = vand.u32 4294901760, %v3766_v0  ;;  %v2564_v3 = vadd.f32 %v2563_v54, %v2527_v49  ;;  %v3784_v63 = vsub.f32 %v12344_v37, %v16616_v14  ;;  %v8859_v0 = vld [vmem:[%s16505_s1 + $0x5e8] sm:$0xff]  ;;  %v8858_v49 = vld [vmem:[%s16505_s1 + $0x5e0] sm:$0xff]  ;;  %v3790_v14 = vsub.f32 %v12360_v13, %v16619_v45 }
 0x211   :  { %3691 = vmatpush.msrb.mxu0 %v12262_v27  ;;  %3836 = vmatpush.msrb.mxu2 %v12265_v17  ;;  %v12431_v40 = vand.u32 4294901760, %v8859_v0  ;;  %v12440_v23 = vand.u32 4294901760, %v8858_v49 }
 0x212   :  { %3744 = vmatpush.msrb.mxu1 %v3743_v30  ;;  %3881 = vmatpush.msrb.mxu3 %v12206_v11  ;;  %v3778_v30 = vsub.f32 %v12332_v25, %v16617_v60  ;;  %v12426_v60 = vsub.f32 %v8830_v44, %v12389_v47  ;;  %v3785_v45 = vand.u32 4294901760, %v3784_v63 }
 0x213   :  { %3693 = vmatpush.msrb.mxu0 %v12278_v48  ;;  %3839 = vmatpush.msrb.mxu2 %v12281_v10 }
 0x214   :  { %3750 = vmatpush.msrb.mxu1 %v3749_v24  ;;  %3883 = vmatpush.msrb.mxu3 %v12231_v8  ;;  %v12398_v24 = vsub.f32 %v8831_v16, %v12367_v62  ;;  %v3709_v16 = vsub.f32 %v12352_v57, %v16626_v52  ;;  %v3779_v54 = vand.u32 4294901760, %v3778_v30  ;;  %v2605_v30 = vadd.f32 %v2604_v51, %v2564_v3 }
 0x215   :  { %3695 = vmatpush.msrb.mxu0 %v12293_v39  ;;  %3842 = vmatpush.msrb.mxu2 %v12297_v7  ;;  %v12446_v3 = vsub.f32 %v8860_v29, %v12416_v12  ;;  %v16630_v63 = vand.u32 4294901760, %v12426_v60  ;;  %v12465_v52 = vsub.f32 %v8858_v49, %v12440_v23 }
 0x216   :  { %3756 = vmatpush.msrb.mxu1 %v3755_v61  ;;  %3885 = vmatpush.msrb.mxu3 %v12248_v55  ;;  %v16624_v61 = vand.u32 4294901760, %v12378_v31  ;;  %v3710_v43 = vand.u32 4294901760, %v3709_v16  ;;  %v2759_v16 = vpop.f32.mrf.mxu0 }
 0x217   :  { %3697 = vmatpush.msrb.mxu0 %v12311_v42  ;;  %3845 = vmatpush.msrb.mxu2 %v12315_v36 }
 0x218   :  { %3762 = vmatpush.msrb.mxu1 %v3761_v26  ;;  %3887 = vmatpush.msrb.mxu3 %v12262_v27  ;;  %v12414_v26 = vsub.f32 %v8861_v28, %v12383_v58  ;;  %v16629_v28 = vand.u32 4294901760, %v12398_v24  ;;  %v3796_v44 = vsub.f32 %v12378_v31, %v16624_v61  ;;  %v8856_v61 = vld [vmem:[%s16505_s1 + $0x5d0] sm:$0xff] }
 0x219   :  { %3699 = vmatpush.msrb.mxu0 %v12328_v6  ;;  %3848 = vmatpush.msrb.mxu2 %v12332_v25 }
 0x21a   :  { %3768 = vmatpush.msrb.mxu1 %v3767_v41  ;;  %3889 = vmatpush.msrb.mxu3 %v12278_v48  ;;  %v8857_v41 = vld [vmem:[%s16505_s1 + $0x5d8] sm:$0xff]  ;;  %v16628_v38 = vand.u32 4294901760, %v12414_v26  ;;  %v3802_v29 = vsub.f32 %v12398_v24, %v16629_v28  ;;  %v3797_v34 = vand.u32 4294901760, %v3796_v44  ;;  %v3808_v44 = vsub.f32 %v12426_v60, %v16630_v63  ;;  %v8852_v63 = vld [vmem:[%s16505_s1 + $0x5b0] sm:$0xff] }
 0x21b   :  { %3701 = vmatpush.msrb.mxu0 %v12340_v46  ;;  %3851 = vmatpush.msrb.mxu2 %v12344_v37  ;;  %v12450_v51 = vand.u32 4294901760, %v8857_v41 }
 0x21c   :  { %3774 = vmatpush.msrb.mxu1 %v3773_v32  ;;  %3891 = vmatpush.msrb.mxu3 %v12293_v39  ;;  %v3791_v32 = vand.u32 4294901760, %v3790_v14  ;;  %v2706_v14 = vadd.f32 %v2705_v4, %v2605_v30  ;;  %v16631_v4 = vand.u32 4294901760, %v12446_v3  ;;  %v12475_v30 = vand.u32 4294901760, %v8856_v61 }
 0x21d   :  { %3703 = vmatpush.msrb.mxu0 %v12367_v62  ;;  %3854 = vmatpush.msrb.mxu2 %v12360_v13  ;;  %v3803_v28 = vand.u32 4294901760, %v3802_v29 }
 0x21e   :  { %3780 = vmatpush.msrb.mxu1 %v3779_v54  ;;  %3893 = vmatpush.msrb.mxu3 %v12311_v42  ;;  %v12461_v54 = vsub.f32 %v8859_v0, %v12431_v40  ;;  %v4059_v0 = vsub.f32 %v12414_v26, %v16628_v38  ;;  %v2760_v49 = vadd.f32 %v2759_v16, %v2706_v14  ;;  %v8854_v38 = vld [vmem:[%s16505_s1 + $0x5c0] sm:$0xff]  ;;  %v8853_v16 = vld [vmem:[%s16505_s1 + $0x5b8] sm:$0xff] }
 0x21f   :  { %3705 = vmatpush.msrb.mxu0 %v12389_v47  ;;  %3857 = vmatpush.msrb.mxu2 %v12378_v31  ;;  %v4065_v29 = vsub.f32 %v12446_v3, %v16631_v4  ;;  %v12505_v59 = vsub.f32 %v8856_v61, %v12475_v30  ;;  %v12523_v5 = vand.u32 4294901760, %v8853_v16 }
 0x220   :  { %3786 = vmatpush.msrb.mxu1 %v3785_v45  ;;  %3895 = vmatpush.msrb.mxu3 %v12328_v6  ;;  %v2798_v45 = vpop.f32.mrf.mxu1  ;;  %v16632_v15 = vand.u32 4294901760, %v12461_v54  ;;  %v2867_v14 = vpop.f32.mrf.mxu2 }
 0x221   :  { %3711 = vmatmul.f32.vlgmr.msrb.gmra.mxu0 %v3710_v43  ;;  %v12483_v43 = vsub.f32 %v8857_v41, %v12450_v51  ;;  %3860 = vmatpush.msrb.mxu2 %v12398_v24  ;;  %v16634_v41 = vand.u32 4294901760, %v12465_v52 }
 0x222   :  { %3912 = vmatpush.msra.mxu0 %v3717_v2  ;;  %3792 = vmatpush.msrb.mxu1 %v3791_v32  ;;  %v12491_v2 = vand.u32 4294901760, %v8855_v19  ;;  %v2799_v32 = vadd.f32 %v2798_v45, %v2760_v49  ;;  %v3809_v45 = vand.u32 4294901760, %v3808_v44  ;;  %v4071_v61 = vsub.f32 %v12461_v54, %v16632_v15 }
 0x223   :  { %3897 = vmatpush.msrb.mxu3 %v12340_v46  ;;  %3863 = vmatpush.msrb.mxu2 %v12426_v60  ;;  %v4077_v44 = vsub.f32 %v12465_v52, %v16634_v41  ;;  %v16899_v15 = vand.u32 4294901760, %v12352_v57  ;;  %v2904_v49 = vpop.f32.mrf.mxu3  ;;  %v12554_v41 = vsub.f32 %v8853_v16, %v12523_v5  ;;  %v16902_v16 = vand.u32 4294901760, %v12238_v35 }
 0x224   :  { %3916 = vmatpush.msra.mxu0 %v3723_v50  ;;  %3798 = vmatpush.msrb.mxu1 %v3797_v34  ;;  %v12507_v50 = vand.u32 4294901760, %v8854_v38  ;;  %v4060_v34 = vand.u32 4294901760, %v4059_v0  ;;  %v12521_v4 = vsub.f32 %v8855_v19, %v12491_v2  ;;  %v2868_v0 = vadd.f32 %v2867_v14, %v2799_v32 }
 0x225   :  { %3899 = vmatpush.msrb.mxu3 %v12367_v62  ;;  %3866 = vmatmul.f32.vlgmr.msrb.gmra.mxu2 %v12352_v57  ;;  %v4066_v19 = vand.u32 4294901760, %v4065_v29  ;;  %v12541_v32 = vand.u32 4294901760, %v8852_v63  ;;  %v16900_v14 = vand.u32 4294901760, %v12483_v43  ;;  %v8850_v57 = vld [vmem:[%s16505_s1 + $0x5a0] sm:$0xff]  ;;  %v4072_v29 = vand.u32 4294901760, %v4071_v61 }
 0x226   :  { %3920 = vmatpush.msra.mxu0 %v3729_v21  ;;  %4016 = vmatpush.msra.mxu2 %v12383_v58  ;;  %v16898_v21 = vand.u32 4294901760, %v12215_v56  ;;  %v12539_v56 = vsub.f32 %v8854_v38, %v12507_v50  ;;  %v16635_v38 = vand.u32 4294901760, %v12521_v4  ;;  %v16903_v61 = vand.u32 4294901760, %v12505_v59 }
 0x227   :  { %3804 = vmatpush.msrb.mxu1 %v3803_v28  ;;  %3901 = vmatpush.msrb.mxu3 %v12389_v47  ;;  %v8851_v28 = vld [vmem:[%s16505_s1 + $0x5a8] sm:$0xff]  ;;  %v9077_v47 = vld [vmem:[%s16508_s3 + $0x1] ss:$0 sm:$0xff]  ;;  %v16904_v35 = vand.u32 4294901760, %v12265_v17 }
 0x228   :  { %3924 = vmatpush.msra.mxu0 %v16898_v21  ;;  %3905 = vmatmul.f32.vlgmr.msrb.gmra.mxu3 %v16899_v15  ;;  %v4083_v21 = vsub.f32 %v12483_v43, %v16900_v14  ;;  %v16901_v15 = vand.u32 4294901760, %v12221_v53  ;;  %v2905_v14 = vadd.f32 %v2904_v49, %v2868_v0  ;;  %v8849_v53 = vld [vmem:[%s16505_s1 + $0x598] sm:$0xff]  ;;  %v12573_v49 = vsub.f32 %v8852_v63, %v12541_v32 }
 0x229   :  { %4018 = vmatpush.msra.mxu2 %v12416_v12  ;;  %4061 = vmatpush.msra.mxu3 %v4060_v34  ;;  %v12556_v34 = vand.u32 4294901760, %v8851_v28  ;;  %v12575_v0 = vand.u32 4294901760, %v8850_v57 }
 0x22a   :  { %3810 = vmatpush.msrb.mxu1 %v3809_v45  ;;  %3928 = vmatpush.msra.mxu0 %v16901_v15  ;;  %v4078_v45 = vand.u32 4294901760, %v4077_v44  ;;  %v16637_v15 = vand.u32 4294901760, %v12539_v56  ;;  %v4084_v44 = vand.u32 4294901760, %v4083_v21  ;;  %v2912_v17 = vmul.f32 %v9077_v47, %v2905_v14  ;;  %v8797_v47 = vld [vmem:[%s16506_s0 + $0x58] sm:$0xff] }
 0x22b   :  { %3812 = vmatmul.f32.vlgmr.msrb.gmra.mxu1 %v12322_v9  ;;  %4020 = vmatpush.msra.mxu2 %v12431_v40  ;;  %v12586_v63 = vsub.f32 %v8851_v28, %v12556_v34  ;;  %v16905_v21 = vand.u32 4294901760, %v12281_v10 }
 0x22c   :  { %3979 = vmatpush.msra.mxu1 %v12152_v20  ;;  %4067 = vmatpush.msra.mxu3 %v4066_v19  ;;  %v4089_v20 = vsub.f32 %v12505_v59, %v16903_v61  ;;  %v4095_v19 = vsub.f32 %v12521_v4, %v16635_v38  ;;  %v12588_v61 = vand.u32 4294901760, %v8849_v53  ;;  %v4101_v28 = vsub.f32 %v12539_v56, %v16637_v15 }
 0x22d   :  { %3932 = vmatpush.msra.mxu0 %v16902_v16  ;;  %4022 = vmatpush.msra.mxu2 %v12440_v23  ;;  %v16636_v16 = vand.u32 4294901760, %v12554_v41  ;;  %v12602_v38 = vsub.f32 %v8850_v57, %v12575_v0 }
 0x22e   :  { %3981 = vmatpush.msra.mxu1 %v12162_v33  ;;  %4073 = vmatpush.msra.mxu3 %v4072_v29  ;;  %v8848_v33 = vld [vmem:[%s16505_s1 + $0x590] sm:$0xff]  ;;  %v4090_v29 = vand.u32 4294901760, %v4089_v20  ;;  %v4096_v57 = vand.u32 4294901760, %v4095_v19  ;;  %v4118_v20 = vand.u32 4294901760, %v12586_v63  ;;  %v12631_v19 = vand.u32 4294901760, %v8797_v47 }
 0x22f   :  { %3936 = vmatpush.msra.mxu0 %v16904_v35  ;;  %4024 = vmatpush.msra.mxu2 %v12450_v51  ;;  %v4112_v35 = vand.u32 4294901760, %v12573_v49  ;;  %v12612_v10 = vand.u32 4294901760, %v8848_v33  ;;  %v4107_v14 = vsub.f32 %v12554_v41, %v16636_v16  ;;  %v4124_v15 = vand.u32 4294901760, %v12602_v38 }
 0x230   :  { %3983 = vmatpush.msra.mxu1 %v12172_v1  ;;  %4079 = vmatpush.msra.mxu3 %v4078_v45  ;;  %v8847_v1 = vld [vmem:[%s16505_s1 + $0x588] sm:$0xff]  ;;  %v16906_v45 = vand.u32 4294901760, %v12297_v7  ;;  %v2913_v7 = vsel %vm1463_vm0, %v2912_v17, 0.0 }
 0x231   :  { %3940 = vmatpush.msra.mxu0 %v16905_v21  ;;  %4026 = vmatpush.msra.mxu2 %v12475_v30  ;;  %v12621_v21 = vsub.f32 %v8849_v53, %v12588_v61  ;;  %v4102_v53 = vand.u32 4294901760, %v4101_v28  ;;  %v4113_v16 = vsub.f32 %v12573_v49, %v4112_v35 }
 0x232   :  { %3985 = vmatpush.msra.mxu1 %v12185_v22  ;;  %4085 = vmatpush.msra.mxu3 %v4084_v44  ;;  %v8846_v22 = vld [vmem:[%s16505_s1 + $0x580] sm:$0xff]  ;;  %v12629_v44 = vand.u32 4294901760, %v8847_v1 }
 0x233   :  { %3944 = vmatpush.msra.mxu0 %v16906_v45  ;;  %4028 = vmatpush.msra.mxu2 %v12491_v2  ;;  %v16907_v45 = vand.u32 4294901760, %v12315_v36  ;;  %v12644_v17 = vand.u32 4294901760, %v8846_v22  ;;  %v4108_v36 = vand.u32 4294901760, %v4107_v14  ;;  %v4130_v28 = vand.u32 4294901760, %v12621_v21 }
 0x234   :  { %3987 = vmatpush.msra.mxu1 %v12195_v18  ;;  %4091 = vmatpush.msra.mxu3 %v4090_v29  ;;  %v12642_v18 = vsub.f32 %v8848_v33, %v12612_v10  ;;  %v4119_v29 = vsub.f32 %v12586_v63, %v4118_v20  ;;  %v12657_v33 = vsub.f32 %v8797_v47, %v12631_v19  ;;  %v16910_v47 = vand.u32 4294901760, %v12360_v13 }
 0x235   :  { %3948 = vmatpush.msra.mxu0 %v16907_v45  ;;  %4030 = vmatpush.msra.mxu2 %v12507_v50  ;;  %v16908_v45 = vand.u32 4294901760, %v12332_v25  ;;  %v4125_v14 = vsub.f32 %v12602_v38, %v4124_v15  ;;  %v12668_v25 = vsub.f32 %v8846_v22, %v12644_v17 }
 0x236   :  { %3989 = vmatpush.msra.mxu1 %v12206_v11  ;;  %4097 = vmatpush.msra.mxu3 %v4096_v57  ;;  %v12654_v11 = vsub.f32 %v8847_v1, %v12629_v44  ;;  %v4114_v57 = vand.u32 4294901760, %v4113_v16  ;;  %v4120_v1 = vand.u32 4294901760, %v4119_v29  ;;  %v4131_v16 = vsub.f32 %v12621_v21, %v4130_v28 }
 0x237   :  { %2914 = vadd.xlane.f32.xlu0 %v2913_v7  ;;  %3952 = vmatpush.msra.mxu0 %v16908_v45  ;;  %v16909_v7 = vand.u32 4294901760, %v12344_v37  ;;  %v4049_v37 = vand.u32 4294901760, %v12657_v33  ;;  %v4126_v22 = vand.u32 4294901760, %v4125_v14  ;;  %v16912_v29 = vand.u32 4294901760, %v12398_v24 }
 0x238   :  { %3991 = vmatpush.msra.mxu1 %v12231_v8  ;;  %4032 = vmatpush.msra.mxu2 %v12523_v5  ;;  %v4136_v8 = vand.u32 4294901760, %v12642_v18  ;;  %v16913_v45 = vand.u32 4294901760, %v12426_v60  ;;  %v16916_v60 = vld [vmem:[#allocation3_spill] sm:$0xff] }
 0x239   :  { %4103 = vmatpush.msra.mxu3 %v4102_v53  ;;  %3956 = vmatpush.msra.mxu0 %v16909_v7  ;;  %v16911_v53 = vand.u32 4294901760, %v12378_v31 }
 0x23a   :  { %3993 = vmatpush.msra.mxu1 %v12248_v55  ;;  %4034 = vmatpush.msra.mxu2 %v12541_v32  ;;  %v4142_v55 = vand.u32 4294901760, %v12654_v11  ;;  %v4137_v13 = vsub.f32 %v12642_v18, %v4136_v8 }
 0x23b   :  { %4109 = vmatpush.msra.mxu3 %v4108_v36  ;;  %3960 = vmatpush.msra.mxu0 %v16910_v47  ;;  %v4148_v36 = vand.u32 4294901760, %v12668_v25 }
 0x23c   :  { %3995 = vmatpush.msra.mxu1 %v12262_v27  ;;  %4036 = vmatpush.msra.mxu2 %v12556_v34  ;;  %v4132_v27 = vand.u32 4294901760, %v4131_v16  ;;  %v4143_v31 = vsub.f32 %v12654_v11, %v4142_v55  ;;  %v4138_v24 = vand.u32 4294901760, %v4137_v13 }
 0x23d   :  { %4115 = vmatpush.msra.mxu3 %v4114_v57  ;;  %3964 = vmatpush.msra.mxu0 %v16911_v53 }
 0x23e   :  { %3997 = vmatpush.msra.mxu1 %v12278_v48  ;;  %4038 = vmatpush.msra.mxu2 %v12575_v0  ;;  %v4050_v48 = vsub.f32 %v12657_v33, %v4049_v37  ;;  %v4144_v57 = vand.u32 4294901760, %v4143_v31 }
 0x23f   :  { %4121 = vmatpush.msra.mxu3 %v4120_v1  ;;  %3968 = vmatpush.msra.mxu0 %v16912_v29 }
 0x240   :  { %3999 = vmatpush.msra.mxu1 %v12293_v39  ;;  %4040 = vmatpush.msra.mxu2 %v12588_v61  ;;  %v4149_v39 = vsub.f32 %v12668_v25, %v4148_v36  ;;  %v4051_v14 = vand.u32 4294901760, %v4050_v48 }
 0x241   :  { %4127 = vmatpush.msra.mxu3 %v4126_v22  ;;  %3972 = vmatpush.msra.mxu0 %v16913_v45  ;;  %v8871_v45 = vld [vmem:[%s16505_s1 + $0x618] sm:$0xff] }
 0x242   :  { %4001 = vmatpush.msra.mxu1 %v12311_v42  ;;  %4042 = vmatpush.msra.mxu2 %v12612_v10  ;;  %v4150_v42 = vand.u32 4294901760, %v4149_v39 }
 0x243   :  { %4133 = vmatpush.msra.mxu3 %v4132_v27  ;;  %3974 = vmatmul.f32.vlgmr.msra.gmra.mxu0 %v12322_v9 }
 0x244   :  { %4003 = vmatpush.msra.mxu1 %v12328_v6  ;;  %4159 = vmatpush.msrb.mxu0 %v12414_v26  ;;  %v16914_v6 = vand.u32 4294901760, %v12414_v26  ;;  %v16917_v26 = vand.u32 4294901760, %v12461_v54 }
 0x245   :  { %4044 = vmatpush.msra.mxu2 %v12629_v44  ;;  %4139 = vmatpush.msra.mxu3 %v4138_v24 }
 0x246   :  { %4005 = vmatpush.msra.mxu1 %v12340_v46  ;;  %4162 = vmatpush.msrb.mxu0 %v12446_v3  ;;  %v16915_v46 = vand.u32 4294901760, %v12446_v3  ;;  %v8882_v3 = vld [vmem:[%s16505_s1 + $0x670] sm:$0xff] }
 0x247   :  { %4046 = vmatpush.msra.mxu2 %v12644_v17  ;;  %4145 = vmatpush.msra.mxu3 %v4144_v57 }
 0x248   :  { %4052 = vmatmul.f32.vlgmr.msra.gmra.mxu2 %v4051_v14  ;;  %4165 = vmatpush.msrb.mxu0 %v12461_v54  ;;  %v8881_v54 = vld [vmem:[%s16505_s1 + $0x668] sm:$0xff] }
 0x249   :  { %4253 = vmatpush.msrb.mxu2 %v16914_v6  ;;  %4007 = vmatpush.msra.mxu1 %v12367_v62  ;;  %v16918_v62 = vand.u32 4294901760, %v12465_v52  ;;  %v8870_v6 = vld [vmem:[%s16505_s1 + $0x610] sm:$0xff] }
 0x24a   :  { %4151 = vmatpush.msra.mxu3 %v4150_v42  ;;  %4168 = vmatpush.msrb.mxu0 %v12465_v52  ;;  %v16921_v52 = vand.u32 4294901760, %v12521_v4 }
 0x24b   :  { %4153 = vmatmul.f32.vlgmr.msra.gmra.mxu3 %v12631_v19  ;;  %4257 = vmatpush.msrb.mxu2 %v16915_v46 }
 0x24c   :  { %4320 = vmatpush.msrb.mxu3 %v12383_v58  ;;  %4009 = vmatpush.msra.mxu1 %v16916_v60 }
 0x24d   :  { %4171 = vmatpush.msrb.mxu0 %v12483_v43  ;;  %4011 = vmatmul.f32.vlgmr.msra.gmra.mxu1 %v12322_v9  ;;  %v16919_v9 = vand.u32 4294901760, %v12483_v43  ;;  %v12789_v43 = vand.u32 4294901760, %v8881_v54 }
 0x24e   :  { %4261 = vmatpush.msrb.mxu2 %v16917_v26  ;;  %4212 = vmatpush.msrb.mxu1 %v12383_v58  ;;  %v16920_v58 = vand.u32 4294901760, %v12505_v59  ;;  %v12941_v26 = vand.u32 4294901760, %v8871_v45 }
 0x24f   :  { %4322 = vmatpush.msrb.mxu3 %v12416_v12  ;;  %4174 = vmatpush.msrb.mxu0 %v12505_v59 }
 0x250   :  { %4265 = vmatpush.msrb.mxu2 %v16918_v62  ;;  %4214 = vmatpush.msrb.mxu1 %v12416_v12  ;;  %v8883_v12 = vld [vmem:[%s16505_s1 + $0x678] sm:$0xff] }
 0x251   :  { %4324 = vmatpush.msrb.mxu3 %v12431_v40  ;;  %4177 = vmatpush.msrb.mxu0 %v12521_v4  ;;  %v12779_v4 = vand.u32 4294901760, %v8882_v3 }
 0x252   :  { %4269 = vmatpush.msrb.mxu2 %v16919_v9  ;;  %4216 = vmatpush.msrb.mxu1 %v12431_v40  ;;  %v16922_v40 = vand.u32 4294901760, %v12539_v56 }
 0x253   :  { %4326 = vmatpush.msrb.mxu3 %v12440_v23  ;;  %4180 = vmatpush.msrb.mxu0 %v12539_v56 }
 0x254   :  { %4273 = vmatpush.msrb.mxu2 %v16920_v58  ;;  %4218 = vmatpush.msrb.mxu1 %v12440_v23  ;;  %v16923_v23 = vand.u32 4294901760, %v12554_v41  ;;  %v8869_v58 = vld [vmem:[%s16505_s1 + $0x608] sm:$0xff] }
 0x255   :  { %4328 = vmatpush.msrb.mxu3 %v12450_v51  ;;  %4183 = vmatpush.msrb.mxu0 %v12554_v41  ;;  %v8879_v41 = vld [vmem:[%s16505_s1 + $0x658] sm:$0xff] }
 0x256   :  { %4277 = vmatpush.msrb.mxu2 %v16921_v52  ;;  %4220 = vmatpush.msrb.mxu1 %v12450_v51  ;;  %v12769_v51 = vand.u32 4294901760, %v8883_v12  ;;  %v12815_v56 = vand.u32 4294901760, %v8879_v41 }
 0x257   :  { %4330 = vmatpush.msrb.mxu3 %v12475_v30  ;;  %4186 = vmatpush.msrb.mxu0 %v12573_v49 }
 0x258   :  { %4281 = vmatpush.msrb.mxu2 %v16922_v40  ;;  %4222 = vmatpush.msrb.mxu1 %v12475_v30  ;;  %v8880_v30 = vld [vmem:[%s16505_s1 + $0x660] sm:$0xff] }
 0x259   :  { %4332 = vmatpush.msrb.mxu3 %v12491_v2  ;;  %4189 = vmatpush.msrb.mxu0 %v12586_v63  ;;  %v12802_v59 = vand.u32 4294901760, %v8880_v30  ;;  %v8876_v63 = vld [vmem:[%s16505_s1 + $0x640] sm:$0xff] }
 0x25a   :  { %4285 = vmatpush.msrb.mxu2 %v16923_v23  ;;  %4224 = vmatpush.msrb.mxu1 %v12491_v2  ;;  %v12792_v2 = vsub.f32 %v8883_v12, %v12769_v51  ;;  %v12956_v23 = vand.u32 4294901760, %v8870_v6 }
 0x25b   :  { %4334 = vmatpush.msrb.mxu3 %v12507_v50  ;;  %4192 = vmatpush.msrb.mxu0 %v12602_v38  ;;  %v12819_v38 = vsub.f32 %v8881_v54, %v12789_v43 }
 0x25c   :  { %4289 = vmatpush.msrb.mxu2 %v4112_v35  ;;  %4226 = vmatpush.msrb.mxu1 %v12507_v50  ;;  %v12805_v50 = vsub.f32 %v8882_v3, %v12779_v4  ;;  %v8899_v3 = vld [vmem:[%s16505_s1 + $0x6f8] sm:$0xff] }
 0x25d   :  { %4336 = vmatpush.msrb.mxu3 %v12523_v5  ;;  %4195 = vmatpush.msrb.mxu0 %v12621_v21  ;;  %v12850_v21 = vsub.f32 %v8879_v41, %v12815_v56 }
 0x25e   :  { %4293 = vmatpush.msrb.mxu2 %v4118_v20  ;;  %4228 = vmatpush.msrb.mxu1 %v12523_v5  ;;  %v8878_v5 = vld [vmem:[%s16505_s1 + $0x650] sm:$0xff]  ;;  %v4490_v49 = vand.u32 4294901760, %v12805_v50  ;;  %v4496_v20 = vand.u32 4294901760, %v12819_v38 }
 0x25f   :  { %4338 = vmatpush.msrb.mxu3 %v12541_v32  ;;  %4198 = vmatpush.msrb.mxu0 %v12642_v18  ;;  %v8875_v18 = vld [vmem:[%s16505_s1 + $0x638] sm:$0xff]  ;;  %v4508_v47 = vand.u32 4294901760, %v12850_v21 }
 0x260   :  { %4297 = vmatpush.msrb.mxu2 %v4124_v15  ;;  %4230 = vmatpush.msrb.mxu1 %v12541_v32  ;;  %v4484_v32 = vand.u32 4294901760, %v12792_v2  ;;  %v12829_v15 = vand.u32 4294901760, %v8878_v5  ;;  %v4497_v16 = vsub.f32 %v12819_v38, %v4496_v20 }
 0x261   :  { %4340 = vmatpush.msrb.mxu3 %v12556_v34  ;;  %4201 = vmatpush.msrb.mxu0 %v12654_v11  ;;  %v4509_v31 = vsub.f32 %v12850_v21, %v4508_v47 }
 0x262   :  { %4301 = vmatpush.msrb.mxu2 %v4130_v28  ;;  %4232 = vmatpush.msrb.mxu1 %v12556_v34  ;;  %v8877_v34 = vld [vmem:[%s16505_s1 + $0x648] sm:$0xff]  ;;  %v12862_v28 = vand.u32 4294901760, %v8876_v63  ;;  %v12866_v7 = vsub.f32 %v8878_v5, %v12829_v15  ;;  %v4498_v29 = vand.u32 4294901760, %v4497_v16  ;;  %v12973_v5 = vand.u32 4294901760, %v8869_v58 }
 0x263   :  { %4342 = vmatpush.msrb.mxu3 %v12575_v0  ;;  %4204 = vmatpush.msrb.mxu0 %v12668_v25  ;;  %v12846_v35 = vand.u32 4294901760, %v8877_v34  ;;  %v12873_v25 = vand.u32 4294901760, %v8875_v18  ;;  %v4510_v46 = vand.u32 4294901760, %v4509_v31 }
 0x264   :  { %4305 = vmatpush.msrb.mxu2 %v4136_v8  ;;  %4234 = vmatpush.msrb.mxu1 %v12575_v0  ;;  %v12833_v0 = vsub.f32 %v8880_v30, %v12802_v59  ;;  %v8874_v8 = vld [vmem:[%s16505_s1 + $0x630] sm:$0xff]  ;;  %v16647_v13 = vand.u32 4294901760, %v12866_v7  ;;  %v8868_v30 = vld [vmem:[%s16505_s1 + $0x600] sm:$0xff]  ;;  %v13007_v31 = vsub.f32 %v8869_v58, %v12973_v5 }
 0x265   :  { %4344 = vmatpush.msrb.mxu3 %v12588_v61  ;;  %4207 = vmatmul.f32.vlgmr.msrb.gmra.mxu0 %v12657_v33  ;;  %v12904_v27 = vsub.f32 %v8875_v18, %v12873_v25  ;;  %v12984_v18 = vand.u32 4294901760, %v8899_v3 }
 0x266   :  { %4309 = vmatpush.msrb.mxu2 %v4142_v55  ;;  %4442 = vmatpush.msra.mxu0 %v12769_v51  ;;  %v4502_v11 = vand.u32 4294901760, %v12833_v0  ;;  %v12882_v55 = vsub.f32 %v8877_v34, %v12846_v35  ;;  %v4515_v39 = vsub.f32 %v12866_v7, %v16647_v13 }
 0x267   :  { %4236 = vmatpush.msrb.mxu1 %v12588_v61  ;;  %4346 = vmatpush.msrb.mxu3 %v12612_v10  ;;  %v4485_v61 = vsub.f32 %v12792_v2, %v4484_v32  ;;  %v16643_v42 = vand.u32 4294901760, %v12904_v27 }
 0x268   :  { %4313 = vmatpush.msrb.mxu2 %v4148_v36  ;;  %4444 = vmatpush.msra.mxu0 %v12779_v4  ;;  %v4503_v53 = vsub.f32 %v12833_v0, %v4502_v11  ;;  %v12898_v36 = vsub.f32 %v8876_v63, %v12862_v28  ;;  %v16646_v33 = vand.u32 4294901760, %v12882_v55  ;;  %v4516_v52 = vand.u32 4294901760, %v4515_v39 }
 0x269   :  { %4238 = vmatpush.msrb.mxu1 %v12612_v10  ;;  %4348 = vmatpush.msrb.mxu3 %v12629_v44  ;;  %v4491_v10 = vsub.f32 %v12805_v50, %v4490_v49  ;;  %v4486_v1 = vand.u32 4294901760, %v4485_v61  ;;  %v4533_v54 = vsub.f32 %v12904_v27, %v16643_v42  ;;  %v12977_v63 = vsub.f32 %v8871_v45, %v12941_v26 }
 0x26a   :  { %4315 = vmatmul.f32.vlgmr.msrb.gmra.mxu2 %v12631_v19  ;;  %4446 = vmatpush.msra.mxu0 %v12789_v43  ;;  %v4504_v24 = vand.u32 4294901760, %v4503_v53  ;;  %v16645_v14 = vand.u32 4294901760, %v12898_v36  ;;  %v4521_v60 = vsub.f32 %v12882_v55, %v16646_v33  ;;  %v8897_v53 = vld [vmem:[%s16505_s1 + $0x6e8] sm:$0xff] }
 0x26b   :  { %4585 = vmatpush.msra.mxu2 %v12792_v2  ;;  %4240 = vmatpush.msrb.mxu1 %v12629_v44  ;;  %v12886_v44 = vand.u32 4294901760, %v8874_v8  ;;  %v4492_v22 = vand.u32 4294901760, %v4491_v10  ;;  %v8898_v10 = vld [vmem:[%s16505_s1 + $0x6f0] sm:$0xff] }
 0x26c   :  { %4350 = vmatpush.msrb.mxu3 %v12644_v17  ;;  %4448 = vmatpush.msra.mxu0 %v12802_v59  ;;  %v4527_v40 = vsub.f32 %v12898_v36, %v16645_v14  ;;  %v4522_v41 = vand.u32 4294901760, %v4521_v60  ;;  %v13009_v45 = vand.u32 4294901760, %v8898_v10 }
 0x26d   :  { %4352 = vmatmul.f32.vlgmr.msrb.gmra.mxu3 %v12631_v19  ;;  %4588 = vmatpush.msra.mxu2 %v12805_v50  ;;  %v8873_v19 = vld [vmem:[%s16505_s1 + $0x628] sm:$0xff] }
 0x26e   :  { %4638 = vmatpush.msra.mxu3 %v12769_v51  ;;  %4242 = vmatpush.msrb.mxu1 %v12644_v17  ;;  %v8872_v17 = vld [vmem:[%s16505_s1 + $0x620] sm:$0xff]  ;;  %v12913_v48 = vand.u32 4294901760, %v8873_v19 }
 0x26f   :  { %4450 = vmatpush.msra.mxu0 %v12815_v56  ;;  %4246 = vmatmul.f32.vlgmr.msrb.gmra.mxu1 %v4049_v37  ;;  %v12919_v37 = vsub.f32 %v8874_v8, %v12886_v44  ;;  %v12928_v57 = vand.u32 4294901760, %v8872_v17  ;;  %v4528_v8 = vand.u32 4294901760, %v4527_v40  ;;  %v8895_v40 = vld [vmem:[%s16505_s1 + $0x6d8] sm:$0xff] }
 0x270   :  { %4591 = vmatpush.msra.mxu2 %v12819_v38  ;;  %4487 = vmatpush.msra.mxu1 %v4486_v1  ;;  %v12944_v62 = vsub.f32 %v8873_v19, %v12913_v48  ;;  %v12990_v1 = vand.u32 4294901760, %v8868_v30  ;;  %v12994_v19 = vsub.f32 %v8870_v6, %v12956_v23  ;;  %v13017_v6 = vsub.f32 %v8899_v3, %v12984_v18 }
 0x271   :  { %4640 = vmatpush.msra.mxu3 %v12779_v4  ;;  %4452 = vmatpush.msra.mxu0 %v12829_v15  ;;  %v16641_v9 = vand.u32 4294901760, %v12919_v37  ;;  %v12959_v12 = vsub.f32 %v8872_v17, %v12928_v57 }
 0x272   :  { %4594 = vmatpush.msra.mxu2 %v12833_v0  ;;  %4493 = vmatpush.msra.mxu1 %v4492_v22  ;;  %v16640_v34 = vand.u32 4294901760, %v12944_v62  ;;  %v4534_v22 = vand.u32 4294901760, %v4533_v54  ;;  %v16642_v60 = vand.u32 4294901760, %v12994_v19  ;;  %v13025_v58 = vsub.f32 %v8868_v30, %v12990_v1 }
 0x273   :  { %4642 = vmatpush.msra.mxu3 %v12789_v43  ;;  %4454 = vmatpush.msra.mxu0 %v12846_v35  ;;  %v4539_v61 = vsub.f32 %v12919_v37, %v16641_v9  ;;  %v16638_v16 = vand.u32 4294901760, %v12959_v12 }
 0x274   :  { %4597 = vmatpush.msra.mxu2 %v12850_v21  ;;  %4499 = vmatpush.msra.mxu1 %v4498_v29  ;;  %v4545_v17 = vsub.f32 %v12944_v62, %v16640_v34  ;;  %v16639_v29 = vand.u32 4294901760, %v12977_v63 }
 0x275   :  { %4644 = vmatpush.msra.mxu3 %v12802_v59  ;;  %4456 = vmatpush.msra.mxu0 %v12862_v28  ;;  %v4540_v39 = vand.u32 4294901760, %v4539_v61  ;;  %v13042_v61 = vsub.f32 %v8898_v10, %v13009_v45  ;;  %v4563_v10 = vsub.f32 %v12994_v19, %v16642_v60 }
 0x276   :  { %4600 = vmatpush.msra.mxu2 %v12866_v7  ;;  %4505 = vmatpush.msra.mxu1 %v4504_v24  ;;  %v8896_v24 = vld [vmem:[%s16505_s1 + $0x6e0] sm:$0xff]  ;;  %v4546_v54 = vand.u32 4294901760, %v4545_v17  ;;  %v4557_v30 = vsub.f32 %v12977_v63, %v16639_v29  ;;  %v16649_v29 = vand.u32 4294901760, %v13025_v58 }
 0x277   :  { %4646 = vmatpush.msra.mxu3 %v12815_v56  ;;  %4458 = vmatpush.msra.mxu0 %v12873_v25  ;;  %v13034_v3 = vand.u32 4294901760, %v8896_v24  ;;  %v16650_v60 = vand.u32 4294901760, %v13042_v61 }
 0x278   :  { %4603 = vmatpush.msra.mxu2 %v12882_v55  ;;  %4511 = vmatpush.msra.mxu1 %v4510_v46  ;;  %v4551_v46 = vsub.f32 %v12959_v12, %v16638_v16  ;;  %v13047_v16 = vand.u32 4294901760, %v8895_v40  ;;  %v4575_v14 = vsub.f32 %v13025_v58, %v16649_v29 }
 0x279   :  { %4648 = vmatpush.msra.mxu3 %v12829_v15  ;;  %4460 = vmatpush.msra.mxu0 %v12886_v44  ;;  %v13063_v9 = vsub.f32 %v8896_v24, %v13034_v3 }
 0x27a   :  { %4606 = vmatpush.msra.mxu2 %v12898_v36  ;;  %4517 = vmatpush.msra.mxu1 %v4516_v52  ;;  %v13027_v52 = vand.u32 4294901760, %v8897_v53  ;;  %v4552_v17 = vand.u32 4294901760, %v4551_v46  ;;  %v4558_v46 = vand.u32 4294901760, %v4557_v30  ;;  %v8892_v30 = vld [vmem:[%s16505_s1 + $0x6c0] sm:$0xff] }
 0x27b   :  { %4650 = vmatpush.msra.mxu3 %v12846_v35  ;;  %4462 = vmatpush.msra.mxu0 %v12913_v48  ;;  %v13107_v2 = vand.u32 4294901760, %v8892_v30 }
 0x27c   :  { %4609 = vmatpush.msra.mxu2 %v12904_v27  ;;  %4523 = vmatpush.msra.mxu1 %v4522_v41  ;;  %v16644_v41 = vand.u32 4294901760, %v13007_v31  ;;  %v13058_v34 = vsub.f32 %v8897_v53, %v13027_v52 }
 0x27d   :  { %4652 = vmatpush.msra.mxu3 %v12862_v28  ;;  %4464 = vmatpush.msra.mxu0 %v12928_v57 }
 0x27e   :  { %4612 = vmatpush.msra.mxu2 %v12919_v37  ;;  %4529 = vmatpush.msra.mxu1 %v4528_v8  ;;  %v16648_v8 = vand.u32 4294901760, %v13017_v6  ;;  %v4569_v53 = vsub.f32 %v13007_v31, %v16644_v41  ;;  %v4564_v41 = vand.u32 4294901760, %v4563_v10  ;;  %v16651_v33 = vand.u32 4294901760, %v13058_v34 }
 0x27f   :  { %4654 = vmatpush.msra.mxu3 %v12873_v25  ;;  %4466 = vmatpush.msra.mxu0 %v12941_v26 }
 0x280   :  { %4615 = vmatpush.msra.mxu2 %v12944_v62  ;;  %4535 = vmatpush.msra.mxu1 %v4534_v22  ;;  %v8894_v22 = vld [vmem:[%s16505_s1 + $0x6d0] sm:$0xff]  ;;  %v4826_v24 = vsub.f32 %v13017_v6, %v16648_v8  ;;  %v4570_v10 = vand.u32 4294901760, %v4569_v53  ;;  %v4832_v8 = vsub.f32 %v13042_v61, %v16650_v60  ;;  %v4576_v60 = vand.u32 4294901760, %v4575_v14  ;;  %v8889_v14 = vld [vmem:[%s16505_s1 + $0x6a8] sm:$0xff] }
 0x281   :  { %4656 = vmatpush.msra.mxu3 %v12886_v44  ;;  %4468 = vmatpush.msra.mxu0 %v12956_v23  ;;  %v13073_v42 = vand.u32 4294901760, %v8894_v22  ;;  %v8890_v53 = vld [vmem:[%s16505_s1 + $0x6b0] sm:$0xff]  ;;  %v13154_v0 = vand.u32 4294901760, %v8889_v14 }
 0x282   :  { %4618 = vmatpush.msra.mxu2 %v12959_v12  ;;  %4541 = vmatpush.msra.mxu1 %v4540_v39  ;;  %v8893_v39 = vld [vmem:[%s16505_s1 + $0x6c8] sm:$0xff]  ;;  %v13139_v38 = vand.u32 4294901760, %v8890_v53 }
 0x283   :  { %4658 = vmatpush.msra.mxu3 %v12913_v48  ;;  %4470 = vmatpush.msra.mxu0 %v12973_v5  ;;  %v13091_v13 = vand.u32 4294901760, %v8893_v39  ;;  %v13105_v29 = vsub.f32 %v8894_v22, %v13073_v42  ;;  %v4838_v22 = vsub.f32 %v13058_v34, %v16651_v33  ;;  %v13137_v33 = vsub.f32 %v8892_v30, %v13107_v2 }
 0x284   :  { %4621 = vmatpush.msra.mxu2 %v12977_v63  ;;  %4547 = vmatpush.msra.mxu1 %v4546_v54  ;;  %v13081_v54 = vsub.f32 %v8895_v40, %v13047_v16  ;;  %v16652_v40 = vand.u32 4294901760, %v13063_v9 }
 0x285   :  { %4660 = vmatpush.msra.mxu3 %v12928_v57  ;;  %4472 = vmatpush.msra.mxu0 %v12990_v1  ;;  %v13121_v50 = vsub.f32 %v8893_v39, %v13091_v13  ;;  %v4833_v39 = vand.u32 4294901760, %v4832_v8  ;;  %v8888_v8 = vld [vmem:[%s16505_s1 + $0x6a0] sm:$0xff] }
 0x286   :  { %4624 = vmatpush.msra.mxu2 %v12994_v19  ;;  %4553 = vmatpush.msra.mxu1 %v4552_v17  ;;  %v8891_v17 = vld [vmem:[%s16505_s1 + $0x6b8] sm:$0xff]  ;;  %v13170_v21 = vand.u32 4294901760, %v8888_v8 }
 0x287   :  { %4662 = vmatpush.msra.mxu3 %v12941_v26  ;;  %4679 = vmatpush.msrb.mxu0 %v4484_v32  ;;  %v4827_v32 = vand.u32 4294901760, %v4826_v24  ;;  %v16654_v24 = vand.u32 4294901760, %v13105_v29  ;;  %v16655_v30 = vand.u32 4294901760, %v13121_v50 }
 0x288   :  { %4627 = vmatpush.msra.mxu2 %v13007_v31  ;;  %4559 = vmatpush.msra.mxu1 %v4558_v46  ;;  %v16653_v46 = vand.u32 4294901760, %v13081_v54 }
 0x289   :  { %4664 = vmatpush.msra.mxu3 %v12956_v23  ;;  %4683 = vmatpush.msrb.mxu0 %v4490_v49  ;;  %v13123_v49 = vand.u32 4294901760, %v8891_v17 }
 0x28a   :  { %4630 = vmatpush.msra.mxu2 %v13025_v58  ;;  %4565 = vmatpush.msra.mxu1 %v4564_v41  ;;  %v4844_v41 = vsub.f32 %v13063_v9, %v16652_v40 }
 0x28b   :  { %4666 = vmatpush.msra.mxu3 %v12973_v5  ;;  %4687 = vmatpush.msrb.mxu0 %v4496_v20  ;;  %v4850_v20 = vsub.f32 %v13081_v54, %v16653_v46  ;;  %v13152_v40 = vsub.f32 %v8891_v17, %v13123_v49  ;;  %v8887_v46 = vld [vmem:[%s16505_s1 + $0x698] sm:$0xff]  ;;  %v16656_v17 = vand.u32 4294901760, %v13137_v33 }
 0x28c   :  { %4783 = vmatpush.msrb.mxu2 %v12984_v18  ;;  %4571 = vmatpush.msra.mxu1 %v4570_v10  ;;  %v4839_v10 = vand.u32 4294901760, %v4838_v22 }
 0x28d   :  { %4668 = vmatpush.msra.mxu3 %v12990_v1  ;;  %4691 = vmatpush.msrb.mxu0 %v4502_v11  ;;  %v4845_v11 = vand.u32 4294901760, %v4844_v41  ;;  %v4851_v22 = vand.u32 4294901760, %v4850_v20  ;;  %v16657_v41 = vand.u32 4294901760, %v13152_v40 }
 0x28e   :  { %4785 = vmatpush.msrb.mxu2 %v13009_v45  ;;  %4577 = vmatpush.msra.mxu1 %v4576_v60  ;;  %v4856_v60 = vsub.f32 %v13105_v29, %v16654_v24  ;;  %v13186_v24 = vand.u32 4294901760, %v8887_v46 }
 0x28f   :  { %4828 = vmatpush.msrb.mxu3 %v4827_v32  ;;  %4695 = vmatpush.msrb.mxu0 %v4508_v47  ;;  %v13168_v32 = vsub.f32 %v8890_v53, %v13139_v38  ;;  %v16924_v47 = vand.u32 4294901760, %v12866_v7  ;;  %v4862_v53 = vsub.f32 %v13121_v50, %v16655_v30  ;;  %v8886_v7 = vld [vmem:[%s16505_s1 + $0x690] sm:$0xff]  ;;  %v13202_v30 = vsub.f32 %v8888_v8, %v13170_v21 }
 0x290   :  { %4746 = vmatpush.msrb.mxu1 %v12769_v51  ;;  %4787 = vmatpush.msrb.mxu2 %v13027_v52  ;;  %v8864_v51 = vld [vmem:[%s16506_s0 + $0x60] sm:$0xff]  ;;  %v4874_v8 = vsub.f32 %v13152_v40, %v16657_v41 }
 0x291   :  { %4834 = vmatpush.msrb.mxu3 %v4833_v39  ;;  %4699 = vmatpush.msrb.mxu0 %v16924_v47  ;;  %v13184_v39 = vsub.f32 %v8889_v14, %v13154_v0  ;;  %v13194_v20 = vand.u32 4294901760, %v8864_v51  ;;  %v4868_v14 = vsub.f32 %v13137_v33, %v16656_v17  ;;  %v4879_v47 = vand.u32 4294901760, %v13168_v32 }
 0x292   :  { %4748 = vmatpush.msrb.mxu1 %v12779_v4  ;;  %4789 = vmatpush.msrb.mxu2 %v13034_v3  ;;  %v16925_v4 = vand.u32 4294901760, %v12882_v55  ;;  %v8885_v55 = vld [vmem:[%s16505_s1 + $0x688] sm:$0xff]  ;;  %v13218_v17 = vsub.f32 %v8887_v46, %v13186_v24  ;;  %v4891_v41 = vand.u32 4294901760, %v13202_v30 }
 0x293   :  { %4840 = vmatpush.msrb.mxu3 %v4839_v10  ;;  %v4857_v10 = vand.u32 4294901760, %v4856_v60  ;;  %v4863_v60 = vand.u32 4294901760, %v4862_v53  ;;  %v13229_v53 = vand.u32 4294901760, %v8885_v55  ;;  %v4880_v46 = vsub.f32 %v13168_v32, %v4879_v47  ;;  %4579 = vmatmul.f32.vlgmr.msra.gmra.mxu1 %v13194_v20 }
 0x294   :  { %4703 = vmatpush.msrb.mxu0 %v16925_v4  ;;  %4750 = vmatpush.msrb.mxu1 %v12789_v43  ;;  %v16926_v43 = vand.u32 4294901760, %v12898_v36  ;;  %v4885_v4 = vand.u32 4294901760, %v13184_v39  ;;  %v8884_v36 = vld [vmem:[%s16505_s1 + $0x680] sm:$0xff] }
 0x295   :  { %4791 = vmatpush.msrb.mxu2 %v13047_v16  ;;  %4846 = vmatpush.msrb.mxu3 %v4845_v11  ;;  %v13210_v11 = vand.u32 4294901760, %v8886_v7 }
 0x296   :  { %4707 = vmatpush.msrb.mxu0 %v16926_v43  ;;  %4752 = vmatpush.msrb.mxu1 %v12802_v59  ;;  %v16927_v59 = vand.u32 4294901760, %v12904_v27  ;;  %v4869_v43 = vand.u32 4294901760, %v4868_v14  ;;  %v16928_v27 = vand.u32 4294901760, %v12919_v37  ;;  %v4886_v14 = vsub.f32 %v13184_v39, %v4885_v4 }
 0x297   :  { %4793 = vmatpush.msrb.mxu2 %v13073_v42  ;;  %4852 = vmatpush.msrb.mxu3 %v4851_v22  ;;  %v13227_v22 = vsub.f32 %v8864_v51, %v13194_v20  ;;  %v13242_v51 = vand.u32 4294901760, %v8884_v36  ;;  %v16929_v37 = vand.u32 4294901760, %v12944_v62 }
 0x298   :  { %4711 = vmatpush.msrb.mxu0 %v16927_v59  ;;  %4754 = vmatpush.msrb.mxu1 %v12815_v56  ;;  %v13240_v56 = vsub.f32 %v8886_v7, %v13210_v11  ;;  %v4897_v59 = vand.u32 4294901760, %v13218_v17  ;;  %v13254_v7 = vsub.f32 %v8885_v55, %v13229_v53  ;;  %v4887_v55 = vand.u32 4294901760, %v4886_v14 }
 0x299   :  { %4795 = vmatpush.msrb.mxu2 %v13091_v13  ;;  %4858 = vmatpush.msrb.mxu3 %v4857_v10  ;;  %v4875_v10 = vand.u32 4294901760, %v4874_v8  ;;  %v4892_v8 = vsub.f32 %v13202_v30, %v4891_v41  ;;  %v13265_v62 = vsub.f32 %v8884_v36, %v13242_v51  ;;  %v16932_v14 = vand.u32 4294901760, %v12994_v19 }
 0x29a   :  { %4715 = vmatpush.msrb.mxu0 %v16928_v27  ;;  %4756 = vmatpush.msrb.mxu1 %v12829_v15  ;;  %v4475_v15 = vand.u32 4294901760, %v13227_v22  ;;  %v16930_v27 = vand.u32 4294901760, %v12959_v12  ;;  %v8865_v12 = vld [vmem:[%s16506_s0 + $0x68] sm:$0xff]  ;;  %v4909_v36 = vand.u32 4294901760, %v13254_v7 }
 0x29b   :  { %4797 = vmatpush.msrb.mxu2 %v13107_v2  ;;  %4864 = vmatpush.msrb.mxu3 %v4863_v60  ;;  %v4881_v60 = vand.u32 4294901760, %v4880_v46  ;;  %v16931_v46 = vand.u32 4294901760, %v12977_v63 }
 0x29c   :  { %4719 = vmatpush.msrb.mxu0 %v16929_v37  ;;  %4758 = vmatpush.msrb.mxu1 %v12846_v35  ;;  %v4903_v35 = vand.u32 4294901760, %v13240_v56  ;;  %v13289_v37 = vand.u32 4294901760, %v8865_v12 }
 0x29d   :  { %4799 = vmatpush.msrb.mxu2 %v13123_v49  ;;  %4870 = vmatpush.msrb.mxu3 %v4869_v43  ;;  %v4898_v43 = vsub.f32 %v13218_v17, %v4897_v59 }
 0x29e   :  { %4723 = vmatpush.msrb.mxu0 %v16930_v27  ;;  %4760 = vmatpush.msrb.mxu1 %v12862_v28  ;;  %v4476_v28 = vsub.f32 %v13227_v22, %v4475_v15  ;;  %v4904_v63 = vsub.f32 %v13240_v56, %v4903_v35 }
 0x29f   :  { %4801 = vmatpush.msrb.mxu2 %v13139_v38  ;;  %4876 = vmatpush.msrb.mxu3 %v4875_v10  ;;  %v4893_v10 = vand.u32 4294901760, %v4892_v8  ;;  %v4899_v27 = vand.u32 4294901760, %v4898_v43  ;;  %v16934_v8 = vand.u32 4294901760, %v13025_v58  ;;  %v9078_v43 = vld [vmem:[%s16507_s2 + $0x2] ss:$0 sm:$0xff] }
 0x2a0   :  { %4727 = vmatpush.msrb.mxu0 %v16931_v46  ;;  %4762 = vmatpush.msrb.mxu1 %v12873_v25  ;;  %v4915_v25 = vand.u32 4294901760, %v13265_v62  ;;  %v4477_v19 = vand.u32 4294901760, %v4476_v28 }
 0x2a1   :  { %4803 = vmatpush.msrb.mxu2 %v13154_v0  ;;  %4882 = vmatpush.msrb.mxu3 %v4881_v60  ;;  %v16933_v60 = vand.u32 4294901760, %v13007_v31 }
 0x2a2   :  { %4731 = vmatpush.msrb.mxu0 %v16932_v14  ;;  %4764 = vmatpush.msrb.mxu1 %v12886_v44  ;;  %v4910_v44 = vsub.f32 %v13254_v7, %v4909_v36  ;;  %v4916_v31 = vsub.f32 %v13265_v62, %v4915_v25 }
 0x2a3   :  { %4805 = vmatpush.msrb.mxu2 %v13170_v21  ;;  %4888 = vmatpush.msrb.mxu3 %v4887_v55  ;;  %v4905_v55 = vand.u32 4294901760, %v4904_v63  ;;  %v16936_v63 = vand.u32 4294901760, %v13042_v61 }
 0x2a4   :  { %4735 = vmatpush.msrb.mxu0 %v16933_v60  ;;  %4766 = vmatpush.msrb.mxu1 %v12913_v48  ;;  %v13306_v48 = vsub.f32 %v8865_v12, %v13289_v37  ;;  %v4911_v58 = vand.u32 4294901760, %v4910_v44  ;;  %v4917_v12 = vand.u32 4294901760, %v4916_v31  ;;  %v8911_v60 = vld [vmem:[%s16505_s1 + $0x758] sm:$0xff]  ;;  %v8910_v44 = vld [vmem:[%s16505_s1 + $0x750] sm:$0xff] }
 0x2a5   :  { %4807 = vmatpush.msrb.mxu2 %v13186_v24  ;;  %4894 = vmatpush.msrb.mxu3 %v4893_v10  ;;  %v16935_v10 = vand.u32 4294901760, %v13017_v6  ;;  %v13438_v31 = vand.u32 4294901760, %v8910_v44 }
 0x2a6   :  { %4739 = vmatpush.msrb.mxu0 %v16934_v8  ;;  %4768 = vmatpush.msrb.mxu1 %v12928_v57  ;;  %v3030_v57 = vpop.f32.mrf.mxu0  ;;  %v4816_v46 = vand.u32 4294901760, %v13306_v48 }
 0x2a7   :  { %4809 = vmatpush.msrb.mxu2 %v13210_v11  ;;  %4900 = vmatpush.msrb.mxu3 %v4899_v27  ;;  %v3031_v28 = vadd.f32 %v9078_v43, %v3030_v57  ;;  %v3224_v27 = vpop.f32.mrf.mxu3 }
 0x2a8   :  { %4478 = vmatmul.f32.vlgmr.msra.gmra.mxu0 %v4477_v19  ;;  %4770 = vmatpush.msrb.mxu1 %v12941_v26  ;;  %v3131_v26 = vpop.f32.mrf.mxu1 }
 0x2a9   :  { %4926 = vmatpush.msra.mxu0 %v13017_v6  ;;  %4811 = vmatpush.msrb.mxu2 %v13229_v53  ;;  %v3132_v14 = vadd.f32 %v3131_v26, %v3031_v28  ;;  %v3185_v6 = vpop.f32.mrf.mxu2 }
 0x2aa   :  { %4906 = vmatpush.msrb.mxu3 %v4905_v55  ;;  %4772 = vmatpush.msrb.mxu1 %v12956_v23  ;;  %v4817_v23 = vsub.f32 %v13306_v48, %v4816_v46 }
 0x2ab   :  { %4929 = vmatpush.msra.mxu0 %v13042_v61  ;;  %4813 = vmatpush.msrb.mxu2 %v13242_v51  ;;  %v16938_v61 = vand.u32 4294901760, %v13063_v9 }
 0x2ac   :  { %4912 = vmatpush.msrb.mxu3 %v4911_v58  ;;  %4633 = vmatmul.f32.vlgmr.msra.gmra.mxu2 %v13227_v22  ;;  %v4818_v22 = vand.u32 4294901760, %v4817_v23  ;;  %v8908_v58 = vld [vmem:[%s16505_s1 + $0x740] sm:$0xff] }
 0x2ad   :  { %4932 = vmatpush.msra.mxu0 %v13058_v34  ;;  %5020 = vmatpush.msra.mxu2 %v16935_v10  ;;  %v13480_v26 = vand.u32 4294901760, %v8908_v58 }
 0x2ae   :  { %4774 = vmatpush.msrb.mxu1 %v12973_v5  ;;  %4918 = vmatpush.msrb.mxu3 %v4917_v12  ;;  %v16937_v5 = vand.u32 4294901760, %v13058_v34  ;;  %v16939_v34 = vand.u32 4294901760, %v13081_v54  ;;  %v13470_v12 = vsub.f32 %v8910_v44, %v13438_v31 }
 0x2af   :  { %4672 = vmatmul.f32.vlgmr.msra.gmra.mxu3 %v4475_v15  ;;  %4935 = vmatpush.msra.mxu0 %v13063_v9  ;;  %v3186_v15 = vadd.f32 %v3185_v6, %v3132_v14  ;;  %v3293_v9 = vpop.f32.mrf.mxu0  ;;  %v8906_v14 = vld [vmem:[%s16505_s1 + $0x730] sm:$0xff] }
 0x2b0   :  { %5024 = vmatpush.msra.mxu2 %v16936_v63  ;;  %5087 = vmatpush.msra.mxu3 %v12984_v18 }
 0x2b1   :  { %4776 = vmatpush.msrb.mxu1 %v12990_v1  ;;  %4938 = vmatpush.msra.mxu0 %v13081_v54  ;;  %v16940_v1 = vand.u32 4294901760, %v13105_v29  ;;  %v16941_v54 = vand.u32 4294901760, %v13121_v50 }
 0x2b2   :  { %5028 = vmatpush.msra.mxu2 %v16937_v5  ;;  %5089 = vmatpush.msra.mxu3 %v13009_v45 }
 0x2b3   :  { %4979 = vmatpush.msra.mxu1 %v12984_v18  ;;  %4941 = vmatpush.msra.mxu0 %v13105_v29  ;;  %v3225_v18 = vadd.f32 %v3224_v27, %v3186_v15  ;;  %v16942_v29 = vand.u32 4294901760, %v13137_v33 }
 0x2b4   :  { %5032 = vmatpush.msra.mxu2 %v16938_v61  ;;  %5091 = vmatpush.msra.mxu3 %v13027_v52  ;;  %v16666_v61 = vand.u32 4294901760, %v13470_v12 }
 0x2b5   :  { %4981 = vmatpush.msra.mxu1 %v13009_v45  ;;  %4819 = vmatmul.f32.vlgmr.msrb.gmra.mxu2 %v4818_v22  ;;  %v3294_v45 = vadd.f32 %v3293_v9, %v3225_v18  ;;  %v13510_v9 = vand.u32 4294901760, %v8906_v14 }
 0x2b6   :  { %4944 = vmatpush.msra.mxu0 %v13121_v50  ;;  %5036 = vmatpush.msra.mxu2 %v16939_v34  ;;  %v3371_v50 = vpop.f32.mrf.mxu2 }
 0x2b7   :  { %4983 = vmatpush.msra.mxu1 %v13027_v52  ;;  %5093 = vmatpush.msra.mxu3 %v13034_v3  ;;  %v3330_v52 = vpop.f32.mrf.mxu1 }
 0x2b8   :  { %4741 = vmatmul.f32.vlgmr.msrb.gmra.mxu0 %v13194_v20  ;;  %4920 = vmatmul.f32.vlgmr.msrb.gmra.mxu3 %v13289_v37 }
 0x2b9   :  { %4947 = vmatpush.msra.mxu0 %v13137_v33  ;;  %4985 = vmatpush.msra.mxu1 %v13034_v3  ;;  %v3331_v3 = vadd.f32 %v3330_v52, %v3294_v45  ;;  %v8914_v33 = vld [vmem:[%s16505_s1 + $0x770] sm:$0xff]  ;;  %v8904_v52 = vld [vmem:[%s16505_s1 + $0x720] sm:$0xff] }
 0x2ba   :  { %5040 = vmatpush.msra.mxu2 %v16940_v1  ;;  %5095 = vmatpush.msra.mxu3 %v13047_v16  ;;  %v13513_v1 = vsub.f32 %v8908_v58, %v13480_v26 }
 0x2bb   :  { %4778 = vmatmul.f32.vlgmr.msrb.gmra.mxu1 %v13194_v20  ;;  %4950 = vmatpush.msra.mxu0 %v13152_v40  ;;  %v16943_v20 = vand.u32 4294901760, %v13152_v40  ;;  %v8913_v40 = vld [vmem:[%s16505_s1 + $0x768] sm:$0xff] }
 0x2bc   :  { %4987 = vmatpush.msra.mxu1 %v13047_v16  ;;  %5044 = vmatpush.msra.mxu2 %v16941_v54  ;;  %v8915_v16 = vld [vmem:[%s16505_s1 + $0x778] sm:$0xff] }
 0x2bd   :  { %5097 = vmatpush.msra.mxu3 %v13073_v42  ;;  %4953 = vmatpush.msra.mxu0 %v13168_v32  ;;  %v13394_v32 = vand.u32 4294901760, %v8914_v33 }
 0x2be   :  { %4989 = vmatpush.msra.mxu1 %v13073_v42  ;;  %5048 = vmatpush.msra.mxu2 %v16942_v29  ;;  %v3372_v42 = vadd.f32 %v3371_v50, %v3331_v3  ;;  %v5197_v50 = vsub.f32 %v13470_v12, %v16666_v61 }
 0x2bf   :  { %5099 = vmatpush.msra.mxu3 %v13091_v13  ;;  %4956 = vmatpush.msra.mxu0 %v13184_v39  ;;  %v13404_v39 = vand.u32 4294901760, %v8913_v40  ;;  %v3565_v19 = vpop.f32.mrf.mxu1 }
 0x2c0   :  { %4991 = vmatpush.msra.mxu1 %v13091_v13  ;;  %5052 = vmatpush.msra.mxu2 %v16943_v20  ;;  %v13384_v13 = vand.u32 4294901760, %v8915_v16  ;;  %v8903_v20 = vld [vmem:[%s16505_s1 + $0x718] sm:$0xff] }
 0x2c1   :  { %5101 = vmatpush.msra.mxu3 %v13107_v2  ;;  %4959 = vmatpush.msra.mxu0 %v13202_v30  ;;  %v13560_v44 = vand.u32 4294901760, %v8903_v20 }
 0x2c2   :  { %4993 = vmatpush.msra.mxu1 %v13107_v2  ;;  %5056 = vmatpush.msra.mxu2 %v4879_v47  ;;  %v3472_v2 = vpop.f32.mrf.mxu3  ;;  %v3526_v47 = vpop.f32.mrf.mxu0 }
 0x2c3   :  { %5103 = vmatpush.msra.mxu3 %v13123_v49  ;;  %4962 = vmatpush.msra.mxu0 %v13218_v17 }
 0x2c4   :  { %4995 = vmatpush.msra.mxu1 %v13123_v49  ;;  %5060 = vmatpush.msra.mxu2 %v4885_v4  ;;  %v8912_v49 = vld [vmem:[%s16505_s1 + $0x760] sm:$0xff]  ;;  %v13407_v4 = vsub.f32 %v8915_v16, %v13384_v13 }
 0x2c5   :  { %5105 = vmatpush.msra.mxu3 %v13139_v38  ;;  %4965 = vmatpush.msra.mxu0 %v13240_v56  ;;  %v13417_v30 = vand.u32 4294901760, %v8912_v49  ;;  %v3634_v56 = vpop.f32.mrf.mxu2 }
 0x2c6   :  { %4997 = vmatpush.msra.mxu1 %v13139_v38  ;;  %5064 = vmatpush.msra.mxu2 %v4891_v41  ;;  %v3473_v38 = vadd.f32 %v3472_v2, %v3372_v42  ;;  %v13420_v41 = vsub.f32 %v8914_v33, %v13394_v32  ;;  %v5166_v17 = vand.u32 4294901760, %v13407_v4  ;;  %v16663_v2 = vand.u32 4294901760, %v13513_v1 }
 0x2c7   :  { %5107 = vmatpush.msra.mxu3 %v13154_v0  ;;  %4968 = vmatpush.msra.mxu0 %v13254_v7  ;;  %v13448_v43 = vsub.f32 %v8912_v49, %v13417_v30  ;;  %v3813_v27 = vpop.f32.mrf.mxu1  ;;  %v13547_v49 = vsub.f32 %v8906_v14, %v13510_v9 }
 0x2c8   :  { %4999 = vmatpush.msra.mxu1 %v13154_v0  ;;  %5068 = vmatpush.msra.mxu2 %v4897_v59  ;;  %v3527_v8 = vadd.f32 %v3526_v47, %v3473_v38  ;;  %v13427_v0 = vand.u32 4294901760, %v8911_v60  ;;  %v13434_v59 = vsub.f32 %v8913_v40, %v13404_v39  ;;  %v5167_v7 = vsub.f32 %v13407_v4, %v5166_v17 }
 0x2c9   :  { %5109 = vmatpush.msra.mxu3 %v13170_v21  ;;  %4971 = vmatpush.msra.mxu0 %v13265_v62  ;;  %v8907_v62 = vld [vmem:[%s16505_s1 + $0x738] sm:$0xff]  ;;  %v16668_v10 = vand.u32 4294901760, %v13448_v43  ;;  %v13543_v40 = vand.u32 4294901760, %v8904_v52 }
 0x2ca   :  { %5001 = vmatpush.msra.mxu1 %v13170_v21  ;;  %5072 = vmatpush.msra.mxu2 %v4903_v35  ;;  %v3566_v55 = vadd.f32 %v3565_v19, %v3527_v8  ;;  %v8909_v21 = vld [vmem:[%s16505_s1 + $0x748] sm:$0xff]  ;;  %v5172_v35 = vand.u32 4294901760, %v13420_v41  ;;  %v3712_v63 = vpop.f32.mrf.mxu0  ;;  %v5168_v6 = vand.u32 4294901760, %v5167_v7  ;;  %v13494_v22 = vand.u32 4294901760, %v8907_v62 }
 0x2cb   :  { %5111 = vmatpush.msra.mxu3 %v13186_v24  ;;  %4974 = vmatmul.f32.vlgmr.msra.gmra.mxu0 %v13306_v48  ;;  %v5185_v18 = vsub.f32 %v13448_v43, %v16668_v10  ;;  %v5209_v7 = vsub.f32 %v13513_v1, %v16663_v2 }
 0x2cc   :  { %5003 = vmatpush.msra.mxu1 %v13186_v24  ;;  %5124 = vmatpush.msrb.mxu0 %v13384_v13  ;;  %v13453_v24 = vsub.f32 %v8911_v60, %v13427_v0  ;;  %v3635_v57 = vadd.f32 %v3634_v56, %v3566_v55  ;;  %v5173_v28 = vsub.f32 %v13420_v41, %v5172_v35  ;;  %v8902_v60 = vld [vmem:[%s16505_s1 + $0x710] sm:$0xff]  ;;  %v5198_v56 = vand.u32 4294901760, %v5197_v50 }
 0x2cd   :  { %5076 = vmatpush.msra.mxu2 %v4909_v36  ;;  %5113 = vmatpush.msra.mxu3 %v13210_v11  ;;  %v13464_v36 = vand.u32 4294901760, %v8909_v21  ;;  %v13529_v48 = vsub.f32 %v8907_v62, %v13494_v22  ;;  %v3867_v33 = vpop.f32.mrf.mxu2  ;;  %v5186_v42 = vand.u32 4294901760, %v5185_v18  ;;  %v16660_v62 = vand.u32 4294901760, %v13547_v49 }
 0x2ce   :  { %5005 = vmatpush.msra.mxu1 %v13210_v11  ;;  %5126 = vmatpush.msrb.mxu0 %v13394_v32  ;;  %v16671_v11 = vand.u32 4294901760, %v13434_v59  ;;  %v16667_v23 = vand.u32 4294901760, %v13453_v24  ;;  %v5174_v34 = vand.u32 4294901760, %v5173_v28  ;;  %v8901_v28 = vld [vmem:[%s16505_s1 + $0x708] sm:$0xff] }
 0x2cf   :  { %5080 = vmatpush.msra.mxu2 %v4915_v25  ;;  %5115 = vmatpush.msra.mxu3 %v13229_v53  ;;  %v3671_v25 = vpop.f32.mrf.mxu3  ;;  %v16661_v8 = vand.u32 4294901760, %v13529_v48 }
 0x2d0   :  { %5082 = vmatmul.f32.vlgmr.msra.gmra.mxu2 %v13289_v37  ;;  %5128 = vmatpush.msrb.mxu0 %v13404_v39  ;;  %v5179_v5 = vsub.f32 %v13434_v59, %v16671_v11  ;;  %v3672_v15 = vadd.f32 %v3671_v25, %v3635_v57  ;;  %v13572_v57 = vand.u32 4294901760, %v8902_v60  ;;  %v13576_v25 = vsub.f32 %v8904_v52, %v13543_v40 }
 0x2d1   :  { %5267 = vmatpush.msrb.mxu2 %v13407_v4  ;;  %5007 = vmatpush.msra.mxu1 %v13229_v53  ;;  %v13497_v53 = vsub.f32 %v8909_v21, %v13464_v36  ;;  %v5210_v52 = vand.u32 4294901760, %v5209_v7  ;;  %v8929_v7 = vld [vmem:[%s16505_s1 + $0x7e8] sm:$0xff] }
 0x2d2   :  { %5117 = vmatpush.msra.mxu3 %v13242_v51  ;;  %5130 = vmatpush.msrb.mxu0 %v13417_v30  ;;  %v3713_v45 = vadd.f32 %v3712_v63, %v3672_v15  ;;  %v5180_v54 = vand.u32 4294901760, %v5179_v5  ;;  %v3975_v63 = vpop.f32.mrf.mxu0  ;;  %v5215_v5 = vsub.f32 %v13529_v48, %v16661_v8 }
 0x2d3   :  { %5119 = vmatmul.f32.vlgmr.msra.gmra.mxu3 %v13289_v37  ;;  %5270 = vmatpush.msrb.mxu2 %v13420_v41  ;;  %v8905_v37 = vld [vmem:[%s16505_s1 + $0x728] sm:$0xff]  ;;  %v16664_v3 = vand.u32 4294901760, %v13497_v53 }
 0x2d4   :  { %5320 = vmatpush.msrb.mxu3 %v13384_v13  ;;  %5009 = vmatpush.msra.mxu1 %v13242_v51  ;;  %v5191_v51 = vsub.f32 %v13453_v24, %v16667_v23  ;;  %v13525_v29 = vand.u32 4294901760, %v8905_v37  ;;  %v3814_v16 = vadd.f32 %v3813_v27, %v3713_v45  ;;  %v8900_v27 = vld [vmem:[%s16505_s1 + $0x700] sm:$0xff]  ;;  %v13602_v45 = vand.u32 4294901760, %v8901_v28 }
 0x2d5   :  { %5132 = vmatpush.msrb.mxu0 %v13427_v0  ;;  %5013 = vmatmul.f32.vlgmr.msra.gmra.mxu1 %v4816_v46  ;;  %v8866_v46 = vld [vmem:[%s16506_s0 + $0x70] sm:$0xff]  ;;  %v5203_v19 = vsub.f32 %v13497_v53, %v16664_v3 }
 0x2d6   :  { %5273 = vmatpush.msrb.mxu2 %v13434_v59  ;;  %5169 = vmatpush.msrb.mxu1 %v5168_v6  ;;  %v5192_v47 = vand.u32 4294901760, %v5191_v51  ;;  %v13554_v38 = vand.u32 4294901760, %v8866_v46  ;;  %v13564_v55 = vsub.f32 %v8905_v37, %v13525_v29  ;;  %v3868_v21 = vadd.f32 %v3867_v33, %v3814_v16  ;;  %v4012_v51 = vpop.f32.mrf.mxu1 }
 0x2d7   :  { %5322 = vmatpush.msrb.mxu3 %v13394_v32  ;;  %5134 = vmatpush.msrb.mxu0 %v13438_v31  ;;  %v3906_v58 = vpop.f32.mrf.mxu3  ;;  %v5204_v6 = vand.u32 4294901760, %v5203_v19  ;;  %v13592_v37 = vsub.f32 %v8903_v20, %v13560_v44  ;;  %v13610_v16 = vsub.f32 %v8902_v60, %v13572_v57  ;;  %v13614_v20 = vand.u32 4294901760, %v8900_v27 }
 0x2d8   :  { %5276 = vmatpush.msrb.mxu2 %v13448_v43  ;;  %5175 = vmatpush.msrb.mxu1 %v5174_v34  ;;  %v13584_v14 = vsub.f32 %v8866_v46, %v13554_v38  ;;  %v16659_v15 = vand.u32 4294901760, %v13564_v55  ;;  %v8931_v34 = vld [vmem:[%s16505_s1 + $0x7f8] sm:$0xff]  ;;  %v3907_v18 = vadd.f32 %v3906_v58, %v3868_v21  ;;  %v16658_v46 = vand.u32 4294901760, %v13576_v25 }
 0x2d9   :  { %5324 = vmatpush.msrb.mxu3 %v13404_v39  ;;  %5136 = vmatpush.msrb.mxu0 %v13464_v36  ;;  %v5216_v60 = vand.u32 4294901760, %v5215_v5  ;;  %v16662_v21 = vand.u32 4294901760, %v13592_v37  ;;  %v13630_v58 = vsub.f32 %v8901_v28, %v13602_v45 }
 0x2da   :  { %5279 = vmatpush.msrb.mxu2 %v13453_v24  ;;  %5181 = vmatpush.msrb.mxu1 %v5180_v54  ;;  %v5221_v54 = vsub.f32 %v13547_v49, %v16660_v62  ;;  %v3976_v50 = vadd.f32 %v3975_v63, %v3907_v18  ;;  %v16670_v33 = vand.u32 4294901760, %v13584_v14  ;;  %v5227_v19 = vsub.f32 %v13564_v55, %v16659_v15  ;;  %v4053_v63 = vpop.f32.mrf.mxu2 }
 0x2db   :  { %5326 = vmatpush.msrb.mxu3 %v13417_v30  ;;  %5138 = vmatpush.msrb.mxu0 %v13480_v26  ;;  %v5233_v5 = vsub.f32 %v13576_v25, %v16658_v46  ;;  %v16665_v18 = vand.u32 4294901760, %v13610_v16  ;;  %v5239_v15 = vsub.f32 %v13592_v37, %v16662_v21  ;;  %v13660_v62 = vand.u32 4294901760, %v8929_v7 }
 0x2dc   :  { %5282 = vmatpush.msrb.mxu2 %v13470_v12  ;;  %5187 = vmatpush.msrb.mxu1 %v5186_v42  ;;  %v13617_v42 = vand.u32 4294901760, %v8931_v34  ;;  %v5158_v28 = vsub.f32 %v13584_v14, %v16670_v33  ;;  %v5228_v46 = vand.u32 4294901760, %v5227_v19 }
 0x2dd   :  { %5328 = vmatpush.msrb.mxu3 %v13427_v0  ;;  %5140 = vmatpush.msrb.mxu0 %v13494_v22  ;;  %v5234_v19 = vand.u32 4294901760, %v5233_v5  ;;  %v5245_v21 = vsub.f32 %v13610_v16, %v16665_v18  ;;  %v8926_v5 = vld [vmem:[%s16505_s1 + $0x7d0] sm:$0xff]  ;;  %v13686_v18 = vsub.f32 %v8929_v7, %v13660_v62 }
 0x2de   :  { %5285 = vmatpush.msrb.mxu2 %v13497_v53  ;;  %5193 = vmatpush.msrb.mxu1 %v5192_v47  ;;  %v8930_v47 = vld [vmem:[%s16505_s1 + $0x7f0] sm:$0xff]  ;;  %v5159_v2 = vand.u32 4294901760, %v5158_v28 }
 0x2df   :  { %5330 = vmatpush.msrb.mxu3 %v13438_v31  ;;  %5142 = vmatpush.msrb.mxu0 %v13510_v9 }
 0x2e0   :  { %5288 = vmatpush.msrb.mxu2 %v13513_v1  ;;  %5199 = vmatpush.msrb.mxu1 %v5198_v56  ;;  %v4013_v56 = vadd.f32 %v4012_v51, %v3976_v50  ;;  %v13640_v51 = vand.u32 4294901760, %v8930_v47  ;;  %v8928_v50 = vld [vmem:[%s16505_s1 + $0x7e0] sm:$0xff] }
 0x2e1   :  { %5332 = vmatpush.msrb.mxu3 %v13464_v36  ;;  %5144 = vmatpush.msrb.mxu0 %v13525_v29 }
 0x2e2   :  { %5291 = vmatpush.msrb.mxu2 %v13529_v48  ;;  %5205 = vmatpush.msrb.mxu1 %v5204_v6  ;;  %v5222_v6 = vand.u32 4294901760, %v5221_v54  ;;  %v13651_v54 = vsub.f32 %v8931_v34, %v13617_v42  ;;  %v4054_v8 = vadd.f32 %v4053_v63, %v4013_v56  ;;  %v8927_v34 = vld [vmem:[%s16505_s1 + $0x7d8] sm:$0xff]  ;;  %v13673_v56 = vsub.f32 %v8930_v47, %v13640_v51  ;;  %v4208_v28 = vpop.f32.mrf.mxu0 }
 0x2e3   :  { %5334 = vmatpush.msrb.mxu3 %v13480_v26  ;;  %5146 = vmatpush.msrb.mxu0 %v13543_v40  ;;  %v13675_v63 = vand.u32 4294901760, %v8928_v50  ;;  %v5240_v47 = vand.u32 4294901760, %v5239_v15  ;;  %v13688_v61 = vand.u32 4294901760, %v8927_v34  ;;  %v5246_v15 = vand.u32 4294901760, %v5245_v21 }
 0x2e4   :  { %5294 = vmatpush.msrb.mxu2 %v13547_v49  ;;  %5211 = vmatpush.msrb.mxu1 %v5210_v52  ;;  %v13648_v52 = vsub.f32 %v8900_v27, %v13614_v20  ;;  %v16669_v27 = vand.u32 4294901760, %v13630_v58  ;;  %v16672_v3 = vand.u32 4294901760, %v13651_v54  ;;  %v16675_v7 = vand.u32 4294901760, %v13673_v56 }
 0x2e5   :  { %5336 = vmatpush.msrb.mxu3 %v13494_v22  ;;  %5148 = vmatpush.msrb.mxu0 %v13560_v44 }
 0x2e6   :  { %5297 = vmatpush.msrb.mxu2 %v13564_v55  ;;  %5217 = vmatpush.msrb.mxu1 %v5216_v60  ;;  %v4154_v60 = vpop.f32.mrf.mxu3  ;;  %v5251_v10 = vsub.f32 %v13630_v58, %v16669_v27  ;;  %v5508_v27 = vsub.f32 %v13651_v54, %v16672_v3  ;;  %v8924_v3 = vld [vmem:[%s16505_s1 + $0x7c0] sm:$0xff]  ;;  %v5514_v4 = vsub.f32 %v13673_v56, %v16675_v7 }
 0x2e7   :  { %5338 = vmatpush.msrb.mxu3 %v13510_v9  ;;  %5150 = vmatpush.msrb.mxu0 %v13572_v57  ;;  %v4155_v23 = vadd.f32 %v4154_v60, %v4054_v8  ;;  %v13701_v8 = vsub.f32 %v8928_v50, %v13675_v63  ;;  %v13703_v60 = vand.u32 4294901760, %v8926_v5  ;;  %v16674_v50 = vand.u32 4294901760, %v13686_v18 }
 0x2e8   :  { %5300 = vmatpush.msrb.mxu2 %v13576_v25  ;;  %5223 = vmatpush.msrb.mxu1 %v5222_v6  ;;  %v16673_v6 = vand.u32 4294901760, %v13648_v52  ;;  %v5509_v41 = vand.u32 4294901760, %v5508_v27  ;;  %v8922_v27 = vld [vmem:[%s16505_s1 + $0x7b0] sm:$0xff] }
 0x2e9   :  { %5340 = vmatpush.msrb.mxu3 %v13525_v29  ;;  %5152 = vmatpush.msrb.mxu0 %v13602_v45  ;;  %v4209_v21 = vadd.f32 %v4208_v28, %v4155_v23  ;;  %v16676_v23 = vand.u32 4294901760, %v13701_v8  ;;  %v16945_v28 = vand.u32 4294901760, %v13434_v59 }
 0x2ea   :  { %5303 = vmatpush.msrb.mxu2 %v13592_v37  ;;  %5229 = vmatpush.msrb.mxu1 %v5228_v46  ;;  %v8925_v46 = vld [vmem:[%s16505_s1 + $0x7c8] sm:$0xff] }
 0x2eb   :  { %5342 = vmatpush.msrb.mxu3 %v13543_v40  ;;  %5154 = vmatpush.msrb.mxu0 %v13614_v20  ;;  %v13718_v11 = vand.u32 4294901760, %v8925_v46 }
 0x2ec   :  { %5306 = vmatpush.msrb.mxu2 %v13610_v16  ;;  %5235 = vmatpush.msrb.mxu1 %v5234_v19  ;;  %v5257_v19 = vsub.f32 %v13648_v52, %v16673_v6  ;;  %v4247_v33 = vpop.f32.mrf.mxu1  ;;  %v5252_v6 = vand.u32 4294901760, %v5251_v10  ;;  %v13739_v10 = vand.u32 4294901760, %v8924_v3 }
 0x2ed   :  { %5344 = vmatpush.msrb.mxu3 %v13560_v44  ;;  %5160 = vmatmul.f32.vlgmr.msrb.gmra.mxu0 %v5159_v2  ;;  %v13716_v2 = vsub.f32 %v8927_v34, %v13688_v61  ;;  %16944 = vst [vmem:[#allocation3_spill] sm:$0xff] %v13718_v11  ;;  %v13732_v34 = vsub.f32 %v8926_v5, %v13703_v60 }
 0x2ee   :  { %5309 = vmatpush.msrb.mxu2 %v13630_v58  ;;  %5361 = vmatpush.msra.mxu0 %v5166_v17  ;;  %v4248_v17 = vadd.f32 %v4247_v33, %v4209_v21  ;;  %v5258_v33 = vand.u32 4294901760, %v5257_v19  ;;  %v5520_v5 = vsub.f32 %v13686_v18, %v16674_v50  ;;  %v13749_v21 = vsub.f32 %v8925_v46, %v13718_v11 }
 0x2ef   :  { %5241 = vmatpush.msrb.mxu1 %v5240_v47  ;;  %5346 = vmatpush.msrb.mxu3 %v13572_v57  ;;  %v8923_v47 = vld [vmem:[%s16505_s1 + $0x7b8] sm:$0xff]  ;;  %v16946_v19 = vand.u32 4294901760, %v13584_v14  ;;  %v5515_v50 = vand.u32 4294901760, %v5514_v4  ;;  %v5526_v46 = vsub.f32 %v13701_v8, %v16676_v23  ;;  %v16948_v4 = vand.u32 4294901760, %v13453_v24 }
 0x2f0   :  { %5312 = vmatpush.msrb.mxu2 %v13648_v52  ;;  %5365 = vmatpush.msra.mxu0 %v5172_v35  ;;  %v4316_v35 = vpop.f32.mrf.mxu2  ;;  %v13755_v59 = vand.u32 4294901760, %v8923_v47  ;;  %v16950_v23 = vand.u32 4294901760, %v13470_v12  ;;  %v8918_v12 = vld [vmem:[%s16505_s1 + $0x790] sm:$0xff] }
 0x2f1   :  { %5247 = vmatpush.msrb.mxu1 %v5246_v15  ;;  %5348 = vmatpush.msrb.mxu3 %v13602_v45  ;;  %v4317_v7 = vadd.f32 %v4316_v35, %v4248_v17  ;;  %v16677_v15 = vand.u32 4294901760, %v13732_v34  ;;  %v5521_v17 = vand.u32 4294901760, %v5520_v5  ;;  %v16949_v35 = vand.u32 4294901760, %v13716_v2 }
 0x2f2   :  { %5315 = vmatmul.f32.vlgmr.msrb.gmra.mxu2 %v13584_v14  ;;  %5369 = vmatpush.msra.mxu0 %v16945_v28  ;;  %v16947_v28 = vand.u32 4294901760, %v13448_v43  ;;  %v4353_v14 = vpop.f32.mrf.mxu3  ;;  %v13772_v43 = vand.u32 4294901760, %v8922_v27 }
 0x2f3   :  { %5465 = vmatpush.msra.mxu2 %v13617_v42  ;;  %5253 = vmatpush.msrb.mxu1 %v5252_v6  ;;  %v8921_v6 = vld [vmem:[%s16505_s1 + $0x7a8] sm:$0xff]  ;;  %v4354_v5 = vadd.f32 %v4353_v14, %v4317_v7  ;;  %v16951_v14 = vand.u32 4294901760, %v13749_v21 }
 0x2f4   :  { %5350 = vmatpush.msrb.mxu3 %v13614_v20  ;;  %5373 = vmatpush.msra.mxu0 %v16947_v28  ;;  %v5532_v28 = vsub.f32 %v13716_v2, %v16949_v35  ;;  %v13788_v24 = vand.u32 4294901760, %v8921_v6  ;;  %v9079_v35 = vld [vmem:[%s16508_s3 + $0x2] ss:$0 sm:$0xff]  ;;  %v13805_v7 = vsub.f32 %v8922_v27, %v13772_v43 }
 0x2f5   :  { %5354 = vmatmul.f32.vlgmr.msrb.gmra.mxu3 %v16946_v19  ;;  %5467 = vmatpush.msra.mxu2 %v13640_v51  ;;  %v13770_v19 = vsub.f32 %v8924_v3, %v13739_v10  ;;  %v13786_v3 = vsub.f32 %v8923_v47, %v13755_v59  ;;  %v8919_v47 = vld [vmem:[%s16505_s1 + $0x798] sm:$0xff] }
 0x2f6   :  { %5510 = vmatpush.msra.mxu3 %v5509_v41  ;;  %5259 = vmatpush.msrb.mxu1 %v5258_v33  ;;  %v8920_v41 = vld [vmem:[%s16505_s1 + $0x7a0] sm:$0xff]  ;;  %v5527_v33 = vand.u32 4294901760, %v5526_v46  ;;  %v5533_v46 = vand.u32 4294901760, %v5532_v28  ;;  %v4361_v28 = vmul.f32 %v9079_v35, %v4354_v5  ;;  %v8867_v5 = vld [vmem:[%s16506_s0 + $0x78] sm:$0xff] }
 0x2f7   :  { %5377 = vmatpush.msra.mxu0 %v16948_v4  ;;  %5261 = vmatmul.f32.vlgmr.msrb.gmra.mxu1 %v13554_v38  ;;  %v5538_v4 = vsub.f32 %v13732_v34, %v16677_v15  ;;  %v5544_v15 = vsub.f32 %v13749_v21, %v16951_v14  ;;  %v8917_v14 = vld [vmem:[%s16505_s1 + $0x788] sm:$0xff]  ;;  %v16956_v35 = vand.u32 4294901760, %v13786_v3 }
 0x2f8   :  { %5469 = vmatpush.msra.mxu2 %v13660_v62  ;;  %5428 = vmatpush.msra.mxu1 %v13384_v13  ;;  %v13821_v13 = vsub.f32 %v8921_v6, %v13788_v24  ;;  %v13855_v27 = vand.u32 4294901760, %v8917_v14 }
 0x2f9   :  { %5516 = vmatpush.msra.mxu3 %v5515_v50  ;;  %5381 = vmatpush.msra.mxu0 %v16950_v23  ;;  %v13807_v50 = vand.u32 4294901760, %v8920_v41  ;;  %v16952_v23 = vand.u32 4294901760, %v13497_v53  ;;  %v16953_v53 = vand.u32 4294901760, %v13513_v1  ;;  %v5545_v1 = vand.u32 4294901760, %v5544_v15 }
 0x2fa   :  { %5471 = vmatpush.msra.mxu2 %v13675_v63  ;;  %5430 = vmatpush.msra.mxu1 %v13394_v32  ;;  %v13823_v32 = vand.u32 4294901760, %v8919_v47  ;;  %v13862_v15 = vand.u32 4294901760, %v8867_v5 }
 0x2fb   :  { %5522 = vmatpush.msra.mxu3 %v5521_v17  ;;  %5385 = vmatpush.msra.mxu0 %v16952_v23  ;;  %v5539_v17 = vand.u32 4294901760, %v5538_v4  ;;  %v16954_v23 = vand.u32 4294901760, %v13770_v19  ;;  %v16955_v4 = vand.u32 4294901760, %v13529_v48  ;;  %v4362_v48 = vsel %vm1463_vm0, %v4361_v28, 0.0 }
 0x2fc   :  { %5473 = vmatpush.msra.mxu2 %v13688_v61  ;;  %5432 = vmatpush.msra.mxu1 %v13404_v39  ;;  %v13837_v39 = vsub.f32 %v8920_v41, %v13807_v50  ;;  %v5556_v41 = vsub.f32 %v13786_v3, %v16956_v35  ;;  %v16960_v28 = vand.u32 4294901760, %v13821_v13 }
 0x2fd   :  { %5528 = vmatpush.msra.mxu3 %v5527_v33  ;;  %5389 = vmatpush.msra.mxu0 %v16953_v53  ;;  %v5550_v6 = vsub.f32 %v13770_v19, %v16954_v23  ;;  %v13839_v33 = vand.u32 4294901760, %v8918_v12  ;;  %v13853_v23 = vsub.f32 %v8919_v47, %v13823_v32 }
 0x2fe   :  { %5475 = vmatpush.msra.mxu2 %v13703_v60  ;;  %5434 = vmatpush.msra.mxu1 %v13417_v30  ;;  %v8916_v30 = vld [vmem:[%s16505_s1 + $0x780] sm:$0xff]  ;;  %v5573_v53 = vand.u32 4294901760, %v13837_v39 }
 0x2ff   :  { %5534 = vmatpush.msra.mxu3 %v5533_v46  ;;  %5393 = vmatpush.msra.mxu0 %v16955_v4  ;;  %v16957_v46 = vand.u32 4294901760, %v13547_v49  ;;  %v5551_v47 = vand.u32 4294901760, %v5550_v6  ;;  %v16958_v4 = vand.u32 4294901760, %v13805_v7  ;;  %v16959_v49 = vand.u32 4294901760, %v13564_v55 }
 0x300   :  { %5477 = vmatpush.msra.mxu2 %v13718_v11  ;;  %5436 = vmatpush.msra.mxu1 %v13427_v0  ;;  %v13872_v11 = vsub.f32 %v8918_v12, %v13839_v33  ;;  %v13875_v0 = vand.u32 4294901760, %v8916_v30  ;;  %v5568_v6 = vsub.f32 %v13821_v13, %v16960_v28  ;;  %v16961_v55 = vand.u32 4294901760, %v13576_v25 }
 0x301   :  { %5540 = vmatpush.msra.mxu3 %v5539_v17  ;;  %5397 = vmatpush.msra.mxu0 %v16957_v46  ;;  %v5562_v35 = vsub.f32 %v13805_v7, %v16958_v4  ;;  %v5557_v17 = vand.u32 4294901760, %v5556_v41  ;;  %v5579_v46 = vand.u32 4294901760, %v13853_v23  ;;  %v13884_v4 = vsub.f32 %v8917_v14, %v13855_v27 }
 0x302   :  { %5479 = vmatpush.msra.mxu2 %v13739_v10  ;;  %5438 = vmatpush.msra.mxu1 %v13438_v31  ;;  %v13889_v31 = vsub.f32 %v8867_v5, %v13862_v15  ;;  %v5585_v41 = vand.u32 4294901760, %v13872_v11  ;;  %v16962_v14 = vand.u32 4294901760, %v13592_v37  ;;  %v5569_v25 = vand.u32 4294901760, %v5568_v6 }
 0x303   :  { %5546 = vmatpush.msra.mxu3 %v5545_v1  ;;  %4363 = vadd.xlane.f32.xlu1 %v4362_v48  ;;  %v5563_v12 = vand.u32 4294901760, %v5562_v35  ;;  %v5574_v1 = vsub.f32 %v13837_v39, %v5573_v53  ;;  %v5580_v5 = vsub.f32 %v13853_v23, %v5579_v46  ;;  %v5591_v48 = vand.u32 4294901760, %v13884_v4 }
 0x304   :  { %5401 = vmatpush.msra.mxu0 %v16959_v49  ;;  %5440 = vmatpush.msra.mxu1 %v13464_v36  ;;  %v13900_v36 = vsub.f32 %v8916_v30, %v13875_v0  ;;  %v16963_v30 = vand.u32 4294901760, %v13610_v16  ;;  %v5586_v37 = vsub.f32 %v13872_v11, %v5585_v41 }
 0x305   :  { %5481 = vmatpush.msra.mxu2 %v13755_v59  ;;  %5552 = vmatpush.msra.mxu3 %v5551_v47  ;;  %v5575_v47 = vand.u32 4294901760, %v5574_v1  ;;  %v5581_v49 = vand.u32 4294901760, %v5580_v5  ;;  %v5592_v16 = vsub.f32 %v13884_v4, %v5591_v48 }
 0x306   :  { %5405 = vmatpush.msra.mxu0 %v16961_v55  ;;  %5442 = vmatpush.msra.mxu1 %v13480_v26  ;;  %v5498_v26 = vand.u32 4294901760, %v13889_v31  ;;  %v5597_v35 = vand.u32 4294901760, %v13900_v36  ;;  %v5587_v28 = vand.u32 4294901760, %v5586_v37  ;;  %v8943_v37 = vld [vmem:[%s16505_s1 + $0x828] sm:$0xff] }
 0x307   :  { %5483 = vmatpush.msra.mxu2 %v13772_v43  ;;  %5558 = vmatpush.msra.mxu3 %v5557_v17  ;;  %v16965_v17 = vand.u32 4294901760, %v13648_v52  ;;  %v16966_v52 = vand.u32 4294901760, %v13651_v54 }
 0x308   :  { %5409 = vmatpush.msra.mxu0 %v16962_v14  ;;  %5444 = vmatpush.msra.mxu1 %v13494_v22  ;;  %v16964_v22 = vand.u32 4294901760, %v13630_v58  ;;  %v5598_v58 = vsub.f32 %v13900_v36, %v5597_v35 }
 0x309   :  { %5485 = vmatpush.msra.mxu2 %v13788_v24  ;;  %5564 = vmatpush.msra.mxu3 %v5563_v12 }
 0x30a   :  { %5413 = vmatpush.msra.mxu0 %v16963_v30  ;;  %5446 = vmatpush.msra.mxu1 %v13510_v9  ;;  %v5499_v9 = vsub.f32 %v13889_v31, %v5498_v26 }
 0x30b   :  { %5487 = vmatpush.msra.mxu2 %v13807_v50  ;;  %5570 = vmatpush.msra.mxu3 %v5569_v25  ;;  %v8944_v25 = vld [vmem:[%s16505_s1 + $0x830] sm:$0xff] }
 0x30c   :  { %5417 = vmatpush.msra.mxu0 %v16964_v22  ;;  %5448 = vmatpush.msra.mxu1 %v13525_v29  ;;  %v5593_v29 = vand.u32 4294901760, %v5592_v16  ;;  %v5500_v6 = vand.u32 4294901760, %v5499_v9 }
 0x30d   :  { %5489 = vmatpush.msra.mxu2 %v13823_v32  ;;  %5576 = vmatpush.msra.mxu3 %v5575_v47 }
 0x30e   :  { %5421 = vmatpush.msra.mxu0 %v16965_v17  ;;  %5450 = vmatpush.msra.mxu1 %v13543_v40  ;;  %v5599_v40 = vand.u32 4294901760, %v5598_v58  ;;  %v8941_v58 = vld [vmem:[%s16505_s1 + $0x818] sm:$0xff] }
 0x30f   :  { %5491 = vmatpush.msra.mxu2 %v13839_v33  ;;  %5582 = vmatpush.msra.mxu3 %v5581_v49  ;;  %v14127_v49 = vand.u32 4294901760, %v8944_v25 }
 0x310   :  { %5423 = vmatmul.f32.vlgmr.msra.gmra.mxu0 %v13554_v38  ;;  %5452 = vmatpush.msra.mxu1 %v13560_v44  ;;  %v16967_v44 = vand.u32 4294901760, %v13673_v56 }
 0x311   :  { %5608 = vmatpush.msrb.mxu0 %v13651_v54  ;;  %5493 = vmatpush.msra.mxu2 %v13855_v27  ;;  %v8952_v54 = vld [vmem:[%s16505_s1 + $0x870] sm:$0xff] }
 0x312   :  { %5588 = vmatpush.msra.mxu3 %v5587_v28  ;;  %5454 = vmatpush.msra.mxu1 %v13572_v57  ;;  %v16968_v57 = vand.u32 4294901760, %v13686_v18  ;;  %v14141_v28 = vand.u32 4294901760, %v8943_v37 }
 0x313   :  { %5611 = vmatpush.msrb.mxu0 %v13673_v56  ;;  %5495 = vmatpush.msra.mxu2 %v13875_v0  ;;  %v16976_v56 = vand.u32 4294901760, %v13805_v7 }
 0x314   :  { %5594 = vmatpush.msra.mxu3 %v5593_v29  ;;  %5501 = vmatmul.f32.vlgmr.msra.gmra.mxu2 %v5500_v6 }
 0x315   :  { %5614 = vmatpush.msrb.mxu0 %v13686_v18  ;;  %5702 = vmatpush.msrb.mxu2 %v16966_v52  ;;  %v16974_v18 = vld [vmem:[#allocation3_spill] sm:$0xff]  ;;  %v14159_v52 = vsub.f32 %v8944_v25, %v14127_v49 }
 0x316   :  { %5456 = vmatpush.msra.mxu1 %v13602_v45  ;;  %5600 = vmatpush.msra.mxu3 %v5599_v40  ;;  %v16969_v45 = vand.u32 4294901760, %v13701_v8 }
 0x317   :  { %5617 = vmatpush.msrb.mxu0 %v13701_v8  ;;  %5602 = vmatmul.f32.vlgmr.msra.gmra.mxu3 %v13862_v15  ;;  %v8951_v8 = vld [vmem:[%s16505_s1 + $0x868] sm:$0xff] }
 0x318   :  { %5706 = vmatpush.msrb.mxu2 %v16967_v44  ;;  %5769 = vmatpush.msrb.mxu3 %v13617_v42 }
 0x319   :  { %5458 = vmatpush.msra.mxu1 %v13614_v20  ;;  %5620 = vmatpush.msrb.mxu0 %v13716_v2  ;;  %v16971_v20 = vand.u32 4294901760, %v13732_v34 }
 0x31a   :  { %5460 = vmatmul.f32.vlgmr.msra.gmra.mxu1 %v13554_v38  ;;  %5710 = vmatpush.msrb.mxu2 %v16968_v57  ;;  %v16970_v38 = vand.u32 4294901760, %v13716_v2  ;;  %v14009_v2 = vand.u32 4294901760, %v8952_v54  ;;  %v8940_v57 = vld [vmem:[%s16505_s1 + $0x810] sm:$0xff] }
 0x31b   :  { %5661 = vmatpush.msrb.mxu1 %v13617_v42  ;;  %5771 = vmatpush.msrb.mxu3 %v13640_v51  ;;  %v16973_v42 = vand.u32 4294901760, %v13770_v19 }
 0x31c   :  { %5623 = vmatpush.msrb.mxu0 %v13732_v34  ;;  %5714 = vmatpush.msrb.mxu2 %v16969_v45  ;;  %v8950_v34 = vld [vmem:[%s16505_s1 + $0x860] sm:$0xff] }
 0x31d   :  { %5663 = vmatpush.msrb.mxu1 %v13640_v51  ;;  %5773 = vmatpush.msrb.mxu3 %v13660_v62  ;;  %v16975_v51 = vand.u32 4294901760, %v13786_v3 }
 0x31e   :  { %5626 = vmatpush.msrb.mxu0 %v13749_v21  ;;  %5718 = vmatpush.msrb.mxu2 %v16970_v38  ;;  %v14170_v38 = vand.u32 4294901760, %v8941_v58 }
 0x31f   :  { %5665 = vmatpush.msrb.mxu1 %v13660_v62  ;;  %5775 = vmatpush.msrb.mxu3 %v13675_v63  ;;  %v16972_v62 = vand.u32 4294901760, %v13749_v21 }
 0x320   :  { %5629 = vmatpush.msrb.mxu0 %v13770_v19  ;;  %5722 = vmatpush.msrb.mxu2 %v16971_v20  ;;  %v14032_v19 = vand.u32 4294901760, %v8950_v34 }
 0x321   :  { %5667 = vmatpush.msrb.mxu1 %v13675_v63  ;;  %5777 = vmatpush.msrb.mxu3 %v13688_v61 }
 0x322   :  { %5632 = vmatpush.msrb.mxu0 %v13786_v3  ;;  %5726 = vmatpush.msrb.mxu2 %v16972_v62  ;;  %v8948_v3 = vld [vmem:[%s16505_s1 + $0x850] sm:$0xff]  ;;  %v14174_v62 = vsub.f32 %v8943_v37, %v14141_v28 }
 0x323   :  { %5669 = vmatpush.msrb.mxu1 %v13688_v61  ;;  %5779 = vmatpush.msrb.mxu3 %v13703_v60  ;;  %v8953_v61 = vld [vmem:[%s16505_s1 + $0x878] sm:$0xff] }
 0x324   :  { %5635 = vmatpush.msrb.mxu0 %v13805_v7  ;;  %5730 = vmatpush.msrb.mxu2 %v16973_v42  ;;  %v13999_v63 = vand.u32 4294901760, %v8953_v61 }
 0x325   :  { %5671 = vmatpush.msrb.mxu1 %v13703_v60  ;;  %5781 = vmatpush.msrb.mxu3 %v16974_v18  ;;  %v16977_v60 = vand.u32 4294901760, %v13821_v13 }
 0x326   :  { %5638 = vmatpush.msrb.mxu0 %v13821_v13  ;;  %5734 = vmatpush.msrb.mxu2 %v16975_v51  ;;  %v14022_v21 = vsub.f32 %v8953_v61, %v13999_v63  ;;  %v14185_v51 = vand.u32 4294901760, %v8940_v57 }
 0x327   :  { %5673 = vmatpush.msrb.mxu1 %v16974_v18  ;;  %5783 = vmatpush.msrb.mxu3 %v13739_v10  ;;  %v8939_v18 = vld [vmem:[%s16505_s1 + $0x808] sm:$0xff] }
 0x328   :  { %5641 = vmatpush.msrb.mxu0 %v13837_v39  ;;  %5738 = vmatpush.msrb.mxu2 %v16976_v56  ;;  %v5933_v13 = vand.u32 4294901760, %v14022_v21  ;;  %v8947_v39 = vld [vmem:[%s16505_s1 + $0x848] sm:$0xff]  ;;  %v14217_v25 = vsub.f32 %v8940_v57, %v14185_v51 }
 0x329   :  { %5675 = vmatpush.msrb.mxu1 %v13739_v10  ;;  %5785 = vmatpush.msrb.mxu3 %v13755_v59  ;;  %v14019_v10 = vand.u32 4294901760, %v8951_v8 }
 0x32a   :  { %5644 = vmatpush.msrb.mxu0 %v13853_v23  ;;  %5742 = vmatpush.msrb.mxu2 %v16977_v60  ;;  %v8946_v23 = vld [vmem:[%s16505_s1 + $0x840] sm:$0xff]  ;;  %v8969_v60 = vld [vmem:[%s16505_s1 + $0x8f8] sm:$0xff] }
 0x32b   :  { %5677 = vmatpush.msrb.mxu1 %v13755_v59  ;;  %5787 = vmatpush.msrb.mxu3 %v13772_v43  ;;  %v8949_v59 = vld [vmem:[%s16505_s1 + $0x858] sm:$0xff]  ;;  %v14049_v7 = vsub.f32 %v8951_v8, %v14019_v10 }
 0x32c   :  { %5647 = vmatpush.msrb.mxu0 %v13872_v11  ;;  %5746 = vmatpush.msrb.mxu2 %v5573_v53  ;;  %v14058_v11 = vand.u32 4294901760, %v8948_v3  ;;  %v14062_v53 = vsub.f32 %v8950_v34, %v14032_v19 }
 0x32d   :  { %5679 = vmatpush.msrb.mxu1 %v13772_v43  ;;  %5789 = vmatpush.msrb.mxu3 %v13788_v24  ;;  %v14035_v43 = vsub.f32 %v8952_v54, %v14009_v2  ;;  %v5945_v55 = vand.u32 4294901760, %v14049_v7  ;;  %v16684_v54 = vand.u32 4294901760, %v14159_v52 }
 0x32e   :  { %5650 = vmatpush.msrb.mxu0 %v13884_v4  ;;  %5750 = vmatpush.msrb.mxu2 %v5579_v46  ;;  %v14070_v46 = vand.u32 4294901760, %v8947_v39  ;;  %v14084_v4 = vand.u32 4294901760, %v8946_v23 }
 0x32f   :  { %5681 = vmatpush.msrb.mxu1 %v13788_v24  ;;  %5791 = vmatpush.msrb.mxu3 %v13807_v50  ;;  %v14045_v24 = vand.u32 4294901760, %v8949_v59 }
 0x330   :  { %5653 = vmatpush.msrb.mxu0 %v13900_v36  ;;  %5754 = vmatpush.msrb.mxu2 %v5585_v41  ;;  %v5951_v41 = vand.u32 4294901760, %v14062_v53  ;;  %v14096_v36 = vsub.f32 %v8948_v3, %v14058_v11  ;;  %v14101_v14 = vsub.f32 %v8947_v39, %v14070_v46  ;;  %v14117_v47 = vsub.f32 %v8946_v23, %v14084_v4  ;;  %v8938_v23 = vld [vmem:[%s16505_s1 + $0x800] sm:$0xff] }
 0x331   :  { %5683 = vmatpush.msrb.mxu1 %v13807_v50  ;;  %5793 = vmatpush.msrb.mxu3 %v13823_v32  ;;  %v5939_v50 = vand.u32 4294901760, %v14035_v43  ;;  %v14079_v12 = vsub.f32 %v8949_v59, %v14045_v24  ;;  %v14200_v59 = vand.u32 4294901760, %v8939_v18  ;;  %v16682_v3 = vand.u32 4294901760, %v14174_v62 }
 0x332   :  { %5656 = vmatmul.f32.vlgmr.msrb.gmra.mxu0 %v13889_v31  ;;  %5758 = vmatpush.msrb.mxu2 %v5591_v48  ;;  %v5946_v48 = vsub.f32 %v14049_v7, %v5945_v55  ;;  %v5952_v22 = vsub.f32 %v14062_v53, %v5951_v41  ;;  %v16689_v16 = vand.u32 4294901760, %v14101_v14  ;;  %v14204_v39 = vsub.f32 %v8941_v58, %v14170_v38 }
 0x333   :  { %5891 = vmatpush.msra.mxu0 %v13999_v63  ;;  %5685 = vmatpush.msrb.mxu1 %v13823_v32  ;;  %v5934_v32 = vsub.f32 %v14022_v21, %v5933_v13  ;;  %v5940_v1 = vsub.f32 %v14035_v43, %v5939_v50  ;;  %v14226_v37 = vand.u32 4294901760, %v8938_v23 }
 0x334   :  { %5795 = vmatpush.msrb.mxu3 %v13839_v33  ;;  %5762 = vmatpush.msrb.mxu2 %v5597_v35  ;;  %v5947_v9 = vand.u32 4294901760, %v5946_v48  ;;  %v5953_v29 = vand.u32 4294901760, %v5952_v22  ;;  %v5970_v44 = vsub.f32 %v14101_v14, %v16689_v16  ;;  %v8968_v48 = vld [vmem:[%s16505_s1 + $0x8f0] sm:$0xff]  ;;  %v5994_v22 = vsub.f32 %v14174_v62, %v16682_v3 }
 0x335   :  { %5893 = vmatpush.msra.mxu0 %v14009_v2  ;;  %5687 = vmatpush.msrb.mxu1 %v13839_v33  ;;  %v8945_v33 = vld [vmem:[%s16505_s1 + $0x838] sm:$0xff]  ;;  %v5935_v5 = vand.u32 4294901760, %v5934_v32  ;;  %v5941_v35 = vand.u32 4294901760, %v5940_v1  ;;  %v14241_v58 = vand.u32 4294901760, %v8968_v48 }
 0x336   :  { %5797 = vmatpush.msrb.mxu3 %v13855_v27  ;;  %5764 = vmatmul.f32.vlgmr.msrb.gmra.mxu2 %v13862_v15  ;;  %v14111_v30 = vand.u32 4294901760, %v8945_v33  ;;  %v5971_v8 = vand.u32 4294901760, %v5970_v44  ;;  %v16683_v44 = vand.u32 4294901760, %v14217_v25 }
 0x337   :  { %5895 = vmatpush.msra.mxu0 %v14019_v10  ;;  %6034 = vmatpush.msra.mxu2 %v14022_v21 }
 0x338   :  { %5689 = vmatpush.msrb.mxu1 %v13855_v27  ;;  %5799 = vmatpush.msrb.mxu3 %v13875_v0  ;;  %v5957_v27 = vand.u32 4294901760, %v14079_v12  ;;  %v14144_v31 = vsub.f32 %v8945_v33, %v14111_v30  ;;  %v5988_v33 = vsub.f32 %v14159_v52, %v16684_v54 }
 0x339   :  { %5897 = vmatpush.msra.mxu0 %v14032_v19  ;;  %5801 = vmatmul.f32.vlgmr.msrb.gmra.mxu3 %v13862_v15  ;;  %v16693_v15 = vand.u32 4294901760, %v14096_v36 }
 0x33a   :  { %6037 = vmatpush.msra.mxu2 %v14035_v43  ;;  %6087 = vmatpush.msra.mxu3 %v13999_v63  ;;  %v5958_v17 = vsub.f32 %v14079_v12, %v5957_v27  ;;  %v16685_v20 = vand.u32 4294901760, %v14144_v31  ;;  %v8960_v43 = vld [vmem:[%s16505_s1 + $0x8b0] sm:$0xff] }
 0x33b   :  { %5691 = vmatpush.msrb.mxu1 %v13875_v0  ;;  %5899 = vmatpush.msra.mxu0 %v14045_v24  ;;  %v8942_v0 = vld [vmem:[%s16505_s1 + $0x820] sm:$0xff]  ;;  %v5964_v6 = vsub.f32 %v14096_v36, %v16693_v15 }
 0x33c   :  { %5695 = vmatmul.f32.vlgmr.msrb.gmra.mxu1 %v5498_v26  ;;  %6040 = vmatpush.msra.mxu2 %v14049_v7  ;;  %v16687_v26 = vand.u32 4294901760, %v14117_v47  ;;  %v14156_v40 = vand.u32 4294901760, %v8942_v0  ;;  %v5959_v45 = vand.u32 4294901760, %v5958_v17  ;;  %v5982_v34 = vsub.f32 %v14144_v31, %v16685_v20  ;;  %v8967_v17 = vld [vmem:[%s16505_s1 + $0x8e8] sm:$0xff] }
 0x33d   :  { %5936 = vmatpush.msra.mxu1 %v5935_v5  ;;  %6089 = vmatpush.msra.mxu3 %v14009_v2  ;;  %v5965_v61 = vand.u32 4294901760, %v5964_v6  ;;  %v14219_v5 = vand.u32 4294901760, %v8969_v60 }
 0x33e   :  { %5901 = vmatpush.msra.mxu0 %v14058_v11  ;;  %6043 = vmatpush.msra.mxu2 %v14062_v53  ;;  %v5976_v42 = vsub.f32 %v14117_v47, %v16687_v26  ;;  %v14189_v56 = vsub.f32 %v8942_v0, %v14156_v40  ;;  %v16680_v0 = vand.u32 4294901760, %v14204_v39  ;;  %v8962_v26 = vld [vmem:[%s16505_s1 + $0x8c0] sm:$0xff] }
 0x33f   :  { %5942 = vmatpush.msra.mxu1 %v5941_v35  ;;  %6091 = vmatpush.msra.mxu3 %v14019_v10  ;;  %v5983_v35 = vand.u32 4294901760, %v5982_v34  ;;  %v14249_v57 = vsub.f32 %v8969_v60, %v14219_v5  ;;  %v8965_v34 = vld [vmem:[%s16505_s1 + $0x8d8] sm:$0xff]  ;;  %v8958_v53 = vld [vmem:[%s16505_s1 + $0x8a0] sm:$0xff] }
 0x340   :  { %5903 = vmatpush.msra.mxu0 %v14070_v46  ;;  %6046 = vmatpush.msra.mxu2 %v14079_v12  ;;  %v5977_v32 = vand.u32 4294901760, %v5976_v42  ;;  %v16681_v1 = vand.u32 4294901760, %v14189_v56  ;;  %v14257_v42 = vsub.f32 %v8938_v23, %v14226_v37  ;;  %v14272_v23 = vsub.f32 %v8968_v48, %v14241_v58  ;;  %v8957_v12 = vld [vmem:[%s16505_s1 + $0x898] sm:$0xff] }
 0x341   :  { %5948 = vmatpush.msra.mxu1 %v5947_v9  ;;  %6093 = vmatpush.msra.mxu3 %v14032_v19  ;;  %v14234_v9 = vsub.f32 %v8939_v18, %v14200_v59  ;;  %v14259_v18 = vand.u32 4294901760, %v8967_v17  ;;  %v14290_v3 = vand.u32 4294901760, %v8965_v34 }
 0x342   :  { %5905 = vmatpush.msra.mxu0 %v14084_v4  ;;  %6049 = vmatpush.msra.mxu2 %v14096_v36  ;;  %v6000_v6 = vsub.f32 %v14189_v56, %v16681_v1  ;;  %v16690_v48 = vand.u32 4294901760, %v14257_v42 }
 0x343   :  { %5954 = vmatpush.msra.mxu1 %v5953_v29  ;;  %6095 = vmatpush.msra.mxu3 %v14045_v24  ;;  %v5989_v29 = vand.u32 4294901760, %v5988_v33  ;;  %v16686_v60 = vand.u32 4294901760, %v14234_v9  ;;  %v8964_v33 = vld [vmem:[%s16505_s1 + $0x8d0] sm:$0xff]  ;;  %v14288_v1 = vsub.f32 %v8967_v17, %v14259_v18  ;;  %v16691_v17 = vand.u32 4294901760, %v14272_v23 }
 0x344   :  { %5907 = vmatpush.msra.mxu0 %v14111_v30  ;;  %6052 = vmatpush.msra.mxu2 %v14101_v14  ;;  %v14299_v54 = vand.u32 4294901760, %v8964_v33 }
 0x345   :  { %5960 = vmatpush.msra.mxu1 %v5959_v45  ;;  %6097 = vmatpush.msra.mxu3 %v14058_v11  ;;  %v8966_v45 = vld [vmem:[%s16505_s1 + $0x8e0] sm:$0xff] }
 0x346   :  { %5909 = vmatpush.msra.mxu0 %v14127_v49  ;;  %6055 = vmatpush.msra.mxu2 %v14117_v47  ;;  %v14331_v21 = vsub.f32 %v8964_v33, %v14299_v54 }
 0x347   :  { %5966 = vmatpush.msra.mxu1 %v5965_v61  ;;  %6099 = vmatpush.msra.mxu3 %v14070_v46  ;;  %v5995_v61 = vand.u32 4294901760, %v5994_v22  ;;  %v6012_v22 = vsub.f32 %v14217_v25, %v16683_v44  ;;  %v6018_v44 = vsub.f32 %v14234_v9, %v16686_v60 }
 0x348   :  { %5911 = vmatpush.msra.mxu0 %v14141_v28  ;;  %6058 = vmatpush.msra.mxu2 %v14144_v31 }
 0x349   :  { %5972 = vmatpush.msra.mxu1 %v5971_v8  ;;  %6101 = vmatpush.msra.mxu3 %v14084_v4  ;;  %v6006_v8 = vsub.f32 %v14204_v39, %v16680_v0  ;;  %v16688_v0 = vand.u32 4294901760, %v14249_v57  ;;  %v6019_v16 = vand.u32 4294901760, %v6018_v44 }
 0x34a   :  { %5913 = vmatpush.msra.mxu0 %v14156_v40  ;;  %6061 = vmatpush.msra.mxu2 %v14159_v52 }
 0x34b   :  { %5978 = vmatpush.msra.mxu1 %v5977_v32  ;;  %6103 = vmatpush.msra.mxu3 %v14111_v30  ;;  %v14274_v32 = vand.u32 4294901760, %v8966_v45 }
 0x34c   :  { %5915 = vmatpush.msra.mxu0 %v14170_v38  ;;  %6064 = vmatpush.msra.mxu2 %v14174_v62 }
 0x34d   :  { %5984 = vmatpush.msra.mxu1 %v5983_v35  ;;  %6105 = vmatpush.msra.mxu3 %v14127_v49  ;;  %v6001_v35 = vand.u32 4294901760, %v6000_v6  ;;  %v6007_v6 = vand.u32 4294901760, %v6006_v8  ;;  %v14305_v20 = vsub.f32 %v8966_v45, %v14274_v32  ;;  %v6275_v8 = vsub.f32 %v14249_v57, %v16688_v0  ;;  %v8961_v0 = vld [vmem:[%s16505_s1 + $0x8b8] sm:$0xff] }
 0x34e   :  { %5917 = vmatpush.msra.mxu0 %v14185_v51  ;;  %6067 = vmatpush.msra.mxu2 %v14189_v56  ;;  %v6024_v45 = vsub.f32 %v14257_v42, %v16690_v48  ;;  %v14340_v48 = vand.u32 4294901760, %v8962_v26 }
 0x34f   :  { %5990 = vmatpush.msra.mxu1 %v5989_v29  ;;  %6107 = vmatpush.msra.mxu3 %v14141_v28  ;;  %v8963_v29 = vld [vmem:[%s16505_s1 + $0x8c8] sm:$0xff]  ;;  %v6276_v44 = vand.u32 4294901760, %v6275_v8 }
 0x350   :  { %5919 = vmatpush.msra.mxu0 %v14200_v59  ;;  %6070 = vmatpush.msra.mxu2 %v14204_v39  ;;  %v14311_v60 = vand.u32 4294901760, %v8963_v29 }
 0x351   :  { %5996 = vmatpush.msra.mxu1 %v5995_v61  ;;  %6109 = vmatpush.msra.mxu3 %v14156_v40  ;;  %v6013_v61 = vand.u32 4294901760, %v6012_v22  ;;  %v14324_v22 = vsub.f32 %v8965_v34, %v14290_v3  ;;  %v16696_v34 = vand.u32 4294901760, %v14305_v20 }
 0x352   :  { %5921 = vmatpush.msra.mxu0 %v14226_v37  ;;  %6073 = vmatpush.msra.mxu2 %v14217_v25  ;;  %v14344_v33 = vsub.f32 %v8963_v29, %v14311_v60  ;;  %v16695_v29 = vand.u32 4294901760, %v14331_v21 }
 0x353   :  { %6002 = vmatpush.msra.mxu1 %v6001_v35  ;;  %6111 = vmatpush.msra.mxu3 %v14170_v38  ;;  %v16692_v35 = vand.u32 4294901760, %v14288_v1  ;;  %v16694_v8 = vand.u32 4294901760, %v14324_v22 }
 0x354   :  { %6128 = vmatpush.msrb.mxu0 %v5933_v13  ;;  %6076 = vmatpush.msra.mxu2 %v14234_v9  ;;  %v6281_v13 = vsub.f32 %v14272_v23, %v16691_v17  ;;  %v8959_v17 = vld [vmem:[%s16505_s1 + $0x8a8] sm:$0xff] }
 0x355   :  { %6008 = vmatpush.msra.mxu1 %v6007_v6  ;;  %6113 = vmatpush.msra.mxu3 %v14185_v51  ;;  %v14346_v6 = vand.u32 4294901760, %v8961_v0 }
 0x356   :  { %6132 = vmatpush.msrb.mxu0 %v5939_v50  ;;  %6079 = vmatpush.msra.mxu2 %v14257_v42  ;;  %v6025_v50 = vand.u32 4294901760, %v6024_v45  ;;  %v6282_v7 = vand.u32 4294901760, %v6281_v13  ;;  %v14370_v45 = vsub.f32 %v8962_v26, %v14340_v48  ;;  %v6299_v26 = vsub.f32 %v14324_v22, %v16694_v8 }
 0x357   :  { %6014 = vmatpush.msra.mxu1 %v6013_v61  ;;  %6115 = vmatpush.msra.mxu3 %v14200_v59  ;;  %v6287_v61 = vsub.f32 %v14288_v1, %v16692_v35  ;;  %v16697_v35 = vand.u32 4294901760, %v14344_v33  ;;  %v14377_v15 = vsub.f32 %v8961_v0, %v14346_v6  ;;  %v14387_v13 = vand.u32 4294901760, %v8959_v17 }
 0x358   :  { %6136 = vmatpush.msrb.mxu0 %v5945_v55  ;;  %6232 = vmatpush.msrb.mxu2 %v14219_v5  ;;  %v6293_v55 = vsub.f32 %v14305_v20, %v16696_v34  ;;  %v6305_v0 = vsub.f32 %v14331_v21, %v16695_v29  ;;  %v14406_v8 = vand.u32 4294901760, %v8958_v53 }
 0x359   :  { %6020 = vmatpush.msra.mxu1 %v6019_v16  ;;  %6117 = vmatpush.msra.mxu3 %v14226_v37  ;;  %v14372_v16 = vand.u32 4294901760, %v8960_v43  ;;  %v6311_v29 = vsub.f32 %v14344_v33, %v16697_v35 }
 0x35a   :  { %6140 = vmatpush.msrb.mxu0 %v5951_v41  ;;  %6234 = vmatpush.msrb.mxu2 %v14241_v58  ;;  %v6288_v41 = vand.u32 4294901760, %v6287_v61  ;;  %v6306_v35 = vand.u32 4294901760, %v6305_v0 }
 0x35b   :  { %6277 = vmatpush.msrb.mxu3 %v6276_v44  ;;  %6026 = vmatpush.msra.mxu1 %v6025_v50  ;;  %v16978_v44 = vand.u32 4294901760, %v14096_v36  ;;  %v6294_v50 = vand.u32 4294901760, %v6293_v55  ;;  %v14404_v61 = vsub.f32 %v8960_v43, %v14372_v16  ;;  %v8956_v36 = vld [vmem:[%s16505_s1 + $0x890] sm:$0xff]  ;;  %v16979_v43 = vand.u32 4294901760, %v14101_v14 }
 0x35c   :  { %6144 = vmatpush.msrb.mxu0 %v5957_v27  ;;  %6236 = vmatpush.msrb.mxu2 %v14259_v18  ;;  %v8934_v27 = vld [vmem:[%s16506_s0 + $0x80] sm:$0xff]  ;;  %v6300_v55 = vand.u32 4294901760, %v6299_v26  ;;  %v16980_v14 = vand.u32 4294901760, %v14117_v47  ;;  %v6312_v0 = vand.u32 4294901760, %v6311_v29 }
 0x35d   :  { %6195 = vmatpush.msrb.mxu1 %v13999_v63  ;;  %6283 = vmatpush.msrb.mxu3 %v6282_v7  ;;  %v16698_v63 = vand.u32 4294901760, %v14370_v45  ;;  %v16699_v7 = vand.u32 4294901760, %v14377_v15  ;;  %v14424_v34 = vand.u32 4294901760, %v8934_v27  ;;  %v6328_v26 = vand.u32 4294901760, %v14404_v61  ;;  %v8954_v29 = vld [vmem:[%s16505_s1 + $0x880] sm:$0xff] }
 0x35e   :  { %6148 = vmatpush.msrb.mxu0 %v16978_v44  ;;  %6238 = vmatpush.msrb.mxu2 %v14274_v32  ;;  %v14420_v44 = vsub.f32 %v8959_v17, %v14387_v13 }
 0x35f   :  { %6197 = vmatpush.msrb.mxu1 %v14009_v2  ;;  %6289 = vmatpush.msrb.mxu3 %v6288_v41  ;;  %v14422_v2 = vand.u32 4294901760, %v8957_v12  ;;  %v8955_v41 = vld [vmem:[%s16505_s1 + $0x888] sm:$0xff]  ;;  %v6317_v17 = vsub.f32 %v14370_v45, %v16698_v63  ;;  %v6323_v47 = vsub.f32 %v14377_v15, %v16699_v7  ;;  %v14454_v63 = vsub.f32 %v8934_v27, %v14424_v34 }
 0x360   :  { %6152 = vmatpush.msrb.mxu0 %v16979_v43  ;;  %6240 = vmatpush.msrb.mxu2 %v14290_v3  ;;  %v14438_v43 = vsub.f32 %v8958_v53, %v14406_v8  ;;  %v14474_v7 = vand.u32 4294901760, %v8954_v29 }
 0x361   :  { %6199 = vmatpush.msrb.mxu1 %v14019_v10  ;;  %6295 = vmatpush.msrb.mxu3 %v6294_v50  ;;  %v14440_v10 = vand.u32 4294901760, %v8956_v36  ;;  %v16981_v50 = vand.u32 4294901760, %v14144_v31  ;;  %v14451_v53 = vsub.f32 %v8957_v12, %v14422_v2  ;;  %v16982_v31 = vand.u32 4294901760, %v14159_v52 }
 0x362   :  { %6156 = vmatpush.msrb.mxu0 %v16980_v14  ;;  %6242 = vmatpush.msrb.mxu2 %v14299_v54  ;;  %v6334_v14 = vand.u32 4294901760, %v14420_v44  ;;  %v6329_v12 = vsub.f32 %v14404_v61, %v6328_v26  ;;  %v6340_v27 = vand.u32 4294901760, %v14438_v43  ;;  %v16983_v52 = vand.u32 4294901760, %v14174_v62 }
 0x363   :  { %6201 = vmatpush.msrb.mxu1 %v14032_v19  ;;  %6301 = vmatpush.msrb.mxu3 %v6300_v55  ;;  %v14456_v19 = vand.u32 4294901760, %v8955_v41  ;;  %v6318_v55 = vand.u32 4294901760, %v6317_v17  ;;  %v6346_v17 = vand.u32 4294901760, %v14451_v53 }
 0x364   :  { %6160 = vmatpush.msrb.mxu0 %v16981_v50  ;;  %6244 = vmatpush.msrb.mxu2 %v14311_v60  ;;  %v14470_v50 = vsub.f32 %v8956_v36, %v14440_v10  ;;  %v5924_v36 = vand.u32 4294901760, %v14454_v63  ;;  %v6330_v62 = vand.u32 4294901760, %v6329_v12 }
 0x365   :  { %6203 = vmatpush.msrb.mxu1 %v14045_v24  ;;  %6307 = vmatpush.msrb.mxu3 %v6306_v35  ;;  %v6324_v24 = vand.u32 4294901760, %v6323_v47  ;;  %v6335_v35 = vsub.f32 %v14420_v44, %v6334_v14  ;;  %v6347_v12 = vsub.f32 %v14451_v53, %v6346_v17 }
 0x366   :  { %6164 = vmatpush.msrb.mxu0 %v16982_v31  ;;  %6246 = vmatpush.msrb.mxu2 %v14340_v48  ;;  %v14484_v31 = vsub.f32 %v8955_v41, %v14456_v19  ;;  %v6352_v47 = vand.u32 4294901760, %v14470_v50  ;;  %v14497_v41 = vsub.f32 %v8954_v29, %v14474_v7 }
 0x367   :  { %6205 = vmatpush.msrb.mxu1 %v14058_v11  ;;  %6313 = vmatpush.msrb.mxu3 %v6312_v0  ;;  %v16984_v11 = vand.u32 4294901760, %v14189_v56  ;;  %v6341_v0 = vsub.f32 %v14438_v43, %v6340_v27  ;;  %v16985_v56 = vand.u32 4294901760, %v14204_v39 }
 0x368   :  { %6168 = vmatpush.msrb.mxu0 %v16983_v52  ;;  %6248 = vmatpush.msrb.mxu2 %v14346_v6  ;;  %v6358_v29 = vand.u32 4294901760, %v14484_v31  ;;  %v6353_v52 = vsub.f32 %v14470_v50, %v6352_v47 }
 0x369   :  { %6207 = vmatpush.msrb.mxu1 %v14070_v46  ;;  %6319 = vmatpush.msrb.mxu3 %v6318_v55  ;;  %v8935_v46 = vld [vmem:[%s16506_s0 + $0x88] sm:$0xff]  ;;  %v6336_v55 = vand.u32 4294901760, %v6335_v35  ;;  %v6342_v39 = vand.u32 4294901760, %v6341_v0 }
 0x36a   :  { %6172 = vmatpush.msrb.mxu0 %v16984_v11  ;;  %6250 = vmatpush.msrb.mxu2 %v14372_v16  ;;  %v14518_v35 = vand.u32 4294901760, %v8935_v46  ;;  %v6364_v11 = vand.u32 4294901760, %v14497_v41  ;;  %v6359_v0 = vsub.f32 %v14484_v31, %v6358_v29 }
 0x36b   :  { %6209 = vmatpush.msrb.mxu1 %v14084_v4  ;;  %6325 = vmatpush.msrb.mxu3 %v6324_v24  ;;  %v5925_v4 = vsub.f32 %v14454_v63, %v5924_v36  ;;  %v16986_v24 = vand.u32 4294901760, %v14217_v25 }
 0x36c   :  { %6176 = vmatpush.msrb.mxu0 %v16985_v56  ;;  %6252 = vmatpush.msrb.mxu2 %v14387_v13  ;;  %v6354_v56 = vand.u32 4294901760, %v6353_v52  ;;  %v16990_v52 = vand.u32 4294901760, %v14272_v23 }
 0x36d   :  { %6211 = vmatpush.msrb.mxu1 %v14111_v30  ;;  %6331 = vmatpush.msrb.mxu3 %v6330_v62  ;;  %v16987_v30 = vand.u32 4294901760, %v14234_v9  ;;  %v6348_v62 = vand.u32 4294901760, %v6347_v12  ;;  %v5926_v25 = vand.u32 4294901760, %v5925_v4  ;;  %v6365_v9 = vsub.f32 %v14497_v41, %v6364_v11  ;;  %v4479_v12 = vpop.f32.mrf.mxu0 }
 0x36e   :  { %6180 = vmatpush.msrb.mxu0 %v16986_v24  ;;  %6254 = vmatpush.msrb.mxu2 %v14406_v8  ;;  %v4580_v24 = vpop.f32.mrf.mxu1 }
 0x36f   :  { %6213 = vmatpush.msrb.mxu1 %v14127_v49  ;;  %6337 = vmatpush.msrb.mxu3 %v6336_v55  ;;  %v16988_v49 = vand.u32 4294901760, %v14257_v42  ;;  %v14533_v55 = vsub.f32 %v8935_v46, %v14518_v35  ;;  %v6360_v42 = vand.u32 4294901760, %v6359_v0  ;;  %v6366_v46 = vand.u32 4294901760, %v6365_v9 }
 0x370   :  { %6184 = vmatpush.msrb.mxu0 %v16987_v30  ;;  %6256 = vmatpush.msrb.mxu2 %v14422_v2  ;;  %v4634_v30 = vpop.f32.mrf.mxu2 }
 0x371   :  { %6215 = vmatpush.msrb.mxu1 %v14141_v28  ;;  %6343 = vmatpush.msrb.mxu3 %v6342_v39  ;;  %v9080_v28 = vld [vmem:[%s16507_s2 + $0x3] ss:$0 sm:$0xff] }
 0x372   :  { %6188 = vmatpush.msrb.mxu0 %v16988_v49  ;;  %6258 = vmatpush.msrb.mxu2 %v14440_v10  ;;  %v4480_v4 = vadd.f32 %v9080_v28, %v4479_v12  ;;  %v8979_v28 = vld [vmem:[%s16505_s1 + $0x948] sm:$0xff]  ;;  %v8978_v12 = vld [vmem:[%s16505_s1 + $0x940] sm:$0xff] }
 0x373   :  { %6217 = vmatpush.msrb.mxu1 %v14156_v40  ;;  %6349 = vmatpush.msrb.mxu3 %v6348_v62  ;;  %v6265_v40 = vand.u32 4294901760, %v14533_v55 }
 0x374   :  { %5927 = vmatmul.f32.vlgmr.msra.gmra.mxu0 %v5926_v25  ;;  %6260 = vmatpush.msrb.mxu2 %v14456_v19 }
 0x375   :  { %6375 = vmatpush.msra.mxu0 %v14249_v57  ;;  %6219 = vmatpush.msrb.mxu1 %v14170_v38  ;;  %v16989_v38 = vand.u32 4294901760, %v14249_v57  ;;  %v6266_v39 = vsub.f32 %v14533_v55, %v6265_v40  ;;  %v16991_v57 = vand.u32 4294901760, %v14288_v1 }
 0x376   :  { %6355 = vmatpush.msrb.mxu3 %v6354_v56  ;;  %6262 = vmatpush.msrb.mxu2 %v14474_v7 }
 0x377   :  { %6378 = vmatpush.msra.mxu0 %v14272_v23  ;;  %6221 = vmatpush.msrb.mxu1 %v14185_v51  ;;  %v4581_v51 = vadd.f32 %v4580_v24, %v4480_v4  ;;  %v4673_v23 = vpop.f32.mrf.mxu3 }
 0x378   :  { %6361 = vmatpush.msrb.mxu3 %v6360_v42  ;;  %6082 = vmatmul.f32.vlgmr.msra.gmra.mxu2 %v14454_v63 }
 0x379   :  { %6381 = vmatpush.msra.mxu0 %v14288_v1  ;;  %6469 = vmatpush.msra.mxu2 %v16989_v38  ;;  %v4635_v63 = vadd.f32 %v4634_v30, %v4581_v51  ;;  %v8976_v51 = vld [vmem:[%s16505_s1 + $0x930] sm:$0xff] }
 0x37a   :  { %6223 = vmatpush.msrb.mxu1 %v14200_v59  ;;  %6367 = vmatpush.msrb.mxu3 %v6366_v46  ;;  %v6267_v59 = vand.u32 4294901760, %v6266_v39  ;;  %v14693_v46 = vand.u32 4294901760, %v8979_v28 }
 0x37b   :  { %6384 = vmatpush.msra.mxu0 %v14305_v20  ;;  %6121 = vmatmul.f32.vlgmr.msra.gmra.mxu3 %v5924_v36  ;;  %v4674_v1 = vadd.f32 %v4673_v23, %v4635_v63  ;;  %v4742_v36 = vpop.f32.mrf.mxu0 }
 0x37c   :  { %6473 = vmatpush.msra.mxu2 %v16990_v52  ;;  %6536 = vmatpush.msra.mxu3 %v14219_v5 }
 0x37d   :  { %6225 = vmatpush.msrb.mxu1 %v14226_v37  ;;  %6387 = vmatpush.msra.mxu0 %v14324_v22  ;;  %v16992_v37 = vand.u32 4294901760, %v14305_v20  ;;  %v16994_v20 = vand.u32 4294901760, %v14331_v21 }
 0x37e   :  { %6028 = vmatmul.f32.vlgmr.msra.gmra.mxu1 %v14424_v34  ;;  %6477 = vmatpush.msra.mxu2 %v16991_v57 }
 0x37f   :  { %6428 = vmatpush.msra.mxu1 %v14219_v5  ;;  %6538 = vmatpush.msra.mxu3 %v14241_v58  ;;  %v16993_v5 = vand.u32 4294901760, %v14324_v22  ;;  %v16995_v22 = vand.u32 4294901760, %v14344_v33 }
 0x380   :  { %6390 = vmatpush.msra.mxu0 %v14331_v21  ;;  %6481 = vmatpush.msra.mxu2 %v16992_v37  ;;  %v8975_v37 = vld [vmem:[%s16505_s1 + $0x928] sm:$0xff] }
 0x381   :  { %6430 = vmatpush.msra.mxu1 %v14241_v58  ;;  %6540 = vmatpush.msra.mxu3 %v14259_v18  ;;  %v4743_v58 = vadd.f32 %v4742_v36, %v4674_v1 }
 0x382   :  { %6268 = vmatmul.f32.vlgmr.msrb.gmra.mxu2 %v6267_v59  ;;  %6393 = vmatpush.msra.mxu0 %v14344_v33  ;;  %v16997_v33 = vand.u32 4294901760, %v14377_v15 }
 0x383   :  { %6432 = vmatpush.msra.mxu1 %v14259_v18  ;;  %6485 = vmatpush.msra.mxu2 %v16993_v5  ;;  %v4779_v18 = vpop.f32.mrf.mxu1 }
 0x384   :  { %6542 = vmatpush.msra.mxu3 %v14274_v32  ;;  %6190 = vmatmul.f32.vlgmr.msrb.gmra.mxu0 %v14424_v34  ;;  %v4780_v21 = vadd.f32 %v4779_v18, %v4743_v58  ;;  %v8974_v18 = vld [vmem:[%s16505_s1 + $0x920] sm:$0xff] }
 0x385   :  { %6369 = vmatmul.f32.vlgmr.msrb.gmra.mxu3 %v14518_v35  ;;  %6396 = vmatpush.msra.mxu0 %v14370_v45 }
 0x386   :  { %6434 = vmatpush.msra.mxu1 %v14274_v32  ;;  %6489 = vmatpush.msra.mxu2 %v16994_v20  ;;  %v16996_v32 = vand.u32 4294901760, %v14370_v45  ;;  %v14740_v20 = vand.u32 4294901760, %v8976_v51 }
 0x387   :  { %6544 = vmatpush.msra.mxu3 %v14290_v3  ;;  %6227 = vmatmul.f32.vlgmr.msrb.gmra.mxu1 %v14424_v34  ;;  %v4820_v34 = vpop.f32.mrf.mxu2 }
 0x388   :  { %6399 = vmatpush.msra.mxu0 %v14377_v15  ;;  %6436 = vmatpush.msra.mxu1 %v14290_v3  ;;  %v8985_v3 = vld [vmem:[%s16505_s1 + $0x978] sm:$0xff]  ;;  %v4821_v62 = vadd.f32 %v4820_v34, %v4780_v21  ;;  %v8983_v15 = vld [vmem:[%s16505_s1 + $0x968] sm:$0xff] }
 0x389   :  { %6493 = vmatpush.msra.mxu2 %v16995_v22  ;;  %6546 = vmatpush.msra.mxu3 %v14299_v54  ;;  %v14614_v45 = vand.u32 4294901760, %v8985_v3 }
 0x38a   :  { %6402 = vmatpush.msra.mxu0 %v14404_v61  ;;  %6438 = vmatpush.msra.mxu1 %v14299_v54  ;;  %v8984_v54 = vld [vmem:[%s16505_s1 + $0x970] sm:$0xff]  ;;  %v8982_v61 = vld [vmem:[%s16505_s1 + $0x960] sm:$0xff] }
 0x38b   :  { %6497 = vmatpush.msra.mxu2 %v16996_v32  ;;  %6548 = vmatpush.msra.mxu3 %v14311_v60  ;;  %v5014_v0 = vpop.f32.mrf.mxu1  ;;  %v14755_v32 = vand.u32 4294901760, %v8975_v37 }
 0x38c   :  { %6405 = vmatpush.msra.mxu0 %v14420_v44  ;;  %6440 = vmatpush.msra.mxu1 %v14311_v60  ;;  %v4921_v60 = vpop.f32.mrf.mxu3  ;;  %v14637_v44 = vsub.f32 %v8985_v3, %v14614_v45 }
 0x38d   :  { %6501 = vmatpush.msra.mxu2 %v16997_v33  ;;  %6550 = vmatpush.msra.mxu3 %v14340_v48  ;;  %v4922_v25 = vadd.f32 %v4921_v60, %v4821_v62  ;;  %v8973_v33 = vld [vmem:[%s16505_s1 + $0x918] sm:$0xff] }
 0x38e   :  { %6408 = vmatpush.msra.mxu0 %v14438_v43  ;;  %6442 = vmatpush.msra.mxu1 %v14340_v48  ;;  %v14624_v48 = vand.u32 4294901760, %v8984_v54 }
 0x38f   :  { %6505 = vmatpush.msra.mxu2 %v6328_v26  ;;  %6552 = vmatpush.msra.mxu3 %v14346_v6  ;;  %v4975_v26 = vpop.f32.mrf.mxu0 }
 0x390   :  { %6411 = vmatpush.msra.mxu0 %v14451_v53  ;;  %6444 = vmatpush.msra.mxu1 %v14346_v6  ;;  %v14634_v6 = vand.u32 4294901760, %v8983_v15  ;;  %v14650_v43 = vsub.f32 %v8984_v54, %v14624_v48  ;;  %v4976_v49 = vadd.f32 %v4975_v26, %v4922_v25 }
 0x391   :  { %6509 = vmatpush.msra.mxu2 %v6334_v14  ;;  %6554 = vmatpush.msra.mxu3 %v14372_v16  ;;  %v8981_v14 = vld [vmem:[%s16505_s1 + $0x958] sm:$0xff] }
 0x392   :  { %6414 = vmatpush.msra.mxu0 %v14470_v50  ;;  %6446 = vmatpush.msra.mxu1 %v14372_v16  ;;  %v14647_v16 = vand.u32 4294901760, %v8982_v61  ;;  %v14657_v56 = vand.u32 4294901760, %v8981_v14  ;;  %v14664_v53 = vsub.f32 %v8983_v15, %v14634_v6  ;;  %v6621_v50 = vand.u32 4294901760, %v14650_v43 }
 0x393   :  { %6513 = vmatpush.msra.mxu2 %v6340_v27  ;;  %6556 = vmatpush.msra.mxu3 %v14387_v13  ;;  %v8980_v27 = vld [vmem:[%s16505_s1 + $0x950] sm:$0xff]  ;;  %v5262_v1 = vpop.f32.mrf.mxu1  ;;  %v14773_v15 = vand.u32 4294901760, %v8974_v18 }
 0x394   :  { %6417 = vmatpush.msra.mxu0 %v14484_v31  ;;  %6448 = vmatpush.msra.mxu1 %v14387_v13  ;;  %v6615_v13 = vand.u32 4294901760, %v14637_v44  ;;  %v14668_v9 = vand.u32 4294901760, %v8980_v27  ;;  %v14683_v42 = vsub.f32 %v8981_v14, %v14657_v56  ;;  %v6627_v31 = vand.u32 4294901760, %v14664_v53  ;;  %v5120_v24 = vpop.f32.mrf.mxu3  ;;  %v8972_v14 = vld [vmem:[%s16505_s1 + $0x910] sm:$0xff] }
 0x395   :  { %6517 = vmatpush.msra.mxu2 %v6346_v17  ;;  %6558 = vmatpush.msra.mxu3 %v14406_v8  ;;  %v5015_v17 = vadd.f32 %v5014_v0, %v4976_v49  ;;  %v6622_v38 = vsub.f32 %v14650_v43, %v6621_v50 }
 0x396   :  { %6420 = vmatpush.msra.mxu0 %v14497_v41  ;;  %6450 = vmatpush.msra.mxu1 %v14406_v8  ;;  %v5083_v8 = vpop.f32.mrf.mxu2  ;;  %v14700_v4 = vsub.f32 %v8980_v27, %v14668_v9  ;;  %v14710_v41 = vand.u32 4294901760, %v8978_v12  ;;  %v16709_v39 = vand.u32 4294901760, %v14683_v42  ;;  %v6628_v59 = vsub.f32 %v14664_v53, %v6627_v31 }
 0x397   :  { %6521 = vmatpush.msra.mxu2 %v6352_v47  ;;  %6560 = vmatpush.msra.mxu3 %v14422_v2  ;;  %v14677_v47 = vsub.f32 %v8982_v61, %v14647_v16  ;;  %v5161_v52 = vpop.f32.mrf.mxu0  ;;  %v6623_v5 = vand.u32 4294901760, %v6622_v38  ;;  %v14777_v61 = vsub.f32 %v8976_v51, %v14740_v20  ;;  %v14790_v27 = vand.u32 4294901760, %v8973_v33  ;;  %v8971_v38 = vld [vmem:[%s16505_s1 + $0x908] sm:$0xff] }
 0x398   :  { %6423 = vmatmul.f32.vlgmr.msra.gmra.mxu0 %v14533_v55  ;;  %6452 = vmatpush.msra.mxu1 %v14422_v2  ;;  %v6616_v2 = vsub.f32 %v14637_v44, %v6615_v13  ;;  %v16707_v23 = vand.u32 4294901760, %v14700_v4  ;;  %v6629_v22 = vand.u32 4294901760, %v6628_v59 }
 0x399   :  { %6573 = vmatpush.msrb.mxu0 %v14614_v45  ;;  %6525 = vmatpush.msra.mxu2 %v6358_v29  ;;  %v5084_v29 = vadd.f32 %v5083_v8, %v5015_v17  ;;  %v14794_v17 = vsub.f32 %v8975_v37, %v14755_v32  ;;  %v14822_v37 = vsub.f32 %v8973_v33, %v14790_v27 }
 0x39a   :  { %6562 = vmatpush.msra.mxu3 %v14440_v10  ;;  %6454 = vmatpush.msra.mxu1 %v14440_v10  ;;  %v8977_v10 = vld [vmem:[%s16505_s1 + $0x938] sm:$0xff]  ;;  %v6617_v30 = vand.u32 4294901760, %v6616_v2  ;;  %v6646_v34 = vsub.f32 %v14700_v4, %v16707_v23 }
 0x39b   :  { %6575 = vmatpush.msrb.mxu0 %v14624_v48  ;;  %6529 = vmatpush.msra.mxu2 %v6364_v11  ;;  %v16711_v11 = vand.u32 4294901760, %v14677_v47  ;;  %v14724_v57 = vand.u32 4294901760, %v8977_v10  ;;  %v5121_v63 = vadd.f32 %v5120_v24, %v5084_v29  ;;  %v14802_v29 = vand.u32 4294901760, %v8972_v14 }
 0x39c   :  { %6564 = vmatpush.msra.mxu3 %v14456_v19  ;;  %6531 = vmatmul.f32.vlgmr.msra.gmra.mxu2 %v14518_v35  ;;  %v6647_v8 = vand.u32 4294901760, %v6646_v34  ;;  %v14806_v24 = vsub.f32 %v8974_v18, %v14773_v15  ;;  %v5461_v34 = vpop.f32.mrf.mxu1 }
 0x39d   :  { %6577 = vmatpush.msrb.mxu0 %v14634_v6  ;;  %6716 = vmatpush.msrb.mxu2 %v14637_v44  ;;  %v6634_v36 = vsub.f32 %v14677_v47, %v16711_v11  ;;  %v5162_v58 = vadd.f32 %v5161_v52, %v5121_v63  ;;  %v14759_v55 = vsub.f32 %v8977_v10, %v14724_v57  ;;  %v16702_v10 = vand.u32 4294901760, %v14777_v61  ;;  %v8995_v11 = vld [vmem:[%s16505_s1 + $0x9c8] sm:$0xff] }
 0x39e   :  { %6456 = vmatpush.msra.mxu1 %v14456_v19  ;;  %6566 = vmatpush.msra.mxu3 %v14474_v7  ;;  %v14727_v19 = vsub.f32 %v8979_v28, %v14693_v46  ;;  %v5316_v54 = vpop.f32.mrf.mxu2  ;;  %v16701_v63 = vand.u32 4294901760, %v14794_v17 }
 0x39f   :  { %6579 = vmatpush.msrb.mxu0 %v14647_v16  ;;  %6568 = vmatmul.f32.vlgmr.msra.gmra.mxu3 %v14518_v35  ;;  %v14743_v35 = vsub.f32 %v8978_v12, %v14710_v41  ;;  %v5263_v3 = vadd.f32 %v5262_v1, %v5162_v58  ;;  %v6635_v62 = vand.u32 4294901760, %v6634_v36  ;;  %v16704_v49 = vand.u32 4294901760, %v14759_v55  ;;  %v5355_v12 = vpop.f32.mrf.mxu3  ;;  %v5424_v52 = vpop.f32.mrf.mxu0  ;;  %v9001_v1 = vld [vmem:[%s16505_s1 + $0x9f8] sm:$0xff]  ;;  %v8970_v58 = vld [vmem:[%s16505_s1 + $0x900] sm:$0xff] }
 0x3a0   :  { %6719 = vmatpush.msrb.mxu2 %v14650_v43  ;;  %6769 = vmatpush.msrb.mxu3 %v14614_v45  ;;  %v16706_v21 = vand.u32 4294901760, %v14727_v19  ;;  %v14829_v36 = vand.u32 4294901760, %v8971_v38  ;;  %v6670_v18 = vsub.f32 %v14777_v61, %v16702_v10 }
 0x3a1   :  { %6458 = vmatpush.msra.mxu1 %v14474_v7  ;;  %6581 = vmatpush.msrb.mxu0 %v14657_v56  ;;  %v6640_v7 = vsub.f32 %v14683_v42, %v16709_v39  ;;  %v16705_v60 = vand.u32 4294901760, %v14743_v35  ;;  %v5317_v28 = vadd.f32 %v5316_v54, %v5263_v3  ;;  %v6664_v59 = vsub.f32 %v14759_v55, %v16704_v49 }
 0x3a2   :  { %6462 = vmatmul.f32.vlgmr.msra.gmra.mxu1 %v6265_v40  ;;  %6722 = vmatpush.msrb.mxu2 %v14664_v53  ;;  %v8936_v40 = vld [vmem:[%s16506_s0 + $0x90] sm:$0xff]  ;;  %v6652_v0 = vsub.f32 %v14727_v19, %v16706_v21  ;;  %v14845_v54 = vand.u32 4294901760, %v9001_v1 }
 0x3a3   :  { %6618 = vmatpush.msrb.mxu1 %v6617_v30  ;;  %6771 = vmatpush.msrb.mxu3 %v14624_v48  ;;  %v6641_v26 = vand.u32 4294901760, %v6640_v7  ;;  %v14784_v25 = vand.u32 4294901760, %v8936_v40  ;;  %v6658_v2 = vsub.f32 %v14743_v35, %v16705_v60 }
 0x3a4   :  { %6583 = vmatpush.msrb.mxu0 %v14668_v9  ;;  %6725 = vmatpush.msrb.mxu2 %v14677_v47  ;;  %v6653_v30 = vand.u32 4294901760, %v6652_v0  ;;  %v16703_v0 = vand.u32 4294901760, %v14822_v37 }
 0x3a5   :  { %6624 = vmatpush.msrb.mxu1 %v6623_v5  ;;  %6773 = vmatpush.msrb.mxu3 %v14634_v6  ;;  %v14814_v51 = vsub.f32 %v8936_v40, %v14784_v25  ;;  %v5356_v5 = vadd.f32 %v5355_v12, %v5317_v28  ;;  %v6659_v7 = vand.u32 4294901760, %v6658_v2  ;;  %v14840_v40 = vsub.f32 %v8972_v14, %v14802_v29  ;;  %v9000_v28 = vld [vmem:[%s16505_s1 + $0x9f0] sm:$0xff] }
 0x3a6   :  { %6585 = vmatpush.msrb.mxu0 %v14693_v46  ;;  %6728 = vmatpush.msrb.mxu2 %v14683_v42  ;;  %v14851_v14 = vand.u32 4294901760, %v8970_v58  ;;  %v6671_v2 = vand.u32 4294901760, %v6670_v18  ;;  %v14878_v18 = vand.u32 4294901760, %v9000_v28 }
 0x3a7   :  { %6630 = vmatpush.msrb.mxu1 %v6629_v22  ;;  %6775 = vmatpush.msrb.mxu3 %v14647_v16  ;;  %v16700_v22 = vand.u32 4294901760, %v14806_v24  ;;  %v5425_v3 = vadd.f32 %v5424_v52, %v5356_v5  ;;  %v16710_v33 = vand.u32 4294901760, %v14814_v51  ;;  %v5502_v5 = vpop.f32.mrf.mxu2  ;;  %v5603_v60 = vpop.f32.mrf.mxu3 }
 0x3a8   :  { %6587 = vmatpush.msrb.mxu0 %v14710_v41  ;;  %6731 = vmatpush.msrb.mxu2 %v14700_v4  ;;  %16998 = vst [vmem:[#allocation3_spill] sm:$0xff] %v14851_v14 }
 0x3a9   :  { %6636 = vmatpush.msrb.mxu1 %v6635_v62  ;;  %6777 = vmatpush.msrb.mxu3 %v14657_v56  ;;  %v6665_v62 = vand.u32 4294901760, %v6664_v59  ;;  %v5462_v12 = vadd.f32 %v5461_v34, %v5425_v3  ;;  %v6682_v52 = vsub.f32 %v14806_v24, %v16700_v22  ;;  %v8999_v59 = vld [vmem:[%s16505_s1 + $0x9e8] sm:$0xff]  ;;  %v8998_v3 = vld [vmem:[%s16505_s1 + $0x9e0] sm:$0xff]  ;;  %v6688_v22 = vsub.f32 %v14822_v37, %v16703_v0 }
 0x3aa   :  { %6589 = vmatpush.msrb.mxu0 %v14724_v57  ;;  %6734 = vmatpush.msrb.mxu2 %v14727_v19  ;;  %v14893_v10 = vand.u32 4294901760, %v8999_v59  ;;  %v14902_v49 = vand.u32 4294901760, %v8998_v3 }
 0x3ab   :  { %6642 = vmatpush.msrb.mxu1 %v6641_v26  ;;  %6779 = vmatpush.msrb.mxu3 %v14668_v9  ;;  %v6676_v26 = vsub.f32 %v14794_v17, %v16701_v63  ;;  %v14888_v63 = vsub.f32 %v8970_v58, %v14851_v14  ;;  %v6683_v0 = vand.u32 4294901760, %v6682_v52 }
 0x3ac   :  { %6591 = vmatpush.msrb.mxu0 %v14740_v20  ;;  %6737 = vmatpush.msrb.mxu2 %v14743_v35 }
 0x3ad   :  { %6648 = vmatpush.msrb.mxu1 %v6647_v8  ;;  %6781 = vmatpush.msrb.mxu3 %v14693_v46  ;;  %v14860_v8 = vsub.f32 %v8971_v38, %v14829_v36  ;;  %v6607_v38 = vsub.f32 %v14814_v51, %v16710_v33  ;;  %v6677_v34 = vand.u32 4294901760, %v6676_v26  ;;  %v5503_v26 = vadd.f32 %v5502_v5, %v5462_v12 }
 0x3ae   :  { %6593 = vmatpush.msrb.mxu0 %v14755_v32  ;;  %6740 = vmatpush.msrb.mxu2 %v14759_v55  ;;  %v14908_v12 = vsub.f32 %v9000_v28, %v14878_v18  ;;  %v16714_v52 = vand.u32 4294901760, %v14888_v63  ;;  %v14927_v33 = vsub.f32 %v8998_v3, %v14902_v49 }
 0x3af   :  { %6654 = vmatpush.msrb.mxu1 %v6653_v30  ;;  %6783 = vmatpush.msrb.mxu3 %v14710_v41  ;;  %v16708_v30 = vand.u32 4294901760, %v14840_v40  ;;  %v6608_v21 = vand.u32 4294901760, %v6607_v38  ;;  %v5657_v38 = vpop.f32.mrf.mxu0 }
 0x3b0   :  { %6595 = vmatpush.msrb.mxu0 %v14773_v15  ;;  %6743 = vmatpush.msrb.mxu2 %v14777_v61 }
 0x3b1   :  { %6660 = vmatpush.msrb.mxu1 %v6659_v7  ;;  %6785 = vmatpush.msrb.mxu3 %v14724_v57  ;;  %v14876_v7 = vsub.f32 %v9001_v1, %v14845_v54  ;;  %v16713_v1 = vand.u32 4294901760, %v14860_v8  ;;  %v6694_v58 = vsub.f32 %v14840_v40, %v16708_v30  ;;  %v8996_v30 = vld [vmem:[%s16505_s1 + $0x9d0] sm:$0xff] }
 0x3b2   :  { %6597 = vmatpush.msrb.mxu0 %v14790_v27  ;;  %6746 = vmatpush.msrb.mxu2 %v14794_v17 }
 0x3b3   :  { %6666 = vmatpush.msrb.mxu1 %v6665_v62  ;;  %6787 = vmatpush.msrb.mxu3 %v14740_v20  ;;  %v8997_v62 = vld [vmem:[%s16505_s1 + $0x9d8] sm:$0xff]  ;;  %v16712_v23 = vand.u32 4294901760, %v14876_v7  ;;  %v6700_v28 = vsub.f32 %v14860_v8, %v16713_v1  ;;  %v6695_v39 = vand.u32 4294901760, %v6694_v58  ;;  %v6706_v58 = vsub.f32 %v14888_v63, %v16714_v52  ;;  %v8992_v52 = vld [vmem:[%s16505_s1 + $0x9b0] sm:$0xff] }
 0x3b4   :  { %6599 = vmatpush.msrb.mxu0 %v14802_v29  ;;  %6749 = vmatpush.msrb.mxu2 %v14806_v24  ;;  %v14912_v5 = vand.u32 4294901760, %v8997_v62 }
 0x3b5   :  { %6672 = vmatpush.msrb.mxu1 %v6671_v2  ;;  %6789 = vmatpush.msrb.mxu3 %v14755_v32  ;;  %v6689_v2 = vand.u32 4294901760, %v6688_v22  ;;  %v5604_v22 = vadd.f32 %v5603_v60, %v5503_v26  ;;  %v16715_v60 = vand.u32 4294901760, %v14908_v12  ;;  %v14937_v26 = vand.u32 4294901760, %v8996_v30 }
 0x3b6   :  { %6601 = vmatpush.msrb.mxu0 %v14829_v36  ;;  %6752 = vmatpush.msrb.mxu2 %v14822_v37  ;;  %v6701_v1 = vand.u32 4294901760, %v6700_v28 }
 0x3b7   :  { %6678 = vmatpush.msrb.mxu1 %v6677_v34  ;;  %6791 = vmatpush.msrb.mxu3 %v14773_v15  ;;  %v14923_v34 = vsub.f32 %v8999_v59, %v14893_v10  ;;  %v6957_v59 = vsub.f32 %v14876_v7, %v16712_v23  ;;  %v5658_v3 = vadd.f32 %v5657_v38, %v5604_v22  ;;  %v8994_v23 = vld [vmem:[%s16505_s1 + $0x9c0] sm:$0xff]  ;;  %v8993_v38 = vld [vmem:[%s16505_s1 + $0x9b8] sm:$0xff] }
 0x3b8   :  { %6603 = vmatpush.msrb.mxu0 %v14851_v14  ;;  %6755 = vmatpush.msrb.mxu2 %v14840_v40  ;;  %v6963_v28 = vsub.f32 %v14908_v12, %v16715_v60  ;;  %v14967_v43 = vsub.f32 %v8996_v30, %v14937_v26  ;;  %v14985_v53 = vand.u32 4294901760, %v8993_v38 }
 0x3b9   :  { %6684 = vmatpush.msrb.mxu1 %v6683_v0  ;;  %6793 = vmatpush.msrb.mxu3 %v14790_v27  ;;  %v5696_v0 = vpop.f32.mrf.mxu1  ;;  %v16716_v44 = vand.u32 4294901760, %v14923_v34  ;;  %v5765_v22 = vpop.f32.mrf.mxu2 }
 0x3ba   :  { %6609 = vmatmul.f32.vlgmr.msrb.gmra.mxu0 %v6608_v21  ;;  %v14945_v21 = vsub.f32 %v8997_v62, %v14912_v5  ;;  %6758 = vmatpush.msrb.mxu2 %v14860_v8  ;;  %v16718_v62 = vand.u32 4294901760, %v14927_v33 }
 0x3bb   :  { %6810 = vmatpush.msra.mxu0 %v6615_v13  ;;  %6690 = vmatpush.msrb.mxu1 %v6689_v2  ;;  %v14953_v13 = vand.u32 4294901760, %v8995_v11  ;;  %v5697_v2 = vadd.f32 %v5696_v0, %v5658_v3  ;;  %v6707_v0 = vand.u32 4294901760, %v6706_v58  ;;  %v6969_v30 = vsub.f32 %v14923_v34, %v16716_v44 }
 0x3bc   :  { %6795 = vmatpush.msrb.mxu3 %v14802_v29  ;;  %6761 = vmatpush.msrb.mxu2 %v14888_v63  ;;  %v6975_v58 = vsub.f32 %v14927_v33, %v16718_v62  ;;  %v17000_v44 = vand.u32 4294901760, %v14814_v51  ;;  %v5802_v3 = vpop.f32.mrf.mxu3  ;;  %v15016_v62 = vsub.f32 %v8993_v38, %v14985_v53  ;;  %v17003_v38 = vand.u32 4294901760, %v14700_v4 }
 0x3bd   :  { %6814 = vmatpush.msra.mxu0 %v6621_v50  ;;  %6696 = vmatpush.msrb.mxu1 %v6695_v39  ;;  %v14969_v50 = vand.u32 4294901760, %v8994_v23  ;;  %v6958_v39 = vand.u32 4294901760, %v6957_v59  ;;  %v14983_v60 = vsub.f32 %v8995_v11, %v14953_v13  ;;  %v5766_v59 = vadd.f32 %v5765_v22, %v5697_v2 }
 0x3be   :  { %6797 = vmatpush.msrb.mxu3 %v14829_v36  ;;  %6764 = vmatmul.f32.vlgmr.msrb.gmra.mxu2 %v14814_v51  ;;  %v6964_v11 = vand.u32 4294901760, %v6963_v28  ;;  %v15003_v2 = vand.u32 4294901760, %v8992_v52  ;;  %v17001_v22 = vand.u32 4294901760, %v14945_v21  ;;  %v8990_v51 = vld [vmem:[%s16505_s1 + $0x9a0] sm:$0xff]  ;;  %v6970_v28 = vand.u32 4294901760, %v6969_v30 }
 0x3bf   :  { %6818 = vmatpush.msra.mxu0 %v6627_v31  ;;  %6914 = vmatpush.msra.mxu2 %v14845_v54  ;;  %v16999_v31 = vand.u32 4294901760, %v14677_v47  ;;  %v15001_v47 = vsub.f32 %v8994_v23, %v14969_v50  ;;  %v16719_v23 = vand.u32 4294901760, %v14983_v60  ;;  %v17004_v30 = vand.u32 4294901760, %v14967_v43 }
 0x3c0   :  { %6702 = vmatpush.msrb.mxu1 %v6701_v1  ;;  %6799 = vmatpush.msrb.mxu3 %v14851_v14  ;;  %v8991_v1 = vld [vmem:[%s16505_s1 + $0x9a8] sm:$0xff]  ;;  %v9081_v14 = vld [vmem:[%s16508_s3 + $0x3] ss:$0 sm:$0xff]  ;;  %v17005_v4 = vand.u32 4294901760, %v14727_v19 }
 0x3c1   :  { %6822 = vmatpush.msra.mxu0 %v16999_v31  ;;  %6803 = vmatmul.f32.vlgmr.msrb.gmra.mxu3 %v17000_v44  ;;  %v6981_v31 = vsub.f32 %v14945_v21, %v17001_v22  ;;  %v17002_v44 = vand.u32 4294901760, %v14683_v42  ;;  %v5803_v22 = vadd.f32 %v5802_v3, %v5766_v59  ;;  %v8989_v42 = vld [vmem:[%s16505_s1 + $0x998] sm:$0xff]  ;;  %v15035_v3 = vsub.f32 %v8992_v52, %v15003_v2 }
 0x3c2   :  { %6916 = vmatpush.msra.mxu2 %v14878_v18  ;;  %6959 = vmatpush.msra.mxu3 %v6958_v39  ;;  %v15018_v39 = vand.u32 4294901760, %v8991_v1  ;;  %v15037_v59 = vand.u32 4294901760, %v8990_v51 }
 0x3c3   :  { %6708 = vmatpush.msrb.mxu1 %v6707_v0  ;;  %6826 = vmatpush.msra.mxu0 %v17002_v44  ;;  %v6976_v0 = vand.u32 4294901760, %v6975_v58  ;;  %v16721_v44 = vand.u32 4294901760, %v15001_v47  ;;  %v6982_v58 = vand.u32 4294901760, %v6981_v31  ;;  %v5810_v19 = vmul.f32 %v9081_v14, %v5803_v22  ;;  %v8937_v14 = vld [vmem:[%s16506_s0 + $0x98] sm:$0xff] }
 0x3c4   :  { %6710 = vmatmul.f32.vlgmr.msrb.gmra.mxu1 %v14784_v25  ;;  %6918 = vmatpush.msra.mxu2 %v14893_v10  ;;  %v15048_v52 = vsub.f32 %v8991_v1, %v15018_v39  ;;  %v17006_v31 = vand.u32 4294901760, %v14743_v35 }
 0x3c5   :  { %6877 = vmatpush.msra.mxu1 %v14614_v45  ;;  %6965 = vmatpush.msra.mxu3 %v6964_v11  ;;  %v6987_v45 = vsub.f32 %v14967_v43, %v17004_v30  ;;  %v6993_v11 = vsub.f32 %v14983_v60, %v16719_v23  ;;  %v15050_v30 = vand.u32 4294901760, %v8989_v42  ;;  %v6999_v1 = vsub.f32 %v15001_v47, %v16721_v44 }
 0x3c6   :  { %6830 = vmatpush.msra.mxu0 %v17003_v38  ;;  %6920 = vmatpush.msra.mxu2 %v14902_v49  ;;  %v16720_v38 = vand.u32 4294901760, %v15016_v62  ;;  %v15064_v23 = vsub.f32 %v8990_v51, %v15037_v59 }
 0x3c7   :  { %6879 = vmatpush.msra.mxu1 %v14624_v48  ;;  %6971 = vmatpush.msra.mxu3 %v6970_v28  ;;  %v8988_v48 = vld [vmem:[%s16505_s1 + $0x990] sm:$0xff]  ;;  %v6988_v28 = vand.u32 4294901760, %v6987_v45  ;;  %v6994_v51 = vand.u32 4294901760, %v6993_v11  ;;  %v7016_v45 = vand.u32 4294901760, %v15048_v52  ;;  %v15093_v11 = vand.u32 4294901760, %v8937_v14 }
 0x3c8   :  { %6834 = vmatpush.msra.mxu0 %v17005_v4  ;;  %6922 = vmatpush.msra.mxu2 %v14912_v5  ;;  %v7010_v4 = vand.u32 4294901760, %v15035_v3  ;;  %v15074_v35 = vand.u32 4294901760, %v8988_v48  ;;  %v7005_v22 = vsub.f32 %v15016_v62, %v16720_v38  ;;  %v7022_v44 = vand.u32 4294901760, %v15064_v23 }
 0x3c9   :  { %6881 = vmatpush.msra.mxu1 %v14634_v6  ;;  %6977 = vmatpush.msra.mxu3 %v6976_v0  ;;  %v8987_v6 = vld [vmem:[%s16505_s1 + $0x988] sm:$0xff]  ;;  %v17007_v0 = vand.u32 4294901760, %v14759_v55  ;;  %v5811_v55 = vsel %vm1463_vm0, %v5810_v19, 0.0 }
 0x3ca   :  { %6838 = vmatpush.msra.mxu0 %v17006_v31  ;;  %6924 = vmatpush.msra.mxu2 %v14937_v26  ;;  %v15083_v31 = vsub.f32 %v8989_v42, %v15050_v30  ;;  %v7000_v42 = vand.u32 4294901760, %v6999_v1  ;;  %v7011_v38 = vsub.f32 %v15035_v3, %v7010_v4 }
 0x3cb   :  { %6883 = vmatpush.msra.mxu1 %v14647_v16  ;;  %6983 = vmatpush.msra.mxu3 %v6982_v58  ;;  %v8986_v16 = vld [vmem:[%s16505_s1 + $0x980] sm:$0xff]  ;;  %v15091_v58 = vand.u32 4294901760, %v8987_v6 }
 0x3cc   :  { %6842 = vmatpush.msra.mxu0 %v17007_v0  ;;  %6926 = vmatpush.msra.mxu2 %v14953_v13  ;;  %v17008_v0 = vand.u32 4294901760, %v14777_v61  ;;  %v15106_v19 = vand.u32 4294901760, %v8986_v16  ;;  %v7006_v61 = vand.u32 4294901760, %v7005_v22  ;;  %v7028_v1 = vand.u32 4294901760, %v15083_v31 }
 0x3cd   :  { %6885 = vmatpush.msra.mxu1 %v14657_v56  ;;  %6989 = vmatpush.msra.mxu3 %v6988_v28  ;;  %v15104_v56 = vsub.f32 %v8988_v48, %v15074_v35  ;;  %v7017_v28 = vsub.f32 %v15048_v52, %v7016_v45  ;;  %v15119_v48 = vsub.f32 %v8937_v14, %v15093_v11  ;;  %v17011_v14 = vand.u32 4294901760, %v14822_v37 }
 0x3ce   :  { %6846 = vmatpush.msra.mxu0 %v17008_v0  ;;  %6928 = vmatpush.msra.mxu2 %v14969_v50  ;;  %v17009_v0 = vand.u32 4294901760, %v14794_v17  ;;  %v7023_v22 = vsub.f32 %v15064_v23, %v7022_v44  ;;  %v15130_v17 = vsub.f32 %v8986_v16, %v15106_v19 }
 0x3cf   :  { %6887 = vmatpush.msra.mxu1 %v14668_v9  ;;  %6995 = vmatpush.msra.mxu3 %v6994_v51  ;;  %v15116_v9 = vsub.f32 %v8987_v6, %v15091_v58  ;;  %v7012_v51 = vand.u32 4294901760, %v7011_v38  ;;  %v7018_v6 = vand.u32 4294901760, %v7017_v28  ;;  %v7029_v38 = vsub.f32 %v15083_v31, %v7028_v1 }
 0x3d0   :  { %5812 = vadd.xlane.f32.xlu1 %v5811_v55  ;;  %6850 = vmatpush.msra.mxu0 %v17009_v0  ;;  %v17010_v55 = vand.u32 4294901760, %v14806_v24  ;;  %v6947_v24 = vand.u32 4294901760, %v15119_v48  ;;  %v7024_v16 = vand.u32 4294901760, %v7023_v22  ;;  %v17013_v28 = vand.u32 4294901760, %v14860_v8 }
 0x3d1   :  { %6889 = vmatpush.msra.mxu1 %v14693_v46  ;;  %6930 = vmatpush.msra.mxu2 %v14985_v53  ;;  %v7034_v46 = vand.u32 4294901760, %v15104_v56  ;;  %v17014_v0 = vand.u32 4294901760, %v14888_v63  ;;  %v17017_v63 = vld [vmem:[#allocation3_spill] sm:$0xff] }
 0x3d2   :  { %7001 = vmatpush.msra.mxu3 %v7000_v42  ;;  %6854 = vmatpush.msra.mxu0 %v17010_v55  ;;  %v17012_v42 = vand.u32 4294901760, %v14840_v40 }
 0x3d3   :  { %6891 = vmatpush.msra.mxu1 %v14710_v41  ;;  %6932 = vmatpush.msra.mxu2 %v15003_v2  ;;  %v7040_v41 = vand.u32 4294901760, %v15116_v9  ;;  %v7035_v37 = vsub.f32 %v15104_v56, %v7034_v46 }
 0x3d4   :  { %7007 = vmatpush.msra.mxu3 %v7006_v61  ;;  %6858 = vmatpush.msra.mxu0 %v17011_v14  ;;  %v7046_v61 = vand.u32 4294901760, %v15130_v17 }
 0x3d5   :  { %6893 = vmatpush.msra.mxu1 %v14724_v57  ;;  %6934 = vmatpush.msra.mxu2 %v15018_v39  ;;  %v7030_v57 = vand.u32 4294901760, %v7029_v38  ;;  %v7041_v40 = vsub.f32 %v15116_v9, %v7040_v41  ;;  %v7036_v8 = vand.u32 4294901760, %v7035_v37 }
 0x3d6   :  { %7013 = vmatpush.msra.mxu3 %v7012_v51  ;;  %6862 = vmatpush.msra.mxu0 %v17012_v42 }
 0x3d7   :  { %6895 = vmatpush.msra.mxu1 %v14740_v20  ;;  %6936 = vmatpush.msra.mxu2 %v15037_v59  ;;  %v6948_v20 = vsub.f32 %v15119_v48, %v6947_v24  ;;  %v7042_v51 = vand.u32 4294901760, %v7041_v40 }
 0x3d8   :  { %7019 = vmatpush.msra.mxu3 %v7018_v6  ;;  %6866 = vmatpush.msra.mxu0 %v17013_v28 }
 0x3d9   :  { %6897 = vmatpush.msra.mxu1 %v14755_v32  ;;  %6938 = vmatpush.msra.mxu2 %v15050_v30  ;;  %v7047_v32 = vsub.f32 %v15130_v17, %v7046_v61  ;;  %v6949_v22 = vand.u32 4294901760, %v6948_v20 }
 0x3da   :  { %7025 = vmatpush.msra.mxu3 %v7024_v16  ;;  %6870 = vmatpush.msra.mxu0 %v17014_v0  ;;  %v9011_v0 = vld [vmem:[%s16505_s1 + $0xa18] sm:$0xff] }
 0x3db   :  { %6899 = vmatpush.msra.mxu1 %v14773_v15  ;;  %6940 = vmatpush.msra.mxu2 %v15074_v35  ;;  %v7048_v15 = vand.u32 4294901760, %v7047_v32 }
 0x3dc   :  { %7031 = vmatpush.msra.mxu3 %v7030_v57  ;;  %6872 = vmatmul.f32.vlgmr.msra.gmra.mxu0 %v14784_v25 }
 0x3dd   :  { %6901 = vmatpush.msra.mxu1 %v14790_v27  ;;  %7057 = vmatpush.msrb.mxu0 %v14876_v7  ;;  %v17015_v27 = vand.u32 4294901760, %v14876_v7  ;;  %v17018_v7 = vand.u32 4294901760, %v14923_v34 }
 0x3de   :  { %6942 = vmatpush.msra.mxu2 %v15091_v58  ;;  %7037 = vmatpush.msra.mxu3 %v7036_v8 }
 0x3df   :  { %6903 = vmatpush.msra.mxu1 %v14802_v29  ;;  %7060 = vmatpush.msrb.mxu0 %v14908_v12  ;;  %v17016_v29 = vand.u32 4294901760, %v14908_v12  ;;  %v9022_v12 = vld [vmem:[%s16505_s1 + $0xa70] sm:$0xff] }
 0x3e0   :  { %6944 = vmatpush.msra.mxu2 %v15106_v19  ;;  %7043 = vmatpush.msra.mxu3 %v7042_v51 }
 0x3e1   :  { %6950 = vmatmul.f32.vlgmr.msra.gmra.mxu2 %v6949_v22  ;;  %7063 = vmatpush.msrb.mxu0 %v14923_v34  ;;  %v9021_v34 = vld [vmem:[%s16505_s1 + $0xa68] sm:$0xff] }
 0x3e2   :  { %7151 = vmatpush.msrb.mxu2 %v17015_v27  ;;  %6905 = vmatpush.msra.mxu1 %v14829_v36  ;;  %v17019_v36 = vand.u32 4294901760, %v14927_v33  ;;  %v9010_v27 = vld [vmem:[%s16505_s1 + $0xa10] sm:$0xff] }
 0x3e3   :  { %7049 = vmatpush.msra.mxu3 %v7048_v15  ;;  %7066 = vmatpush.msrb.mxu0 %v14927_v33  ;;  %v17022_v33 = vand.u32 4294901760, %v14983_v60 }
 0x3e4   :  { %7051 = vmatmul.f32.vlgmr.msra.gmra.mxu3 %v15093_v11  ;;  %7155 = vmatpush.msrb.mxu2 %v17016_v29 }
 0x3e5   :  { %7218 = vmatpush.msrb.mxu3 %v14845_v54  ;;  %6907 = vmatpush.msra.mxu1 %v17017_v63 }
 0x3e6   :  { %7069 = vmatpush.msrb.mxu0 %v14945_v21  ;;  %6909 = vmatmul.f32.vlgmr.msra.gmra.mxu1 %v14784_v25  ;;  %v17020_v25 = vand.u32 4294901760, %v14945_v21  ;;  %v15251_v21 = vand.u32 4294901760, %v9021_v34 }
 0x3e7   :  { %7159 = vmatpush.msrb.mxu2 %v17018_v7  ;;  %7110 = vmatpush.msrb.mxu1 %v14845_v54  ;;  %v17021_v54 = vand.u32 4294901760, %v14967_v43  ;;  %v15403_v7 = vand.u32 4294901760, %v9011_v0 }
 0x3e8   :  { %7220 = vmatpush.msrb.mxu3 %v14878_v18  ;;  %7072 = vmatpush.msrb.mxu0 %v14967_v43 }
 0x3e9   :  { %7163 = vmatpush.msrb.mxu2 %v17019_v36  ;;  %7112 = vmatpush.msrb.mxu1 %v14878_v18  ;;  %v9023_v18 = vld [vmem:[%s16505_s1 + $0xa78] sm:$0xff] }
 0x3ea   :  { %7222 = vmatpush.msrb.mxu3 %v14893_v10  ;;  %7075 = vmatpush.msrb.mxu0 %v14983_v60  ;;  %v15241_v60 = vand.u32 4294901760, %v9022_v12 }
 0x3eb   :  { %7167 = vmatpush.msrb.mxu2 %v17020_v25  ;;  %7114 = vmatpush.msrb.mxu1 %v14893_v10  ;;  %v17023_v10 = vand.u32 4294901760, %v15001_v47 }
 0x3ec   :  { %7224 = vmatpush.msrb.mxu3 %v14902_v49  ;;  %7078 = vmatpush.msrb.mxu0 %v15001_v47 }
 0x3ed   :  { %7171 = vmatpush.msrb.mxu2 %v17021_v54  ;;  %7116 = vmatpush.msrb.mxu1 %v14902_v49  ;;  %v17024_v49 = vand.u32 4294901760, %v15016_v62  ;;  %v9009_v54 = vld [vmem:[%s16505_s1 + $0xa08] sm:$0xff] }
 0x3ee   :  { %7226 = vmatpush.msrb.mxu3 %v14912_v5  ;;  %7081 = vmatpush.msrb.mxu0 %v15016_v62  ;;  %v9019_v62 = vld [vmem:[%s16505_s1 + $0xa58] sm:$0xff] }
 0x3ef   :  { %7175 = vmatpush.msrb.mxu2 %v17022_v33  ;;  %7118 = vmatpush.msrb.mxu1 %v14912_v5  ;;  %v15231_v5 = vand.u32 4294901760, %v9023_v18  ;;  %v15277_v47 = vand.u32 4294901760, %v9019_v62 }
 0x3f0   :  { %7228 = vmatpush.msrb.mxu3 %v14937_v26  ;;  %7084 = vmatpush.msrb.mxu0 %v15035_v3 }
 0x3f1   :  { %7179 = vmatpush.msrb.mxu2 %v17023_v10  ;;  %7120 = vmatpush.msrb.mxu1 %v14937_v26  ;;  %v9020_v26 = vld [vmem:[%s16505_s1 + $0xa60] sm:$0xff] }
 0x3f2   :  { %7230 = vmatpush.msrb.mxu3 %v14953_v13  ;;  %7087 = vmatpush.msrb.mxu0 %v15048_v52  ;;  %v15264_v43 = vand.u32 4294901760, %v9020_v26  ;;  %v9016_v52 = vld [vmem:[%s16505_s1 + $0xa40] sm:$0xff] }
 0x3f3   :  { %7183 = vmatpush.msrb.mxu2 %v17024_v49  ;;  %7122 = vmatpush.msrb.mxu1 %v14953_v13  ;;  %v15254_v13 = vsub.f32 %v9023_v18, %v15231_v5  ;;  %v15418_v49 = vand.u32 4294901760, %v9010_v27 }
 0x3f4   :  { %7232 = vmatpush.msrb.mxu3 %v14969_v50  ;;  %7090 = vmatpush.msrb.mxu0 %v15064_v23  ;;  %v15281_v23 = vsub.f32 %v9021_v34, %v15251_v21 }
 0x3f5   :  { %7187 = vmatpush.msrb.mxu2 %v7010_v4  ;;  %7124 = vmatpush.msrb.mxu1 %v14969_v50  ;;  %v15267_v50 = vsub.f32 %v9022_v12, %v15241_v60  ;;  %v9039_v12 = vld [vmem:[%s16505_s1 + $0xaf8] sm:$0xff] }
 0x3f6   :  { %7234 = vmatpush.msrb.mxu3 %v14985_v53  ;;  %7093 = vmatpush.msrb.mxu0 %v15083_v31  ;;  %v15312_v31 = vsub.f32 %v9019_v62, %v15277_v47 }
 0x3f7   :  { %7191 = vmatpush.msrb.mxu2 %v7016_v45  ;;  %7126 = vmatpush.msrb.mxu1 %v14985_v53  ;;  %v9018_v53 = vld [vmem:[%s16505_s1 + $0xa50] sm:$0xff]  ;;  %v7388_v3 = vand.u32 4294901760, %v15267_v50  ;;  %v7394_v45 = vand.u32 4294901760, %v15281_v23 }
 0x3f8   :  { %7236 = vmatpush.msrb.mxu3 %v15003_v2  ;;  %7096 = vmatpush.msrb.mxu0 %v15104_v56  ;;  %v9015_v56 = vld [vmem:[%s16505_s1 + $0xa38] sm:$0xff]  ;;  %v7406_v14 = vand.u32 4294901760, %v15312_v31 }
 0x3f9   :  { %7195 = vmatpush.msrb.mxu2 %v7022_v44  ;;  %7128 = vmatpush.msrb.mxu1 %v15003_v2  ;;  %v7382_v2 = vand.u32 4294901760, %v15254_v13  ;;  %v15291_v44 = vand.u32 4294901760, %v9018_v53  ;;  %v7395_v38 = vsub.f32 %v15281_v23, %v7394_v45 }
 0x3fa   :  { %7238 = vmatpush.msrb.mxu3 %v15018_v39  ;;  %7099 = vmatpush.msrb.mxu0 %v15116_v9  ;;  %v7407_v40 = vsub.f32 %v15312_v31, %v7406_v14 }
 0x3fb   :  { %7199 = vmatpush.msrb.mxu2 %v7028_v1  ;;  %7130 = vmatpush.msrb.mxu1 %v15018_v39  ;;  %v9017_v39 = vld [vmem:[%s16505_s1 + $0xa48] sm:$0xff]  ;;  %v15324_v1 = vand.u32 4294901760, %v9016_v52  ;;  %v15328_v55 = vsub.f32 %v9018_v53, %v15291_v44  ;;  %v7396_v28 = vand.u32 4294901760, %v7395_v38  ;;  %v15435_v53 = vand.u32 4294901760, %v9009_v54 }
 0x3fc   :  { %7240 = vmatpush.msrb.mxu3 %v15037_v59  ;;  %7102 = vmatpush.msrb.mxu0 %v15130_v17  ;;  %v15308_v4 = vand.u32 4294901760, %v9017_v39  ;;  %v15335_v17 = vand.u32 4294901760, %v9015_v56  ;;  %v7408_v29 = vand.u32 4294901760, %v7407_v40 }
 0x3fd   :  { %7203 = vmatpush.msrb.mxu2 %v7034_v46  ;;  %7132 = vmatpush.msrb.mxu1 %v15037_v59  ;;  %v15295_v59 = vsub.f32 %v9020_v26, %v15264_v43  ;;  %v9014_v46 = vld [vmem:[%s16505_s1 + $0xa30] sm:$0xff]  ;;  %v16731_v37 = vand.u32 4294901760, %v15328_v55  ;;  %v9008_v26 = vld [vmem:[%s16505_s1 + $0xa00] sm:$0xff]  ;;  %v15469_v40 = vsub.f32 %v9009_v54, %v15435_v53 }
 0x3fe   :  { %7242 = vmatpush.msrb.mxu3 %v15050_v30  ;;  %7105 = vmatmul.f32.vlgmr.msrb.gmra.mxu0 %v15119_v48  ;;  %v15366_v57 = vsub.f32 %v9015_v56, %v15335_v17  ;;  %v15446_v56 = vand.u32 4294901760, %v9039_v12 }
 0x3ff   :  { %7207 = vmatpush.msrb.mxu2 %v7040_v41  ;;  %7340 = vmatpush.msra.mxu0 %v15231_v5  ;;  %v7400_v9 = vand.u32 4294901760, %v15295_v59  ;;  %v15344_v41 = vsub.f32 %v9017_v39, %v15308_v4  ;;  %v7413_v32 = vsub.f32 %v15328_v55, %v16731_v37 }
 0x400   :  { %7134 = vmatpush.msrb.mxu1 %v15050_v30  ;;  %7244 = vmatpush.msrb.mxu3 %v15074_v35  ;;  %v7383_v30 = vsub.f32 %v15254_v13, %v7382_v2  ;;  %v16727_v15 = vand.u32 4294901760, %v15366_v57 }
 0x401   :  { %7211 = vmatpush.msrb.mxu2 %v7046_v61  ;;  %7342 = vmatpush.msra.mxu0 %v15241_v60  ;;  %v7401_v42 = vsub.f32 %v15295_v59, %v7400_v9  ;;  %v15360_v61 = vsub.f32 %v9016_v52, %v15324_v1  ;;  %v16730_v48 = vand.u32 4294901760, %v15344_v41  ;;  %v7414_v33 = vand.u32 4294901760, %v7413_v32 }
 0x402   :  { %7136 = vmatpush.msrb.mxu1 %v15074_v35  ;;  %7246 = vmatpush.msrb.mxu3 %v15091_v58  ;;  %v7389_v35 = vsub.f32 %v15267_v50, %v7388_v3  ;;  %v7384_v6 = vand.u32 4294901760, %v7383_v30  ;;  %v7431_v34 = vsub.f32 %v15366_v57, %v16727_v15  ;;  %v15439_v52 = vsub.f32 %v9011_v0, %v15403_v7 }
 0x403   :  { %7213 = vmatmul.f32.vlgmr.msrb.gmra.mxu2 %v15093_v11  ;;  %7344 = vmatpush.msra.mxu0 %v15251_v21  ;;  %v7402_v8 = vand.u32 4294901760, %v7401_v42  ;;  %v16729_v22 = vand.u32 4294901760, %v15360_v61  ;;  %v7419_v63 = vsub.f32 %v15344_v41, %v16730_v48  ;;  %v9037_v42 = vld [vmem:[%s16505_s1 + $0xae8] sm:$0xff] }
 0x404   :  { %7483 = vmatpush.msra.mxu2 %v15254_v13  ;;  %7138 = vmatpush.msrb.mxu1 %v15091_v58  ;;  %v15348_v58 = vand.u32 4294901760, %v9014_v46  ;;  %v7390_v16 = vand.u32 4294901760, %v7389_v35  ;;  %v9038_v35 = vld [vmem:[%s16505_s1 + $0xaf0] sm:$0xff] }
 0x405   :  { %7248 = vmatpush.msrb.mxu3 %v15106_v19  ;;  %7346 = vmatpush.msra.mxu0 %v15264_v43  ;;  %v7425_v10 = vsub.f32 %v15360_v61, %v16729_v22  ;;  %v7420_v62 = vand.u32 4294901760, %v7419_v63  ;;  %v15471_v0 = vand.u32 4294901760, %v9038_v35 }
 0x406   :  { %7250 = vmatmul.f32.vlgmr.msrb.gmra.mxu3 %v15093_v11  ;;  %7486 = vmatpush.msra.mxu2 %v15267_v50  ;;  %v9013_v11 = vld [vmem:[%s16505_s1 + $0xa28] sm:$0xff] }
 0x407   :  { %7536 = vmatpush.msra.mxu3 %v15231_v5  ;;  %7140 = vmatpush.msrb.mxu1 %v15106_v19  ;;  %v9012_v19 = vld [vmem:[%s16505_s1 + $0xa20] sm:$0xff]  ;;  %v15375_v20 = vand.u32 4294901760, %v9013_v11 }
 0x408   :  { %7348 = vmatpush.msra.mxu0 %v15277_v47  ;;  %7144 = vmatmul.f32.vlgmr.msrb.gmra.mxu1 %v6947_v24  ;;  %v15381_v24 = vsub.f32 %v9014_v46, %v15348_v58  ;;  %v15390_v51 = vand.u32 4294901760, %v9012_v19  ;;  %v7426_v46 = vand.u32 4294901760, %v7425_v10  ;;  %v9035_v10 = vld [vmem:[%s16505_s1 + $0xad8] sm:$0xff] }
 0x409   :  { %7489 = vmatpush.msra.mxu2 %v15281_v23  ;;  %7385 = vmatpush.msra.mxu1 %v7384_v6  ;;  %v15406_v36 = vsub.f32 %v9013_v11, %v15375_v20  ;;  %v15452_v6 = vand.u32 4294901760, %v9008_v26  ;;  %v15456_v11 = vsub.f32 %v9010_v27, %v15418_v49  ;;  %v15479_v27 = vsub.f32 %v9039_v12, %v15446_v56 }
 0x40a   :  { %7538 = vmatpush.msra.mxu3 %v15241_v60  ;;  %7350 = vmatpush.msra.mxu0 %v15291_v44  ;;  %v16725_v25 = vand.u32 4294901760, %v15381_v24  ;;  %v15421_v18 = vsub.f32 %v9012_v19, %v15390_v51 }
 0x40b   :  { %7492 = vmatpush.msra.mxu2 %v15295_v59  ;;  %7391 = vmatpush.msra.mxu1 %v7390_v16  ;;  %v16724_v39 = vand.u32 4294901760, %v15406_v36  ;;  %v7432_v16 = vand.u32 4294901760, %v7431_v34  ;;  %v16726_v63 = vand.u32 4294901760, %v15456_v11  ;;  %v15487_v54 = vsub.f32 %v9008_v26, %v15452_v6 }
 0x40c   :  { %7540 = vmatpush.msra.mxu3 %v15251_v21  ;;  %7352 = vmatpush.msra.mxu0 %v15308_v4  ;;  %v7437_v30 = vsub.f32 %v15381_v24, %v16725_v25  ;;  %v16722_v38 = vand.u32 4294901760, %v15421_v18 }
 0x40d   :  { %7495 = vmatpush.msra.mxu2 %v15312_v31  ;;  %7397 = vmatpush.msra.mxu1 %v7396_v28  ;;  %v7443_v19 = vsub.f32 %v15406_v36, %v16724_v39  ;;  %v16723_v28 = vand.u32 4294901760, %v15439_v52 }
 0x40e   :  { %7542 = vmatpush.msra.mxu3 %v15264_v43  ;;  %7354 = vmatpush.msra.mxu0 %v15324_v1  ;;  %v7438_v32 = vand.u32 4294901760, %v7437_v30  ;;  %v15504_v30 = vsub.f32 %v9038_v35, %v15471_v0  ;;  %v7461_v35 = vsub.f32 %v15456_v11, %v16726_v63 }
 0x40f   :  { %7498 = vmatpush.msra.mxu2 %v15328_v55  ;;  %7403 = vmatpush.msra.mxu1 %v7402_v8  ;;  %v9036_v8 = vld [vmem:[%s16505_s1 + $0xae0] sm:$0xff]  ;;  %v7444_v34 = vand.u32 4294901760, %v7443_v19  ;;  %v7455_v26 = vsub.f32 %v15439_v52, %v16723_v28  ;;  %v16733_v28 = vand.u32 4294901760, %v15487_v54 }
 0x410   :  { %7544 = vmatpush.msra.mxu3 %v15277_v47  ;;  %7356 = vmatpush.msra.mxu0 %v15335_v17  ;;  %v15496_v12 = vand.u32 4294901760, %v9036_v8  ;;  %v16734_v63 = vand.u32 4294901760, %v15504_v30 }
 0x411   :  { %7501 = vmatpush.msra.mxu2 %v15344_v41  ;;  %7409 = vmatpush.msra.mxu1 %v7408_v29  ;;  %v7449_v29 = vsub.f32 %v15421_v18, %v16722_v38  ;;  %v15509_v38 = vand.u32 4294901760, %v9035_v10  ;;  %v7473_v22 = vsub.f32 %v15487_v54, %v16733_v28 }
 0x412   :  { %7546 = vmatpush.msra.mxu3 %v15291_v44  ;;  %7358 = vmatpush.msra.mxu0 %v15348_v58  ;;  %v15525_v25 = vsub.f32 %v9036_v8, %v15496_v12 }
 0x413   :  { %7504 = vmatpush.msra.mxu2 %v15360_v61  ;;  %7415 = vmatpush.msra.mxu1 %v7414_v33  ;;  %v15489_v33 = vand.u32 4294901760, %v9037_v42  ;;  %v7450_v19 = vand.u32 4294901760, %v7449_v29  ;;  %v7456_v29 = vand.u32 4294901760, %v7455_v26  ;;  %v9032_v26 = vld [vmem:[%s16505_s1 + $0xac0] sm:$0xff] }
 0x414   :  { %7548 = vmatpush.msra.mxu3 %v15308_v4  ;;  %7360 = vmatpush.msra.mxu0 %v15375_v20  ;;  %v15569_v13 = vand.u32 4294901760, %v9032_v26 }
 0x415   :  { %7507 = vmatpush.msra.mxu2 %v15366_v57  ;;  %7421 = vmatpush.msra.mxu1 %v7420_v62  ;;  %v16728_v62 = vand.u32 4294901760, %v15469_v40  ;;  %v15520_v39 = vsub.f32 %v9037_v42, %v15489_v33 }
 0x416   :  { %7550 = vmatpush.msra.mxu3 %v15324_v1  ;;  %7362 = vmatpush.msra.mxu0 %v15390_v51 }
 0x417   :  { %7510 = vmatpush.msra.mxu2 %v15381_v24  ;;  %7427 = vmatpush.msra.mxu1 %v7426_v46  ;;  %v16732_v46 = vand.u32 4294901760, %v15479_v27  ;;  %v7467_v42 = vsub.f32 %v15469_v40, %v16728_v62  ;;  %v7462_v62 = vand.u32 4294901760, %v7461_v35  ;;  %v16735_v48 = vand.u32 4294901760, %v15520_v39 }
 0x418   :  { %7552 = vmatpush.msra.mxu3 %v15335_v17  ;;  %7364 = vmatpush.msra.mxu0 %v15403_v7 }
 0x419   :  { %7513 = vmatpush.msra.mxu2 %v15406_v36  ;;  %7433 = vmatpush.msra.mxu1 %v7432_v16  ;;  %v9034_v16 = vld [vmem:[%s16505_s1 + $0xad0] sm:$0xff]  ;;  %v7724_v8 = vsub.f32 %v15479_v27, %v16732_v46  ;;  %v7468_v35 = vand.u32 4294901760, %v7467_v42  ;;  %v7730_v46 = vsub.f32 %v15504_v30, %v16734_v63  ;;  %v7474_v63 = vand.u32 4294901760, %v7473_v22  ;;  %v9029_v22 = vld [vmem:[%s16505_s1 + $0xaa8] sm:$0xff] }
 0x41a   :  { %7554 = vmatpush.msra.mxu3 %v15348_v58  ;;  %7366 = vmatpush.msra.mxu0 %v15418_v49  ;;  %v15535_v15 = vand.u32 4294901760, %v9034_v16  ;;  %v9030_v42 = vld [vmem:[%s16505_s1 + $0xab0] sm:$0xff]  ;;  %v15616_v59 = vand.u32 4294901760, %v9029_v22 }
 0x41b   :  { %7516 = vmatpush.msra.mxu2 %v15421_v18  ;;  %7439 = vmatpush.msra.mxu1 %v7438_v32  ;;  %v9033_v32 = vld [vmem:[%s16505_s1 + $0xac8] sm:$0xff]  ;;  %v15601_v23 = vand.u32 4294901760, %v9030_v42 }
 0x41c   :  { %7556 = vmatpush.msra.mxu3 %v15375_v20  ;;  %7368 = vmatpush.msra.mxu0 %v15435_v53  ;;  %v15553_v37 = vand.u32 4294901760, %v9033_v32  ;;  %v15567_v28 = vsub.f32 %v9034_v16, %v15535_v15  ;;  %v7736_v16 = vsub.f32 %v15520_v39, %v16735_v48  ;;  %v15599_v48 = vsub.f32 %v9032_v26, %v15569_v13 }
 0x41d   :  { %7519 = vmatpush.msra.mxu2 %v15439_v52  ;;  %7445 = vmatpush.msra.mxu1 %v7444_v34  ;;  %v15543_v34 = vsub.f32 %v9035_v10, %v15509_v38  ;;  %v16736_v10 = vand.u32 4294901760, %v15525_v25 }
 0x41e   :  { %7558 = vmatpush.msra.mxu3 %v15390_v51  ;;  %7370 = vmatpush.msra.mxu0 %v15452_v6  ;;  %v15583_v50 = vsub.f32 %v9033_v32, %v15553_v37  ;;  %v7731_v32 = vand.u32 4294901760, %v7730_v46  ;;  %v9028_v46 = vld [vmem:[%s16505_s1 + $0xaa0] sm:$0xff] }
 0x41f   :  { %7522 = vmatpush.msra.mxu2 %v15456_v11  ;;  %7451 = vmatpush.msra.mxu1 %v7450_v19  ;;  %v9031_v19 = vld [vmem:[%s16505_s1 + $0xab8] sm:$0xff]  ;;  %v15632_v31 = vand.u32 4294901760, %v9028_v46 }
 0x420   :  { %7560 = vmatpush.msra.mxu3 %v15403_v7  ;;  %7577 = vmatpush.msrb.mxu0 %v7382_v2  ;;  %v7725_v2 = vand.u32 4294901760, %v7724_v8  ;;  %v16738_v8 = vand.u32 4294901760, %v15567_v28  ;;  %v16739_v26 = vand.u32 4294901760, %v15583_v50 }
 0x421   :  { %7525 = vmatpush.msra.mxu2 %v15469_v40  ;;  %7457 = vmatpush.msra.mxu1 %v7456_v29  ;;  %v16737_v29 = vand.u32 4294901760, %v15543_v34 }
 0x422   :  { %7562 = vmatpush.msra.mxu3 %v15418_v49  ;;  %7581 = vmatpush.msrb.mxu0 %v7388_v3  ;;  %v15585_v3 = vand.u32 4294901760, %v9031_v19 }
 0x423   :  { %7528 = vmatpush.msra.mxu2 %v15487_v54  ;;  %7463 = vmatpush.msra.mxu1 %v7462_v62  ;;  %v7742_v62 = vsub.f32 %v15525_v25, %v16736_v10 }
 0x424   :  { %7564 = vmatpush.msra.mxu3 %v15435_v53  ;;  %7585 = vmatpush.msrb.mxu0 %v7394_v45  ;;  %v7748_v45 = vsub.f32 %v15543_v34, %v16737_v29  ;;  %v15614_v10 = vsub.f32 %v9031_v19, %v15585_v3  ;;  %v9027_v29 = vld [vmem:[%s16505_s1 + $0xa98] sm:$0xff]  ;;  %v16740_v19 = vand.u32 4294901760, %v15599_v48 }
 0x425   :  { %7681 = vmatpush.msrb.mxu2 %v15446_v56  ;;  %7469 = vmatpush.msra.mxu1 %v7468_v35  ;;  %v7737_v35 = vand.u32 4294901760, %v7736_v16 }
 0x426   :  { %7566 = vmatpush.msra.mxu3 %v15452_v6  ;;  %7589 = vmatpush.msrb.mxu0 %v7400_v9  ;;  %v7743_v9 = vand.u32 4294901760, %v7742_v62  ;;  %v7749_v16 = vand.u32 4294901760, %v7748_v45  ;;  %v16741_v62 = vand.u32 4294901760, %v15614_v10 }
 0x427   :  { %7683 = vmatpush.msrb.mxu2 %v15471_v0  ;;  %7475 = vmatpush.msra.mxu1 %v7474_v63  ;;  %v7754_v63 = vsub.f32 %v15567_v28, %v16738_v8  ;;  %v15648_v8 = vand.u32 4294901760, %v9027_v29 }
 0x428   :  { %7726 = vmatpush.msrb.mxu3 %v7725_v2  ;;  %7593 = vmatpush.msrb.mxu0 %v7406_v14  ;;  %v15630_v2 = vsub.f32 %v9030_v42, %v15601_v23  ;;  %v17025_v14 = vand.u32 4294901760, %v15328_v55  ;;  %v7760_v42 = vsub.f32 %v15583_v50, %v16739_v26  ;;  %v9026_v55 = vld [vmem:[%s16505_s1 + $0xa90] sm:$0xff]  ;;  %v15664_v26 = vsub.f32 %v9028_v46, %v15632_v31 }
 0x429   :  { %7644 = vmatpush.msrb.mxu1 %v15231_v5  ;;  %7685 = vmatpush.msrb.mxu2 %v15489_v33  ;;  %v9004_v5 = vld [vmem:[%s16506_s0 + $0xa0] sm:$0xff]  ;;  %v7772_v46 = vsub.f32 %v15614_v10, %v16741_v62 }
 0x42a   :  { %7732 = vmatpush.msrb.mxu3 %v7731_v32  ;;  %7597 = vmatpush.msrb.mxu0 %v17025_v14  ;;  %v15646_v32 = vsub.f32 %v9029_v22, %v15616_v59  ;;  %v15656_v45 = vand.u32 4294901760, %v9004_v5  ;;  %v7766_v22 = vsub.f32 %v15599_v48, %v16740_v19  ;;  %v7777_v14 = vand.u32 4294901760, %v15630_v2 }
 0x42b   :  { %7646 = vmatpush.msrb.mxu1 %v15241_v60  ;;  %7687 = vmatpush.msrb.mxu2 %v15496_v12  ;;  %v17026_v60 = vand.u32 4294901760, %v15344_v41  ;;  %v9025_v41 = vld [vmem:[%s16505_s1 + $0xa88] sm:$0xff]  ;;  %v15680_v19 = vsub.f32 %v9027_v29, %v15648_v8  ;;  %v7789_v62 = vand.u32 4294901760, %v15664_v26 }
 0x42c   :  { %7738 = vmatpush.msrb.mxu3 %v7737_v35  ;;  %v7755_v35 = vand.u32 4294901760, %v7754_v63  ;;  %v7761_v63 = vand.u32 4294901760, %v7760_v42  ;;  %v15691_v42 = vand.u32 4294901760, %v9025_v41  ;;  %v7778_v29 = vsub.f32 %v15630_v2, %v7777_v14  ;;  %7477 = vmatmul.f32.vlgmr.msra.gmra.mxu1 %v15656_v45 }
 0x42d   :  { %7601 = vmatpush.msrb.mxu0 %v17026_v60  ;;  %7648 = vmatpush.msrb.mxu1 %v15251_v21  ;;  %v17027_v21 = vand.u32 4294901760, %v15360_v61  ;;  %v7783_v60 = vand.u32 4294901760, %v15646_v32  ;;  %v9024_v61 = vld [vmem:[%s16505_s1 + $0xa80] sm:$0xff] }
 0x42e   :  { %7689 = vmatpush.msrb.mxu2 %v15509_v38  ;;  %7744 = vmatpush.msrb.mxu3 %v7743_v9  ;;  %v15672_v9 = vand.u32 4294901760, %v9026_v55 }
 0x42f   :  { %7605 = vmatpush.msrb.mxu0 %v17027_v21  ;;  %7650 = vmatpush.msrb.mxu1 %v15264_v43  ;;  %v17028_v43 = vand.u32 4294901760, %v15366_v57  ;;  %v7767_v21 = vand.u32 4294901760, %v7766_v22  ;;  %v17029_v57 = vand.u32 4294901760, %v15381_v24  ;;  %v7784_v22 = vsub.f32 %v15646_v32, %v7783_v60 }
 0x430   :  { %7691 = vmatpush.msrb.mxu2 %v15535_v15  ;;  %7750 = vmatpush.msrb.mxu3 %v7749_v16  ;;  %v15689_v16 = vsub.f32 %v9004_v5, %v15656_v45  ;;  %v15704_v5 = vand.u32 4294901760, %v9024_v61  ;;  %v17030_v24 = vand.u32 4294901760, %v15406_v36 }
 0x431   :  { %7609 = vmatpush.msrb.mxu0 %v17028_v43  ;;  %7652 = vmatpush.msrb.mxu1 %v15277_v47  ;;  %v15702_v47 = vsub.f32 %v9026_v55, %v15672_v9  ;;  %v7795_v43 = vand.u32 4294901760, %v15680_v19  ;;  %v15716_v55 = vsub.f32 %v9025_v41, %v15691_v42  ;;  %v7785_v41 = vand.u32 4294901760, %v7784_v22 }
 0x432   :  { %7693 = vmatpush.msrb.mxu2 %v15553_v37  ;;  %7756 = vmatpush.msrb.mxu3 %v7755_v35  ;;  %v7773_v35 = vand.u32 4294901760, %v7772_v46  ;;  %v7790_v46 = vsub.f32 %v15664_v26, %v7789_v62  ;;  %v15727_v36 = vsub.f32 %v9024_v61, %v15704_v5  ;;  %v17033_v22 = vand.u32 4294901760, %v15456_v11 }
 0x433   :  { %7613 = vmatpush.msrb.mxu0 %v17029_v57  ;;  %7654 = vmatpush.msrb.mxu1 %v15291_v44  ;;  %v7373_v44 = vand.u32 4294901760, %v15689_v16  ;;  %v17031_v57 = vand.u32 4294901760, %v15421_v18  ;;  %v9005_v18 = vld [vmem:[%s16506_s0 + $0xa8] sm:$0xff]  ;;  %v7807_v61 = vand.u32 4294901760, %v15716_v55 }
 0x434   :  { %7695 = vmatpush.msrb.mxu2 %v15569_v13  ;;  %7762 = vmatpush.msrb.mxu3 %v7761_v63  ;;  %v7779_v63 = vand.u32 4294901760, %v7778_v29  ;;  %v17032_v29 = vand.u32 4294901760, %v15439_v52 }
 0x435   :  { %7617 = vmatpush.msrb.mxu0 %v17030_v24  ;;  %7656 = vmatpush.msrb.mxu1 %v15308_v4  ;;  %v7801_v4 = vand.u32 4294901760, %v15702_v47  ;;  %v15751_v24 = vand.u32 4294901760, %v9005_v18 }
 0x436   :  { %7697 = vmatpush.msrb.mxu2 %v15585_v3  ;;  %7768 = vmatpush.msrb.mxu3 %v7767_v21  ;;  %v7796_v21 = vsub.f32 %v15680_v19, %v7795_v43 }
 0x437   :  { %7621 = vmatpush.msrb.mxu0 %v17031_v57  ;;  %7658 = vmatpush.msrb.mxu1 %v15324_v1  ;;  %v7374_v1 = vsub.f32 %v15689_v16, %v7373_v44  ;;  %v7802_v52 = vsub.f32 %v15702_v47, %v7801_v4 }
 0x438   :  { %7699 = vmatpush.msrb.mxu2 %v15601_v23  ;;  %7774 = vmatpush.msrb.mxu3 %v7773_v35  ;;  %v7791_v35 = vand.u32 4294901760, %v7790_v46  ;;  %v7797_v57 = vand.u32 4294901760, %v7796_v21  ;;  %v17035_v46 = vand.u32 4294901760, %v15487_v54  ;;  %v9082_v21 = vld [vmem:[%s16507_s2 + $0x4] ss:$0 sm:$0xff] }
 0x439   :  { %7625 = vmatpush.msrb.mxu0 %v17032_v29  ;;  %7660 = vmatpush.msrb.mxu1 %v15335_v17  ;;  %v7813_v17 = vand.u32 4294901760, %v15727_v36  ;;  %v7375_v11 = vand.u32 4294901760, %v7374_v1 }
 0x43a   :  { %7701 = vmatpush.msrb.mxu2 %v15616_v59  ;;  %7780 = vmatpush.msrb.mxu3 %v7779_v63  ;;  %v17034_v63 = vand.u32 4294901760, %v15469_v40 }
 0x43b   :  { %7629 = vmatpush.msrb.mxu0 %v17033_v22  ;;  %7662 = vmatpush.msrb.mxu1 %v15348_v58  ;;  %v7808_v58 = vsub.f32 %v15716_v55, %v7807_v61  ;;  %v7814_v40 = vsub.f32 %v15727_v36, %v7813_v17 }
 0x43c   :  { %7703 = vmatpush.msrb.mxu2 %v15632_v31  ;;  %7786 = vmatpush.msrb.mxu3 %v7785_v41  ;;  %v7803_v41 = vand.u32 4294901760, %v7802_v52  ;;  %v17037_v52 = vand.u32 4294901760, %v15504_v30 }
 0x43d   :  { %7633 = vmatpush.msrb.mxu0 %v17034_v63  ;;  %7664 = vmatpush.msrb.mxu1 %v15375_v20  ;;  %v15768_v20 = vsub.f32 %v9005_v18, %v15751_v24  ;;  %v7809_v54 = vand.u32 4294901760, %v7808_v58  ;;  %v7815_v18 = vand.u32 4294901760, %v7814_v40  ;;  %v9051_v63 = vld [vmem:[%s16505_s1 + $0xb58] sm:$0xff]  ;;  %v9050_v58 = vld [vmem:[%s16505_s1 + $0xb50] sm:$0xff] }
 0x43e   :  { %7705 = vmatpush.msrb.mxu2 %v15648_v8  ;;  %7792 = vmatpush.msrb.mxu3 %v7791_v35  ;;  %v17036_v35 = vand.u32 4294901760, %v15479_v27  ;;  %v15900_v40 = vand.u32 4294901760, %v9050_v58 }
 0x43f   :  { %7637 = vmatpush.msrb.mxu0 %v17035_v46  ;;  %7666 = vmatpush.msrb.mxu1 %v15390_v51  ;;  %v5928_v51 = vpop.f32.mrf.mxu0  ;;  %v7714_v29 = vand.u32 4294901760, %v15768_v20 }
 0x440   :  { %7707 = vmatpush.msrb.mxu2 %v15672_v9  ;;  %7798 = vmatpush.msrb.mxu3 %v7797_v57  ;;  %v5929_v1 = vadd.f32 %v9082_v21, %v5928_v51  ;;  %v6122_v57 = vpop.f32.mrf.mxu3 }
 0x441   :  { %7376 = vmatmul.f32.vlgmr.msra.gmra.mxu0 %v7375_v11  ;;  %7668 = vmatpush.msrb.mxu1 %v15403_v7  ;;  %v6029_v7 = vpop.f32.mrf.mxu1 }
 0x442   :  { %7824 = vmatpush.msra.mxu0 %v15479_v27  ;;  %7709 = vmatpush.msrb.mxu2 %v15691_v42  ;;  %v6030_v22 = vadd.f32 %v6029_v7, %v5929_v1  ;;  %v6083_v27 = vpop.f32.mrf.mxu2 }
 0x443   :  { %7804 = vmatpush.msrb.mxu3 %v7803_v41  ;;  %7670 = vmatpush.msrb.mxu1 %v15418_v49  ;;  %v7715_v49 = vsub.f32 %v15768_v20, %v7714_v29 }
 0x444   :  { %7827 = vmatpush.msra.mxu0 %v15504_v30  ;;  %7711 = vmatpush.msrb.mxu2 %v15704_v5  ;;  %v17039_v30 = vand.u32 4294901760, %v15525_v25 }
 0x445   :  { %7810 = vmatpush.msrb.mxu3 %v7809_v54  ;;  %7531 = vmatmul.f32.vlgmr.msra.gmra.mxu2 %v15689_v16  ;;  %v7716_v16 = vand.u32 4294901760, %v7715_v49  ;;  %v9048_v54 = vld [vmem:[%s16505_s1 + $0xb40] sm:$0xff] }
 0x446   :  { %7830 = vmatpush.msra.mxu0 %v15520_v39  ;;  %7918 = vmatpush.msra.mxu2 %v17036_v35  ;;  %v15942_v7 = vand.u32 4294901760, %v9048_v54 }
 0x447   :  { %7672 = vmatpush.msrb.mxu1 %v15435_v53  ;;  %7816 = vmatpush.msrb.mxu3 %v7815_v18  ;;  %v17038_v53 = vand.u32 4294901760, %v15520_v39  ;;  %v17040_v39 = vand.u32 4294901760, %v15543_v34  ;;  %v15932_v18 = vsub.f32 %v9050_v58, %v15900_v40 }
 0x448   :  { %7570 = vmatmul.f32.vlgmr.msra.gmra.mxu3 %v7373_v44  ;;  %7833 = vmatpush.msra.mxu0 %v15525_v25  ;;  %v6084_v44 = vadd.f32 %v6083_v27, %v6030_v22  ;;  %v6191_v25 = vpop.f32.mrf.mxu0  ;;  %v9046_v22 = vld [vmem:[%s16505_s1 + $0xb30] sm:$0xff] }
 0x449   :  { %7922 = vmatpush.msra.mxu2 %v17037_v52  ;;  %7985 = vmatpush.msra.mxu3 %v15446_v56 }
 0x44a   :  { %7674 = vmatpush.msrb.mxu1 %v15452_v6  ;;  %7836 = vmatpush.msra.mxu0 %v15543_v34  ;;  %v17041_v6 = vand.u32 4294901760, %v15567_v28  ;;  %v17042_v34 = vand.u32 4294901760, %v15583_v50 }
 0x44b   :  { %7926 = vmatpush.msra.mxu2 %v17038_v53  ;;  %7987 = vmatpush.msra.mxu3 %v15471_v0 }
 0x44c   :  { %7877 = vmatpush.msra.mxu1 %v15446_v56  ;;  %7839 = vmatpush.msra.mxu0 %v15567_v28  ;;  %v6123_v56 = vadd.f32 %v6122_v57, %v6084_v44  ;;  %v17043_v28 = vand.u32 4294901760, %v15599_v48 }
 0x44d   :  { %7930 = vmatpush.msra.mxu2 %v17039_v30  ;;  %7989 = vmatpush.msra.mxu3 %v15489_v33  ;;  %v16750_v30 = vand.u32 4294901760, %v15932_v18 }
 0x44e   :  { %7879 = vmatpush.msra.mxu1 %v15471_v0  ;;  %7717 = vmatmul.f32.vlgmr.msrb.gmra.mxu2 %v7716_v16  ;;  %v6192_v0 = vadd.f32 %v6191_v25, %v6123_v56  ;;  %v15972_v25 = vand.u32 4294901760, %v9046_v22 }
 0x44f   :  { %7842 = vmatpush.msra.mxu0 %v15583_v50  ;;  %7934 = vmatpush.msra.mxu2 %v17040_v39  ;;  %v6269_v50 = vpop.f32.mrf.mxu2 }
 0x450   :  { %7881 = vmatpush.msra.mxu1 %v15489_v33  ;;  %7991 = vmatpush.msra.mxu3 %v15496_v12  ;;  %v6228_v33 = vpop.f32.mrf.mxu1 }
 0x451   :  { %7639 = vmatmul.f32.vlgmr.msrb.gmra.mxu0 %v15656_v45  ;;  %7818 = vmatmul.f32.vlgmr.msrb.gmra.mxu3 %v15751_v24 }
 0x452   :  { %7845 = vmatpush.msra.mxu0 %v15599_v48  ;;  %7883 = vmatpush.msra.mxu1 %v15496_v12  ;;  %v6229_v12 = vadd.f32 %v6228_v33, %v6192_v0  ;;  %v9054_v48 = vld [vmem:[%s16505_s1 + $0xb70] sm:$0xff]  ;;  %v9044_v33 = vld [vmem:[%s16505_s1 + $0xb20] sm:$0xff] }
 0x453   :  { %7938 = vmatpush.msra.mxu2 %v17041_v6  ;;  %7993 = vmatpush.msra.mxu3 %v15509_v38  ;;  %v15975_v6 = vsub.f32 %v9048_v54, %v15942_v7 }
 0x454   :  { %7676 = vmatmul.f32.vlgmr.msrb.gmra.mxu1 %v15656_v45  ;;  %7848 = vmatpush.msra.mxu0 %v15614_v10  ;;  %v17044_v45 = vand.u32 4294901760, %v15614_v10  ;;  %v9053_v10 = vld [vmem:[%s16505_s1 + $0xb68] sm:$0xff] }
 0x455   :  { %7885 = vmatpush.msra.mxu1 %v15509_v38  ;;  %7942 = vmatpush.msra.mxu2 %v17042_v34  ;;  %v9055_v38 = vld [vmem:[%s16505_s1 + $0xb78] sm:$0xff] }
 0x456   :  { %7995 = vmatpush.msra.mxu3 %v15535_v15  ;;  %7851 = vmatpush.msra.mxu0 %v15630_v2  ;;  %v15856_v2 = vand.u32 4294901760, %v9054_v48 }
 0x457   :  { %7887 = vmatpush.msra.mxu1 %v15535_v15  ;;  %7946 = vmatpush.msra.mxu2 %v17043_v28  ;;  %v6270_v15 = vadd.f32 %v6269_v50, %v6229_v12  ;;  %v8095_v50 = vsub.f32 %v15932_v18, %v16750_v30 }
 0x458   :  { %7997 = vmatpush.msra.mxu3 %v15553_v37  ;;  %7854 = vmatpush.msra.mxu0 %v15646_v32  ;;  %v15866_v32 = vand.u32 4294901760, %v9053_v10  ;;  %v6463_v11 = vpop.f32.mrf.mxu1 }
 0x459   :  { %7889 = vmatpush.msra.mxu1 %v15553_v37  ;;  %7950 = vmatpush.msra.mxu2 %v17044_v45  ;;  %v15846_v37 = vand.u32 4294901760, %v9055_v38  ;;  %v9043_v45 = vld [vmem:[%s16505_s1 + $0xb18] sm:$0xff] }
 0x45a   :  { %7999 = vmatpush.msra.mxu3 %v15569_v13  ;;  %7857 = vmatpush.msra.mxu0 %v15664_v26  ;;  %v16022_v58 = vand.u32 4294901760, %v9043_v45 }
 0x45b   :  { %7891 = vmatpush.msra.mxu1 %v15569_v13  ;;  %7954 = vmatpush.msra.mxu2 %v7777_v14  ;;  %v6370_v13 = vpop.f32.mrf.mxu3  ;;  %v6424_v14 = vpop.f32.mrf.mxu0 }
 0x45c   :  { %8001 = vmatpush.msra.mxu3 %v15585_v3  ;;  %7860 = vmatpush.msra.mxu0 %v15680_v19 }
 0x45d   :  { %7893 = vmatpush.msra.mxu1 %v15585_v3  ;;  %7958 = vmatpush.msra.mxu2 %v7783_v60  ;;  %v9052_v3 = vld [vmem:[%s16505_s1 + $0xb60] sm:$0xff]  ;;  %v15869_v60 = vsub.f32 %v9055_v38, %v15846_v37 }
 0x45e   :  { %8003 = vmatpush.msra.mxu3 %v15601_v23  ;;  %7863 = vmatpush.msra.mxu0 %v15702_v47  ;;  %v15879_v26 = vand.u32 4294901760, %v9052_v3  ;;  %v6532_v47 = vpop.f32.mrf.mxu2 }
 0x45f   :  { %7895 = vmatpush.msra.mxu1 %v15601_v23  ;;  %7962 = vmatpush.msra.mxu2 %v7789_v62  ;;  %v6371_v23 = vadd.f32 %v6370_v13, %v6270_v15  ;;  %v15882_v62 = vsub.f32 %v9054_v48, %v15856_v2  ;;  %v8064_v19 = vand.u32 4294901760, %v15869_v60  ;;  %v16747_v13 = vand.u32 4294901760, %v15975_v6 }
 0x460   :  { %8005 = vmatpush.msra.mxu3 %v15616_v59  ;;  %7866 = vmatpush.msra.mxu0 %v15716_v55  ;;  %v15910_v21 = vsub.f32 %v9052_v3, %v15879_v26  ;;  %v6711_v57 = vpop.f32.mrf.mxu1  ;;  %v16009_v3 = vsub.f32 %v9046_v22, %v15972_v25 }
 0x461   :  { %7897 = vmatpush.msra.mxu1 %v15616_v59  ;;  %7966 = vmatpush.msra.mxu2 %v7795_v43  ;;  %v6425_v46 = vadd.f32 %v6424_v14, %v6371_v23  ;;  %v15889_v59 = vand.u32 4294901760, %v9051_v63  ;;  %v15896_v43 = vsub.f32 %v9053_v10, %v15866_v32  ;;  %v8065_v55 = vsub.f32 %v15869_v60, %v8064_v19 }
 0x462   :  { %8007 = vmatpush.msra.mxu3 %v15632_v31  ;;  %7869 = vmatpush.msra.mxu0 %v15727_v36  ;;  %v9047_v36 = vld [vmem:[%s16505_s1 + $0xb38] sm:$0xff]  ;;  %v16752_v35 = vand.u32 4294901760, %v15910_v21  ;;  %v16005_v10 = vand.u32 4294901760, %v9044_v33 }
 0x463   :  { %7899 = vmatpush.msra.mxu1 %v15632_v31  ;;  %7970 = vmatpush.msra.mxu2 %v7801_v4  ;;  %v6464_v41 = vadd.f32 %v6463_v11, %v6425_v46  ;;  %v9049_v31 = vld [vmem:[%s16505_s1 + $0xb48] sm:$0xff]  ;;  %v8070_v4 = vand.u32 4294901760, %v15882_v62  ;;  %v6610_v52 = vpop.f32.mrf.mxu0  ;;  %v8066_v27 = vand.u32 4294901760, %v8065_v55  ;;  %v15956_v16 = vand.u32 4294901760, %v9047_v36 }
 0x464   :  { %8009 = vmatpush.msra.mxu3 %v15648_v8  ;;  %7872 = vmatmul.f32.vlgmr.msra.gmra.mxu0 %v15768_v20  ;;  %v8083_v56 = vsub.f32 %v15910_v21, %v16752_v35  ;;  %v8107_v55 = vsub.f32 %v15975_v6, %v16747_v13 }
 0x465   :  { %7901 = vmatpush.msra.mxu1 %v15648_v8  ;;  %8022 = vmatpush.msrb.mxu0 %v15846_v37  ;;  %v15915_v8 = vsub.f32 %v9051_v63, %v15889_v59  ;;  %v6533_v51 = vadd.f32 %v6532_v47, %v6464_v41  ;;  %v8071_v1 = vsub.f32 %v15882_v62, %v8070_v4  ;;  %v9042_v63 = vld [vmem:[%s16505_s1 + $0xb10] sm:$0xff]  ;;  %v8096_v47 = vand.u32 4294901760, %v8095_v50 }
 0x466   :  { %7974 = vmatpush.msra.mxu2 %v7807_v61  ;;  %8011 = vmatpush.msra.mxu3 %v15672_v9  ;;  %v15926_v61 = vand.u32 4294901760, %v9049_v31  ;;  %v15991_v20 = vsub.f32 %v9047_v36, %v15956_v16  ;;  %v6765_v48 = vpop.f32.mrf.mxu2  ;;  %v8084_v15 = vand.u32 4294901760, %v8083_v56  ;;  %v16744_v36 = vand.u32 4294901760, %v16009_v3 }
 0x467   :  { %7903 = vmatpush.msra.mxu1 %v15672_v9  ;;  %8024 = vmatpush.msrb.mxu0 %v15856_v2  ;;  %v16755_v9 = vand.u32 4294901760, %v15896_v43  ;;  %v16751_v49 = vand.u32 4294901760, %v15915_v8  ;;  %v8072_v39 = vand.u32 4294901760, %v8071_v1  ;;  %v9041_v1 = vld [vmem:[%s16505_s1 + $0xb08] sm:$0xff] }
 0x468   :  { %7978 = vmatpush.msra.mxu2 %v7813_v17  ;;  %8013 = vmatpush.msra.mxu3 %v15691_v42  ;;  %v6569_v17 = vpop.f32.mrf.mxu3  ;;  %v16745_v46 = vand.u32 4294901760, %v15991_v20 }
 0x469   :  { %7980 = vmatmul.f32.vlgmr.msra.gmra.mxu2 %v15751_v24  ;;  %8026 = vmatpush.msrb.mxu0 %v15866_v32  ;;  %v8077_v53 = vsub.f32 %v15896_v43, %v16755_v9  ;;  %v6570_v44 = vadd.f32 %v6569_v17, %v6533_v51  ;;  %v16034_v51 = vand.u32 4294901760, %v9042_v63  ;;  %v16038_v17 = vsub.f32 %v9044_v33, %v16005_v10 }
 0x46a   :  { %8165 = vmatpush.msrb.mxu2 %v15869_v60  ;;  %7905 = vmatpush.msra.mxu1 %v15691_v42  ;;  %v15959_v42 = vsub.f32 %v9049_v31, %v15926_v61  ;;  %v8108_v33 = vand.u32 4294901760, %v8107_v55  ;;  %v9069_v55 = vld [vmem:[%s16505_s1 + $0xbe8] sm:$0xff] }
 0x46b   :  { %8015 = vmatpush.msra.mxu3 %v15704_v5  ;;  %8028 = vmatpush.msrb.mxu0 %v15879_v26  ;;  %v6611_v0 = vadd.f32 %v6610_v52, %v6570_v44  ;;  %v8078_v34 = vand.u32 4294901760, %v8077_v53  ;;  %v6873_v52 = vpop.f32.mrf.mxu0  ;;  %v8113_v53 = vsub.f32 %v15991_v20, %v16745_v46 }
 0x46c   :  { %8017 = vmatmul.f32.vlgmr.msra.gmra.mxu3 %v15751_v24  ;;  %8168 = vmatpush.msrb.mxu2 %v15882_v62  ;;  %v9045_v24 = vld [vmem:[%s16505_s1 + $0xb28] sm:$0xff]  ;;  %v16748_v12 = vand.u32 4294901760, %v15959_v42 }
 0x46d   :  { %8218 = vmatpush.msrb.mxu3 %v15846_v37  ;;  %7907 = vmatpush.msra.mxu1 %v15704_v5  ;;  %v8089_v5 = vsub.f32 %v15915_v8, %v16751_v49  ;;  %v15987_v28 = vand.u32 4294901760, %v9045_v24  ;;  %v6712_v38 = vadd.f32 %v6711_v57, %v6611_v0  ;;  %v9040_v57 = vld [vmem:[%s16505_s1 + $0xb00] sm:$0xff]  ;;  %v16064_v0 = vand.u32 4294901760, %v9041_v1 }
 0x46e   :  { %8030 = vmatpush.msrb.mxu0 %v15889_v59  ;;  %7911 = vmatmul.f32.vlgmr.msra.gmra.mxu1 %v7714_v29  ;;  %v9006_v29 = vld [vmem:[%s16506_s0 + $0xb0] sm:$0xff]  ;;  %v8101_v11 = vsub.f32 %v15959_v42, %v16748_v12 }
 0x46f   :  { %8171 = vmatpush.msrb.mxu2 %v15896_v43  ;;  %8067 = vmatpush.msrb.mxu1 %v8066_v27  ;;  %v8090_v14 = vand.u32 4294901760, %v8089_v5  ;;  %v16016_v23 = vand.u32 4294901760, %v9006_v29  ;;  %v16026_v41 = vsub.f32 %v9045_v24, %v15987_v28  ;;  %v6766_v31 = vadd.f32 %v6765_v48, %v6712_v38  ;;  %v6910_v5 = vpop.f32.mrf.mxu1 }
 0x470   :  { %8220 = vmatpush.msrb.mxu3 %v15856_v2  ;;  %8032 = vmatpush.msrb.mxu0 %v15900_v40  ;;  %v6804_v54 = vpop.f32.mrf.mxu3  ;;  %v8102_v27 = vand.u32 4294901760, %v8101_v11  ;;  %v16054_v24 = vsub.f32 %v9043_v45, %v16022_v58  ;;  %v16072_v38 = vsub.f32 %v9042_v63, %v16034_v51  ;;  %v16076_v45 = vand.u32 4294901760, %v9040_v57 }
 0x471   :  { %8174 = vmatpush.msrb.mxu2 %v15910_v21  ;;  %8073 = vmatpush.msrb.mxu1 %v8072_v39  ;;  %v16046_v22 = vsub.f32 %v9006_v29, %v16016_v23  ;;  %v16743_v44 = vand.u32 4294901760, %v16026_v41  ;;  %v9071_v39 = vld [vmem:[%s16505_s1 + $0xbf8] sm:$0xff]  ;;  %v6805_v56 = vadd.f32 %v6804_v54, %v6766_v31  ;;  %v16742_v29 = vand.u32 4294901760, %v16038_v17 }
 0x472   :  { %8222 = vmatpush.msrb.mxu3 %v15866_v32  ;;  %8034 = vmatpush.msrb.mxu0 %v15926_v61  ;;  %v8114_v63 = vand.u32 4294901760, %v8113_v53  ;;  %v16746_v31 = vand.u32 4294901760, %v16054_v24  ;;  %v16092_v54 = vsub.f32 %v9041_v1, %v16064_v0 }
 0x473   :  { %8177 = vmatpush.msrb.mxu2 %v15915_v8  ;;  %8079 = vmatpush.msrb.mxu1 %v8078_v34  ;;  %v8119_v34 = vsub.f32 %v16009_v3, %v16744_v36  ;;  %v6874_v50 = vadd.f32 %v6873_v52, %v6805_v56  ;;  %v16754_v48 = vand.u32 4294901760, %v16046_v22  ;;  %v8125_v11 = vsub.f32 %v16026_v41, %v16743_v44  ;;  %v6951_v52 = vpop.f32.mrf.mxu2 }
 0x474   :  { %8224 = vmatpush.msrb.mxu3 %v15879_v26  ;;  %8036 = vmatpush.msrb.mxu0 %v15942_v7  ;;  %v8131_v53 = vsub.f32 %v16038_v17, %v16742_v29  ;;  %v16749_v56 = vand.u32 4294901760, %v16072_v38  ;;  %v8137_v44 = vsub.f32 %v16054_v24, %v16746_v31  ;;  %v16122_v36 = vand.u32 4294901760, %v9069_v55 }
 0x475   :  { %8180 = vmatpush.msrb.mxu2 %v15932_v18  ;;  %8085 = vmatpush.msrb.mxu1 %v8084_v15  ;;  %v16079_v15 = vand.u32 4294901760, %v9071_v39  ;;  %v8056_v1 = vsub.f32 %v16046_v22, %v16754_v48  ;;  %v8126_v29 = vand.u32 4294901760, %v8125_v11 }
 0x476   :  { %8226 = vmatpush.msrb.mxu3 %v15889_v59  ;;  %8038 = vmatpush.msrb.mxu0 %v15956_v16  ;;  %v8132_v11 = vand.u32 4294901760, %v8131_v53  ;;  %v8143_v31 = vsub.f32 %v16072_v38, %v16749_v56  ;;  %v9066_v53 = vld [vmem:[%s16505_s1 + $0xbd0] sm:$0xff]  ;;  %v16148_v56 = vsub.f32 %v9069_v55, %v16122_v36 }
 0x477   :  { %8183 = vmatpush.msrb.mxu2 %v15959_v42  ;;  %8091 = vmatpush.msrb.mxu1 %v8090_v14  ;;  %v9070_v14 = vld [vmem:[%s16505_s1 + $0xbf0] sm:$0xff]  ;;  %v8057_v13 = vand.u32 4294901760, %v8056_v1 }
 0x478   :  { %8228 = vmatpush.msrb.mxu3 %v15900_v40  ;;  %8040 = vmatpush.msrb.mxu0 %v15972_v25 }
 0x479   :  { %8186 = vmatpush.msrb.mxu2 %v15975_v6  ;;  %8097 = vmatpush.msrb.mxu1 %v8096_v47  ;;  %v6911_v47 = vadd.f32 %v6910_v5, %v6874_v50  ;;  %v16102_v5 = vand.u32 4294901760, %v9070_v14  ;;  %v9068_v50 = vld [vmem:[%s16505_s1 + $0xbe0] sm:$0xff] }
 0x47a   :  { %8230 = vmatpush.msrb.mxu3 %v15926_v61  ;;  %8042 = vmatpush.msrb.mxu0 %v15987_v28 }
 0x47b   :  { %8189 = vmatpush.msrb.mxu2 %v15991_v20  ;;  %8103 = vmatpush.msrb.mxu1 %v8102_v27  ;;  %v8120_v27 = vand.u32 4294901760, %v8119_v34  ;;  %v16113_v34 = vsub.f32 %v9071_v39, %v16079_v15  ;;  %v6952_v46 = vadd.f32 %v6951_v52, %v6911_v47  ;;  %v9067_v39 = vld [vmem:[%s16505_s1 + $0xbd8] sm:$0xff]  ;;  %v16135_v47 = vsub.f32 %v9070_v14, %v16102_v5  ;;  %v7106_v1 = vpop.f32.mrf.mxu0 }
 0x47c   :  { %8232 = vmatpush.msrb.mxu3 %v15942_v7  ;;  %8044 = vmatpush.msrb.mxu0 %v16005_v10  ;;  %v16137_v52 = vand.u32 4294901760, %v9068_v50  ;;  %v8138_v14 = vand.u32 4294901760, %v8137_v44  ;;  %v16150_v30 = vand.u32 4294901760, %v9067_v39  ;;  %v8144_v44 = vand.u32 4294901760, %v8143_v31 }
 0x47d   :  { %8192 = vmatpush.msrb.mxu2 %v16009_v3  ;;  %8109 = vmatpush.msrb.mxu1 %v8108_v33  ;;  %v16110_v33 = vsub.f32 %v9040_v57, %v16076_v45  ;;  %v16753_v57 = vand.u32 4294901760, %v16092_v54  ;;  %v16756_v12 = vand.u32 4294901760, %v16113_v34  ;;  %v16759_v55 = vand.u32 4294901760, %v16135_v47 }
 0x47e   :  { %8234 = vmatpush.msrb.mxu3 %v15956_v16  ;;  %8046 = vmatpush.msrb.mxu0 %v16022_v58 }
 0x47f   :  { %8195 = vmatpush.msrb.mxu2 %v16026_v41  ;;  %8115 = vmatpush.msrb.mxu1 %v8114_v63  ;;  %v7052_v63 = vpop.f32.mrf.mxu3  ;;  %v8149_v35 = vsub.f32 %v16092_v54, %v16753_v57  ;;  %v8406_v57 = vsub.f32 %v16113_v34, %v16756_v12  ;;  %v9064_v12 = vld [vmem:[%s16505_s1 + $0xbc0] sm:$0xff]  ;;  %v8412_v60 = vsub.f32 %v16135_v47, %v16759_v55 }
 0x480   :  { %8236 = vmatpush.msrb.mxu3 %v15972_v25  ;;  %8048 = vmatpush.msrb.mxu0 %v16034_v51  ;;  %v7053_v49 = vadd.f32 %v7052_v63, %v6952_v46  ;;  %v16163_v46 = vsub.f32 %v9068_v50, %v16137_v52  ;;  %v16165_v63 = vand.u32 4294901760, %v9066_v53  ;;  %v16758_v50 = vand.u32 4294901760, %v16148_v56 }
 0x481   :  { %8198 = vmatpush.msrb.mxu2 %v16038_v17  ;;  %8121 = vmatpush.msrb.mxu1 %v8120_v27  ;;  %v16757_v27 = vand.u32 4294901760, %v16110_v33  ;;  %v8407_v62 = vand.u32 4294901760, %v8406_v57  ;;  %v9062_v57 = vld [vmem:[%s16505_s1 + $0xbb0] sm:$0xff] }
 0x482   :  { %8238 = vmatpush.msrb.mxu3 %v15987_v28  ;;  %8050 = vmatpush.msrb.mxu0 %v16064_v0  ;;  %v7107_v31 = vadd.f32 %v7106_v1, %v7053_v49  ;;  %v16760_v49 = vand.u32 4294901760, %v16163_v46  ;;  %v17046_v1 = vand.u32 4294901760, %v15896_v43 }
 0x483   :  { %8201 = vmatpush.msrb.mxu2 %v16054_v24  ;;  %8127 = vmatpush.msrb.mxu1 %v8126_v29  ;;  %v9065_v29 = vld [vmem:[%s16505_s1 + $0xbc8] sm:$0xff] }
 0x484   :  { %8240 = vmatpush.msrb.mxu3 %v16005_v10  ;;  %8052 = vmatpush.msrb.mxu0 %v16076_v45  ;;  %v16180_v9 = vand.u32 4294901760, %v9065_v29 }
 0x485   :  { %8204 = vmatpush.msrb.mxu2 %v16072_v38  ;;  %8133 = vmatpush.msrb.mxu1 %v8132_v11  ;;  %v8155_v11 = vsub.f32 %v16110_v33, %v16757_v27  ;;  %v7145_v48 = vpop.f32.mrf.mxu1  ;;  %v8150_v27 = vand.u32 4294901760, %v8149_v35  ;;  %v16201_v35 = vand.u32 4294901760, %v9064_v12 }
 0x486   :  { %8242 = vmatpush.msrb.mxu3 %v16022_v58  ;;  %8058 = vmatmul.f32.vlgmr.msrb.gmra.mxu0 %v8057_v13  ;;  %v16178_v13 = vsub.f32 %v9067_v39, %v16150_v30  ;;  %17045 = vst [vmem:[#allocation3_spill] sm:$0xff] %v16180_v9  ;;  %v16194_v39 = vsub.f32 %v9066_v53, %v16165_v63 }
 0x487   :  { %8207 = vmatpush.msrb.mxu2 %v16092_v54  ;;  %8259 = vmatpush.msra.mxu0 %v8064_v19  ;;  %v7146_v19 = vadd.f32 %v7145_v48, %v7107_v31  ;;  %v8156_v48 = vand.u32 4294901760, %v8155_v11  ;;  %v8418_v53 = vsub.f32 %v16148_v56, %v16758_v50  ;;  %v16211_v31 = vsub.f32 %v9065_v29, %v16180_v9 }
 0x488   :  { %8139 = vmatpush.msrb.mxu1 %v8138_v14  ;;  %8244 = vmatpush.msrb.mxu3 %v16034_v51  ;;  %v9063_v14 = vld [vmem:[%s16505_s1 + $0xbb8] sm:$0xff]  ;;  %v17047_v11 = vand.u32 4294901760, %v16046_v22  ;;  %v8413_v50 = vand.u32 4294901760, %v8412_v60  ;;  %v8424_v29 = vsub.f32 %v16163_v46, %v16760_v49  ;;  %v17049_v60 = vand.u32 4294901760, %v15915_v8 }
 0x489   :  { %8210 = vmatpush.msrb.mxu2 %v16110_v33  ;;  %8263 = vmatpush.msra.mxu0 %v8070_v4  ;;  %v7214_v4 = vpop.f32.mrf.mxu2  ;;  %v16217_v43 = vand.u32 4294901760, %v9063_v14  ;;  %v17051_v49 = vand.u32 4294901760, %v15932_v18  ;;  %v9058_v18 = vld [vmem:[%s16505_s1 + $0xb90] sm:$0xff] }
 0x48a   :  { %8145 = vmatpush.msrb.mxu1 %v8144_v44  ;;  %8246 = vmatpush.msrb.mxu3 %v16064_v0  ;;  %v7215_v55 = vadd.f32 %v7214_v4, %v7146_v19  ;;  %v16761_v44 = vand.u32 4294901760, %v16194_v39  ;;  %v8419_v19 = vand.u32 4294901760, %v8418_v53  ;;  %v17050_v4 = vand.u32 4294901760, %v16178_v13 }
 0x48b   :  { %8213 = vmatmul.f32.vlgmr.msrb.gmra.mxu2 %v16046_v22  ;;  %8267 = vmatpush.msra.mxu0 %v17046_v1  ;;  %v17048_v1 = vand.u32 4294901760, %v15910_v21  ;;  %v7251_v22 = vpop.f32.mrf.mxu3  ;;  %v16234_v21 = vand.u32 4294901760, %v9062_v57 }
 0x48c   :  { %8363 = vmatpush.msra.mxu2 %v16079_v15  ;;  %8151 = vmatpush.msrb.mxu1 %v8150_v27  ;;  %v9061_v27 = vld [vmem:[%s16505_s1 + $0xba8] sm:$0xff]  ;;  %v7252_v53 = vadd.f32 %v7251_v22, %v7215_v55  ;;  %v17052_v22 = vand.u32 4294901760, %v16211_v31 }
 0x48d   :  { %8248 = vmatpush.msrb.mxu3 %v16076_v45  ;;  %8271 = vmatpush.msra.mxu0 %v17048_v1  ;;  %v8430_v1 = vsub.f32 %v16178_v13, %v17050_v4  ;;  %v16250_v8 = vand.u32 4294901760, %v9061_v27  ;;  %v9083_v4 = vld [vmem:[%s16508_s3 + $0x4] ss:$0 sm:$0xff]  ;;  %v16267_v55 = vsub.f32 %v9062_v57, %v16234_v21 }
 0x48e   :  { %8252 = vmatmul.f32.vlgmr.msrb.gmra.mxu3 %v17047_v11  ;;  %8365 = vmatpush.msra.mxu2 %v16102_v5  ;;  %v16232_v11 = vsub.f32 %v9064_v12, %v16201_v35  ;;  %v16248_v12 = vsub.f32 %v9063_v14, %v16217_v43  ;;  %v9059_v14 = vld [vmem:[%s16505_s1 + $0xb98] sm:$0xff] }
 0x48f   :  { %8408 = vmatpush.msra.mxu3 %v8407_v62  ;;  %8157 = vmatpush.msrb.mxu1 %v8156_v48  ;;  %v9060_v62 = vld [vmem:[%s16505_s1 + $0xba0] sm:$0xff]  ;;  %v8425_v48 = vand.u32 4294901760, %v8424_v29  ;;  %v8431_v29 = vand.u32 4294901760, %v8430_v1  ;;  %v7259_v1 = vmul.f32 %v9083_v4, %v7252_v53  ;;  %v9007_v53 = vld [vmem:[%s16506_s0 + $0xb8] sm:$0xff] }
 0x490   :  { %8275 = vmatpush.msra.mxu0 %v17049_v60  ;;  %8159 = vmatmul.f32.vlgmr.msrb.gmra.mxu1 %v16016_v23  ;;  %v8436_v60 = vsub.f32 %v16194_v39, %v16761_v44  ;;  %v8442_v44 = vsub.f32 %v16211_v31, %v17052_v22  ;;  %v9057_v22 = vld [vmem:[%s16505_s1 + $0xb88] sm:$0xff]  ;;  %v17057_v4 = vand.u32 4294901760, %v16248_v12 }
 0x491   :  { %8367 = vmatpush.msra.mxu2 %v16122_v36  ;;  %8326 = vmatpush.msra.mxu1 %v15846_v37  ;;  %v16283_v37 = vsub.f32 %v9061_v27, %v16250_v8  ;;  %v16317_v57 = vand.u32 4294901760, %v9057_v22 }
 0x492   :  { %8414 = vmatpush.msra.mxu3 %v8413_v50  ;;  %8279 = vmatpush.msra.mxu0 %v17051_v49  ;;  %v16269_v50 = vand.u32 4294901760, %v9060_v62  ;;  %v17053_v49 = vand.u32 4294901760, %v15959_v42  ;;  %v17054_v42 = vand.u32 4294901760, %v15975_v6  ;;  %v8443_v6 = vand.u32 4294901760, %v8442_v44 }
 0x493   :  { %8369 = vmatpush.msra.mxu2 %v16137_v52  ;;  %8328 = vmatpush.msra.mxu1 %v15856_v2  ;;  %v16285_v2 = vand.u32 4294901760, %v9059_v14  ;;  %v16324_v44 = vand.u32 4294901760, %v9007_v53 }
 0x494   :  { %8420 = vmatpush.msra.mxu3 %v8419_v19  ;;  %8283 = vmatpush.msra.mxu0 %v17053_v49  ;;  %v8437_v19 = vand.u32 4294901760, %v8436_v60  ;;  %v17055_v49 = vand.u32 4294901760, %v16232_v11  ;;  %v17056_v60 = vand.u32 4294901760, %v15991_v20  ;;  %v7260_v20 = vsel %vm1463_vm0, %v7259_v1, 0.0 }
 0x495   :  { %8371 = vmatpush.msra.mxu2 %v16150_v30  ;;  %8330 = vmatpush.msra.mxu1 %v15866_v32  ;;  %v16299_v32 = vsub.f32 %v9060_v62, %v16269_v50  ;;  %v8454_v62 = vsub.f32 %v16248_v12, %v17057_v4  ;;  %v17061_v1 = vand.u32 4294901760, %v16283_v37 }
 0x496   :  { %8426 = vmatpush.msra.mxu3 %v8425_v48  ;;  %8287 = vmatpush.msra.mxu0 %v17054_v42  ;;  %v8448_v27 = vsub.f32 %v16232_v11, %v17055_v49  ;;  %v16301_v48 = vand.u32 4294901760, %v9058_v18  ;;  %v16315_v49 = vsub.f32 %v9059_v14, %v16285_v2 }
 0x497   :  { %8373 = vmatpush.msra.mxu2 %v16165_v63  ;;  %8332 = vmatpush.msra.mxu1 %v15879_v26  ;;  %v9056_v26 = vld [vmem:[%s16505_s1 + $0xb80] sm:$0xff]  ;;  %v8471_v42 = vand.u32 4294901760, %v16299_v32 }
 0x498   :  { %8432 = vmatpush.msra.mxu3 %v8431_v29  ;;  %8291 = vmatpush.msra.mxu0 %v17056_v60  ;;  %v17058_v29 = vand.u32 4294901760, %v16009_v3  ;;  %v8449_v14 = vand.u32 4294901760, %v8448_v27  ;;  %v17059_v60 = vand.u32 4294901760, %v16267_v55  ;;  %v17060_v3 = vand.u32 4294901760, %v16026_v41 }
 0x499   :  { %8375 = vmatpush.msra.mxu2 %v16180_v9  ;;  %8334 = vmatpush.msra.mxu1 %v15889_v59  ;;  %v16334_v9 = vsub.f32 %v9058_v18, %v16301_v48  ;;  %v16337_v59 = vand.u32 4294901760, %v9056_v26  ;;  %v8466_v27 = vsub.f32 %v16283_v37, %v17061_v1  ;;  %v17062_v41 = vand.u32 4294901760, %v16038_v17 }
 0x49a   :  { %8438 = vmatpush.msra.mxu3 %v8437_v19  ;;  %8295 = vmatpush.msra.mxu0 %v17058_v29  ;;  %v8460_v4 = vsub.f32 %v16267_v55, %v17059_v60  ;;  %v8455_v19 = vand.u32 4294901760, %v8454_v62  ;;  %v8477_v29 = vand.u32 4294901760, %v16315_v49  ;;  %v16346_v60 = vsub.f32 %v9057_v22, %v16317_v57 }
 0x49b   :  { %8377 = vmatpush.msra.mxu2 %v16201_v35  ;;  %8336 = vmatpush.msra.mxu1 %v15900_v40  ;;  %v16351_v40 = vsub.f32 %v9007_v53, %v16324_v44  ;;  %v8483_v62 = vand.u32 4294901760, %v16334_v9  ;;  %v17063_v22 = vand.u32 4294901760, %v16054_v24  ;;  %v8467_v17 = vand.u32 4294901760, %v8466_v27 }
 0x49c   :  { %8444 = vmatpush.msra.mxu3 %v8443_v6  ;;  %7261 = vadd.xlane.f32.xlu2 %v7260_v20  ;;  %v8461_v18 = vand.u32 4294901760, %v8460_v4  ;;  %v8472_v6 = vsub.f32 %v16299_v32, %v8471_v42  ;;  %v8478_v53 = vsub.f32 %v16315_v49, %v8477_v29  ;;  %v8489_v20 = vand.u32 4294901760, %v16346_v60 }
 0x49d   :  { %8299 = vmatpush.msra.mxu0 %v17060_v3  ;;  %8338 = vmatpush.msra.mxu1 %v15926_v61  ;;  %v16362_v61 = vsub.f32 %v9056_v26, %v16337_v59  ;;  %v17064_v26 = vand.u32 4294901760, %v16072_v38  ;;  %v8484_v24 = vsub.f32 %v16334_v9, %v8483_v62 }
 0x49e   :  { %8379 = vmatpush.msra.mxu2 %v16217_v43  ;;  %8450 = vmatpush.msra.mxu3 %v8449_v14  ;;  %v8473_v14 = vand.u32 4294901760, %v8472_v6  ;;  %v8479_v3 = vand.u32 4294901760, %v8478_v53  ;;  %v8490_v38 = vsub.f32 %v16346_v60, %v8489_v20  ;;  %v10_v6 = vstv %s16509_s4 }
 0x49f   :  { %8303 = vmatpush.msra.mxu0 %v17062_v41  ;;  %8340 = vmatpush.msra.mxu1 %v15942_v7  ;;  %v8396_v7 = vand.u32 4294901760, %v16351_v40  ;;  %v8495_v4 = vand.u32 4294901760, %v16362_v61  ;;  %v8485_v1 = vand.u32 4294901760, %v8484_v24  ;;  %11 = vst [vmem:[#allocation2] sm:$0x1] %v10_v6 }
 0x4a0   :  { %8381 = vmatpush.msra.mxu2 %v16234_v21  ;;  %8456 = vmatpush.msra.mxu3 %v8455_v19  ;;  %v17066_v19 = vand.u32 4294901760, %v16110_v33  ;;  %v17067_v33 = vand.u32 4294901760, %v16113_v34 }
 0x4a1   :  { %8307 = vmatpush.msra.mxu0 %v17063_v22  ;;  %8342 = vmatpush.msra.mxu1 %v15956_v16  ;;  %v17065_v16 = vand.u32 4294901760, %v16092_v54  ;;  %v8496_v54 = vsub.f32 %v16362_v61, %v8495_v4 }
 0x4a2   :  { %8383 = vmatpush.msra.mxu2 %v16250_v8  ;;  %8462 = vmatpush.msra.mxu3 %v8461_v18 }
 0x4a3   :  { %8311 = vmatpush.msra.mxu0 %v17064_v26  ;;  %8344 = vmatpush.msra.mxu1 %v15972_v25  ;;  %v8397_v25 = vsub.f32 %v16351_v40, %v8396_v7 }
 0x4a4   :  { %8385 = vmatpush.msra.mxu2 %v16269_v50  ;;  %8468 = vmatpush.msra.mxu3 %v8467_v17 }
 0x4a5   :  { %8315 = vmatpush.msra.mxu0 %v17065_v16  ;;  %8346 = vmatpush.msra.mxu1 %v15987_v28  ;;  %v8491_v28 = vand.u32 4294901760, %v8490_v38  ;;  %v8398_v27 = vand.u32 4294901760, %v8397_v25 }
 0x4a6   :  { %8387 = vmatpush.msra.mxu2 %v16285_v2  ;;  %8474 = vmatpush.msra.mxu3 %v8473_v14 }
 0x4a7   :  { %8319 = vmatpush.msra.mxu0 %v17066_v19  ;;  %8348 = vmatpush.msra.mxu1 %v16005_v10  ;;  %v8497_v10 = vand.u32 4294901760, %v8496_v54  ;;  %v9085_v54 = vld [vmem:[%s16508_s3 + $0x5] ss:$0 sm:$0xff] }
 0x4a8   :  { %8389 = vmatpush.msra.mxu2 %v16301_v48  ;;  %8480 = vmatpush.msra.mxu3 %v8479_v3 }
 0x4a9   :  { %8321 = vmatmul.f32.vlgmr.msra.gmra.mxu0 %v16016_v23  ;;  %8350 = vmatpush.msra.mxu1 %v16022_v58  ;;  %v17068_v58 = vand.u32 4294901760, %v16135_v47 }
 0x4aa   :  { %8506 = vmatpush.msrb.mxu0 %v16113_v34  ;;  %8391 = vmatpush.msra.mxu2 %v16317_v57  ;;  %v17078_v34 = vand.u32 4294901760, %v16283_v37 }
 0x4ab   :  { %8486 = vmatpush.msra.mxu3 %v8485_v1  ;;  %8352 = vmatpush.msra.mxu1 %v16034_v51  ;;  %v17069_v51 = vand.u32 4294901760, %v16148_v56 }
 0x4ac   :  { %8509 = vmatpush.msrb.mxu0 %v16135_v47  ;;  %8393 = vmatpush.msra.mxu2 %v16337_v59 }
 0x4ad   :  { %8492 = vmatpush.msra.mxu3 %v8491_v28  ;;  %8399 = vmatmul.f32.vlgmr.msra.gmra.mxu2 %v8398_v27 }
 0x4ae   :  { %8512 = vmatpush.msrb.mxu0 %v16148_v56  ;;  %8600 = vmatpush.msrb.mxu2 %v17067_v33  ;;  %v17075_v56 = vld [vmem:[#allocation3_spill] sm:$0xff] }
 0x4af   :  { %8354 = vmatpush.msra.mxu1 %v16064_v0  ;;  %8498 = vmatpush.msra.mxu3 %v8497_v10  ;;  %v17070_v0 = vand.u32 4294901760, %v16163_v46 }
 0x4b0   :  { %8515 = vmatpush.msrb.mxu0 %v16163_v46  ;;  %8500 = vmatmul.f32.vlgmr.msra.gmra.mxu3 %v16324_v44  ;;  %v7478_v46 = vpop.f32.mrf.mxu1 }
 0x4b1   :  { %8604 = vmatpush.msrb.mxu2 %v17068_v58  ;;  %8667 = vmatpush.msrb.mxu3 %v16079_v15  ;;  %v1466_v58 = vpop.xlane.xlu0 %1465 }
 0x4b2   :  { %8356 = vmatpush.msra.mxu1 %v16076_v45  ;;  %8518 = vmatpush.msrb.mxu0 %v16178_v13  ;;  %v17072_v45 = vand.u32 4294901760, %v16194_v39 }
 0x4b3   :  { %8358 = vmatmul.f32.vlgmr.msra.gmra.mxu1 %v16016_v23  ;;  %8608 = vmatpush.msrb.mxu2 %v17069_v51  ;;  %v17071_v23 = vand.u32 4294901760, %v16178_v13  ;;  %v4364_v51 = vpop.xlane.xlu1 %4363 }
 0x4b4   :  { %8559 = vmatpush.msrb.mxu1 %v16079_v15  ;;  %8669 = vmatpush.msrb.mxu3 %v16102_v5  ;;  %v17074_v15 = vand.u32 4294901760, %v16232_v11 }
 0x4b5   :  { %8521 = vmatpush.msrb.mxu0 %v16194_v39  ;;  %8612 = vmatpush.msrb.mxu2 %v17070_v0 }
 0x4b6   :  { %8561 = vmatpush.msrb.mxu1 %v16102_v5  ;;  %8671 = vmatpush.msrb.mxu3 %v16122_v36  ;;  %v17077_v5 = vand.u32 4294901760, %v16267_v55 }
 0x4b7   :  { %8524 = vmatpush.msrb.mxu0 %v16211_v31  ;;  %8616 = vmatpush.msrb.mxu2 %v17071_v23 }
 0x4b8   :  { %8563 = vmatpush.msrb.mxu1 %v16122_v36  ;;  %8673 = vmatpush.msrb.mxu3 %v16137_v52  ;;  %v17073_v36 = vand.u32 4294901760, %v16211_v31 }
 0x4b9   :  { %8527 = vmatpush.msrb.mxu0 %v16232_v11  ;;  %8620 = vmatpush.msrb.mxu2 %v17072_v45  ;;  %v2915_v0 = vpop.xlane.xlu0 %2914 }
 0x4ba   :  { %8565 = vmatpush.msrb.mxu1 %v16137_v52  ;;  %8675 = vmatpush.msrb.mxu3 %v16150_v30  ;;  %v2916_v45 = vadd.f32 %v2915_v0, %v1466_v58 }
 0x4bb   :  { %8530 = vmatpush.msrb.mxu0 %v16248_v12  ;;  %8624 = vmatpush.msrb.mxu2 %v17073_v36  ;;  %v5813_v36 = vpop.xlane.xlu1 %5812 }
 0x4bc   :  { %8567 = vmatpush.msrb.mxu1 %v16150_v30  ;;  %8677 = vmatpush.msrb.mxu3 %v16165_v63  ;;  %v17076_v30 = vand.u32 4294901760, %v16248_v12 }
 0x4bd   :  { %8533 = vmatpush.msrb.mxu0 %v16267_v55  ;;  %8628 = vmatpush.msrb.mxu2 %v17074_v15  ;;  %v4365_v15 = vadd.f32 %v4364_v51, %v2916_v45 }
 0x4be   :  { %8569 = vmatpush.msrb.mxu1 %v16165_v63  ;;  %8679 = vmatpush.msrb.mxu3 %v17075_v56  ;;  %v7377_v47 = vpop.f32.mrf.mxu0 }
 0x4bf   :  { %8536 = vmatpush.msrb.mxu0 %v16283_v37  ;;  %8632 = vmatpush.msrb.mxu2 %v17076_v30 }
 0x4c0   :  { %8571 = vmatpush.msrb.mxu1 %v17075_v56  ;;  %8681 = vmatpush.msrb.mxu3 %v16201_v35  ;;  %v5814_v56 = vadd.f32 %v5813_v36, %v4365_v15 }
 0x4c1   :  { %8539 = vmatpush.msrb.mxu0 %v16299_v32  ;;  %8636 = vmatpush.msrb.mxu2 %v17077_v5  ;;  %v9086_v5 = vld [vmem:[#allocation2] ss:$0 sm:$0xff] }
 0x4c2   :  { %8573 = vmatpush.msrb.mxu1 %v16201_v35  ;;  %8683 = vmatpush.msrb.mxu3 %v16217_v43 }
 0x4c3   :  { %8542 = vmatpush.msrb.mxu0 %v16315_v49  ;;  %8640 = vmatpush.msrb.mxu2 %v17078_v34 }
 0x4c4   :  { %8575 = vmatpush.msrb.mxu1 %v16217_v43  ;;  %8685 = vmatpush.msrb.mxu3 %v16234_v21 }
 0x4c5   :  { %8545 = vmatpush.msrb.mxu0 %v16334_v9  ;;  %8644 = vmatpush.msrb.mxu2 %v8471_v42  ;;  %v9084_v9 = vld [vmem:[%s16507_s2 + $0x5] ss:$0 sm:$0xff] }
 0x4c6   :  { %8577 = vmatpush.msrb.mxu1 %v16234_v21  ;;  %8687 = vmatpush.msrb.mxu3 %v16250_v8  ;;  %v7378_v52 = vadd.f32 %v9084_v9, %v7377_v47 }
 0x4c7   :  { %8548 = vmatpush.msrb.mxu0 %v16346_v60  ;;  %8648 = vmatpush.msrb.mxu2 %v8477_v29 }
 0x4c8   :  { %8579 = vmatpush.msrb.mxu1 %v16250_v8  ;;  %8689 = vmatpush.msrb.mxu3 %v16269_v50  ;;  %v7479_v63 = vadd.f32 %v7478_v46, %v7378_v52  ;;  %v7532_v13 = vpop.f32.mrf.mxu2 }
 0x4c9   :  { %8551 = vmatpush.msrb.mxu0 %v16362_v61  ;;  %8652 = vmatpush.msrb.mxu2 %v8483_v62 }
 0x4ca   :  { %8581 = vmatpush.msrb.mxu1 %v16269_v50  ;;  %8691 = vmatpush.msrb.mxu3 %v16285_v2  ;;  %v7533_v39 = vadd.f32 %v7532_v13, %v7479_v63 }
 0x4cb   :  { %8554 = vmatmul.f32.vlgmr.msrb.gmra.mxu0 %v16351_v40  ;;  %8656 = vmatpush.msrb.mxu2 %v8489_v20  ;;  %v7571_v35 = vpop.f32.mrf.mxu3 }
 0x4cc   :  { %8583 = vmatpush.msrb.mxu1 %v16285_v2  ;;  %8693 = vmatpush.msrb.mxu3 %v16301_v48  ;;  %v7572_v31 = vadd.f32 %v7571_v35, %v7533_v39 }
 0x4cd   :  { %8660 = vmatpush.msrb.mxu2 %v8495_v4 }
 0x4ce   :  { %8585 = vmatpush.msrb.mxu1 %v16301_v48  ;;  %8695 = vmatpush.msrb.mxu3 %v16317_v57  ;;  %v7640_v43 = vpop.f32.mrf.mxu0 }
 0x4cf   :  { %8662 = vmatmul.f32.vlgmr.msrb.gmra.mxu2 %v16324_v44  ;;  %v7641_v11 = vadd.f32 %v7640_v43, %v7572_v31 }
 0x4d0   :  { %8587 = vmatpush.msrb.mxu1 %v16317_v57  ;;  %8697 = vmatpush.msrb.mxu3 %v16337_v59 }
 0x4d1   :  { %8699 = vmatmul.f32.vlgmr.msrb.gmra.mxu3 %v16324_v44  ;;  %v7677_v21 = vpop.f32.mrf.mxu1  ;;  %v7718_v8 = vpop.f32.mrf.mxu2 }
 0x4d2   :  { %8589 = vmatpush.msrb.mxu1 %v16337_v59  ;;  %v7678_v12 = vadd.f32 %v7677_v21, %v7641_v11 }
 0x4d3   :  { %8593 = vmatmul.f32.vlgmr.msrb.gmra.mxu1 %v8396_v7 }
 0x4d4   :  { %v7719_v37 = vadd.f32 %v7718_v8, %v7678_v12  ;;  %v7819_v55 = vpop.f32.mrf.mxu3 }
 0x4d6   :  { %v7820_v57 = vadd.f32 %v7819_v55, %v7719_v37 }
 0x4e1   :  { %v7873_v50 = vpop.f32.mrf.mxu0 }
 0x4e2   :  { %v7874_v32 = vadd.f32 %v7873_v50, %v7820_v57 }
 0x4eb   :  { %v7912_v2 = vpop.f32.mrf.mxu1 }
 0x4ec   :  { %v7913_v48 = vadd.f32 %v7912_v2, %v7874_v32  ;;  %v7981_v42 = vpop.f32.mrf.mxu2 }
 0x4ee   :  { %v7982_v49 = vadd.f32 %v7981_v42, %v7913_v48 }
 0x4ef   :  { %v8018_v44 = vpop.f32.mrf.mxu3 }
 0x4f0   :  { %v8019_v29 = vadd.f32 %v8018_v44, %v7982_v49 }
 0x503   :  { %v8059_v59 = vpop.f32.mrf.mxu0 }
 0x504   :  { %v8060_v40 = vadd.f32 %v8059_v59, %v8019_v29 }
 0x50d   :  { %v8160_v60 = vpop.f32.mrf.mxu1 }
 0x50e   :  { %v8161_v41 = vadd.f32 %v8160_v60, %v8060_v40  ;;  %v8214_v18 = vpop.f32.mrf.mxu2 }
 0x50f   :  { %v7262_v23 = vpop.xlane.xlu2 %7261 }
 0x510   :  { %v8215_v62 = vadd.f32 %v8214_v18, %v8161_v41  ;;  %v7263_v30 = vadd.f32 %v7262_v23, %v5814_v56 }
 0x511   :  { %v8253_v61 = vpop.f32.mrf.mxu3 }
 0x512   :  { %v8254_v17 = vadd.f32 %v8253_v61, %v8215_v62 }
 0x526   :  { %v8322_v22 = vpop.f32.mrf.mxu0 }
 0x527   :  { %v8323_v20 = vadd.f32 %v8322_v22, %v8254_v17 }
 0x530   :  { %v8359_v53 = vpop.f32.mrf.mxu1  ;;  %v8400_v26 = vpop.f32.mrf.mxu2 }
 0x531   :  { %v8360_v7 = vadd.f32 %v8359_v53, %v8323_v20 }
 0x533   :  { %v8401_v14 = vadd.f32 %v8400_v26, %v8360_v7  ;;  %v8501_v24 = vpop.f32.mrf.mxu3 }
 0x535   :  { %v8502_v16 = vadd.f32 %v8501_v24, %v8401_v14 }
 0x548   :  { %v8555_v4 = vpop.f32.mrf.mxu0 }
 0x549   :  { %v8556_v3 = vadd.f32 %v8555_v4, %v8502_v16 }
 0x550   :  { %v8594_v38 = vpop.f32.mrf.mxu1 }
 0x551   :  { %v8595_v25 = vadd.f32 %v8594_v38, %v8556_v3 }
 0x552   :  { %v8663_v19 = vpop.f32.mrf.mxu2 }
 0x553   :  { %v8664_v1 = vadd.f32 %v8663_v19, %v8595_v25 }
 0x554   :  { %v8700_v28 = vpop.f32.mrf.mxu3 }
 0x555   :  { %v8701_v27 = vadd.f32 %v8700_v28, %v8664_v1 }
 0x557   :  { %v8708_v10 = vmul.f32 %v9085_v54, %v8701_v27 }
 0x559   :  { %v8709_v33 = vsel %vm1463_vm0, %v8708_v10, 0.0 }
 0x55a   :  { %8710 = vadd.xlane.f32.xlu2 %v8709_v33 }
 0x5cd   :  { %v8711_v34 = vpop.xlane.xlu2 %8710 }
 0x5ce   :  { %v8712_v9 = vadd.f32 %v8711_v34, %v7263_v30 }
 0x5d0   :  { %v8717_v47 = vadd.f32 %v9086_v5, %v8712_v9 }
 0x5d2   :  { %8719 = vst.msk [vmem:[%s16510_s5] sm:$0xff] %vm8718_vm1, %v8717_v47 }

</bundles_post_ra>
